<compile_context>
chip_gen: v5e
topology: v5e:2x2
jax: 0.10.0
libtpu: 0.0.40
codegen_flags: <defaults>
</compile_context>

<pallas_src>
import functools
import math

import jax
import jax.numpy as jnp
from jax.experimental import pallas as pl
from jax.experimental.pallas import tpu as pltpu


LAYERS = [1, 1, 1, 1]                     # one BasicBlock per stage
STAGES = [(64, 1), (128, 2), (256, 2), (512, 2)]
NUM_CLASSES = 10
BN_EPS = 1e-5


def _pick_tile(n, cands):
    """Largest candidate tile that divides n (else the full dim)."""
    for c in cands:
        if n % c == 0:
            return c
    return n


# ----------------------------------------------------------------------------
# Conv matmul: bf16 operands, f32 VMEM accumulator, per-channel sum / sum-sq
# side outputs (for BatchNorm batch statistics).
# ----------------------------------------------------------------------------

def _conv_mm_kernel(a_ref, b_ref, o_ref, sum_ref, sq_ref, acc_ref):
    k = pl.program_id(2)

    @pl.when(k == 0)
    def _():
        acc_ref[...] = jnp.zeros_like(acc_ref)

    acc_ref[...] += jnp.dot(a_ref[...], b_ref[...],
                            preferred_element_type=jnp.float32)

    @pl.when(k == pl.num_programs(2) - 1)
    def _():
        acc = acc_ref[...]
        o_ref[...] = acc.astype(o_ref.dtype)
        sum_ref[...] = jnp.sum(acc, axis=0, keepdims=True)[None]
        sq_ref[...] = jnp.sum(acc * acc, axis=0, keepdims=True)[None]


def conv_matmul(a, b):
    """a: (M, K) bf16, b: (K, N) bf16 ->
       (out (M, N) bf16, per-tile channel sums (gm,1,N) f32, sum-sq (gm,1,N) f32)."""
    M, K = a.shape
    K2, N = b.shape
    assert K == K2
    tm = _pick_tile(M, (512, 256, 128, 64, 32, 16, 8))
    tn = N if N <= 256 else 256
    tk = _pick_tile(K, (512, 256, 128))
    gm, gn, gk = M // tm, N // tn, K // tk

    return pl.pallas_call(
        _conv_mm_kernel,
        out_shape=(
            jax.ShapeDtypeStruct((M, N), jnp.bfloat16),
            jax.ShapeDtypeStruct((gm, 1, N), jnp.float32),
            jax.ShapeDtypeStruct((gm, 1, N), jnp.float32),
        ),
        grid_spec=pltpu.PrefetchScalarGridSpec(
            num_scalar_prefetch=0,
            grid=(gm, gn, gk),
            in_specs=[
                pl.BlockSpec((tm, tk), lambda i, j, k: (i, k)),
                pl.BlockSpec((tk, tn), lambda i, j, k: (k, j)),
            ],
            out_specs=[
                pl.BlockSpec((tm, tn), lambda i, j, k: (i, j)),
                pl.BlockSpec((1, 1, tn), lambda i, j, k: (i, 0, j)),
                pl.BlockSpec((1, 1, tn), lambda i, j, k: (i, 0, j)),
            ],
            scratch_shapes=[pltpu.VMEM((tm, tn), jnp.float32)],
        ),
        compiler_params=pltpu.CompilerParams(
            dimension_semantics=("parallel", "parallel", "arbitrary")),
    )(a, b)


# ----------------------------------------------------------------------------
# Fused BN-affine (+ residual add) (+ ReLU) epilogue, row-tiled.
# ----------------------------------------------------------------------------

def _bn_act_kernel(x_ref, sc_ref, sh_ref, o_ref, *, relu):
    y = x_ref[...].astype(jnp.float32) * sc_ref[...] + sh_ref[...]
    if relu:
        y = jnp.maximum(y, 0.0)
    o_ref[...] = y.astype(o_ref.dtype)


def _bn_add_relu_kernel(x_ref, sc_ref, sh_ref, r_ref, o_ref):
    y = x_ref[...].astype(jnp.float32) * sc_ref[...] + sh_ref[...]
    y = y + r_ref[...].astype(jnp.float32)
    o_ref[...] = jnp.maximum(y, 0.0).astype(o_ref.dtype)


def _bn_bn_add_relu_kernel(x_ref, sc_ref, sh_ref, r_ref, rsc_ref, rsh_ref, o_ref):
    y = x_ref[...].astype(jnp.float32) * sc_ref[...] + sh_ref[...]
    y = y + (r_ref[...].astype(jnp.float32) * rsc_ref[...] + rsh_ref[...])
    o_ref[...] = jnp.maximum(y, 0.0).astype(o_ref.dtype)


def bn_epilogue(x2d, scale, shift, *, relu=True,
                res=None, rscale=None, rshift=None):
    M, C = x2d.shape
    bm = _pick_tile(M, (1024, 512, 256, 128, 64, 32, 16, 8))
    row = pl.BlockSpec((bm, C), lambda i: (i, 0))
    vec = pl.BlockSpec((1, C), lambda i: (0, 0))

    if res is None:
        kern = functools.partial(_bn_act_kernel, relu=relu)
        in_specs, args = [row, vec, vec], (x2d, scale, shift)
    elif rscale is None:
        kern = _bn_add_relu_kernel
        in_specs, args = [row, vec, vec, row], (x2d, scale, shift, res)
    else:
        kern = _bn_bn_add_relu_kernel
        in_specs = [row, vec, vec, row, vec, vec]
        args = (x2d, scale, shift, res, rscale, rshift)

    return pl.pallas_call(
        kern,
        out_shape=jax.ShapeDtypeStruct((M, C), jnp.bfloat16),
        grid_spec=pltpu.PrefetchScalarGridSpec(
            num_scalar_prefetch=0,
            grid=(M // bm,),
            in_specs=in_specs,
            out_specs=row,
        ),
        compiler_params=pltpu.CompilerParams(
            dimension_semantics=("parallel",)),
    )(*args)


# ----------------------------------------------------------------------------
# Convolution = im2col (bf16 glue) + Pallas matmul; BN stats from side outputs.
# ----------------------------------------------------------------------------

def _im2col(x, kh, kw, stride, pad):
    N, H, W, C = x.shape
    if pad:
        x = jnp.pad(x, ((0, 0), (pad, pad), (pad, pad), (0, 0)))
    OH = (H + 2 * pad - kh) // stride + 1
    OW = (W + 2 * pad - kw) // stride + 1
    if kh == 1 and kw == 1:
        cols = x[:, ::stride, ::stride, :][:, :OH, :OW, :].reshape(N * OH * OW, C)
    else:
        # TODO(synk): replace materialized im2col with in-kernel tap accumulation
        # (extra grid axis over the kh*kw taps) to remove the remaining HBM
        # amplification of the stacked activation.
        taps = [x[:, i::stride, j::stride, :][:, :OH, :OW, :]
                for i in range(kh) for j in range(kw)]
        cols = jnp.stack(taps, axis=3).reshape(N * OH * OW, kh * kw * C)
    return cols, (N, OH, OW)


def conv_bn_stats(x_nhwc, wmat, kh, kw, stride, pad, gamma, beta):
    """Conv via Pallas bf16 matmul; returns raw output (M, OC) bf16 plus the
    fused train-mode BN scale/shift derived from the matmul's partial sums."""
    cols, (N, OH, OW) = _im2col(x_nhwc, kh, kw, stride, pad)
    out, psum, psq = conv_matmul(cols, wmat)
    M = cols.shape[0]
    tot = jnp.sum(psum, axis=(0, 1))
    tot_sq = jnp.sum(psq, axis=(0, 1))
    mean = tot / M
    var = jnp.maximum(tot_sq / M - mean * mean, 0.0)      # biased batch variance
    scale = gamma * jax.lax.rsqrt(var + BN_EPS)
    shift = beta - mean * scale
    return out, scale[None, :], shift[None, :], (N, OH, OW)


# ----------------------------------------------------------------------------
# Pooling
# ----------------------------------------------------------------------------

def maxpool_3x3_s2_p1(x_nhwc):
    # Overlapping 3x3 windows: 9-way maximum tree left to XLA (fuses into one
    # elementwise pass; avoids materializing a 9x-stacked tensor in HBM).
    N, H, W, C = x_nhwc.shape
    xp = jnp.pad(x_nhwc, ((0, 0), (1, 1), (1, 1), (0, 0)),
                 constant_values=-jnp.inf)
    OH = (H + 2 - 3) // 2 + 1
    OW = (W + 2 - 3) // 2 + 1
    out = None
    for i in range(3):
        for j in range(3):
            tap = xp[:, i::2, j::2, :][:, :OH, :OW, :]
            out = tap if out is None else jnp.maximum(out, tap)
    return out


def _avgpool_kernel(x_ref, o_ref):
    o_ref[...] = jnp.mean(x_ref[...].astype(jnp.float32), axis=1)


def global_avgpool(x_nhwc):
    N, H, W, C = x_nhwc.shape
    return pl.pallas_call(
        _avgpool_kernel,
        out_shape=jax.ShapeDtypeStruct((N, C), jnp.float32),
    )(x_nhwc.reshape(N, H * W, C))


# ----------------------------------------------------------------------------
# Parameters (conv weights pre-transposed to matmul layout, bf16) + forward
# ----------------------------------------------------------------------------

def init_params(key):
    keys = iter(jax.random.split(key, 64))

    def conv_w(oc, cin, kh, kw):
        # kaiming_normal_(mode='fan_out', nonlinearity='relu') on OIHW, then
        # pre-transposed once at init to (KH*KW*Cin, OC) and cast to bf16.
        std = math.sqrt(2.0 / (oc * kh * kw))
        w = jax.random.normal(next(keys), (oc, cin, kh, kw), jnp.float32) * std
        return jnp.transpose(w, (2, 3, 1, 0)).reshape(kh * kw * cin, oc).astype(jnp.bfloat16)

    def bn(c):  # weight=1, bias=0 as in the module's init loop
        return jnp.ones((c,), jnp.float32), jnp.zeros((c,), jnp.float32)

    params = {"conv1_w": conv_w(64, 3, 7, 7)}
    params["bn1_g"], params["bn1_b"] = bn(64)

    blocks, config = [], []
    inplanes = 64
    for (planes, stride), nblocks in zip(STAGES, LAYERS):
        for b in range(nblocks):
            s = stride if b == 0 else 1
            ds = (s != 1 or inplanes != planes)
            bp = {"w1": conv_w(planes, inplanes, 3, 3)}
            bp["g1"], bp["b1"] = bn(planes)
            bp["w2"] = conv_w(planes, planes, 3, 3)
            bp["g2"], bp["b2"] = bn(planes)
            if ds:
                bp["wd"] = conv_w(planes, inplanes, 1, 1)
                bp["gd"], bp["bd"] = bn(planes)
            blocks.append(bp)
            config.append((s, ds))
            inplanes = planes
    params["blocks"] = blocks

    bound = 1.0 / math.sqrt(512)
    params["fc_w"] = jax.random.uniform(next(keys), (512, NUM_CLASSES),
                                        jnp.float32, -bound, bound)  # pre-transposed
    params["fc_b"] = jax.random.uniform(next(keys), (NUM_CLASSES,),
                                        jnp.float32, -bound, bound)
    return params, tuple(config)


def basic_block(x, bp, stride, downsample):
    N, H, W, Cin = x.shape
    y1, sc1, sh1, (n, oh, ow) = conv_bn_stats(x, bp["w1"], 3, 3, stride, 1,
                                              bp["g1"], bp["b1"])
    planes = y1.shape[-1]
    h1 = bn_epilogue(y1, sc1, sh1, relu=True).reshape(n, oh, ow, planes)
    y2, sc2, sh2, _ = conv_bn_stats(h1, bp["w2"], 3, 3, 1, 1,
                                    bp["g2"], bp["b2"])
    if downsample:
        yd, scd, shd, _ = conv_bn_stats(x, bp["wd"], 1, 1, stride, 0,
                                        bp["gd"], bp["bd"])
        out = bn_epilogue(y2, sc2, sh2, relu=True,
                          res=yd, rscale=scd, rshift=shd)
    else:
        out = bn_epilogue(y2, sc2, sh2, relu=True,
                          res=x.reshape(N * H * W, Cin))
    return out.reshape(n, oh, ow, planes)


def resnet_forward(params, x_nchw, config):
    x = jnp.transpose(x_nchw, (0, 2, 3, 1)).astype(jnp.bfloat16)   # NCHW -> NHWC
    y, sc, sh, (n, oh, ow) = conv_bn_stats(x, params["conv1_w"], 7, 7, 2, 3,
                                           params["bn1_g"], params["bn1_b"])
    h = bn_epilogue(y, sc, sh, relu=True).reshape(n, oh, ow, -1)
    h = maxpool_3x3_s2_p1(h)
    for (stride, ds), bp in zip(config, params["blocks"]):
        h = basic_block(h, bp, stride, ds)
    pooled = global_avgpool(h)                                     # (N, 512) f32
    # Tiny (N,512)x(512,num_classes) FC: output lane width < 128 -> leave to XLA.
    return pooled @ params["fc_w"] + params["fc_b"][None, :]


# ----------------------------------------------------------------------------

if __name__ == "__main__":
    key = jax.random.PRNGKey(0)
    pkey, xkey = jax.random.split(key)
    params, config = init_params(pkey)

    # Small deterministic input, NCHW like the PyTorch module expects.
    x = jax.random.normal(xkey, (2, 3, 32, 32), jnp.float32)

    fwd = jax.jit(functools.partial(resnet_forward, config=config))
    logits = jax.block_until_ready(fwd(params, x))

    assert logits.shape == (2, NUM_CLASSES), logits.shape
    assert bool(jnp.all(jnp.isfinite(logits)))
    print("KERNEL_OK")
</pallas_src>

<mosaic_0001>
module attributes {stable_mosaic.version = 11 : i64} {
  func.func @_conv_mm_kernel(%arg0: i32, %arg1: i32, %arg2: i32, %arg3: memref<512x147xbf16, #tpu.memory_space<vmem>>, %arg4: memref<147x64xbf16, #tpu.memory_space<vmem>>, %arg5: memref<512x64xbf16, #tpu.memory_space<vmem>>, %arg6: memref<1x1x64xf32, #tpu.memory_space<vmem>>, %arg7: memref<1x1x64xf32, #tpu.memory_space<vmem>>, %arg8: memref<512x64xf32, #tpu.memory_space<vmem>>) attributes {dimension_semantics = [#tpu.dimension_semantics<parallel>, #tpu.dimension_semantics<parallel>, #tpu.dimension_semantics<arbitrary>], iteration_bounds = array<i64: 1, 1, 1>, scalar_prefetch = 0 : i64, scratch_operands = 1 : i64, tpu.core_type = #tpu.core_type<tc>, window_params = [{transform_indices = @transform_0, window_bounds = array<i64: 512, 147>}, {transform_indices = @transform_1, window_bounds = array<i64: 147, 64>}, {transform_indices = @transform_2, window_bounds = array<i64: 512, 64>}, {transform_indices = @transform_3, window_bounds = array<i64: 1, 1, 64>}, {transform_indices = @transform_4, window_bounds = array<i64: 1, 1, 64>}]} {
    %c0_i32 = arith.constant 0 : i32
    %0 = arith.cmpi eq, %arg2, %c0_i32 : i32
    %1 = arith.extui %0 : i1 to i32
    %c0_i32_0 = arith.constant 0 : i32
    %2 = arith.cmpi ne, %1, %c0_i32_0 : i32
    scf.if %2 {
      %cst_10 = arith.constant 0.000000e+00 : f32
      %12 = vector.broadcast %cst_10 : f32 to vector<512x64xf32>
      %c0_11 = arith.constant 0 : index
      %c0_12 = arith.constant 0 : index
      %13 = vector.load %arg8[%c0_11, %c0_12] : memref<512x64xf32, #tpu.memory_space<vmem>>, vector<512x64xf32>
      tpu.vector_store %arg8[%c0_11, %c0_12], %12 {strides = array<i32>} : memref<512x64xf32, #tpu.memory_space<vmem>>, vector<512x64xf32>,
    } else {
    }
    %c0 = arith.constant 0 : index
    %c0_1 = arith.constant 0 : index
    %3 = vector.load %arg8[%c0, %c0_1] : memref<512x64xf32, #tpu.memory_space<vmem>>, vector<512x64xf32>
    %c0_2 = arith.constant 0 : index
    %c0_3 = arith.constant 0 : index
    %4 = vector.load %arg3[%c0_2, %c0_3] : memref<512x147xbf16, #tpu.memory_space<vmem>>, vector<512x147xbf16>
    %c0_4 = arith.constant 0 : index
    %c0_5 = arith.constant 0 : index
    %5 = vector.load %arg4[%c0_4, %c0_5] : memref<147x64xbf16, #tpu.memory_space<vmem>>, vector<147x64xbf16>
    %cst = arith.constant dense<0.000000e+00> : vector<512x64xf32>
    %6 = tpu.matmul %4, %5, %cst {dimension_numbers = #tpu.dot_dimension_numbers<[1], [0], [0], [1], [0, 0, 1, 1], [], []>} : vector<512x147xbf16>, vector<147x64xbf16>, vector<512x64xf32> -> vector<512x64xf32>
    %7 = arith.addf %3, %6 : vector<512x64xf32>
    %c0_6 = arith.constant 0 : index
    %c0_7 = arith.constant 0 : index
    %8 = vector.load %arg8[%c0_6, %c0_7] : memref<512x64xf32, #tpu.memory_space<vmem>>, vector<512x64xf32>
    tpu.vector_store %arg8[%c0_6, %c0_7], %7 {strides = array<i32>} : memref<512x64xf32, #tpu.memory_space<vmem>>, vector<512x64xf32>,
    %c0_i32_8 = arith.constant 0 : i32
    %9 = arith.cmpi eq, %arg2, %c0_i32_8 : i32
    %10 = arith.extui %9 : i1 to i32
    %c0_i32_9 = arith.constant 0 : i32
    %11 = arith.cmpi ne, %10, %c0_i32_9 : i32
    scf.if %11 {
      %c0_10 = arith.constant 0 : index
      %c0_11 = arith.constant 0 : index
      %12 = vector.load %arg8[%c0_10, %c0_11] : memref<512x64xf32, #tpu.memory_space<vmem>>, vector<512x64xf32>
      %13 = arith.truncf %12 : vector<512x64xf32> to vector<512x64xbf16>
      %c0_12 = arith.constant 0 : index
      %c0_13 = arith.constant 0 : index
      %14 = vector.load %arg5[%c0_12, %c0_13] : memref<512x64xbf16, #tpu.memory_space<vmem>>, vector<512x64xbf16>
      tpu.vector_store %arg5[%c0_12, %c0_13], %13 {strides = array<i32>} : memref<512x64xbf16, #tpu.memory_space<vmem>>, vector<512x64xbf16>,
      %cst_14 = arith.constant dense<0.000000e+00> : vector<64xf32>
      %15 = vector.multi_reduction <add>, %12, %cst_14 [0] : vector<512x64xf32> to vector<64xf32>
      %16 = vector.shape_cast %15 : vector<64xf32> to vector<1x64xf32>
      %17 = vector.shape_cast %16 : vector<1x64xf32> to vector<1x1x64xf32>
      %c0_15 = arith.constant 0 : index
      %c0_16 = arith.constant 0 : index
      %c0_17 = arith.constant 0 : index
      %18 = vector.load %arg6[%c0_15, %c0_16, %c0_17] : memref<1x1x64xf32, #tpu.memory_space<vmem>>, vector<1x1x64xf32>
      tpu.vector_store %arg6[%c0_15, %c0_16, %c0_17], %17 {strides = array<i32>} : memref<1x1x64xf32, #tpu.memory_space<vmem>>, vector<1x1x64xf32>,
      %19 = arith.mulf %12, %12 : vector<512x64xf32>
      %cst_18 = arith.constant dense<0.000000e+00> : vector<64xf32>
      %20 = vector.multi_reduction <add>, %19, %cst_18 [0] : vector<512x64xf32> to vector<64xf32>
      %21 = vector.shape_cast %20 : vector<64xf32> to vector<1x64xf32>
      %22 = vector.shape_cast %21 : vector<1x64xf32> to vector<1x1x64xf32>
      %c0_19 = arith.constant 0 : index
      %c0_20 = arith.constant 0 : index
      %c0_21 = arith.constant 0 : index
      %23 = vector.load %arg7[%c0_19, %c0_20, %c0_21] : memref<1x1x64xf32, #tpu.memory_space<vmem>>, vector<1x1x64xf32>
      tpu.vector_store %arg7[%c0_19, %c0_20, %c0_21], %22 {strides = array<i32>} : memref<1x1x64xf32, #tpu.memory_space<vmem>>, vector<1x1x64xf32>,
    } else {
    }
    return
  }
  func.func @transform_0(%arg0: i32, %arg1: i32, %arg2: i32) -> (i32, i32) {
    %c0_i32 = arith.constant 0 : i32
    return %arg0, %arg2 : i32, i32
  }
  func.func @transform_1(%arg0: i32, %arg1: i32, %arg2: i32) -> (i32, i32) {
    %c0_i32 = arith.constant 0 : i32
    return %arg2, %arg1 : i32, i32
  }
  func.func @transform_2(%arg0: i32, %arg1: i32, %arg2: i32) -> (i32, i32) {
    %c0_i32 = arith.constant 0 : i32
    return %arg0, %arg1 : i32, i32
  }
  func.func @transform_3(%arg0: i32, %arg1: i32, %arg2: i32) -> (i32, i32, i32) {
    %c0_i32 = arith.constant 0 : i32
    %c0_i32_0 = arith.constant 0 : i32
    return %arg0, %c0_i32, %arg1 : i32, i32, i32
  }
  func.func @transform_4(%arg0: i32, %arg1: i32, %arg2: i32) -> (i32, i32, i32) {
    %c0_i32 = arith.constant 0 : i32
    %c0_i32_0 = arith.constant 0 : i32
    return %arg0, %c0_i32, %arg1 : i32, i32, i32
  }
}

module attributes {stable_mosaic.version = 11 : i64} {
  func.func @_bn_act_kernel(%arg0: i32, %arg1: memref<512x64xbf16, #tpu.memory_space<vmem>>, %arg2: memref<1x64xf32, #tpu.memory_space<vmem>>, %arg3: memref<1x64xf32, #tpu.memory_space<vmem>>, %arg4: memref<512x64xbf16, #tpu.memory_space<vmem>>) attributes {dimension_semantics = [#tpu.dimension_semantics<parallel>], iteration_bounds = array<i64: 1>, scalar_prefetch = 0 : i64, scratch_operands = 0 : i64, tpu.core_type = #tpu.core_type<tc>, window_params = [{transform_indices = @transform_0, window_bounds = array<i64: 512, 64>}, {pipeline_mode = #tpu.pipeline_mode<synchronous>, transform_indices = @transform_1, window_bounds = array<i64: 1, 64>}, {pipeline_mode = #tpu.pipeline_mode<synchronous>, transform_indices = @transform_2, window_bounds = array<i64: 1, 64>}, {transform_indices = @transform_3, window_bounds = array<i64: 512, 64>}]} {
    %c0 = arith.constant 0 : index
    %c0_0 = arith.constant 0 : index
    %0 = vector.load %arg1[%c0, %c0_0] : memref<512x64xbf16, #tpu.memory_space<vmem>>, vector<512x64xbf16>
    %1 = arith.extf %0 : vector<512x64xbf16> to vector<512x64xf32>
    %c0_1 = arith.constant 0 : index
    %c0_2 = arith.constant 0 : index
    %2 = vector.load %arg2[%c0_1, %c0_2] : memref<1x64xf32, #tpu.memory_space<vmem>>, vector<1x64xf32>
    %3 = vector.broadcast %2 : vector<1x64xf32> to vector<512x64xf32>
    %4 = arith.mulf %1, %3 : vector<512x64xf32>
    %c0_3 = arith.constant 0 : index
    %c0_4 = arith.constant 0 : index
    %5 = vector.load %arg3[%c0_3, %c0_4] : memref<1x64xf32, #tpu.memory_space<vmem>>, vector<1x64xf32>
    %6 = vector.broadcast %5 : vector<1x64xf32> to vector<512x64xf32>
    %7 = arith.addf %4, %6 : vector<512x64xf32>
    %cst = arith.constant 0.000000e+00 : f32
    %8 = vector.broadcast %cst : f32 to vector<512x64xf32>
    %9 = arith.maximumf %7, %8 : vector<512x64xf32>
    %10 = arith.truncf %9 : vector<512x64xf32> to vector<512x64xbf16>
    %c0_5 = arith.constant 0 : index
    %c0_6 = arith.constant 0 : index
    %11 = vector.load %arg4[%c0_5, %c0_6] : memref<512x64xbf16, #tpu.memory_space<vmem>>, vector<512x64xbf16>
    tpu.vector_store %arg4[%c0_5, %c0_6], %10 {strides = array<i32>} : memref<512x64xbf16, #tpu.memory_space<vmem>>, vector<512x64xbf16>,
    return
  }
  func.func @transform_0(%arg0: i32) -> (i32, i32) {
    %c0_i32 = arith.constant 0 : i32
    %c0_i32_0 = arith.constant 0 : i32
    return %arg0, %c0_i32 : i32, i32
  }
  func.func @transform_1(%arg0: i32) -> (i32, i32) {
    %c0_i32 = arith.constant 0 : i32
    %c0_i32_0 = arith.constant 0 : i32
    %c0_i32_1 = arith.constant 0 : i32
    return %c0_i32, %c0_i32_0 : i32, i32
  }
  func.func @transform_2(%arg0: i32) -> (i32, i32) {
    %c0_i32 = arith.constant 0 : i32
    %c0_i32_0 = arith.constant 0 : i32
    %c0_i32_1 = arith.constant 0 : i32
    return %c0_i32, %c0_i32_0 : i32, i32
  }
  func.func @transform_3(%arg0: i32) -> (i32, i32) {
    %c0_i32 = arith.constant 0 : i32
    %c0_i32_0 = arith.constant 0 : i32
    return %arg0, %c0_i32 : i32, i32
  }
}

module attributes {stable_mosaic.version = 11 : i64} {
  func.func @_conv_mm_kernel(%arg0: i32, %arg1: i32, %arg2: i32, %arg3: memref<128x576xbf16, #tpu.memory_space<vmem>>, %arg4: memref<576x64xbf16, #tpu.memory_space<vmem>>, %arg5: memref<128x64xbf16, #tpu.memory_space<vmem>>, %arg6: memref<1x1x64xf32, #tpu.memory_space<vmem>>, %arg7: memref<1x1x64xf32, #tpu.memory_space<vmem>>, %arg8: memref<128x64xf32, #tpu.memory_space<vmem>>) attributes {dimension_semantics = [#tpu.dimension_semantics<parallel>, #tpu.dimension_semantics<parallel>, #tpu.dimension_semantics<arbitrary>], iteration_bounds = array<i64: 1, 1, 1>, scalar_prefetch = 0 : i64, scratch_operands = 1 : i64, tpu.core_type = #tpu.core_type<tc>, window_params = [{transform_indices = @transform_0, window_bounds = array<i64: 128, 576>}, {transform_indices = @transform_1, window_bounds = array<i64: 576, 64>}, {transform_indices = @transform_2, window_bounds = array<i64: 128, 64>}, {transform_indices = @transform_3, window_bounds = array<i64: 1, 1, 64>}, {transform_indices = @transform_4, window_bounds = array<i64: 1, 1, 64>}]} {
    %c0_i32 = arith.constant 0 : i32
    %0 = arith.cmpi eq, %arg2, %c0_i32 : i32
    %1 = arith.extui %0 : i1 to i32
    %c0_i32_0 = arith.constant 0 : i32
    %2 = arith.cmpi ne, %1, %c0_i32_0 : i32
    scf.if %2 {
      %cst_10 = arith.constant 0.000000e+00 : f32
      %12 = vector.broadcast %cst_10 : f32 to vector<128x64xf32>
      %c0_11 = arith.constant 0 : index
      %c0_12 = arith.constant 0 : index
      %13 = vector.load %arg8[%c0_11, %c0_12] : memref<128x64xf32, #tpu.memory_space<vmem>>, vector<128x64xf32>
      tpu.vector_store %arg8[%c0_11, %c0_12], %12 {strides = array<i32>} : memref<128x64xf32, #tpu.memory_space<vmem>>, vector<128x64xf32>,
    } else {
    }
    %c0 = arith.constant 0 : index
    %c0_1 = arith.constant 0 : index
    %3 = vector.load %arg8[%c0, %c0_1] : memref<128x64xf32, #tpu.memory_space<vmem>>, vector<128x64xf32>
    %c0_2 = arith.constant 0 : index
    %c0_3 = arith.constant 0 : index
    %4 = vector.load %arg3[%c0_2, %c0_3] : memref<128x576xbf16, #tpu.memory_space<vmem>>, vector<128x576xbf16>
    %c0_4 = arith.constant 0 : index
    %c0_5 = arith.constant 0 : index
    %5 = vector.load %arg4[%c0_4, %c0_5] : memref<576x64xbf16, #tpu.memory_space<vmem>>, vector<576x64xbf16>
    %cst = arith.constant dense<0.000000e+00> : vector<128x64xf32>
    %6 = tpu.matmul %4, %5, %cst {dimension_numbers = #tpu.dot_dimension_numbers<[1], [0], [0], [1], [0, 0, 1, 1], [], []>} : vector<128x576xbf16>, vector<576x64xbf16>, vector<128x64xf32> -> vector<128x64xf32>
    %7 = arith.addf %3, %6 : vector<128x64xf32>
    %c0_6 = arith.constant 0 : index
    %c0_7 = arith.constant 0 : index
    %8 = vector.load %arg8[%c0_6, %c0_7] : memref<128x64xf32, #tpu.memory_space<vmem>>, vector<128x64xf32>
    tpu.vector_store %arg8[%c0_6, %c0_7], %7 {strides = array<i32>} : memref<128x64xf32, #tpu.memory_space<vmem>>, vector<128x64xf32>,
    %c0_i32_8 = arith.constant 0 : i32
    %9 = arith.cmpi eq, %arg2, %c0_i32_8 : i32
    %10 = arith.extui %9 : i1 to i32
    %c0_i32_9 = arith.constant 0 : i32
    %11 = arith.cmpi ne, %10, %c0_i32_9 : i32
    scf.if %11 {
      %c0_10 = arith.constant 0 : index
      %c0_11 = arith.constant 0 : index
      %12 = vector.load %arg8[%c0_10, %c0_11] : memref<128x64xf32, #tpu.memory_space<vmem>>, vector<128x64xf32>
      %13 = arith.truncf %12 : vector<128x64xf32> to vector<128x64xbf16>
      %c0_12 = arith.constant 0 : index
      %c0_13 = arith.constant 0 : index
      %14 = vector.load %arg5[%c0_12, %c0_13] : memref<128x64xbf16, #tpu.memory_space<vmem>>, vector<128x64xbf16>
      tpu.vector_store %arg5[%c0_12, %c0_13], %13 {strides = array<i32>} : memref<128x64xbf16, #tpu.memory_space<vmem>>, vector<128x64xbf16>,
      %cst_14 = arith.constant dense<0.000000e+00> : vector<64xf32>
      %15 = vector.multi_reduction <add>, %12, %cst_14 [0] : vector<128x64xf32> to vector<64xf32>
      %16 = vector.shape_cast %15 : vector<64xf32> to vector<1x64xf32>
      %17 = vector.shape_cast %16 : vector<1x64xf32> to vector<1x1x64xf32>
      %c0_15 = arith.constant 0 : index
      %c0_16 = arith.constant 0 : index
      %c0_17 = arith.constant 0 : index
      %18 = vector.load %arg6[%c0_15, %c0_16, %c0_17] : memref<1x1x64xf32, #tpu.memory_space<vmem>>, vector<1x1x64xf32>
      tpu.vector_store %arg6[%c0_15, %c0_16, %c0_17], %17 {strides = array<i32>} : memref<1x1x64xf32, #tpu.memory_space<vmem>>, vector<1x1x64xf32>,
      %19 = arith.mulf %12, %12 : vector<128x64xf32>
      %cst_18 = arith.constant dense<0.000000e+00> : vector<64xf32>
      %20 = vector.multi_reduction <add>, %19, %cst_18 [0] : vector<128x64xf32> to vector<64xf32>
      %21 = vector.shape_cast %20 : vector<64xf32> to vector<1x64xf32>
      %22 = vector.shape_cast %21 : vector<1x64xf32> to vector<1x1x64xf32>
      %c0_19 = arith.constant 0 : index
      %c0_20 = arith.constant 0 : index
      %c0_21 = arith.constant 0 : index
      %23 = vector.load %arg7[%c0_19, %c0_20, %c0_21] : memref<1x1x64xf32, #tpu.memory_space<vmem>>, vector<1x1x64xf32>
      tpu.vector_store %arg7[%c0_19, %c0_20, %c0_21], %22 {strides = array<i32>} : memref<1x1x64xf32, #tpu.memory_space<vmem>>, vector<1x1x64xf32>,
    } else {
    }
    return
  }
  func.func @transform_0(%arg0: i32, %arg1: i32, %arg2: i32) -> (i32, i32) {
    %c0_i32 = arith.constant 0 : i32
    return %arg0, %arg2 : i32, i32
  }
  func.func @transform_1(%arg0: i32, %arg1: i32, %arg2: i32) -> (i32, i32) {
    %c0_i32 = arith.constant 0 : i32
    return %arg2, %arg1 : i32, i32
  }
  func.func @transform_2(%arg0: i32, %arg1: i32, %arg2: i32) -> (i32, i32) {
    %c0_i32 = arith.constant 0 : i32
    return %arg0, %arg1 : i32, i32
  }
  func.func @transform_3(%arg0: i32, %arg1: i32, %arg2: i32) -> (i32, i32, i32) {
    %c0_i32 = arith.constant 0 : i32
    %c0_i32_0 = arith.constant 0 : i32
    return %arg0, %c0_i32, %arg1 : i32, i32, i32
  }
  func.func @transform_4(%arg0: i32, %arg1: i32, %arg2: i32) -> (i32, i32, i32) {
    %c0_i32 = arith.constant 0 : i32
    %c0_i32_0 = arith.constant 0 : i32
    return %arg0, %c0_i32, %arg1 : i32, i32, i32
  }
}

module attributes {stable_mosaic.version = 11 : i64} {
  func.func @_bn_act_kernel(%arg0: i32, %arg1: memref<128x64xbf16, #tpu.memory_space<vmem>>, %arg2: memref<1x64xf32, #tpu.memory_space<vmem>>, %arg3: memref<1x64xf32, #tpu.memory_space<vmem>>, %arg4: memref<128x64xbf16, #tpu.memory_space<vmem>>) attributes {dimension_semantics = [#tpu.dimension_semantics<parallel>], iteration_bounds = array<i64: 1>, scalar_prefetch = 0 : i64, scratch_operands = 0 : i64, tpu.core_type = #tpu.core_type<tc>, window_params = [{transform_indices = @transform_0, window_bounds = array<i64: 128, 64>}, {pipeline_mode = #tpu.pipeline_mode<synchronous>, transform_indices = @transform_1, window_bounds = array<i64: 1, 64>}, {pipeline_mode = #tpu.pipeline_mode<synchronous>, transform_indices = @transform_2, window_bounds = array<i64: 1, 64>}, {transform_indices = @transform_3, window_bounds = array<i64: 128, 64>}]} {
    %c0 = arith.constant 0 : index
    %c0_0 = arith.constant 0 : index
    %0 = vector.load %arg1[%c0, %c0_0] : memref<128x64xbf16, #tpu.memory_space<vmem>>, vector<128x64xbf16>
    %1 = arith.extf %0 : vector<128x64xbf16> to vector<128x64xf32>
    %c0_1 = arith.constant 0 : index
    %c0_2 = arith.constant 0 : index
    %2 = vector.load %arg2[%c0_1, %c0_2] : memref<1x64xf32, #tpu.memory_space<vmem>>, vector<1x64xf32>
    %3 = vector.broadcast %2 : vector<1x64xf32> to vector<128x64xf32>
    %4 = arith.mulf %1, %3 : vector<128x64xf32>
    %c0_3 = arith.constant 0 : index
    %c0_4 = arith.constant 0 : index
    %5 = vector.load %arg3[%c0_3, %c0_4] : memref<1x64xf32, #tpu.memory_space<vmem>>, vector<1x64xf32>
    %6 = vector.broadcast %5 : vector<1x64xf32> to vector<128x64xf32>
    %7 = arith.addf %4, %6 : vector<128x64xf32>
    %cst = arith.constant 0.000000e+00 : f32
    %8 = vector.broadcast %cst : f32 to vector<128x64xf32>
    %9 = arith.maximumf %7, %8 : vector<128x64xf32>
    %10 = arith.truncf %9 : vector<128x64xf32> to vector<128x64xbf16>
    %c0_5 = arith.constant 0 : index
    %c0_6 = arith.constant 0 : index
    %11 = vector.load %arg4[%c0_5, %c0_6] : memref<128x64xbf16, #tpu.memory_space<vmem>>, vector<128x64xbf16>
    tpu.vector_store %arg4[%c0_5, %c0_6], %10 {strides = array<i32>} : memref<128x64xbf16, #tpu.memory_space<vmem>>, vector<128x64xbf16>,
    return
  }
  func.func @transform_0(%arg0: i32) -> (i32, i32) {
    %c0_i32 = arith.constant 0 : i32
    %c0_i32_0 = arith.constant 0 : i32
    return %arg0, %c0_i32 : i32, i32
  }
  func.func @transform_1(%arg0: i32) -> (i32, i32) {
    %c0_i32 = arith.constant 0 : i32
    %c0_i32_0 = arith.constant 0 : i32
    %c0_i32_1 = arith.constant 0 : i32
    return %c0_i32, %c0_i32_0 : i32, i32
  }
  func.func @transform_2(%arg0: i32) -> (i32, i32) {
    %c0_i32 = arith.constant 0 : i32
    %c0_i32_0 = arith.constant 0 : i32
    %c0_i32_1 = arith.constant 0 : i32
    return %c0_i32, %c0_i32_0 : i32, i32
  }
  func.func @transform_3(%arg0: i32) -> (i32, i32) {
    %c0_i32 = arith.constant 0 : i32
    %c0_i32_0 = arith.constant 0 : i32
    return %arg0, %c0_i32 : i32, i32
  }
}

module attributes {stable_mosaic.version = 11 : i64} {
  func.func @_bn_add_relu_kernel(%arg0: i32, %arg1: memref<128x64xbf16, #tpu.memory_space<vmem>>, %arg2: memref<1x64xf32, #tpu.memory_space<vmem>>, %arg3: memref<1x64xf32, #tpu.memory_space<vmem>>, %arg4: memref<128x64xbf16, #tpu.memory_space<vmem>>, %arg5: memref<128x64xbf16, #tpu.memory_space<vmem>>) attributes {dimension_semantics = [#tpu.dimension_semantics<parallel>], iteration_bounds = array<i64: 1>, scalar_prefetch = 0 : i64, scratch_operands = 0 : i64, tpu.core_type = #tpu.core_type<tc>, window_params = [{transform_indices = @transform_0, window_bounds = array<i64: 128, 64>}, {pipeline_mode = #tpu.pipeline_mode<synchronous>, transform_indices = @transform_1, window_bounds = array<i64: 1, 64>}, {pipeline_mode = #tpu.pipeline_mode<synchronous>, transform_indices = @transform_2, window_bounds = array<i64: 1, 64>}, {transform_indices = @transform_3, window_bounds = array<i64: 128, 64>}, {transform_indices = @transform_4, window_bounds = array<i64: 128, 64>}]} {
    %c0 = arith.constant 0 : index
    %c0_0 = arith.constant 0 : index
    %0 = vector.load %arg1[%c0, %c0_0] : memref<128x64xbf16, #tpu.memory_space<vmem>>, vector<128x64xbf16>
    %1 = arith.extf %0 : vector<128x64xbf16> to vector<128x64xf32>
    %c0_1 = arith.constant 0 : index
    %c0_2 = arith.constant 0 : index
    %2 = vector.load %arg2[%c0_1, %c0_2] : memref<1x64xf32, #tpu.memory_space<vmem>>, vector<1x64xf32>
    %3 = vector.broadcast %2 : vector<1x64xf32> to vector<128x64xf32>
    %4 = arith.mulf %1, %3 : vector<128x64xf32>
    %c0_3 = arith.constant 0 : index
    %c0_4 = arith.constant 0 : index
    %5 = vector.load %arg3[%c0_3, %c0_4] : memref<1x64xf32, #tpu.memory_space<vmem>>, vector<1x64xf32>
    %6 = vector.broadcast %5 : vector<1x64xf32> to vector<128x64xf32>
    %7 = arith.addf %4, %6 : vector<128x64xf32>
    %c0_5 = arith.constant 0 : index
    %c0_6 = arith.constant 0 : index
    %8 = vector.load %arg4[%c0_5, %c0_6] : memref<128x64xbf16, #tpu.memory_space<vmem>>, vector<128x64xbf16>
    %9 = arith.extf %8 : vector<128x64xbf16> to vector<128x64xf32>
    %10 = arith.addf %7, %9 : vector<128x64xf32>
    %cst = arith.constant 0.000000e+00 : f32
    %11 = vector.broadcast %cst : f32 to vector<128x64xf32>
    %12 = arith.maximumf %10, %11 : vector<128x64xf32>
    %13 = arith.truncf %12 : vector<128x64xf32> to vector<128x64xbf16>
    %c0_7 = arith.constant 0 : index
    %c0_8 = arith.constant 0 : index
    %14 = vector.load %arg5[%c0_7, %c0_8] : memref<128x64xbf16, #tpu.memory_space<vmem>>, vector<128x64xbf16>
    tpu.vector_store %arg5[%c0_7, %c0_8], %13 {strides = array<i32>} : memref<128x64xbf16, #tpu.memory_space<vmem>>, vector<128x64xbf16>,
    return
  }
  func.func @transform_0(%arg0: i32) -> (i32, i32) {
    %c0_i32 = arith.constant 0 : i32
    %c0_i32_0 = arith.constant 0 : i32
    return %arg0, %c0_i32 : i32, i32
  }
  func.func @transform_1(%arg0: i32) -> (i32, i32) {
    %c0_i32 = arith.constant 0 : i32
    %c0_i32_0 = arith.constant 0 : i32
    %c0_i32_1 = arith.constant 0 : i32
    return %c0_i32, %c0_i32_0 : i32, i32
  }
  func.func @transform_2(%arg0: i32) -> (i32, i32) {
    %c0_i32 = arith.constant 0 : i32
    %c0_i32_0 = arith.constant 0 : i32
    %c0_i32_1 = arith.constant 0 : i32
    return %c0_i32, %c0_i32_0 : i32, i32
  }
  func.func @transform_3(%arg0: i32) -> (i32, i32) {
    %c0_i32 = arith.constant 0 : i32
    %c0_i32_0 = arith.constant 0 : i32
    return %arg0, %c0_i32 : i32, i32
  }
  func.func @transform_4(%arg0: i32) -> (i32, i32) {
    %c0_i32 = arith.constant 0 : i32
    %c0_i32_0 = arith.constant 0 : i32
    return %arg0, %c0_i32 : i32, i32
  }
}

module attributes {stable_mosaic.version = 11 : i64} {
  func.func @_conv_mm_kernel(%arg0: i32, %arg1: i32, %arg2: i32, %arg3: memref<32x64xbf16, #tpu.memory_space<vmem>>, %arg4: memref<64x128xbf16, #tpu.memory_space<vmem>>, %arg5: memref<32x128xbf16, #tpu.memory_space<vmem>>, %arg6: memref<1x1x128xf32, #tpu.memory_space<vmem>>, %arg7: memref<1x1x128xf32, #tpu.memory_space<vmem>>, %arg8: memref<32x128xf32, #tpu.memory_space<vmem>>) attributes {dimension_semantics = [#tpu.dimension_semantics<parallel>, #tpu.dimension_semantics<parallel>, #tpu.dimension_semantics<arbitrary>], iteration_bounds = array<i64: 1, 1, 1>, scalar_prefetch = 0 : i64, scratch_operands = 1 : i64, tpu.core_type = #tpu.core_type<tc>, window_params = [{transform_indices = @transform_0, window_bounds = array<i64: 32, 64>}, {transform_indices = @transform_1, window_bounds = array<i64: 64, 128>}, {transform_indices = @transform_2, window_bounds = array<i64: 32, 128>}, {transform_indices = @transform_3, window_bounds = array<i64: 1, 1, 128>}, {transform_indices = @transform_4, window_bounds = array<i64: 1, 1, 128>}]} {
    %c0_i32 = arith.constant 0 : i32
    %0 = arith.cmpi eq, %arg2, %c0_i32 : i32
    %1 = arith.extui %0 : i1 to i32
    %c0_i32_0 = arith.constant 0 : i32
    %2 = arith.cmpi ne, %1, %c0_i32_0 : i32
    scf.if %2 {
      %cst_10 = arith.constant 0.000000e+00 : f32
      %12 = vector.broadcast %cst_10 : f32 to vector<32x128xf32>
      %c0_11 = arith.constant 0 : index
      %c0_12 = arith.constant 0 : index
      %13 = vector.load %arg8[%c0_11, %c0_12] : memref<32x128xf32, #tpu.memory_space<vmem>>, vector<32x128xf32>
      tpu.vector_store %arg8[%c0_11, %c0_12], %12 {strides = array<i32>} : memref<32x128xf32, #tpu.memory_space<vmem>>, vector<32x128xf32>,
    } else {
    }
    %c0 = arith.constant 0 : index
    %c0_1 = arith.constant 0 : index
    %3 = vector.load %arg8[%c0, %c0_1] : memref<32x128xf32, #tpu.memory_space<vmem>>, vector<32x128xf32>
    %c0_2 = arith.constant 0 : index
    %c0_3 = arith.constant 0 : index
    %4 = vector.load %arg3[%c0_2, %c0_3] : memref<32x64xbf16, #tpu.memory_space<vmem>>, vector<32x64xbf16>
    %c0_4 = arith.constant 0 : index
    %c0_5 = arith.constant 0 : index
    %5 = vector.load %arg4[%c0_4, %c0_5] : memref<64x128xbf16, #tpu.memory_space<vmem>>, vector<64x128xbf16>
    %cst = arith.constant dense<0.000000e+00> : vector<32x128xf32>
    %6 = tpu.matmul %4, %5, %cst {dimension_numbers = #tpu.dot_dimension_numbers<[1], [0], [0], [1], [0, 0, 1, 1], [], []>} : vector<32x64xbf16>, vector<64x128xbf16>, vector<32x128xf32> -> vector<32x128xf32>
    %7 = arith.addf %3, %6 : vector<32x128xf32>
    %c0_6 = arith.constant 0 : index
    %c0_7 = arith.constant 0 : index
    %8 = vector.load %arg8[%c0_6, %c0_7] : memref<32x128xf32, #tpu.memory_space<vmem>>, vector<32x128xf32>
    tpu.vector_store %arg8[%c0_6, %c0_7], %7 {strides = array<i32>} : memref<32x128xf32, #tpu.memory_space<vmem>>, vector<32x128xf32>,
    %c0_i32_8 = arith.constant 0 : i32
    %9 = arith.cmpi eq, %arg2, %c0_i32_8 : i32
    %10 = arith.extui %9 : i1 to i32
    %c0_i32_9 = arith.constant 0 : i32
    %11 = arith.cmpi ne, %10, %c0_i32_9 : i32
    scf.if %11 {
      %c0_10 = arith.constant 0 : index
      %c0_11 = arith.constant 0 : index
      %12 = vector.load %arg8[%c0_10, %c0_11] : memref<32x128xf32, #tpu.memory_space<vmem>>, vector<32x128xf32>
      %13 = arith.truncf %12 : vector<32x128xf32> to vector<32x128xbf16>
      %c0_12 = arith.constant 0 : index
      %c0_13 = arith.constant 0 : index
      %14 = vector.load %arg5[%c0_12, %c0_13] : memref<32x128xbf16, #tpu.memory_space<vmem>>, vector<32x128xbf16>
      tpu.vector_store %arg5[%c0_12, %c0_13], %13 {strides = array<i32>} : memref<32x128xbf16, #tpu.memory_space<vmem>>, vector<32x128xbf16>,
      %cst_14 = arith.constant dense<0.000000e+00> : vector<128xf32>
      %15 = vector.multi_reduction <add>, %12, %cst_14 [0] : vector<32x128xf32> to vector<128xf32>
      %16 = vector.shape_cast %15 : vector<128xf32> to vector<1x128xf32>
      %17 = vector.shape_cast %16 : vector<1x128xf32> to vector<1x1x128xf32>
      %c0_15 = arith.constant 0 : index
      %c0_16 = arith.constant 0 : index
      %c0_17 = arith.constant 0 : index
      %18 = vector.load %arg6[%c0_15, %c0_16, %c0_17] : memref<1x1x128xf32, #tpu.memory_space<vmem>>, vector<1x1x128xf32>
      tpu.vector_store %arg6[%c0_15, %c0_16, %c0_17], %17 {strides = array<i32>} : memref<1x1x128xf32, #tpu.memory_space<vmem>>, vector<1x1x128xf32>,
      %19 = arith.mulf %12, %12 : vector<32x128xf32>
      %cst_18 = arith.constant dense<0.000000e+00> : vector<128xf32>
      %20 = vector.multi_reduction <add>, %19, %cst_18 [0] : vector<32x128xf32> to vector<128xf32>
      %21 = vector.shape_cast %20 : vector<128xf32> to vector<1x128xf32>
      %22 = vector.shape_cast %21 : vector<1x128xf32> to vector<1x1x128xf32>
      %c0_19 = arith.constant 0 : index
      %c0_20 = arith.constant 0 : index
      %c0_21 = arith.constant 0 : index
      %23 = vector.load %arg7[%c0_19, %c0_20, %c0_21] : memref<1x1x128xf32, #tpu.memory_space<vmem>>, vector<1x1x128xf32>
      tpu.vector_store %arg7[%c0_19, %c0_20, %c0_21], %22 {strides = array<i32>} : memref<1x1x128xf32, #tpu.memory_space<vmem>>, vector<1x1x128xf32>,
    } else {
    }
    return
  }
  func.func @transform_0(%arg0: i32, %arg1: i32, %arg2: i32) -> (i32, i32) {
    %c0_i32 = arith.constant 0 : i32
    return %arg0, %arg2 : i32, i32
  }
  func.func @transform_1(%arg0: i32, %arg1: i32, %arg2: i32) -> (i32, i32) {
    %c0_i32 = arith.constant 0 : i32
    return %arg2, %arg1 : i32, i32
  }
  func.func @transform_2(%arg0: i32, %arg1: i32, %arg2: i32) -> (i32, i32) {
    %c0_i32 = arith.constant 0 : i32
    return %arg0, %arg1 : i32, i32
  }
  func.func @transform_3(%arg0: i32, %arg1: i32, %arg2: i32) -> (i32, i32, i32) {
    %c0_i32 = arith.constant 0 : i32
    %c0_i32_0 = arith.constant 0 : i32
    return %arg0, %c0_i32, %arg1 : i32, i32, i32
  }
  func.func @transform_4(%arg0: i32, %arg1: i32, %arg2: i32) -> (i32, i32, i32) {
    %c0_i32 = arith.constant 0 : i32
    %c0_i32_0 = arith.constant 0 : i32
    return %arg0, %c0_i32, %arg1 : i32, i32, i32
  }
}

module attributes {stable_mosaic.version = 11 : i64} {
  func.func @_conv_mm_kernel(%arg0: i32, %arg1: i32, %arg2: i32, %arg3: memref<32x576xbf16, #tpu.memory_space<vmem>>, %arg4: memref<576x128xbf16, #tpu.memory_space<vmem>>, %arg5: memref<32x128xbf16, #tpu.memory_space<vmem>>, %arg6: memref<1x1x128xf32, #tpu.memory_space<vmem>>, %arg7: memref<1x1x128xf32, #tpu.memory_space<vmem>>, %arg8: memref<32x128xf32, #tpu.memory_space<vmem>>) attributes {dimension_semantics = [#tpu.dimension_semantics<parallel>, #tpu.dimension_semantics<parallel>, #tpu.dimension_semantics<arbitrary>], iteration_bounds = array<i64: 1, 1, 1>, scalar_prefetch = 0 : i64, scratch_operands = 1 : i64, tpu.core_type = #tpu.core_type<tc>, window_params = [{transform_indices = @transform_0, window_bounds = array<i64: 32, 576>}, {transform_indices = @transform_1, window_bounds = array<i64: 576, 128>}, {transform_indices = @transform_2, window_bounds = array<i64: 32, 128>}, {transform_indices = @transform_3, window_bounds = array<i64: 1, 1, 128>}, {transform_indices = @transform_4, window_bounds = array<i64: 1, 1, 128>}]} {
    %c0_i32 = arith.constant 0 : i32
    %0 = arith.cmpi eq, %arg2, %c0_i32 : i32
    %1 = arith.extui %0 : i1 to i32
    %c0_i32_0 = arith.constant 0 : i32
    %2 = arith.cmpi ne, %1, %c0_i32_0 : i32
    scf.if %2 {
      %cst_10 = arith.constant 0.000000e+00 : f32
      %12 = vector.broadcast %cst_10 : f32 to vector<32x128xf32>
      %c0_11 = arith.constant 0 : index
      %c0_12 = arith.constant 0 : index
      %13 = vector.load %arg8[%c0_11, %c0_12] : memref<32x128xf32, #tpu.memory_space<vmem>>, vector<32x128xf32>
      tpu.vector_store %arg8[%c0_11, %c0_12], %12 {strides = array<i32>} : memref<32x128xf32, #tpu.memory_space<vmem>>, vector<32x128xf32>,
    } else {
    }
    %c0 = arith.constant 0 : index
    %c0_1 = arith.constant 0 : index
    %3 = vector.load %arg8[%c0, %c0_1] : memref<32x128xf32, #tpu.memory_space<vmem>>, vector<32x128xf32>
    %c0_2 = arith.constant 0 : index
    %c0_3 = arith.constant 0 : index
    %4 = vector.load %arg3[%c0_2, %c0_3] : memref<32x576xbf16, #tpu.memory_space<vmem>>, vector<32x576xbf16>
    %c0_4 = arith.constant 0 : index
    %c0_5 = arith.constant 0 : index
    %5 = vector.load %arg4[%c0_4, %c0_5] : memref<576x128xbf16, #tpu.memory_space<vmem>>, vector<576x128xbf16>
    %cst = arith.constant dense<0.000000e+00> : vector<32x128xf32>
    %6 = tpu.matmul %4, %5, %cst {dimension_numbers = #tpu.dot_dimension_numbers<[1], [0], [0], [1], [0, 0, 1, 1], [], []>} : vector<32x576xbf16>, vector<576x128xbf16>, vector<32x128xf32> -> vector<32x128xf32>
    %7 = arith.addf %3, %6 : vector<32x128xf32>
    %c0_6 = arith.constant 0 : index
    %c0_7 = arith.constant 0 : index
    %8 = vector.load %arg8[%c0_6, %c0_7] : memref<32x128xf32, #tpu.memory_space<vmem>>, vector<32x128xf32>
    tpu.vector_store %arg8[%c0_6, %c0_7], %7 {strides = array<i32>} : memref<32x128xf32, #tpu.memory_space<vmem>>, vector<32x128xf32>,
    %c0_i32_8 = arith.constant 0 : i32
    %9 = arith.cmpi eq, %arg2, %c0_i32_8 : i32
    %10 = arith.extui %9 : i1 to i32
    %c0_i32_9 = arith.constant 0 : i32
    %11 = arith.cmpi ne, %10, %c0_i32_9 : i32
    scf.if %11 {
      %c0_10 = arith.constant 0 : index
      %c0_11 = arith.constant 0 : index
      %12 = vector.load %arg8[%c0_10, %c0_11] : memref<32x128xf32, #tpu.memory_space<vmem>>, vector<32x128xf32>
      %13 = arith.truncf %12 : vector<32x128xf32> to vector<32x128xbf16>
      %c0_12 = arith.constant 0 : index
      %c0_13 = arith.constant 0 : index
      %14 = vector.load %arg5[%c0_12, %c0_13] : memref<32x128xbf16, #tpu.memory_space<vmem>>, vector<32x128xbf16>
      tpu.vector_store %arg5[%c0_12, %c0_13], %13 {strides = array<i32>} : memref<32x128xbf16, #tpu.memory_space<vmem>>, vector<32x128xbf16>,
      %cst_14 = arith.constant dense<0.000000e+00> : vector<128xf32>
      %15 = vector.multi_reduction <add>, %12, %cst_14 [0] : vector<32x128xf32> to vector<128xf32>
      %16 = vector.shape_cast %15 : vector<128xf32> to vector<1x128xf32>
      %17 = vector.shape_cast %16 : vector<1x128xf32> to vector<1x1x128xf32>
      %c0_15 = arith.constant 0 : index
      %c0_16 = arith.constant 0 : index
      %c0_17 = arith.constant 0 : index
      %18 = vector.load %arg6[%c0_15, %c0_16, %c0_17] : memref<1x1x128xf32, #tpu.memory_space<vmem>>, vector<1x1x128xf32>
      tpu.vector_store %arg6[%c0_15, %c0_16, %c0_17], %17 {strides = array<i32>} : memref<1x1x128xf32, #tpu.memory_space<vmem>>, vector<1x1x128xf32>,
      %19 = arith.mulf %12, %12 : vector<32x128xf32>
      %cst_18 = arith.constant dense<0.000000e+00> : vector<128xf32>
      %20 = vector.multi_reduction <add>, %19, %cst_18 [0] : vector<32x128xf32> to vector<128xf32>
      %21 = vector.shape_cast %20 : vector<128xf32> to vector<1x128xf32>
      %22 = vector.shape_cast %21 : vector<1x128xf32> to vector<1x1x128xf32>
      %c0_19 = arith.constant 0 : index
      %c0_20 = arith.constant 0 : index
      %c0_21 = arith.constant 0 : index
      %23 = vector.load %arg7[%c0_19, %c0_20, %c0_21] : memref<1x1x128xf32, #tpu.memory_space<vmem>>, vector<1x1x128xf32>
      tpu.vector_store %arg7[%c0_19, %c0_20, %c0_21], %22 {strides = array<i32>} : memref<1x1x128xf32, #tpu.memory_space<vmem>>, vector<1x1x128xf32>,
    } else {
    }
    return
  }
  func.func @transform_0(%arg0: i32, %arg1: i32, %arg2: i32) -> (i32, i32) {
    %c0_i32 = arith.constant 0 : i32
    return %arg0, %arg2 : i32, i32
  }
  func.func @transform_1(%arg0: i32, %arg1: i32, %arg2: i32) -> (i32, i32) {
    %c0_i32 = arith.constant 0 : i32
    return %arg2, %arg1 : i32, i32
  }
  func.func @transform_2(%arg0: i32, %arg1: i32, %arg2: i32) -> (i32, i32) {
    %c0_i32 = arith.constant 0 : i32
    return %arg0, %arg1 : i32, i32
  }
  func.func @transform_3(%arg0: i32, %arg1: i32, %arg2: i32) -> (i32, i32, i32) {
    %c0_i32 = arith.constant 0 : i32
    %c0_i32_0 = arith.constant 0 : i32
    return %arg0, %c0_i32, %arg1 : i32, i32, i32
  }
  func.func @transform_4(%arg0: i32, %arg1: i32, %arg2: i32) -> (i32, i32, i32) {
    %c0_i32 = arith.constant 0 : i32
    %c0_i32_0 = arith.constant 0 : i32
    return %arg0, %c0_i32, %arg1 : i32, i32, i32
  }
}

module attributes {stable_mosaic.version = 11 : i64} {
  func.func @_bn_act_kernel(%arg0: i32, %arg1: memref<32x128xbf16, #tpu.memory_space<vmem>>, %arg2: memref<1x128xf32, #tpu.memory_space<vmem>>, %arg3: memref<1x128xf32, #tpu.memory_space<vmem>>, %arg4: memref<32x128xbf16, #tpu.memory_space<vmem>>) attributes {dimension_semantics = [#tpu.dimension_semantics<parallel>], iteration_bounds = array<i64: 1>, scalar_prefetch = 0 : i64, scratch_operands = 0 : i64, tpu.core_type = #tpu.core_type<tc>, window_params = [{transform_indices = @transform_0, window_bounds = array<i64: 32, 128>}, {pipeline_mode = #tpu.pipeline_mode<synchronous>, transform_indices = @transform_1, window_bounds = array<i64: 1, 128>}, {pipeline_mode = #tpu.pipeline_mode<synchronous>, transform_indices = @transform_2, window_bounds = array<i64: 1, 128>}, {transform_indices = @transform_3, window_bounds = array<i64: 32, 128>}]} {
    %c0 = arith.constant 0 : index
    %c0_0 = arith.constant 0 : index
    %0 = vector.load %arg1[%c0, %c0_0] : memref<32x128xbf16, #tpu.memory_space<vmem>>, vector<32x128xbf16>
    %1 = arith.extf %0 : vector<32x128xbf16> to vector<32x128xf32>
    %c0_1 = arith.constant 0 : index
    %c0_2 = arith.constant 0 : index
    %2 = vector.load %arg2[%c0_1, %c0_2] : memref<1x128xf32, #tpu.memory_space<vmem>>, vector<1x128xf32>
    %3 = vector.broadcast %2 : vector<1x128xf32> to vector<32x128xf32>
    %4 = arith.mulf %1, %3 : vector<32x128xf32>
    %c0_3 = arith.constant 0 : index
    %c0_4 = arith.constant 0 : index
    %5 = vector.load %arg3[%c0_3, %c0_4] : memref<1x128xf32, #tpu.memory_space<vmem>>, vector<1x128xf32>
    %6 = vector.broadcast %5 : vector<1x128xf32> to vector<32x128xf32>
    %7 = arith.addf %4, %6 : vector<32x128xf32>
    %cst = arith.constant 0.000000e+00 : f32
    %8 = vector.broadcast %cst : f32 to vector<32x128xf32>
    %9 = arith.maximumf %7, %8 : vector<32x128xf32>
    %10 = arith.truncf %9 : vector<32x128xf32> to vector<32x128xbf16>
    %c0_5 = arith.constant 0 : index
    %c0_6 = arith.constant 0 : index
    %11 = vector.load %arg4[%c0_5, %c0_6] : memref<32x128xbf16, #tpu.memory_space<vmem>>, vector<32x128xbf16>
    tpu.vector_store %arg4[%c0_5, %c0_6], %10 {strides = array<i32>} : memref<32x128xbf16, #tpu.memory_space<vmem>>, vector<32x128xbf16>,
    return
  }
  func.func @transform_0(%arg0: i32) -> (i32, i32) {
    %c0_i32 = arith.constant 0 : i32
    %c0_i32_0 = arith.constant 0 : i32
    return %arg0, %c0_i32 : i32, i32
  }
  func.func @transform_1(%arg0: i32) -> (i32, i32) {
    %c0_i32 = arith.constant 0 : i32
    %c0_i32_0 = arith.constant 0 : i32
    %c0_i32_1 = arith.constant 0 : i32
    return %c0_i32, %c0_i32_0 : i32, i32
  }
  func.func @transform_2(%arg0: i32) -> (i32, i32) {
    %c0_i32 = arith.constant 0 : i32
    %c0_i32_0 = arith.constant 0 : i32
    %c0_i32_1 = arith.constant 0 : i32
    return %c0_i32, %c0_i32_0 : i32, i32
  }
  func.func @transform_3(%arg0: i32) -> (i32, i32) {
    %c0_i32 = arith.constant 0 : i32
    %c0_i32_0 = arith.constant 0 : i32
    return %arg0, %c0_i32 : i32, i32
  }
}

module attributes {stable_mosaic.version = 11 : i64} {
  func.func @_bn_bn_add_relu_kernel(%arg0: i32, %arg1: memref<32x128xbf16, #tpu.memory_space<vmem>>, %arg2: memref<1x128xf32, #tpu.memory_space<vmem>>, %arg3: memref<1x128xf32, #tpu.memory_space<vmem>>, %arg4: memref<32x128xbf16, #tpu.memory_space<vmem>>, %arg5: memref<1x128xf32, #tpu.memory_space<vmem>>, %arg6: memref<1x128xf32, #tpu.memory_space<vmem>>, %arg7: memref<32x128xbf16, #tpu.memory_space<vmem>>) attributes {dimension_semantics = [#tpu.dimension_semantics<parallel>], iteration_bounds = array<i64: 1>, scalar_prefetch = 0 : i64, scratch_operands = 0 : i64, tpu.core_type = #tpu.core_type<tc>, window_params = [{transform_indices = @transform_0, window_bounds = array<i64: 32, 128>}, {pipeline_mode = #tpu.pipeline_mode<synchronous>, transform_indices = @transform_1, window_bounds = array<i64: 1, 128>}, {pipeline_mode = #tpu.pipeline_mode<synchronous>, transform_indices = @transform_2, window_bounds = array<i64: 1, 128>}, {transform_indices = @transform_3, window_bounds = array<i64: 32, 128>}, {pipeline_mode = #tpu.pipeline_mode<synchronous>, transform_indices = @transform_4, window_bounds = array<i64: 1, 128>}, {pipeline_mode = #tpu.pipeline_mode<synchronous>, transform_indices = @transform_5, window_bounds = array<i64: 1, 128>}, {transform_indices = @transform_6, window_bounds = array<i64: 32, 128>}]} {
    %c0 = arith.constant 0 : index
    %c0_0 = arith.constant 0 : index
    %0 = vector.load %arg1[%c0, %c0_0] : memref<32x128xbf16, #tpu.memory_space<vmem>>, vector<32x128xbf16>
    %1 = arith.extf %0 : vector<32x128xbf16> to vector<32x128xf32>
    %c0_1 = arith.constant 0 : index
    %c0_2 = arith.constant 0 : index
    %2 = vector.load %arg2[%c0_1, %c0_2] : memref<1x128xf32, #tpu.memory_space<vmem>>, vector<1x128xf32>
    %3 = vector.broadcast %2 : vector<1x128xf32> to vector<32x128xf32>
    %4 = arith.mulf %1, %3 : vector<32x128xf32>
    %c0_3 = arith.constant 0 : index
    %c0_4 = arith.constant 0 : index
    %5 = vector.load %arg3[%c0_3, %c0_4] : memref<1x128xf32, #tpu.memory_space<vmem>>, vector<1x128xf32>
    %6 = vector.broadcast %5 : vector<1x128xf32> to vector<32x128xf32>
    %7 = arith.addf %4, %6 : vector<32x128xf32>
    %c0_5 = arith.constant 0 : index
    %c0_6 = arith.constant 0 : index
    %8 = vector.load %arg4[%c0_5, %c0_6] : memref<32x128xbf16, #tpu.memory_space<vmem>>, vector<32x128xbf16>
    %9 = arith.extf %8 : vector<32x128xbf16> to vector<32x128xf32>
    %c0_7 = arith.constant 0 : index
    %c0_8 = arith.constant 0 : index
    %10 = vector.load %arg5[%c0_7, %c0_8] : memref<1x128xf32, #tpu.memory_space<vmem>>, vector<1x128xf32>
    %11 = vector.broadcast %10 : vector<1x128xf32> to vector<32x128xf32>
    %12 = arith.mulf %9, %11 : vector<32x128xf32>
    %c0_9 = arith.constant 0 : index
    %c0_10 = arith.constant 0 : index
    %13 = vector.load %arg6[%c0_9, %c0_10] : memref<1x128xf32, #tpu.memory_space<vmem>>, vector<1x128xf32>
    %14 = vector.broadcast %13 : vector<1x128xf32> to vector<32x128xf32>
    %15 = arith.addf %12, %14 : vector<32x128xf32>
    %16 = arith.addf %7, %15 : vector<32x128xf32>
    %cst = arith.constant 0.000000e+00 : f32
    %17 = vector.broadcast %cst : f32 to vector<32x128xf32>
    %18 = arith.maximumf %16, %17 : vector<32x128xf32>
    %19 = arith.truncf %18 : vector<32x128xf32> to vector<32x128xbf16>
    %c0_11 = arith.constant 0 : index
    %c0_12 = arith.constant 0 : index
    %20 = vector.load %arg7[%c0_11, %c0_12] : memref<32x128xbf16, #tpu.memory_space<vmem>>, vector<32x128xbf16>
    tpu.vector_store %arg7[%c0_11, %c0_12], %19 {strides = array<i32>} : memref<32x128xbf16, #tpu.memory_space<vmem>>, vector<32x128xbf16>,
    return
  }
  func.func @transform_0(%arg0: i32) -> (i32, i32) {
    %c0_i32 = arith.constant 0 : i32
    %c0_i32_0 = arith.constant 0 : i32
    return %arg0, %c0_i32 : i32, i32
  }
  func.func @transform_1(%arg0: i32) -> (i32, i32) {
    %c0_i32 = arith.constant 0 : i32
    %c0_i32_0 = arith.constant 0 : i32
    %c0_i32_1 = arith.constant 0 : i32
    return %c0_i32, %c0_i32_0 : i32, i32
  }
  func.func @transform_2(%arg0: i32) -> (i32, i32) {
    %c0_i32 = arith.constant 0 : i32
    %c0_i32_0 = arith.constant 0 : i32
    %c0_i32_1 = arith.constant 0 : i32
    return %c0_i32, %c0_i32_0 : i32, i32
  }
  func.func @transform_3(%arg0: i32) -> (i32, i32) {
    %c0_i32 = arith.constant 0 : i32
    %c0_i32_0 = arith.constant 0 : i32
    return %arg0, %c0_i32 : i32, i32
  }
  func.func @transform_4(%arg0: i32) -> (i32, i32) {
    %c0_i32 = arith.constant 0 : i32
    %c0_i32_0 = arith.constant 0 : i32
    %c0_i32_1 = arith.constant 0 : i32
    return %c0_i32, %c0_i32_0 : i32, i32
  }
  func.func @transform_5(%arg0: i32) -> (i32, i32) {
    %c0_i32 = arith.constant 0 : i32
    %c0_i32_0 = arith.constant 0 : i32
    %c0_i32_1 = arith.constant 0 : i32
    return %c0_i32, %c0_i32_0 : i32, i32
  }
  func.func @transform_6(%arg0: i32) -> (i32, i32) {
    %c0_i32 = arith.constant 0 : i32
    %c0_i32_0 = arith.constant 0 : i32
    return %arg0, %c0_i32 : i32, i32
  }
}

module attributes {stable_mosaic.version = 11 : i64} {
  func.func @_conv_mm_kernel(%arg0: i32, %arg1: i32, %arg2: i32, %arg3: memref<32x128xbf16, #tpu.memory_space<vmem>>, %arg4: memref<128x128xbf16, #tpu.memory_space<vmem>>, %arg5: memref<32x128xbf16, #tpu.memory_space<vmem>>, %arg6: memref<1x1x128xf32, #tpu.memory_space<vmem>>, %arg7: memref<1x1x128xf32, #tpu.memory_space<vmem>>, %arg8: memref<32x128xf32, #tpu.memory_space<vmem>>) attributes {dimension_semantics = [#tpu.dimension_semantics<parallel>, #tpu.dimension_semantics<parallel>, #tpu.dimension_semantics<arbitrary>], iteration_bounds = array<i64: 1, 1, 9>, scalar_prefetch = 0 : i64, scratch_operands = 1 : i64, tpu.core_type = #tpu.core_type<tc>, window_params = [{transform_indices = @transform_0, window_bounds = array<i64: 32, 128>}, {transform_indices = @transform_1, window_bounds = array<i64: 128, 128>}, {transform_indices = @transform_2, window_bounds = array<i64: 32, 128>}, {transform_indices = @transform_3, window_bounds = array<i64: 1, 1, 128>}, {transform_indices = @transform_4, window_bounds = array<i64: 1, 1, 128>}]} {
    %c0_i32 = arith.constant 0 : i32
    %0 = arith.cmpi eq, %arg2, %c0_i32 : i32
    %1 = arith.extui %0 : i1 to i32
    %c0_i32_0 = arith.constant 0 : i32
    %2 = arith.cmpi ne, %1, %c0_i32_0 : i32
    scf.if %2 {
      %cst_9 = arith.constant 0.000000e+00 : f32
      %12 = vector.broadcast %cst_9 : f32 to vector<32x128xf32>
      %c0_10 = arith.constant 0 : index
      %c0_11 = arith.constant 0 : index
      %13 = vector.load %arg8[%c0_10, %c0_11] : memref<32x128xf32, #tpu.memory_space<vmem>>, vector<32x128xf32>
      tpu.vector_store %arg8[%c0_10, %c0_11], %12 {strides = array<i32>} : memref<32x128xf32, #tpu.memory_space<vmem>>, vector<32x128xf32>,
    } else {
    }
    %c0 = arith.constant 0 : index
    %c0_1 = arith.constant 0 : index
    %3 = vector.load %arg8[%c0, %c0_1] : memref<32x128xf32, #tpu.memory_space<vmem>>, vector<32x128xf32>
    %c0_2 = arith.constant 0 : index
    %c0_3 = arith.constant 0 : index
    %4 = vector.load %arg3[%c0_2, %c0_3] : memref<32x128xbf16, #tpu.memory_space<vmem>>, vector<32x128xbf16>
    %c0_4 = arith.constant 0 : index
    %c0_5 = arith.constant 0 : index
    %5 = vector.load %arg4[%c0_4, %c0_5] : memref<128x128xbf16, #tpu.memory_space<vmem>>, vector<128x128xbf16>
    %cst = arith.constant dense<0.000000e+00> : vector<32x128xf32>
    %6 = tpu.matmul %4, %5, %cst {dimension_numbers = #tpu.dot_dimension_numbers<[1], [0], [0], [1], [0, 0, 1, 1], [], []>} : vector<32x128xbf16>, vector<128x128xbf16>, vector<32x128xf32> -> vector<32x128xf32>
    %7 = arith.addf %3, %6 : vector<32x128xf32>
    %c0_6 = arith.constant 0 : index
    %c0_7 = arith.constant 0 : index
    %8 = vector.load %arg8[%c0_6, %c0_7] : memref<32x128xf32, #tpu.memory_space<vmem>>, vector<32x128xf32>
    tpu.vector_store %arg8[%c0_6, %c0_7], %7 {strides = array<i32>} : memref<32x128xf32, #tpu.memory_space<vmem>>, vector<32x128xf32>,
    %c8_i32 = arith.constant 8 : i32
    %9 = arith.cmpi eq, %arg2, %c8_i32 : i32
    %10 = arith.extui %9 : i1 to i32
    %c0_i32_8 = arith.constant 0 : i32
    %11 = arith.cmpi ne, %10, %c0_i32_8 : i32
    scf.if %11 {
      %c0_9 = arith.constant 0 : index
      %c0_10 = arith.constant 0 : index
      %12 = vector.load %arg8[%c0_9, %c0_10] : memref<32x128xf32, #tpu.memory_space<vmem>>, vector<32x128xf32>
      %13 = arith.truncf %12 : vector<32x128xf32> to vector<32x128xbf16>
      %c0_11 = arith.constant 0 : index
      %c0_12 = arith.constant 0 : index
      %14 = vector.load %arg5[%c0_11, %c0_12] : memref<32x128xbf16, #tpu.memory_space<vmem>>, vector<32x128xbf16>
      tpu.vector_store %arg5[%c0_11, %c0_12], %13 {strides = array<i32>} : memref<32x128xbf16, #tpu.memory_space<vmem>>, vector<32x128xbf16>,
      %cst_13 = arith.constant dense<0.000000e+00> : vector<128xf32>
      %15 = vector.multi_reduction <add>, %12, %cst_13 [0] : vector<32x128xf32> to vector<128xf32>
      %16 = vector.shape_cast %15 : vector<128xf32> to vector<1x128xf32>
      %17 = vector.shape_cast %16 : vector<1x128xf32> to vector<1x1x128xf32>
      %c0_14 = arith.constant 0 : index
      %c0_15 = arith.constant 0 : index
      %c0_16 = arith.constant 0 : index
      %18 = vector.load %arg6[%c0_14, %c0_15, %c0_16] : memref<1x1x128xf32, #tpu.memory_space<vmem>>, vector<1x1x128xf32>
      tpu.vector_store %arg6[%c0_14, %c0_15, %c0_16], %17 {strides = array<i32>} : memref<1x1x128xf32, #tpu.memory_space<vmem>>, vector<1x1x128xf32>,
      %19 = arith.mulf %12, %12 : vector<32x128xf32>
      %cst_17 = arith.constant dense<0.000000e+00> : vector<128xf32>
      %20 = vector.multi_reduction <add>, %19, %cst_17 [0] : vector<32x128xf32> to vector<128xf32>
      %21 = vector.shape_cast %20 : vector<128xf32> to vector<1x128xf32>
      %22 = vector.shape_cast %21 : vector<1x128xf32> to vector<1x1x128xf32>
      %c0_18 = arith.constant 0 : index
      %c0_19 = arith.constant 0 : index
      %c0_20 = arith.constant 0 : index
      %23 = vector.load %arg7[%c0_18, %c0_19, %c0_20] : memref<1x1x128xf32, #tpu.memory_space<vmem>>, vector<1x1x128xf32>
      tpu.vector_store %arg7[%c0_18, %c0_19, %c0_20], %22 {strides = array<i32>} : memref<1x1x128xf32, #tpu.memory_space<vmem>>, vector<1x1x128xf32>,
    } else {
    }
    return
  }
  func.func @transform_0(%arg0: i32, %arg1: i32, %arg2: i32) -> (i32, i32) {
    %c0_i32 = arith.constant 0 : i32
    return %arg0, %arg2 : i32, i32
  }
  func.func @transform_1(%arg0: i32, %arg1: i32, %arg2: i32) -> (i32, i32) {
    %c0_i32 = arith.constant 0 : i32
    return %arg2, %arg1 : i32, i32
  }
  func.func @transform_2(%arg0: i32, %arg1: i32, %arg2: i32) -> (i32, i32) {
    %c0_i32 = arith.constant 0 : i32
    return %arg0, %arg1 : i32, i32
  }
  func.func @transform_3(%arg0: i32, %arg1: i32, %arg2: i32) -> (i32, i32, i32) {
    %c0_i32 = arith.constant 0 : i32
    %c0_i32_0 = arith.constant 0 : i32
    return %arg0, %c0_i32, %arg1 : i32, i32, i32
  }
  func.func @transform_4(%arg0: i32, %arg1: i32, %arg2: i32) -> (i32, i32, i32) {
    %c0_i32 = arith.constant 0 : i32
    %c0_i32_0 = arith.constant 0 : i32
    return %arg0, %c0_i32, %arg1 : i32, i32, i32
  }
}

module attributes {stable_mosaic.version = 11 : i64} {
  func.func @_conv_mm_kernel(%arg0: i32, %arg1: i32, %arg2: i32, %arg3: memref<8x128xbf16, #tpu.memory_space<vmem>>, %arg4: memref<128x256xbf16, #tpu.memory_space<vmem>>, %arg5: memref<8x256xbf16, #tpu.memory_space<vmem>>, %arg6: memref<1x1x256xf32, #tpu.memory_space<vmem>>, %arg7: memref<1x1x256xf32, #tpu.memory_space<vmem>>, %arg8: memref<8x256xf32, #tpu.memory_space<vmem>>) attributes {dimension_semantics = [#tpu.dimension_semantics<parallel>, #tpu.dimension_semantics<parallel>, #tpu.dimension_semantics<arbitrary>], iteration_bounds = array<i64: 1, 1, 1>, scalar_prefetch = 0 : i64, scratch_operands = 1 : i64, tpu.core_type = #tpu.core_type<tc>, window_params = [{transform_indices = @transform_0, window_bounds = array<i64: 8, 128>}, {transform_indices = @transform_1, window_bounds = array<i64: 128, 256>}, {transform_indices = @transform_2, window_bounds = array<i64: 8, 256>}, {transform_indices = @transform_3, window_bounds = array<i64: 1, 1, 256>}, {transform_indices = @transform_4, window_bounds = array<i64: 1, 1, 256>}]} {
    %c0_i32 = arith.constant 0 : i32
    %0 = arith.cmpi eq, %arg2, %c0_i32 : i32
    %1 = arith.extui %0 : i1 to i32
    %c0_i32_0 = arith.constant 0 : i32
    %2 = arith.cmpi ne, %1, %c0_i32_0 : i32
    scf.if %2 {
      %cst_10 = arith.constant 0.000000e+00 : f32
      %12 = vector.broadcast %cst_10 : f32 to vector<8x256xf32>
      %c0_11 = arith.constant 0 : index
      %c0_12 = arith.constant 0 : index
      %13 = vector.load %arg8[%c0_11, %c0_12] : memref<8x256xf32, #tpu.memory_space<vmem>>, vector<8x256xf32>
      tpu.vector_store %arg8[%c0_11, %c0_12], %12 {strides = array<i32>} : memref<8x256xf32, #tpu.memory_space<vmem>>, vector<8x256xf32>,
    } else {
    }
    %c0 = arith.constant 0 : index
    %c0_1 = arith.constant 0 : index
    %3 = vector.load %arg8[%c0, %c0_1] : memref<8x256xf32, #tpu.memory_space<vmem>>, vector<8x256xf32>
    %c0_2 = arith.constant 0 : index
    %c0_3 = arith.constant 0 : index
    %4 = vector.load %arg3[%c0_2, %c0_3] : memref<8x128xbf16, #tpu.memory_space<vmem>>, vector<8x128xbf16>
    %c0_4 = arith.constant 0 : index
    %c0_5 = arith.constant 0 : index
    %5 = vector.load %arg4[%c0_4, %c0_5] : memref<128x256xbf16, #tpu.memory_space<vmem>>, vector<128x256xbf16>
    %cst = arith.constant dense<0.000000e+00> : vector<8x256xf32>
    %6 = tpu.matmul %4, %5, %cst {dimension_numbers = #tpu.dot_dimension_numbers<[1], [0], [0], [1], [0, 0, 1, 1], [], []>} : vector<8x128xbf16>, vector<128x256xbf16>, vector<8x256xf32> -> vector<8x256xf32>
    %7 = arith.addf %3, %6 : vector<8x256xf32>
    %c0_6 = arith.constant 0 : index
    %c0_7 = arith.constant 0 : index
    %8 = vector.load %arg8[%c0_6, %c0_7] : memref<8x256xf32, #tpu.memory_space<vmem>>, vector<8x256xf32>
    tpu.vector_store %arg8[%c0_6, %c0_7], %7 {strides = array<i32>} : memref<8x256xf32, #tpu.memory_space<vmem>>, vector<8x256xf32>,
    %c0_i32_8 = arith.constant 0 : i32
    %9 = arith.cmpi eq, %arg2, %c0_i32_8 : i32
    %10 = arith.extui %9 : i1 to i32
    %c0_i32_9 = arith.constant 0 : i32
    %11 = arith.cmpi ne, %10, %c0_i32_9 : i32
    scf.if %11 {
      %c0_10 = arith.constant 0 : index
      %c0_11 = arith.constant 0 : index
      %12 = vector.load %arg8[%c0_10, %c0_11] : memref<8x256xf32, #tpu.memory_space<vmem>>, vector<8x256xf32>
      %13 = arith.truncf %12 : vector<8x256xf32> to vector<8x256xbf16>
      %c0_12 = arith.constant 0 : index
      %c0_13 = arith.constant 0 : index
      %14 = vector.load %arg5[%c0_12, %c0_13] : memref<8x256xbf16, #tpu.memory_space<vmem>>, vector<8x256xbf16>
      tpu.vector_store %arg5[%c0_12, %c0_13], %13 {strides = array<i32>} : memref<8x256xbf16, #tpu.memory_space<vmem>>, vector<8x256xbf16>,
      %cst_14 = arith.constant dense<0.000000e+00> : vector<256xf32>
      %15 = vector.multi_reduction <add>, %12, %cst_14 [0] : vector<8x256xf32> to vector<256xf32>
      %16 = vector.shape_cast %15 : vector<256xf32> to vector<1x256xf32>
      %17 = vector.shape_cast %16 : vector<1x256xf32> to vector<1x1x256xf32>
      %c0_15 = arith.constant 0 : index
      %c0_16 = arith.constant 0 : index
      %c0_17 = arith.constant 0 : index
      %18 = vector.load %arg6[%c0_15, %c0_16, %c0_17] : memref<1x1x256xf32, #tpu.memory_space<vmem>>, vector<1x1x256xf32>
      tpu.vector_store %arg6[%c0_15, %c0_16, %c0_17], %17 {strides = array<i32>} : memref<1x1x256xf32, #tpu.memory_space<vmem>>, vector<1x1x256xf32>,
      %19 = arith.mulf %12, %12 : vector<8x256xf32>
      %cst_18 = arith.constant dense<0.000000e+00> : vector<256xf32>
      %20 = vector.multi_reduction <add>, %19, %cst_18 [0] : vector<8x256xf32> to vector<256xf32>
      %21 = vector.shape_cast %20 : vector<256xf32> to vector<1x256xf32>
      %22 = vector.shape_cast %21 : vector<1x256xf32> to vector<1x1x256xf32>
      %c0_19 = arith.constant 0 : index
      %c0_20 = arith.constant 0 : index
      %c0_21 = arith.constant 0 : index
      %23 = vector.load %arg7[%c0_19, %c0_20, %c0_21] : memref<1x1x256xf32, #tpu.memory_space<vmem>>, vector<1x1x256xf32>
      tpu.vector_store %arg7[%c0_19, %c0_20, %c0_21], %22 {strides = array<i32>} : memref<1x1x256xf32, #tpu.memory_space<vmem>>, vector<1x1x256xf32>,
    } else {
    }
    return
  }
  func.func @transform_0(%arg0: i32, %arg1: i32, %arg2: i32) -> (i32, i32) {
    %c0_i32 = arith.constant 0 : i32
    return %arg0, %arg2 : i32, i32
  }
  func.func @transform_1(%arg0: i32, %arg1: i32, %arg2: i32) -> (i32, i32) {
    %c0_i32 = arith.constant 0 : i32
    return %arg2, %arg1 : i32, i32
  }
  func.func @transform_2(%arg0: i32, %arg1: i32, %arg2: i32) -> (i32, i32) {
    %c0_i32 = arith.constant 0 : i32
    return %arg0, %arg1 : i32, i32
  }
  func.func @transform_3(%arg0: i32, %arg1: i32, %arg2: i32) -> (i32, i32, i32) {
    %c0_i32 = arith.constant 0 : i32
    %c0_i32_0 = arith.constant 0 : i32
    return %arg0, %c0_i32, %arg1 : i32, i32, i32
  }
  func.func @transform_4(%arg0: i32, %arg1: i32, %arg2: i32) -> (i32, i32, i32) {
    %c0_i32 = arith.constant 0 : i32
    %c0_i32_0 = arith.constant 0 : i32
    return %arg0, %c0_i32, %arg1 : i32, i32, i32
  }
}

module attributes {stable_mosaic.version = 11 : i64} {
  func.func @_bn_act_kernel(%arg0: i32, %arg1: memref<8x256xbf16, #tpu.memory_space<vmem>>, %arg2: memref<1x256xf32, #tpu.memory_space<vmem>>, %arg3: memref<1x256xf32, #tpu.memory_space<vmem>>, %arg4: memref<8x256xbf16, #tpu.memory_space<vmem>>) attributes {dimension_semantics = [#tpu.dimension_semantics<parallel>], iteration_bounds = array<i64: 1>, scalar_prefetch = 0 : i64, scratch_operands = 0 : i64, tpu.core_type = #tpu.core_type<tc>, window_params = [{transform_indices = @transform_0, window_bounds = array<i64: 8, 256>}, {pipeline_mode = #tpu.pipeline_mode<synchronous>, transform_indices = @transform_1, window_bounds = array<i64: 1, 256>}, {pipeline_mode = #tpu.pipeline_mode<synchronous>, transform_indices = @transform_2, window_bounds = array<i64: 1, 256>}, {transform_indices = @transform_3, window_bounds = array<i64: 8, 256>}]} {
    %c0 = arith.constant 0 : index
    %c0_0 = arith.constant 0 : index
    %0 = vector.load %arg1[%c0, %c0_0] : memref<8x256xbf16, #tpu.memory_space<vmem>>, vector<8x256xbf16>
    %1 = arith.extf %0 : vector<8x256xbf16> to vector<8x256xf32>
    %c0_1 = arith.constant 0 : index
    %c0_2 = arith.constant 0 : index
    %2 = vector.load %arg2[%c0_1, %c0_2] : memref<1x256xf32, #tpu.memory_space<vmem>>, vector<1x256xf32>
    %3 = vector.broadcast %2 : vector<1x256xf32> to vector<8x256xf32>
    %4 = arith.mulf %1, %3 : vector<8x256xf32>
    %c0_3 = arith.constant 0 : index
    %c0_4 = arith.constant 0 : index
    %5 = vector.load %arg3[%c0_3, %c0_4] : memref<1x256xf32, #tpu.memory_space<vmem>>, vector<1x256xf32>
    %6 = vector.broadcast %5 : vector<1x256xf32> to vector<8x256xf32>
    %7 = arith.addf %4, %6 : vector<8x256xf32>
    %cst = arith.constant 0.000000e+00 : f32
    %8 = vector.broadcast %cst : f32 to vector<8x256xf32>
    %9 = arith.maximumf %7, %8 : vector<8x256xf32>
    %10 = arith.truncf %9 : vector<8x256xf32> to vector<8x256xbf16>
    %c0_5 = arith.constant 0 : index
    %c0_6 = arith.constant 0 : index
    %11 = vector.load %arg4[%c0_5, %c0_6] : memref<8x256xbf16, #tpu.memory_space<vmem>>, vector<8x256xbf16>
    tpu.vector_store %arg4[%c0_5, %c0_6], %10 {strides = array<i32>} : memref<8x256xbf16, #tpu.memory_space<vmem>>, vector<8x256xbf16>,
    return
  }
  func.func @transform_0(%arg0: i32) -> (i32, i32) {
    %c0_i32 = arith.constant 0 : i32
    %c0_i32_0 = arith.constant 0 : i32
    return %arg0, %c0_i32 : i32, i32
  }
  func.func @transform_1(%arg0: i32) -> (i32, i32) {
    %c0_i32 = arith.constant 0 : i32
    %c0_i32_0 = arith.constant 0 : i32
    %c0_i32_1 = arith.constant 0 : i32
    return %c0_i32, %c0_i32_0 : i32, i32
  }
  func.func @transform_2(%arg0: i32) -> (i32, i32) {
    %c0_i32 = arith.constant 0 : i32
    %c0_i32_0 = arith.constant 0 : i32
    %c0_i32_1 = arith.constant 0 : i32
    return %c0_i32, %c0_i32_0 : i32, i32
  }
  func.func @transform_3(%arg0: i32) -> (i32, i32) {
    %c0_i32 = arith.constant 0 : i32
    %c0_i32_0 = arith.constant 0 : i32
    return %arg0, %c0_i32 : i32, i32
  }
}

module attributes {stable_mosaic.version = 11 : i64} {
  func.func @_conv_mm_kernel(%arg0: i32, %arg1: i32, %arg2: i32, %arg3: memref<8x128xbf16, #tpu.memory_space<vmem>>, %arg4: memref<128x256xbf16, #tpu.memory_space<vmem>>, %arg5: memref<8x256xbf16, #tpu.memory_space<vmem>>, %arg6: memref<1x1x256xf32, #tpu.memory_space<vmem>>, %arg7: memref<1x1x256xf32, #tpu.memory_space<vmem>>, %arg8: memref<8x256xf32, #tpu.memory_space<vmem>>) attributes {dimension_semantics = [#tpu.dimension_semantics<parallel>, #tpu.dimension_semantics<parallel>, #tpu.dimension_semantics<arbitrary>], iteration_bounds = array<i64: 1, 1, 9>, scalar_prefetch = 0 : i64, scratch_operands = 1 : i64, tpu.core_type = #tpu.core_type<tc>, window_params = [{transform_indices = @transform_0, window_bounds = array<i64: 8, 128>}, {transform_indices = @transform_1, window_bounds = array<i64: 128, 256>}, {transform_indices = @transform_2, window_bounds = array<i64: 8, 256>}, {transform_indices = @transform_3, window_bounds = array<i64: 1, 1, 256>}, {transform_indices = @transform_4, window_bounds = array<i64: 1, 1, 256>}]} {
    %c0_i32 = arith.constant 0 : i32
    %0 = arith.cmpi eq, %arg2, %c0_i32 : i32
    %1 = arith.extui %0 : i1 to i32
    %c0_i32_0 = arith.constant 0 : i32
    %2 = arith.cmpi ne, %1, %c0_i32_0 : i32
    scf.if %2 {
      %cst_9 = arith.constant 0.000000e+00 : f32
      %12 = vector.broadcast %cst_9 : f32 to vector<8x256xf32>
      %c0_10 = arith.constant 0 : index
      %c0_11 = arith.constant 0 : index
      %13 = vector.load %arg8[%c0_10, %c0_11] : memref<8x256xf32, #tpu.memory_space<vmem>>, vector<8x256xf32>
      tpu.vector_store %arg8[%c0_10, %c0_11], %12 {strides = array<i32>} : memref<8x256xf32, #tpu.memory_space<vmem>>, vector<8x256xf32>,
    } else {
    }
    %c0 = arith.constant 0 : index
    %c0_1 = arith.constant 0 : index
    %3 = vector.load %arg8[%c0, %c0_1] : memref<8x256xf32, #tpu.memory_space<vmem>>, vector<8x256xf32>
    %c0_2 = arith.constant 0 : index
    %c0_3 = arith.constant 0 : index
    %4 = vector.load %arg3[%c0_2, %c0_3] : memref<8x128xbf16, #tpu.memory_space<vmem>>, vector<8x128xbf16>
    %c0_4 = arith.constant 0 : index
    %c0_5 = arith.constant 0 : index
    %5 = vector.load %arg4[%c0_4, %c0_5] : memref<128x256xbf16, #tpu.memory_space<vmem>>, vector<128x256xbf16>
    %cst = arith.constant dense<0.000000e+00> : vector<8x256xf32>
    %6 = tpu.matmul %4, %5, %cst {dimension_numbers = #tpu.dot_dimension_numbers<[1], [0], [0], [1], [0, 0, 1, 1], [], []>} : vector<8x128xbf16>, vector<128x256xbf16>, vector<8x256xf32> -> vector<8x256xf32>
    %7 = arith.addf %3, %6 : vector<8x256xf32>
    %c0_6 = arith.constant 0 : index
    %c0_7 = arith.constant 0 : index
    %8 = vector.load %arg8[%c0_6, %c0_7] : memref<8x256xf32, #tpu.memory_space<vmem>>, vector<8x256xf32>
    tpu.vector_store %arg8[%c0_6, %c0_7], %7 {strides = array<i32>} : memref<8x256xf32, #tpu.memory_space<vmem>>, vector<8x256xf32>,
    %c8_i32 = arith.constant 8 : i32
    %9 = arith.cmpi eq, %arg2, %c8_i32 : i32
    %10 = arith.extui %9 : i1 to i32
    %c0_i32_8 = arith.constant 0 : i32
    %11 = arith.cmpi ne, %10, %c0_i32_8 : i32
    scf.if %11 {
      %c0_9 = arith.constant 0 : index
      %c0_10 = arith.constant 0 : index
      %12 = vector.load %arg8[%c0_9, %c0_10] : memref<8x256xf32, #tpu.memory_space<vmem>>, vector<8x256xf32>
      %13 = arith.truncf %12 : vector<8x256xf32> to vector<8x256xbf16>
      %c0_11 = arith.constant 0 : index
      %c0_12 = arith.constant 0 : index
      %14 = vector.load %arg5[%c0_11, %c0_12] : memref<8x256xbf16, #tpu.memory_space<vmem>>, vector<8x256xbf16>
      tpu.vector_store %arg5[%c0_11, %c0_12], %13 {strides = array<i32>} : memref<8x256xbf16, #tpu.memory_space<vmem>>, vector<8x256xbf16>,
      %cst_13 = arith.constant dense<0.000000e+00> : vector<256xf32>
      %15 = vector.multi_reduction <add>, %12, %cst_13 [0] : vector<8x256xf32> to vector<256xf32>
      %16 = vector.shape_cast %15 : vector<256xf32> to vector<1x256xf32>
      %17 = vector.shape_cast %16 : vector<1x256xf32> to vector<1x1x256xf32>
      %c0_14 = arith.constant 0 : index
      %c0_15 = arith.constant 0 : index
      %c0_16 = arith.constant 0 : index
      %18 = vector.load %arg6[%c0_14, %c0_15, %c0_16] : memref<1x1x256xf32, #tpu.memory_space<vmem>>, vector<1x1x256xf32>
      tpu.vector_store %arg6[%c0_14, %c0_15, %c0_16], %17 {strides = array<i32>} : memref<1x1x256xf32, #tpu.memory_space<vmem>>, vector<1x1x256xf32>,
      %19 = arith.mulf %12, %12 : vector<8x256xf32>
      %cst_17 = arith.constant dense<0.000000e+00> : vector<256xf32>
      %20 = vector.multi_reduction <add>, %19, %cst_17 [0] : vector<8x256xf32> to vector<256xf32>
      %21 = vector.shape_cast %20 : vector<256xf32> to vector<1x256xf32>
      %22 = vector.shape_cast %21 : vector<1x256xf32> to vector<1x1x256xf32>
      %c0_18 = arith.constant 0 : index
      %c0_19 = arith.constant 0 : index
      %c0_20 = arith.constant 0 : index
      %23 = vector.load %arg7[%c0_18, %c0_19, %c0_20] : memref<1x1x256xf32, #tpu.memory_space<vmem>>, vector<1x1x256xf32>
      tpu.vector_store %arg7[%c0_18, %c0_19, %c0_20], %22 {strides = array<i32>} : memref<1x1x256xf32, #tpu.memory_space<vmem>>, vector<1x1x256xf32>,
    } else {
    }
    return
  }
  func.func @transform_0(%arg0: i32, %arg1: i32, %arg2: i32) -> (i32, i32) {
    %c0_i32 = arith.constant 0 : i32
    return %arg0, %arg2 : i32, i32
  }
  func.func @transform_1(%arg0: i32, %arg1: i32, %arg2: i32) -> (i32, i32) {
    %c0_i32 = arith.constant 0 : i32
    return %arg2, %arg1 : i32, i32
  }
  func.func @transform_2(%arg0: i32, %arg1: i32, %arg2: i32) -> (i32, i32) {
    %c0_i32 = arith.constant 0 : i32
    return %arg0, %arg1 : i32, i32
  }
  func.func @transform_3(%arg0: i32, %arg1: i32, %arg2: i32) -> (i32, i32, i32) {
    %c0_i32 = arith.constant 0 : i32
    %c0_i32_0 = arith.constant 0 : i32
    return %arg0, %c0_i32, %arg1 : i32, i32, i32
  }
  func.func @transform_4(%arg0: i32, %arg1: i32, %arg2: i32) -> (i32, i32, i32) {
    %c0_i32 = arith.constant 0 : i32
    %c0_i32_0 = arith.constant 0 : i32
    return %arg0, %c0_i32, %arg1 : i32, i32, i32
  }
}

module attributes {stable_mosaic.version = 11 : i64} {
  func.func @_bn_bn_add_relu_kernel(%arg0: i32, %arg1: memref<8x256xbf16, #tpu.memory_space<vmem>>, %arg2: memref<1x256xf32, #tpu.memory_space<vmem>>, %arg3: memref<1x256xf32, #tpu.memory_space<vmem>>, %arg4: memref<8x256xbf16, #tpu.memory_space<vmem>>, %arg5: memref<1x256xf32, #tpu.memory_space<vmem>>, %arg6: memref<1x256xf32, #tpu.memory_space<vmem>>, %arg7: memref<8x256xbf16, #tpu.memory_space<vmem>>) attributes {dimension_semantics = [#tpu.dimension_semantics<parallel>], iteration_bounds = array<i64: 1>, scalar_prefetch = 0 : i64, scratch_operands = 0 : i64, tpu.core_type = #tpu.core_type<tc>, window_params = [{transform_indices = @transform_0, window_bounds = array<i64: 8, 256>}, {pipeline_mode = #tpu.pipeline_mode<synchronous>, transform_indices = @transform_1, window_bounds = array<i64: 1, 256>}, {pipeline_mode = #tpu.pipeline_mode<synchronous>, transform_indices = @transform_2, window_bounds = array<i64: 1, 256>}, {transform_indices = @transform_3, window_bounds = array<i64: 8, 256>}, {pipeline_mode = #tpu.pipeline_mode<synchronous>, transform_indices = @transform_4, window_bounds = array<i64: 1, 256>}, {pipeline_mode = #tpu.pipeline_mode<synchronous>, transform_indices = @transform_5, window_bounds = array<i64: 1, 256>}, {transform_indices = @transform_6, window_bounds = array<i64: 8, 256>}]} {
    %c0 = arith.constant 0 : index
    %c0_0 = arith.constant 0 : index
    %0 = vector.load %arg1[%c0, %c0_0] : memref<8x256xbf16, #tpu.memory_space<vmem>>, vector<8x256xbf16>
    %1 = arith.extf %0 : vector<8x256xbf16> to vector<8x256xf32>
    %c0_1 = arith.constant 0 : index
    %c0_2 = arith.constant 0 : index
    %2 = vector.load %arg2[%c0_1, %c0_2] : memref<1x256xf32, #tpu.memory_space<vmem>>, vector<1x256xf32>
    %3 = vector.broadcast %2 : vector<1x256xf32> to vector<8x256xf32>
    %4 = arith.mulf %1, %3 : vector<8x256xf32>
    %c0_3 = arith.constant 0 : index
    %c0_4 = arith.constant 0 : index
    %5 = vector.load %arg3[%c0_3, %c0_4] : memref<1x256xf32, #tpu.memory_space<vmem>>, vector<1x256xf32>
    %6 = vector.broadcast %5 : vector<1x256xf32> to vector<8x256xf32>
    %7 = arith.addf %4, %6 : vector<8x256xf32>
    %c0_5 = arith.constant 0 : index
    %c0_6 = arith.constant 0 : index
    %8 = vector.load %arg4[%c0_5, %c0_6] : memref<8x256xbf16, #tpu.memory_space<vmem>>, vector<8x256xbf16>
    %9 = arith.extf %8 : vector<8x256xbf16> to vector<8x256xf32>
    %c0_7 = arith.constant 0 : index
    %c0_8 = arith.constant 0 : index
    %10 = vector.load %arg5[%c0_7, %c0_8] : memref<1x256xf32, #tpu.memory_space<vmem>>, vector<1x256xf32>
    %11 = vector.broadcast %10 : vector<1x256xf32> to vector<8x256xf32>
    %12 = arith.mulf %9, %11 : vector<8x256xf32>
    %c0_9 = arith.constant 0 : index
    %c0_10 = arith.constant 0 : index
    %13 = vector.load %arg6[%c0_9, %c0_10] : memref<1x256xf32, #tpu.memory_space<vmem>>, vector<1x256xf32>
    %14 = vector.broadcast %13 : vector<1x256xf32> to vector<8x256xf32>
    %15 = arith.addf %12, %14 : vector<8x256xf32>
    %16 = arith.addf %7, %15 : vector<8x256xf32>
    %cst = arith.constant 0.000000e+00 : f32
    %17 = vector.broadcast %cst : f32 to vector<8x256xf32>
    %18 = arith.maximumf %16, %17 : vector<8x256xf32>
    %19 = arith.truncf %18 : vector<8x256xf32> to vector<8x256xbf16>
    %c0_11 = arith.constant 0 : index
    %c0_12 = arith.constant 0 : index
    %20 = vector.load %arg7[%c0_11, %c0_12] : memref<8x256xbf16, #tpu.memory_space<vmem>>, vector<8x256xbf16>
    tpu.vector_store %arg7[%c0_11, %c0_12], %19 {strides = array<i32>} : memref<8x256xbf16, #tpu.memory_space<vmem>>, vector<8x256xbf16>,
    return
  }
  func.func @transform_0(%arg0: i32) -> (i32, i32) {
    %c0_i32 = arith.constant 0 : i32
    %c0_i32_0 = arith.constant 0 : i32
    return %arg0, %c0_i32 : i32, i32
  }
  func.func @transform_1(%arg0: i32) -> (i32, i32) {
    %c0_i32 = arith.constant 0 : i32
    %c0_i32_0 = arith.constant 0 : i32
    %c0_i32_1 = arith.constant 0 : i32
    return %c0_i32, %c0_i32_0 : i32, i32
  }
  func.func @transform_2(%arg0: i32) -> (i32, i32) {
    %c0_i32 = arith.constant 0 : i32
    %c0_i32_0 = arith.constant 0 : i32
    %c0_i32_1 = arith.constant 0 : i32
    return %c0_i32, %c0_i32_0 : i32, i32
  }
  func.func @transform_3(%arg0: i32) -> (i32, i32) {
    %c0_i32 = arith.constant 0 : i32
    %c0_i32_0 = arith.constant 0 : i32
    return %arg0, %c0_i32 : i32, i32
  }
  func.func @transform_4(%arg0: i32) -> (i32, i32) {
    %c0_i32 = arith.constant 0 : i32
    %c0_i32_0 = arith.constant 0 : i32
    %c0_i32_1 = arith.constant 0 : i32
    return %c0_i32, %c0_i32_0 : i32, i32
  }
  func.func @transform_5(%arg0: i32) -> (i32, i32) {
    %c0_i32 = arith.constant 0 : i32
    %c0_i32_0 = arith.constant 0 : i32
    %c0_i32_1 = arith.constant 0 : i32
    return %c0_i32, %c0_i32_0 : i32, i32
  }
  func.func @transform_6(%arg0: i32) -> (i32, i32) {
    %c0_i32 = arith.constant 0 : i32
    %c0_i32_0 = arith.constant 0 : i32
    return %arg0, %c0_i32 : i32, i32
  }
}

module attributes {stable_mosaic.version = 11 : i64} {
  func.func @_conv_mm_kernel(%arg0: i32, %arg1: i32, %arg2: i32, %arg3: memref<8x256xbf16, #tpu.memory_space<vmem>>, %arg4: memref<256x256xbf16, #tpu.memory_space<vmem>>, %arg5: memref<8x256xbf16, #tpu.memory_space<vmem>>, %arg6: memref<1x1x256xf32, #tpu.memory_space<vmem>>, %arg7: memref<1x1x256xf32, #tpu.memory_space<vmem>>, %arg8: memref<8x256xf32, #tpu.memory_space<vmem>>) attributes {dimension_semantics = [#tpu.dimension_semantics<parallel>, #tpu.dimension_semantics<parallel>, #tpu.dimension_semantics<arbitrary>], iteration_bounds = array<i64: 1, 1, 9>, scalar_prefetch = 0 : i64, scratch_operands = 1 : i64, tpu.core_type = #tpu.core_type<tc>, window_params = [{transform_indices = @transform_0, window_bounds = array<i64: 8, 256>}, {transform_indices = @transform_1, window_bounds = array<i64: 256, 256>}, {transform_indices = @transform_2, window_bounds = array<i64: 8, 256>}, {transform_indices = @transform_3, window_bounds = array<i64: 1, 1, 256>}, {transform_indices = @transform_4, window_bounds = array<i64: 1, 1, 256>}]} {
    %c0_i32 = arith.constant 0 : i32
    %0 = arith.cmpi eq, %arg2, %c0_i32 : i32
    %1 = arith.extui %0 : i1 to i32
    %c0_i32_0 = arith.constant 0 : i32
    %2 = arith.cmpi ne, %1, %c0_i32_0 : i32
    scf.if %2 {
      %cst_9 = arith.constant 0.000000e+00 : f32
      %12 = vector.broadcast %cst_9 : f32 to vector<8x256xf32>
      %c0_10 = arith.constant 0 : index
      %c0_11 = arith.constant 0 : index
      %13 = vector.load %arg8[%c0_10, %c0_11] : memref<8x256xf32, #tpu.memory_space<vmem>>, vector<8x256xf32>
      tpu.vector_store %arg8[%c0_10, %c0_11], %12 {strides = array<i32>} : memref<8x256xf32, #tpu.memory_space<vmem>>, vector<8x256xf32>,
    } else {
    }
    %c0 = arith.constant 0 : index
    %c0_1 = arith.constant 0 : index
    %3 = vector.load %arg8[%c0, %c0_1] : memref<8x256xf32, #tpu.memory_space<vmem>>, vector<8x256xf32>
    %c0_2 = arith.constant 0 : index
    %c0_3 = arith.constant 0 : index
    %4 = vector.load %arg3[%c0_2, %c0_3] : memref<8x256xbf16, #tpu.memory_space<vmem>>, vector<8x256xbf16>
    %c0_4 = arith.constant 0 : index
    %c0_5 = arith.constant 0 : index
    %5 = vector.load %arg4[%c0_4, %c0_5] : memref<256x256xbf16, #tpu.memory_space<vmem>>, vector<256x256xbf16>
    %cst = arith.constant dense<0.000000e+00> : vector<8x256xf32>
    %6 = tpu.matmul %4, %5, %cst {dimension_numbers = #tpu.dot_dimension_numbers<[1], [0], [0], [1], [0, 0, 1, 1], [], []>} : vector<8x256xbf16>, vector<256x256xbf16>, vector<8x256xf32> -> vector<8x256xf32>
    %7 = arith.addf %3, %6 : vector<8x256xf32>
    %c0_6 = arith.constant 0 : index
    %c0_7 = arith.constant 0 : index
    %8 = vector.load %arg8[%c0_6, %c0_7] : memref<8x256xf32, #tpu.memory_space<vmem>>, vector<8x256xf32>
    tpu.vector_store %arg8[%c0_6, %c0_7], %7 {strides = array<i32>} : memref<8x256xf32, #tpu.memory_space<vmem>>, vector<8x256xf32>,
    %c8_i32 = arith.constant 8 : i32
    %9 = arith.cmpi eq, %arg2, %c8_i32 : i32
    %10 = arith.extui %9 : i1 to i32
    %c0_i32_8 = arith.constant 0 : i32
    %11 = arith.cmpi ne, %10, %c0_i32_8 : i32
    scf.if %11 {
      %c0_9 = arith.constant 0 : index
      %c0_10 = arith.constant 0 : index
      %12 = vector.load %arg8[%c0_9, %c0_10] : memref<8x256xf32, #tpu.memory_space<vmem>>, vector<8x256xf32>
      %13 = arith.truncf %12 : vector<8x256xf32> to vector<8x256xbf16>
      %c0_11 = arith.constant 0 : index
      %c0_12 = arith.constant 0 : index
      %14 = vector.load %arg5[%c0_11, %c0_12] : memref<8x256xbf16, #tpu.memory_space<vmem>>, vector<8x256xbf16>
      tpu.vector_store %arg5[%c0_11, %c0_12], %13 {strides = array<i32>} : memref<8x256xbf16, #tpu.memory_space<vmem>>, vector<8x256xbf16>,
      %cst_13 = arith.constant dense<0.000000e+00> : vector<256xf32>
      %15 = vector.multi_reduction <add>, %12, %cst_13 [0] : vector<8x256xf32> to vector<256xf32>
      %16 = vector.shape_cast %15 : vector<256xf32> to vector<1x256xf32>
      %17 = vector.shape_cast %16 : vector<1x256xf32> to vector<1x1x256xf32>
      %c0_14 = arith.constant 0 : index
      %c0_15 = arith.constant 0 : index
      %c0_16 = arith.constant 0 : index
      %18 = vector.load %arg6[%c0_14, %c0_15, %c0_16] : memref<1x1x256xf32, #tpu.memory_space<vmem>>, vector<1x1x256xf32>
      tpu.vector_store %arg6[%c0_14, %c0_15, %c0_16], %17 {strides = array<i32>} : memref<1x1x256xf32, #tpu.memory_space<vmem>>, vector<1x1x256xf32>,
      %19 = arith.mulf %12, %12 : vector<8x256xf32>
      %cst_17 = arith.constant dense<0.000000e+00> : vector<256xf32>
      %20 = vector.multi_reduction <add>, %19, %cst_17 [0] : vector<8x256xf32> to vector<256xf32>
      %21 = vector.shape_cast %20 : vector<256xf32> to vector<1x256xf32>
      %22 = vector.shape_cast %21 : vector<1x256xf32> to vector<1x1x256xf32>
      %c0_18 = arith.constant 0 : index
      %c0_19 = arith.constant 0 : index
      %c0_20 = arith.constant 0 : index
      %23 = vector.load %arg7[%c0_18, %c0_19, %c0_20] : memref<1x1x256xf32, #tpu.memory_space<vmem>>, vector<1x1x256xf32>
      tpu.vector_store %arg7[%c0_18, %c0_19, %c0_20], %22 {strides = array<i32>} : memref<1x1x256xf32, #tpu.memory_space<vmem>>, vector<1x1x256xf32>,
    } else {
    }
    return
  }
  func.func @transform_0(%arg0: i32, %arg1: i32, %arg2: i32) -> (i32, i32) {
    %c0_i32 = arith.constant 0 : i32
    return %arg0, %arg2 : i32, i32
  }
  func.func @transform_1(%arg0: i32, %arg1: i32, %arg2: i32) -> (i32, i32) {
    %c0_i32 = arith.constant 0 : i32
    return %arg2, %arg1 : i32, i32
  }
  func.func @transform_2(%arg0: i32, %arg1: i32, %arg2: i32) -> (i32, i32) {
    %c0_i32 = arith.constant 0 : i32
    return %arg0, %arg1 : i32, i32
  }
  func.func @transform_3(%arg0: i32, %arg1: i32, %arg2: i32) -> (i32, i32, i32) {
    %c0_i32 = arith.constant 0 : i32
    %c0_i32_0 = arith.constant 0 : i32
    return %arg0, %c0_i32, %arg1 : i32, i32, i32
  }
  func.func @transform_4(%arg0: i32, %arg1: i32, %arg2: i32) -> (i32, i32, i32) {
    %c0_i32 = arith.constant 0 : i32
    %c0_i32_0 = arith.constant 0 : i32
    return %arg0, %c0_i32, %arg1 : i32, i32, i32
  }
}

module attributes {stable_mosaic.version = 11 : i64} {
  func.func @_conv_mm_kernel(%arg0: i32, %arg1: i32, %arg2: i32, %arg3: memref<2x256xbf16, #tpu.memory_space<vmem>>, %arg4: memref<256x256xbf16, #tpu.memory_space<vmem>>, %arg5: memref<2x256xbf16, #tpu.memory_space<vmem>>, %arg6: memref<1x1x256xf32, #tpu.memory_space<vmem>>, %arg7: memref<1x1x256xf32, #tpu.memory_space<vmem>>, %arg8: memref<2x256xf32, #tpu.memory_space<vmem>>) attributes {dimension_semantics = [#tpu.dimension_semantics<parallel>, #tpu.dimension_semantics<parallel>, #tpu.dimension_semantics<arbitrary>], iteration_bounds = array<i64: 1, 2, 1>, scalar_prefetch = 0 : i64, scratch_operands = 1 : i64, tpu.core_type = #tpu.core_type<tc>, window_params = [{transform_indices = @transform_0, window_bounds = array<i64: 2, 256>}, {transform_indices = @transform_1, window_bounds = array<i64: 256, 256>}, {transform_indices = @transform_2, window_bounds = array<i64: 2, 256>}, {transform_indices = @transform_3, window_bounds = array<i64: 1, 1, 256>}, {transform_indices = @transform_4, window_bounds = array<i64: 1, 1, 256>}]} {
    %c0_i32 = arith.constant 0 : i32
    %0 = arith.cmpi eq, %arg2, %c0_i32 : i32
    %1 = arith.extui %0 : i1 to i32
    %c0_i32_0 = arith.constant 0 : i32
    %2 = arith.cmpi ne, %1, %c0_i32_0 : i32
    scf.if %2 {
      %cst_10 = arith.constant 0.000000e+00 : f32
      %12 = vector.broadcast %cst_10 : f32 to vector<2x256xf32>
      %c0_11 = arith.constant 0 : index
      %c0_12 = arith.constant 0 : index
      %13 = vector.load %arg8[%c0_11, %c0_12] : memref<2x256xf32, #tpu.memory_space<vmem>>, vector<2x256xf32>
      tpu.vector_store %arg8[%c0_11, %c0_12], %12 {strides = array<i32>} : memref<2x256xf32, #tpu.memory_space<vmem>>, vector<2x256xf32>,
    } else {
    }
    %c0 = arith.constant 0 : index
    %c0_1 = arith.constant 0 : index
    %3 = vector.load %arg8[%c0, %c0_1] : memref<2x256xf32, #tpu.memory_space<vmem>>, vector<2x256xf32>
    %c0_2 = arith.constant 0 : index
    %c0_3 = arith.constant 0 : index
    %4 = vector.load %arg3[%c0_2, %c0_3] : memref<2x256xbf16, #tpu.memory_space<vmem>>, vector<2x256xbf16>
    %c0_4 = arith.constant 0 : index
    %c0_5 = arith.constant 0 : index
    %5 = vector.load %arg4[%c0_4, %c0_5] : memref<256x256xbf16, #tpu.memory_space<vmem>>, vector<256x256xbf16>
    %cst = arith.constant dense<0.000000e+00> : vector<2x256xf32>
    %6 = tpu.matmul %4, %5, %cst {dimension_numbers = #tpu.dot_dimension_numbers<[1], [0], [0], [1], [0, 0, 1, 1], [], []>} : vector<2x256xbf16>, vector<256x256xbf16>, vector<2x256xf32> -> vector<2x256xf32>
    %7 = arith.addf %3, %6 : vector<2x256xf32>
    %c0_6 = arith.constant 0 : index
    %c0_7 = arith.constant 0 : index
    %8 = vector.load %arg8[%c0_6, %c0_7] : memref<2x256xf32, #tpu.memory_space<vmem>>, vector<2x256xf32>
    tpu.vector_store %arg8[%c0_6, %c0_7], %7 {strides = array<i32>} : memref<2x256xf32, #tpu.memory_space<vmem>>, vector<2x256xf32>,
    %c0_i32_8 = arith.constant 0 : i32
    %9 = arith.cmpi eq, %arg2, %c0_i32_8 : i32
    %10 = arith.extui %9 : i1 to i32
    %c0_i32_9 = arith.constant 0 : i32
    %11 = arith.cmpi ne, %10, %c0_i32_9 : i32
    scf.if %11 {
      %c0_10 = arith.constant 0 : index
      %c0_11 = arith.constant 0 : index
      %12 = vector.load %arg8[%c0_10, %c0_11] : memref<2x256xf32, #tpu.memory_space<vmem>>, vector<2x256xf32>
      %13 = arith.truncf %12 : vector<2x256xf32> to vector<2x256xbf16>
      %c0_12 = arith.constant 0 : index
      %c0_13 = arith.constant 0 : index
      %14 = vector.load %arg5[%c0_12, %c0_13] : memref<2x256xbf16, #tpu.memory_space<vmem>>, vector<2x256xbf16>
      tpu.vector_store %arg5[%c0_12, %c0_13], %13 {strides = array<i32>} : memref<2x256xbf16, #tpu.memory_space<vmem>>, vector<2x256xbf16>,
      %cst_14 = arith.constant dense<0.000000e+00> : vector<256xf32>
      %15 = vector.multi_reduction <add>, %12, %cst_14 [0] : vector<2x256xf32> to vector<256xf32>
      %16 = vector.shape_cast %15 : vector<256xf32> to vector<1x256xf32>
      %17 = vector.shape_cast %16 : vector<1x256xf32> to vector<1x1x256xf32>
      %c0_15 = arith.constant 0 : index
      %c0_16 = arith.constant 0 : index
      %c0_17 = arith.constant 0 : index
      %18 = vector.load %arg6[%c0_15, %c0_16, %c0_17] : memref<1x1x256xf32, #tpu.memory_space<vmem>>, vector<1x1x256xf32>
      tpu.vector_store %arg6[%c0_15, %c0_16, %c0_17], %17 {strides = array<i32>} : memref<1x1x256xf32, #tpu.memory_space<vmem>>, vector<1x1x256xf32>,
      %19 = arith.mulf %12, %12 : vector<2x256xf32>
      %cst_18 = arith.constant dense<0.000000e+00> : vector<256xf32>
      %20 = vector.multi_reduction <add>, %19, %cst_18 [0] : vector<2x256xf32> to vector<256xf32>
      %21 = vector.shape_cast %20 : vector<256xf32> to vector<1x256xf32>
      %22 = vector.shape_cast %21 : vector<1x256xf32> to vector<1x1x256xf32>
      %c0_19 = arith.constant 0 : index
      %c0_20 = arith.constant 0 : index
      %c0_21 = arith.constant 0 : index
      %23 = vector.load %arg7[%c0_19, %c0_20, %c0_21] : memref<1x1x256xf32, #tpu.memory_space<vmem>>, vector<1x1x256xf32>
      tpu.vector_store %arg7[%c0_19, %c0_20, %c0_21], %22 {strides = array<i32>} : memref<1x1x256xf32, #tpu.memory_space<vmem>>, vector<1x1x256xf32>,
    } else {
    }
    return
  }
  func.func @transform_0(%arg0: i32, %arg1: i32, %arg2: i32) -> (i32, i32) {
    %c0_i32 = arith.constant 0 : i32
    return %arg0, %arg2 : i32, i32
  }
  func.func @transform_1(%arg0: i32, %arg1: i32, %arg2: i32) -> (i32, i32) {
    %c0_i32 = arith.constant 0 : i32
    return %arg2, %arg1 : i32, i32
  }
  func.func @transform_2(%arg0: i32, %arg1: i32, %arg2: i32) -> (i32, i32) {
    %c0_i32 = arith.constant 0 : i32
    return %arg0, %arg1 : i32, i32
  }
  func.func @transform_3(%arg0: i32, %arg1: i32, %arg2: i32) -> (i32, i32, i32) {
    %c0_i32 = arith.constant 0 : i32
    %c0_i32_0 = arith.constant 0 : i32
    return %arg0, %c0_i32, %arg1 : i32, i32, i32
  }
  func.func @transform_4(%arg0: i32, %arg1: i32, %arg2: i32) -> (i32, i32, i32) {
    %c0_i32 = arith.constant 0 : i32
    %c0_i32_0 = arith.constant 0 : i32
    return %arg0, %c0_i32, %arg1 : i32, i32, i32
  }
}

module attributes {stable_mosaic.version = 11 : i64} {
  func.func @_conv_mm_kernel(%arg0: i32, %arg1: i32, %arg2: i32, %arg3: memref<2x256xbf16, #tpu.memory_space<vmem>>, %arg4: memref<256x256xbf16, #tpu.memory_space<vmem>>, %arg5: memref<2x256xbf16, #tpu.memory_space<vmem>>, %arg6: memref<1x1x256xf32, #tpu.memory_space<vmem>>, %arg7: memref<1x1x256xf32, #tpu.memory_space<vmem>>, %arg8: memref<2x256xf32, #tpu.memory_space<vmem>>) attributes {dimension_semantics = [#tpu.dimension_semantics<parallel>, #tpu.dimension_semantics<parallel>, #tpu.dimension_semantics<arbitrary>], iteration_bounds = array<i64: 1, 2, 9>, scalar_prefetch = 0 : i64, scratch_operands = 1 : i64, tpu.core_type = #tpu.core_type<tc>, window_params = [{transform_indices = @transform_0, window_bounds = array<i64: 2, 256>}, {transform_indices = @transform_1, window_bounds = array<i64: 256, 256>}, {transform_indices = @transform_2, window_bounds = array<i64: 2, 256>}, {transform_indices = @transform_3, window_bounds = array<i64: 1, 1, 256>}, {transform_indices = @transform_4, window_bounds = array<i64: 1, 1, 256>}]} {
    %c0_i32 = arith.constant 0 : i32
    %0 = arith.cmpi eq, %arg2, %c0_i32 : i32
    %1 = arith.extui %0 : i1 to i32
    %c0_i32_0 = arith.constant 0 : i32
    %2 = arith.cmpi ne, %1, %c0_i32_0 : i32
    scf.if %2 {
      %cst_9 = arith.constant 0.000000e+00 : f32
      %12 = vector.broadcast %cst_9 : f32 to vector<2x256xf32>
      %c0_10 = arith.constant 0 : index
      %c0_11 = arith.constant 0 : index
      %13 = vector.load %arg8[%c0_10, %c0_11] : memref<2x256xf32, #tpu.memory_space<vmem>>, vector<2x256xf32>
      tpu.vector_store %arg8[%c0_10, %c0_11], %12 {strides = array<i32>} : memref<2x256xf32, #tpu.memory_space<vmem>>, vector<2x256xf32>,
    } else {
    }
    %c0 = arith.constant 0 : index
    %c0_1 = arith.constant 0 : index
    %3 = vector.load %arg8[%c0, %c0_1] : memref<2x256xf32, #tpu.memory_space<vmem>>, vector<2x256xf32>
    %c0_2 = arith.constant 0 : index
    %c0_3 = arith.constant 0 : index
    %4 = vector.load %arg3[%c0_2, %c0_3] : memref<2x256xbf16, #tpu.memory_space<vmem>>, vector<2x256xbf16>
    %c0_4 = arith.constant 0 : index
    %c0_5 = arith.constant 0 : index
    %5 = vector.load %arg4[%c0_4, %c0_5] : memref<256x256xbf16, #tpu.memory_space<vmem>>, vector<256x256xbf16>
    %cst = arith.constant dense<0.000000e+00> : vector<2x256xf32>
    %6 = tpu.matmul %4, %5, %cst {dimension_numbers = #tpu.dot_dimension_numbers<[1], [0], [0], [1], [0, 0, 1, 1], [], []>} : vector<2x256xbf16>, vector<256x256xbf16>, vector<2x256xf32> -> vector<2x256xf32>
    %7 = arith.addf %3, %6 : vector<2x256xf32>
    %c0_6 = arith.constant 0 : index
    %c0_7 = arith.constant 0 : index
    %8 = vector.load %arg8[%c0_6, %c0_7] : memref<2x256xf32, #tpu.memory_space<vmem>>, vector<2x256xf32>
    tpu.vector_store %arg8[%c0_6, %c0_7], %7 {strides = array<i32>} : memref<2x256xf32, #tpu.memory_space<vmem>>, vector<2x256xf32>,
    %c8_i32 = arith.constant 8 : i32
    %9 = arith.cmpi eq, %arg2, %c8_i32 : i32
    %10 = arith.extui %9 : i1 to i32
    %c0_i32_8 = arith.constant 0 : i32
    %11 = arith.cmpi ne, %10, %c0_i32_8 : i32
    scf.if %11 {
      %c0_9 = arith.constant 0 : index
      %c0_10 = arith.constant 0 : index
      %12 = vector.load %arg8[%c0_9, %c0_10] : memref<2x256xf32, #tpu.memory_space<vmem>>, vector<2x256xf32>
      %13 = arith.truncf %12 : vector<2x256xf32> to vector<2x256xbf16>
      %c0_11 = arith.constant 0 : index
      %c0_12 = arith.constant 0 : index
      %14 = vector.load %arg5[%c0_11, %c0_12] : memref<2x256xbf16, #tpu.memory_space<vmem>>, vector<2x256xbf16>
      tpu.vector_store %arg5[%c0_11, %c0_12], %13 {strides = array<i32>} : memref<2x256xbf16, #tpu.memory_space<vmem>>, vector<2x256xbf16>,
      %cst_13 = arith.constant dense<0.000000e+00> : vector<256xf32>
      %15 = vector.multi_reduction <add>, %12, %cst_13 [0] : vector<2x256xf32> to vector<256xf32>
      %16 = vector.shape_cast %15 : vector<256xf32> to vector<1x256xf32>
      %17 = vector.shape_cast %16 : vector<1x256xf32> to vector<1x1x256xf32>
      %c0_14 = arith.constant 0 : index
      %c0_15 = arith.constant 0 : index
      %c0_16 = arith.constant 0 : index
      %18 = vector.load %arg6[%c0_14, %c0_15, %c0_16] : memref<1x1x256xf32, #tpu.memory_space<vmem>>, vector<1x1x256xf32>
      tpu.vector_store %arg6[%c0_14, %c0_15, %c0_16], %17 {strides = array<i32>} : memref<1x1x256xf32, #tpu.memory_space<vmem>>, vector<1x1x256xf32>,
      %19 = arith.mulf %12, %12 : vector<2x256xf32>
      %cst_17 = arith.constant dense<0.000000e+00> : vector<256xf32>
      %20 = vector.multi_reduction <add>, %19, %cst_17 [0] : vector<2x256xf32> to vector<256xf32>
      %21 = vector.shape_cast %20 : vector<256xf32> to vector<1x256xf32>
      %22 = vector.shape_cast %21 : vector<1x256xf32> to vector<1x1x256xf32>
      %c0_18 = arith.constant 0 : index
      %c0_19 = arith.constant 0 : index
      %c0_20 = arith.constant 0 : index
      %23 = vector.load %arg7[%c0_18, %c0_19, %c0_20] : memref<1x1x256xf32, #tpu.memory_space<vmem>>, vector<1x1x256xf32>
      tpu.vector_store %arg7[%c0_18, %c0_19, %c0_20], %22 {strides = array<i32>} : memref<1x1x256xf32, #tpu.memory_space<vmem>>, vector<1x1x256xf32>,
    } else {
    }
    return
  }
  func.func @transform_0(%arg0: i32, %arg1: i32, %arg2: i32) -> (i32, i32) {
    %c0_i32 = arith.constant 0 : i32
    return %arg0, %arg2 : i32, i32
  }
  func.func @transform_1(%arg0: i32, %arg1: i32, %arg2: i32) -> (i32, i32) {
    %c0_i32 = arith.constant 0 : i32
    return %arg2, %arg1 : i32, i32
  }
  func.func @transform_2(%arg0: i32, %arg1: i32, %arg2: i32) -> (i32, i32) {
    %c0_i32 = arith.constant 0 : i32
    return %arg0, %arg1 : i32, i32
  }
  func.func @transform_3(%arg0: i32, %arg1: i32, %arg2: i32) -> (i32, i32, i32) {
    %c0_i32 = arith.constant 0 : i32
    %c0_i32_0 = arith.constant 0 : i32
    return %arg0, %c0_i32, %arg1 : i32, i32, i32
  }
  func.func @transform_4(%arg0: i32, %arg1: i32, %arg2: i32) -> (i32, i32, i32) {
    %c0_i32 = arith.constant 0 : i32
    %c0_i32_0 = arith.constant 0 : i32
    return %arg0, %c0_i32, %arg1 : i32, i32, i32
  }
}

module attributes {stable_mosaic.version = 11 : i64} {
  func.func @_bn_act_kernel(%arg0: i32, %arg1: memref<2x512xbf16, #tpu.memory_space<vmem>>, %arg2: memref<1x512xf32, #tpu.memory_space<vmem>>, %arg3: memref<1x512xf32, #tpu.memory_space<vmem>>, %arg4: memref<2x512xbf16, #tpu.memory_space<vmem>>) attributes {dimension_semantics = [#tpu.dimension_semantics<parallel>], iteration_bounds = array<i64: 1>, scalar_prefetch = 0 : i64, scratch_operands = 0 : i64, tpu.core_type = #tpu.core_type<tc>, window_params = [{transform_indices = @transform_0, window_bounds = array<i64: 2, 512>}, {pipeline_mode = #tpu.pipeline_mode<synchronous>, transform_indices = @transform_1, window_bounds = array<i64: 1, 512>}, {pipeline_mode = #tpu.pipeline_mode<synchronous>, transform_indices = @transform_2, window_bounds = array<i64: 1, 512>}, {transform_indices = @transform_3, window_bounds = array<i64: 2, 512>}]} {
    %c0 = arith.constant 0 : index
    %c0_0 = arith.constant 0 : index
    %0 = vector.load %arg1[%c0, %c0_0] : memref<2x512xbf16, #tpu.memory_space<vmem>>, vector<2x512xbf16>
    %1 = arith.extf %0 : vector<2x512xbf16> to vector<2x512xf32>
    %c0_1 = arith.constant 0 : index
    %c0_2 = arith.constant 0 : index
    %2 = vector.load %arg2[%c0_1, %c0_2] : memref<1x512xf32, #tpu.memory_space<vmem>>, vector<1x512xf32>
    %3 = vector.broadcast %2 : vector<1x512xf32> to vector<2x512xf32>
    %4 = arith.mulf %1, %3 : vector<2x512xf32>
    %c0_3 = arith.constant 0 : index
    %c0_4 = arith.constant 0 : index
    %5 = vector.load %arg3[%c0_3, %c0_4] : memref<1x512xf32, #tpu.memory_space<vmem>>, vector<1x512xf32>
    %6 = vector.broadcast %5 : vector<1x512xf32> to vector<2x512xf32>
    %7 = arith.addf %4, %6 : vector<2x512xf32>
    %cst = arith.constant 0.000000e+00 : f32
    %8 = vector.broadcast %cst : f32 to vector<2x512xf32>
    %9 = arith.maximumf %7, %8 : vector<2x512xf32>
    %10 = arith.truncf %9 : vector<2x512xf32> to vector<2x512xbf16>
    %c0_5 = arith.constant 0 : index
    %c0_6 = arith.constant 0 : index
    %11 = vector.load %arg4[%c0_5, %c0_6] : memref<2x512xbf16, #tpu.memory_space<vmem>>, vector<2x512xbf16>
    tpu.vector_store %arg4[%c0_5, %c0_6], %10 {strides = array<i32>} : memref<2x512xbf16, #tpu.memory_space<vmem>>, vector<2x512xbf16>,
    return
  }
  func.func @transform_0(%arg0: i32) -> (i32, i32) {
    %c0_i32 = arith.constant 0 : i32
    %c0_i32_0 = arith.constant 0 : i32
    return %arg0, %c0_i32 : i32, i32
  }
  func.func @transform_1(%arg0: i32) -> (i32, i32) {
    %c0_i32 = arith.constant 0 : i32
    %c0_i32_0 = arith.constant 0 : i32
    %c0_i32_1 = arith.constant 0 : i32
    return %c0_i32, %c0_i32_0 : i32, i32
  }
  func.func @transform_2(%arg0: i32) -> (i32, i32) {
    %c0_i32 = arith.constant 0 : i32
    %c0_i32_0 = arith.constant 0 : i32
    %c0_i32_1 = arith.constant 0 : i32
    return %c0_i32, %c0_i32_0 : i32, i32
  }
  func.func @transform_3(%arg0: i32) -> (i32, i32) {
    %c0_i32 = arith.constant 0 : i32
    %c0_i32_0 = arith.constant 0 : i32
    return %arg0, %c0_i32 : i32, i32
  }
}

module attributes {stable_mosaic.version = 11 : i64} {
  func.func @_conv_mm_kernel(%arg0: i32, %arg1: i32, %arg2: i32, %arg3: memref<2x512xbf16, #tpu.memory_space<vmem>>, %arg4: memref<512x256xbf16, #tpu.memory_space<vmem>>, %arg5: memref<2x256xbf16, #tpu.memory_space<vmem>>, %arg6: memref<1x1x256xf32, #tpu.memory_space<vmem>>, %arg7: memref<1x1x256xf32, #tpu.memory_space<vmem>>, %arg8: memref<2x256xf32, #tpu.memory_space<vmem>>) attributes {dimension_semantics = [#tpu.dimension_semantics<parallel>, #tpu.dimension_semantics<parallel>, #tpu.dimension_semantics<arbitrary>], iteration_bounds = array<i64: 1, 2, 9>, scalar_prefetch = 0 : i64, scratch_operands = 1 : i64, tpu.core_type = #tpu.core_type<tc>, window_params = [{transform_indices = @transform_0, window_bounds = array<i64: 2, 512>}, {transform_indices = @transform_1, window_bounds = array<i64: 512, 256>}, {transform_indices = @transform_2, window_bounds = array<i64: 2, 256>}, {transform_indices = @transform_3, window_bounds = array<i64: 1, 1, 256>}, {transform_indices = @transform_4, window_bounds = array<i64: 1, 1, 256>}]} {
    %c0_i32 = arith.constant 0 : i32
    %0 = arith.cmpi eq, %arg2, %c0_i32 : i32
    %1 = arith.extui %0 : i1 to i32
    %c0_i32_0 = arith.constant 0 : i32
    %2 = arith.cmpi ne, %1, %c0_i32_0 : i32
    scf.if %2 {
      %cst_9 = arith.constant 0.000000e+00 : f32
      %12 = vector.broadcast %cst_9 : f32 to vector<2x256xf32>
      %c0_10 = arith.constant 0 : index
      %c0_11 = arith.constant 0 : index
      %13 = vector.load %arg8[%c0_10, %c0_11] : memref<2x256xf32, #tpu.memory_space<vmem>>, vector<2x256xf32>
      tpu.vector_store %arg8[%c0_10, %c0_11], %12 {strides = array<i32>} : memref<2x256xf32, #tpu.memory_space<vmem>>, vector<2x256xf32>,
    } else {
    }
    %c0 = arith.constant 0 : index
    %c0_1 = arith.constant 0 : index
    %3 = vector.load %arg8[%c0, %c0_1] : memref<2x256xf32, #tpu.memory_space<vmem>>, vector<2x256xf32>
    %c0_2 = arith.constant 0 : index
    %c0_3 = arith.constant 0 : index
    %4 = vector.load %arg3[%c0_2, %c0_3] : memref<2x512xbf16, #tpu.memory_space<vmem>>, vector<2x512xbf16>
    %c0_4 = arith.constant 0 : index
    %c0_5 = arith.constant 0 : index
    %5 = vector.load %arg4[%c0_4, %c0_5] : memref<512x256xbf16, #tpu.memory_space<vmem>>, vector<512x256xbf16>
    %cst = arith.constant dense<0.000000e+00> : vector<2x256xf32>
    %6 = tpu.matmul %4, %5, %cst {dimension_numbers = #tpu.dot_dimension_numbers<[1], [0], [0], [1], [0, 0, 1, 1], [], []>} : vector<2x512xbf16>, vector<512x256xbf16>, vector<2x256xf32> -> vector<2x256xf32>
    %7 = arith.addf %3, %6 : vector<2x256xf32>
    %c0_6 = arith.constant 0 : index
    %c0_7 = arith.constant 0 : index
    %8 = vector.load %arg8[%c0_6, %c0_7] : memref<2x256xf32, #tpu.memory_space<vmem>>, vector<2x256xf32>
    tpu.vector_store %arg8[%c0_6, %c0_7], %7 {strides = array<i32>} : memref<2x256xf32, #tpu.memory_space<vmem>>, vector<2x256xf32>,
    %c8_i32 = arith.constant 8 : i32
    %9 = arith.cmpi eq, %arg2, %c8_i32 : i32
    %10 = arith.extui %9 : i1 to i32
    %c0_i32_8 = arith.constant 0 : i32
    %11 = arith.cmpi ne, %10, %c0_i32_8 : i32
    scf.if %11 {
      %c0_9 = arith.constant 0 : index
      %c0_10 = arith.constant 0 : index
      %12 = vector.load %arg8[%c0_9, %c0_10] : memref<2x256xf32, #tpu.memory_space<vmem>>, vector<2x256xf32>
      %13 = arith.truncf %12 : vector<2x256xf32> to vector<2x256xbf16>
      %c0_11 = arith.constant 0 : index
      %c0_12 = arith.constant 0 : index
      %14 = vector.load %arg5[%c0_11, %c0_12] : memref<2x256xbf16, #tpu.memory_space<vmem>>, vector<2x256xbf16>
      tpu.vector_store %arg5[%c0_11, %c0_12], %13 {strides = array<i32>} : memref<2x256xbf16, #tpu.memory_space<vmem>>, vector<2x256xbf16>,
      %cst_13 = arith.constant dense<0.000000e+00> : vector<256xf32>
      %15 = vector.multi_reduction <add>, %12, %cst_13 [0] : vector<2x256xf32> to vector<256xf32>
      %16 = vector.shape_cast %15 : vector<256xf32> to vector<1x256xf32>
      %17 = vector.shape_cast %16 : vector<1x256xf32> to vector<1x1x256xf32>
      %c0_14 = arith.constant 0 : index
      %c0_15 = arith.constant 0 : index
      %c0_16 = arith.constant 0 : index
      %18 = vector.load %arg6[%c0_14, %c0_15, %c0_16] : memref<1x1x256xf32, #tpu.memory_space<vmem>>, vector<1x1x256xf32>
      tpu.vector_store %arg6[%c0_14, %c0_15, %c0_16], %17 {strides = array<i32>} : memref<1x1x256xf32, #tpu.memory_space<vmem>>, vector<1x1x256xf32>,
      %19 = arith.mulf %12, %12 : vector<2x256xf32>
      %cst_17 = arith.constant dense<0.000000e+00> : vector<256xf32>
      %20 = vector.multi_reduction <add>, %19, %cst_17 [0] : vector<2x256xf32> to vector<256xf32>
      %21 = vector.shape_cast %20 : vector<256xf32> to vector<1x256xf32>
      %22 = vector.shape_cast %21 : vector<1x256xf32> to vector<1x1x256xf32>
      %c0_18 = arith.constant 0 : index
      %c0_19 = arith.constant 0 : index
      %c0_20 = arith.constant 0 : index
      %23 = vector.load %arg7[%c0_18, %c0_19, %c0_20] : memref<1x1x256xf32, #tpu.memory_space<vmem>>, vector<1x1x256xf32>
      tpu.vector_store %arg7[%c0_18, %c0_19, %c0_20], %22 {strides = array<i32>} : memref<1x1x256xf32, #tpu.memory_space<vmem>>, vector<1x1x256xf32>,
    } else {
    }
    return
  }
  func.func @transform_0(%arg0: i32, %arg1: i32, %arg2: i32) -> (i32, i32) {
    %c0_i32 = arith.constant 0 : i32
    return %arg0, %arg2 : i32, i32
  }
  func.func @transform_1(%arg0: i32, %arg1: i32, %arg2: i32) -> (i32, i32) {
    %c0_i32 = arith.constant 0 : i32
    return %arg2, %arg1 : i32, i32
  }
  func.func @transform_2(%arg0: i32, %arg1: i32, %arg2: i32) -> (i32, i32) {
    %c0_i32 = arith.constant 0 : i32
    return %arg0, %arg1 : i32, i32
  }
  func.func @transform_3(%arg0: i32, %arg1: i32, %arg2: i32) -> (i32, i32, i32) {
    %c0_i32 = arith.constant 0 : i32
    %c0_i32_0 = arith.constant 0 : i32
    return %arg0, %c0_i32, %arg1 : i32, i32, i32
  }
  func.func @transform_4(%arg0: i32, %arg1: i32, %arg2: i32) -> (i32, i32, i32) {
    %c0_i32 = arith.constant 0 : i32
    %c0_i32_0 = arith.constant 0 : i32
    return %arg0, %c0_i32, %arg1 : i32, i32, i32
  }
}

module attributes {stable_mosaic.version = 11 : i64} {
  func.func @_bn_bn_add_relu_kernel(%arg0: i32, %arg1: memref<2x512xbf16, #tpu.memory_space<vmem>>, %arg2: memref<1x512xf32, #tpu.memory_space<vmem>>, %arg3: memref<1x512xf32, #tpu.memory_space<vmem>>, %arg4: memref<2x512xbf16, #tpu.memory_space<vmem>>, %arg5: memref<1x512xf32, #tpu.memory_space<vmem>>, %arg6: memref<1x512xf32, #tpu.memory_space<vmem>>, %arg7: memref<2x512xbf16, #tpu.memory_space<vmem>>) attributes {dimension_semantics = [#tpu.dimension_semantics<parallel>], iteration_bounds = array<i64: 1>, scalar_prefetch = 0 : i64, scratch_operands = 0 : i64, tpu.core_type = #tpu.core_type<tc>, window_params = [{transform_indices = @transform_0, window_bounds = array<i64: 2, 512>}, {pipeline_mode = #tpu.pipeline_mode<synchronous>, transform_indices = @transform_1, window_bounds = array<i64: 1, 512>}, {pipeline_mode = #tpu.pipeline_mode<synchronous>, transform_indices = @transform_2, window_bounds = array<i64: 1, 512>}, {transform_indices = @transform_3, window_bounds = array<i64: 2, 512>}, {pipeline_mode = #tpu.pipeline_mode<synchronous>, transform_indices = @transform_4, window_bounds = array<i64: 1, 512>}, {pipeline_mode = #tpu.pipeline_mode<synchronous>, transform_indices = @transform_5, window_bounds = array<i64: 1, 512>}, {transform_indices = @transform_6, window_bounds = array<i64: 2, 512>}]} {
    %c0 = arith.constant 0 : index
    %c0_0 = arith.constant 0 : index
    %0 = vector.load %arg1[%c0, %c0_0] : memref<2x512xbf16, #tpu.memory_space<vmem>>, vector<2x512xbf16>
    %1 = arith.extf %0 : vector<2x512xbf16> to vector<2x512xf32>
    %c0_1 = arith.constant 0 : index
    %c0_2 = arith.constant 0 : index
    %2 = vector.load %arg2[%c0_1, %c0_2] : memref<1x512xf32, #tpu.memory_space<vmem>>, vector<1x512xf32>
    %3 = vector.broadcast %2 : vector<1x512xf32> to vector<2x512xf32>
    %4 = arith.mulf %1, %3 : vector<2x512xf32>
    %c0_3 = arith.constant 0 : index
    %c0_4 = arith.constant 0 : index
    %5 = vector.load %arg3[%c0_3, %c0_4] : memref<1x512xf32, #tpu.memory_space<vmem>>, vector<1x512xf32>
    %6 = vector.broadcast %5 : vector<1x512xf32> to vector<2x512xf32>
    %7 = arith.addf %4, %6 : vector<2x512xf32>
    %c0_5 = arith.constant 0 : index
    %c0_6 = arith.constant 0 : index
    %8 = vector.load %arg4[%c0_5, %c0_6] : memref<2x512xbf16, #tpu.memory_space<vmem>>, vector<2x512xbf16>
    %9 = arith.extf %8 : vector<2x512xbf16> to vector<2x512xf32>
    %c0_7 = arith.constant 0 : index
    %c0_8 = arith.constant 0 : index
    %10 = vector.load %arg5[%c0_7, %c0_8] : memref<1x512xf32, #tpu.memory_space<vmem>>, vector<1x512xf32>
    %11 = vector.broadcast %10 : vector<1x512xf32> to vector<2x512xf32>
    %12 = arith.mulf %9, %11 : vector<2x512xf32>
    %c0_9 = arith.constant 0 : index
    %c0_10 = arith.constant 0 : index
    %13 = vector.load %arg6[%c0_9, %c0_10] : memref<1x512xf32, #tpu.memory_space<vmem>>, vector<1x512xf32>
    %14 = vector.broadcast %13 : vector<1x512xf32> to vector<2x512xf32>
    %15 = arith.addf %12, %14 : vector<2x512xf32>
    %16 = arith.addf %7, %15 : vector<2x512xf32>
    %cst = arith.constant 0.000000e+00 : f32
    %17 = vector.broadcast %cst : f32 to vector<2x512xf32>
    %18 = arith.maximumf %16, %17 : vector<2x512xf32>
    %19 = arith.truncf %18 : vector<2x512xf32> to vector<2x512xbf16>
    %c0_11 = arith.constant 0 : index
    %c0_12 = arith.constant 0 : index
    %20 = vector.load %arg7[%c0_11, %c0_12] : memref<2x512xbf16, #tpu.memory_space<vmem>>, vector<2x512xbf16>
    tpu.vector_store %arg7[%c0_11, %c0_12], %19 {strides = array<i32>} : memref<2x512xbf16, #tpu.memory_space<vmem>>, vector<2x512xbf16>,
    return
  }
  func.func @transform_0(%arg0: i32) -> (i32, i32) {
    %c0_i32 = arith.constant 0 : i32
    %c0_i32_0 = arith.constant 0 : i32
    return %arg0, %c0_i32 : i32, i32
  }
  func.func @transform_1(%arg0: i32) -> (i32, i32) {
    %c0_i32 = arith.constant 0 : i32
    %c0_i32_0 = arith.constant 0 : i32
    %c0_i32_1 = arith.constant 0 : i32
    return %c0_i32, %c0_i32_0 : i32, i32
  }
  func.func @transform_2(%arg0: i32) -> (i32, i32) {
    %c0_i32 = arith.constant 0 : i32
    %c0_i32_0 = arith.constant 0 : i32
    %c0_i32_1 = arith.constant 0 : i32
    return %c0_i32, %c0_i32_0 : i32, i32
  }
  func.func @transform_3(%arg0: i32) -> (i32, i32) {
    %c0_i32 = arith.constant 0 : i32
    %c0_i32_0 = arith.constant 0 : i32
    return %arg0, %c0_i32 : i32, i32
  }
  func.func @transform_4(%arg0: i32) -> (i32, i32) {
    %c0_i32 = arith.constant 0 : i32
    %c0_i32_0 = arith.constant 0 : i32
    %c0_i32_1 = arith.constant 0 : i32
    return %c0_i32, %c0_i32_0 : i32, i32
  }
  func.func @transform_5(%arg0: i32) -> (i32, i32) {
    %c0_i32 = arith.constant 0 : i32
    %c0_i32_0 = arith.constant 0 : i32
    %c0_i32_1 = arith.constant 0 : i32
    return %c0_i32, %c0_i32_0 : i32, i32
  }
  func.func @transform_6(%arg0: i32) -> (i32, i32) {
    %c0_i32 = arith.constant 0 : i32
    %c0_i32_0 = arith.constant 0 : i32
    return %arg0, %c0_i32 : i32, i32
  }
}

module attributes {stable_mosaic.version = 11 : i64} {
  func.func @_avgpool_kernel(%arg0: memref<2x1x512xbf16, #tpu.memory_space<vmem>>, %arg1: memref<2x512xf32, #tpu.memory_space<vmem>>) attributes {dimension_semantics = [], scalar_prefetch = 0 : i64, scratch_operands = 0 : i64, tpu.core_type = #tpu.core_type<tc>} {
    %c0 = arith.constant 0 : index
    %c0_0 = arith.constant 0 : index
    %c0_1 = arith.constant 0 : index
    %0 = vector.load %arg0[%c0, %c0_0, %c0_1] : memref<2x1x512xbf16, #tpu.memory_space<vmem>>, vector<2x1x512xbf16>
    %1 = arith.extf %0 : vector<2x1x512xbf16> to vector<2x1x512xf32>
    %cst = arith.constant dense<0.000000e+00> : vector<2x512xf32>
    %2 = vector.multi_reduction <add>, %1, %cst [1] : vector<2x1x512xf32> to vector<2x512xf32>
    %cst_2 = arith.constant 1.000000e+00 : f32
    %3 = vector.broadcast %cst_2 : f32 to vector<2x512xf32>
    %4 = arith.divf %2, %3 : vector<2x512xf32>
    %c0_3 = arith.constant 0 : index
    %c0_4 = arith.constant 0 : index
    %5 = vector.load %arg1[%c0_3, %c0_4] : memref<2x512xf32, #tpu.memory_space<vmem>>, vector<2x512xf32>
    tpu.vector_store %arg1[%c0_3, %c0_4], %4 {strides = array<i32>} : memref<2x512xf32, #tpu.memory_space<vmem>>, vector<2x512xf32>,
    return
  }
}

</mosaic_0001>

<bundles_post_ra>
// kernel: resnet_forward.24
= control target key start
LH: loop header
LB: loop body
LE: loop exit
PB: predicated region body
PF: predicated region fallthrough
CT: control target
= control target key end

     0   :  { %vm406_vm0 = vcmask 519168   ;;  %s1146_s0 = inlined_call_operand.vmem [shape: bf16[512,64], index: 0, kind: input, shape index: {}]   ;;  %s1147_s1 = inlined_call_operand.vmem [shape: f32[1,64], index: 1, kind: input, shape index: {}]   ;;  %s1148_s2 = inlined_call_operand.vmem [shape: f32[1,64], index: 2, kind: input, shape index: {}]   ;;  %s1149_s3 = inlined_call_operand.vmem [shape: bf16[512,64], index: 3, kind: output, shape index: {}]  }
   0x1   :  { %v476_v0 = vld [vmem:[%s1146_s0] sm:$0xff]   ;;  %v603_v5 = vld [vmem:[%s1146_s0 + $0x8] sm:$0xff]   ;;  %v604_v8 = vld [vmem:[%s1146_s0 + $0x10] sm:$0xff]  }
   0x2   :  { %v662_v1 = vld [vmem:[%s1147_s1] ss:$0 sm:$0xff]  ;;  %v477_v2 = vunpack.c.l.bf16 %v476_v0  ;;  %v478_v4 = vunpack.c.h.bf16 %v476_v0  ;;  %v481_v6 = vunpack.c.l.bf16 %v603_v5  ;;  %v482_v7 = vunpack.c.h.bf16 %v603_v5  ;;  %v605_v9 = vld [vmem:[%s1146_s0 + $0x18] sm:$0xff]   ;;  %v607_v39 = vld [vmem:[%s1146_s0 + $0x28] sm:$0xff]  }
   0x3   :  { %v667_v3 = vld [vmem:[%s1148_s2] ss:$0 sm:$0xff]  ;;  %v485_v12 = vunpack.c.l.bf16 %v604_v8  ;;  %v486_v13 = vunpack.c.h.bf16 %v604_v8  ;;  %v489_v16 = vunpack.c.l.bf16 %v605_v9  ;;  %v490_v17 = vunpack.c.h.bf16 %v605_v9  ;;  %v608_v44 = vld [vmem:[%s1146_s0 + $0x30] sm:$0xff]   ;;  %v609_v49 = vld [vmem:[%s1146_s0 + $0x38] sm:$0xff]  }
   0x4   :  { %v146_v10 = vmul.f32 %v662_v1, %v477_v2  ;;  %v147_v11 = vmul.f32 %v662_v1, %v478_v4  ;;  %v148_v14 = vmul.f32 %v662_v1, %v481_v6  ;;  %v149_v15 = vmul.f32 %v662_v1, %v482_v7  ;;  %v606_v34 = vld [vmem:[%s1146_s0 + $0x20] sm:$0xff]  }
   0x5   :  { %v150_v20 = vmul.f32 %v662_v1, %v485_v12  ;;  %v151_v21 = vmul.f32 %v662_v1, %v486_v13  ;;  %v152_v24 = vmul.f32 %v662_v1, %v489_v16  ;;  %v153_v25 = vmul.f32 %v662_v1, %v490_v17  ;;  %v610_v16 = vld [vmem:[%s1146_s0 + $0x40] sm:$0xff]  }
   0x6   :  { %v214_v18 = vadd.f32 %v667_v3, %v146_v10  ;;  %v215_v19 = vadd.f32 %v667_v3, %v147_v11  ;;  %v216_v22 = vadd.f32 %v667_v3, %v148_v14  ;;  %v217_v23 = vadd.f32 %v667_v3, %v149_v15 }
   0x7   :  { %v218_v28 = vadd.f32 %v667_v3, %v150_v20  ;;  %v219_v29 = vadd.f32 %v667_v3, %v151_v21  ;;  %v220_v32 = vadd.f32 %v667_v3, %v152_v24  ;;  %v221_v33 = vadd.f32 %v667_v3, %v153_v25  ;;  %v611_v21 = vld [vmem:[%s1146_s0 + $0x48] sm:$0xff]  }
   0x8   :  { %v278_v26 = vmax.f32 %v214_v18, 0.0  ;;  %v279_v27 = vmax.f32 %v215_v19, 0.0  ;;  %v280_v30 = vmax.f32 %v216_v22, 0.0  ;;  %v281_v31 = vmax.f32 %v217_v23, 0.0 }
   0x9   :  { %v282_v37 = vmax.f32 %v218_v28, 0.0  ;;  %v283_v38 = vmax.f32 %v219_v29, 0.0  ;;  %v284_v42 = vmax.f32 %v220_v32, 0.0  ;;  %v285_v43 = vmax.f32 %v221_v33, 0.0 }
   0xa   :  { %v342_v35 = vpack.c.bf16 %v278_v26, %v278_v26  ;;  %v343_v36 = vpack.c.bf16 %v279_v27, %v279_v27  ;;  %v344_v40 = vpack.c.bf16 %v280_v30, %v280_v30  ;;  %v345_v41 = vpack.c.bf16 %v281_v31, %v281_v31  ;;  %v612_v26 = vld [vmem:[%s1146_s0 + $0x50] sm:$0xff]   ;;  %v613_v31 = vld [vmem:[%s1146_s0 + $0x58] sm:$0xff]  }
   0xb   :  { %v346_v45 = vpack.c.bf16 %v282_v37, %v282_v37  ;;  %v347_v46 = vpack.c.bf16 %v283_v38, %v283_v38  ;;  %v493_v47 = vunpack.c.l.bf16 %v606_v34  ;;  %v494_v48 = vunpack.c.h.bf16 %v606_v34 }
   0xc   :  { %407 = vst.msk [vmem:[%s1149_s3] sm:$0xf] %vm406_vm0, %v342_v35  ;;  %v348_v50 = vpack.c.bf16 %v284_v42, %v284_v42  ;;  %v349_v51 = vpack.c.bf16 %v285_v43, %v285_v43  ;;  %v497_v52 = vunpack.c.l.bf16 %v607_v39  ;;  %v498_v53 = vunpack.c.h.bf16 %v607_v39 }
   0xd   :  { %408 = vst.msk [vmem:[%s1149_s3 + $0x4] sm:$0xf] %vm406_vm0, %v343_v36  ;;  %v154_v54 = vmul.f32 %v662_v1, %v493_v47  ;;  %v155_v55 = vmul.f32 %v662_v1, %v494_v48  ;;  %v501_v56 = vunpack.c.l.bf16 %v608_v44  ;;  %v502_v57 = vunpack.c.h.bf16 %v608_v44 }
   0xe   :  { %409 = vst.msk [vmem:[%s1149_s3 + $0x8] sm:$0xf] %vm406_vm0, %v344_v40  ;;  %v156_v58 = vmul.f32 %v662_v1, %v497_v52  ;;  %v157_v59 = vmul.f32 %v662_v1, %v498_v53  ;;  %v505_v60 = vunpack.c.l.bf16 %v609_v49  ;;  %v506_v61 = vunpack.c.h.bf16 %v609_v49 }
   0xf   :  { %410 = vst.msk [vmem:[%s1149_s3 + $0xc] sm:$0xf] %vm406_vm0, %v345_v41  ;;  %v222_v62 = vadd.f32 %v667_v3, %v154_v54  ;;  %v223_v63 = vadd.f32 %v667_v3, %v155_v55  ;;  %v158_v0 = vmul.f32 %v662_v1, %v501_v56  ;;  %v159_v2 = vmul.f32 %v662_v1, %v502_v57 }
  0x10   :  { %411 = vst.msk [vmem:[%s1149_s3 + $0x10] sm:$0xf] %vm406_vm0, %v346_v45  ;;  %v224_v4 = vadd.f32 %v667_v3, %v156_v58  ;;  %v225_v5 = vadd.f32 %v667_v3, %v157_v59  ;;  %v160_v6 = vmul.f32 %v662_v1, %v505_v60  ;;  %v161_v7 = vmul.f32 %v662_v1, %v506_v61  ;;  %v614_v60 = vld [vmem:[%s1146_s0 + $0x60] sm:$0xff]  }
  0x11   :  { %412 = vst.msk [vmem:[%s1149_s3 + $0x14] sm:$0xf] %vm406_vm0, %v347_v46  ;;  %v286_v8 = vmax.f32 %v222_v62, 0.0  ;;  %v287_v9 = vmax.f32 %v223_v63, 0.0  ;;  %v226_v10 = vadd.f32 %v667_v3, %v158_v0  ;;  %v227_v11 = vadd.f32 %v667_v3, %v159_v2  ;;  %v615_v2 = vld [vmem:[%s1146_s0 + $0x68] sm:$0xff]  }
  0x12   :  { %413 = vst.msk [vmem:[%s1149_s3 + $0x18] sm:$0xf] %vm406_vm0, %v348_v50  ;;  %v288_v12 = vmax.f32 %v224_v4, 0.0  ;;  %v289_v13 = vmax.f32 %v225_v5, 0.0  ;;  %v228_v14 = vadd.f32 %v667_v3, %v160_v6  ;;  %v229_v15 = vadd.f32 %v667_v3, %v161_v7 }
  0x13   :  { %414 = vst.msk [vmem:[%s1149_s3 + $0x1c] sm:$0xf] %vm406_vm0, %v349_v51  ;;  %v350_v17 = vpack.c.bf16 %v286_v8, %v286_v8  ;;  %v351_v18 = vpack.c.bf16 %v287_v9, %v287_v9  ;;  %v290_v19 = vmax.f32 %v226_v10, 0.0  ;;  %v291_v20 = vmax.f32 %v227_v11, 0.0  ;;  %v616_v8 = vld [vmem:[%s1146_s0 + $0x70] sm:$0xff]  }
  0x14   :  { %v352_v22 = vpack.c.bf16 %v288_v12, %v288_v12  ;;  %v353_v23 = vpack.c.bf16 %v289_v13, %v289_v13  ;;  %v292_v24 = vmax.f32 %v228_v14, 0.0  ;;  %v293_v25 = vmax.f32 %v229_v15, 0.0  ;;  %v617_v13 = vld [vmem:[%s1146_s0 + $0x78] sm:$0xff]  }
  0x15   :  { %415 = vst.msk [vmem:[%s1149_s3 + $0x20] sm:$0xf] %vm406_vm0, %v350_v17  ;;  %v354_v27 = vpack.c.bf16 %v290_v19, %v290_v19  ;;  %v355_v28 = vpack.c.bf16 %v291_v20, %v291_v20  ;;  %v509_v29 = vunpack.c.l.bf16 %v610_v16  ;;  %v510_v30 = vunpack.c.h.bf16 %v610_v16 }
  0x16   :  { %416 = vst.msk [vmem:[%s1149_s3 + $0x24] sm:$0xf] %vm406_vm0, %v351_v18  ;;  %v356_v32 = vpack.c.bf16 %v292_v24, %v292_v24  ;;  %v357_v33 = vpack.c.bf16 %v293_v25, %v293_v25  ;;  %v513_v34 = vunpack.c.l.bf16 %v611_v21  ;;  %v514_v35 = vunpack.c.h.bf16 %v611_v21 }
  0x17   :  { %417 = vst.msk [vmem:[%s1149_s3 + $0x28] sm:$0xf] %vm406_vm0, %v352_v22  ;;  %v162_v36 = vmul.f32 %v662_v1, %v509_v29  ;;  %v163_v37 = vmul.f32 %v662_v1, %v510_v30  ;;  %v517_v38 = vunpack.c.l.bf16 %v612_v26  ;;  %v518_v39 = vunpack.c.h.bf16 %v612_v26 }
  0x18   :  { %418 = vst.msk [vmem:[%s1149_s3 + $0x2c] sm:$0xf] %vm406_vm0, %v353_v23  ;;  %v164_v40 = vmul.f32 %v662_v1, %v513_v34  ;;  %v165_v41 = vmul.f32 %v662_v1, %v514_v35  ;;  %v521_v42 = vunpack.c.l.bf16 %v613_v31  ;;  %v522_v43 = vunpack.c.h.bf16 %v613_v31 }
  0x19   :  { %419 = vst.msk [vmem:[%s1149_s3 + $0x30] sm:$0xf] %vm406_vm0, %v354_v27  ;;  %v230_v44 = vadd.f32 %v667_v3, %v162_v36  ;;  %v231_v45 = vadd.f32 %v667_v3, %v163_v37  ;;  %v166_v46 = vmul.f32 %v662_v1, %v517_v38  ;;  %v167_v47 = vmul.f32 %v662_v1, %v518_v39 }
  0x1a   :  { %420 = vst.msk [vmem:[%s1149_s3 + $0x34] sm:$0xf] %vm406_vm0, %v355_v28  ;;  %v232_v48 = vadd.f32 %v667_v3, %v164_v40  ;;  %v233_v49 = vadd.f32 %v667_v3, %v165_v41  ;;  %v168_v50 = vmul.f32 %v662_v1, %v521_v42  ;;  %v169_v51 = vmul.f32 %v662_v1, %v522_v43  ;;  %v618_v42 = vld [vmem:[%s1146_s0 + $0x80] sm:$0xff]  }
  0x1b   :  { %421 = vst.msk [vmem:[%s1149_s3 + $0x38] sm:$0xf] %vm406_vm0, %v356_v32  ;;  %v294_v52 = vmax.f32 %v230_v44, 0.0  ;;  %v295_v53 = vmax.f32 %v231_v45, 0.0  ;;  %v234_v54 = vadd.f32 %v667_v3, %v166_v46  ;;  %v235_v55 = vadd.f32 %v667_v3, %v167_v47  ;;  %v619_v47 = vld [vmem:[%s1146_s0 + $0x88] sm:$0xff]  }
  0x1c   :  { %422 = vst.msk [vmem:[%s1149_s3 + $0x3c] sm:$0xf] %vm406_vm0, %v357_v33  ;;  %v296_v56 = vmax.f32 %v232_v48, 0.0  ;;  %v297_v57 = vmax.f32 %v233_v49, 0.0  ;;  %v236_v58 = vadd.f32 %v667_v3, %v168_v50  ;;  %v237_v59 = vadd.f32 %v667_v3, %v169_v51 }
  0x1d   :  { %v358_v61 = vpack.c.bf16 %v294_v52, %v294_v52  ;;  %v359_v62 = vpack.c.bf16 %v295_v53, %v295_v53  ;;  %v298_v63 = vmax.f32 %v234_v54, 0.0  ;;  %v299_v0 = vmax.f32 %v235_v55, 0.0  ;;  %v620_v52 = vld [vmem:[%s1146_s0 + $0x90] sm:$0xff]  }
  0x1e   :  { %v360_v4 = vpack.c.bf16 %v296_v56, %v296_v56  ;;  %v361_v5 = vpack.c.bf16 %v297_v57, %v297_v57  ;;  %v300_v6 = vmax.f32 %v236_v58, 0.0  ;;  %v301_v7 = vmax.f32 %v237_v59, 0.0  ;;  %v621_v57 = vld [vmem:[%s1146_s0 + $0x98] sm:$0xff]  }
  0x1f   :  { %423 = vst.msk [vmem:[%s1149_s3 + $0x40] sm:$0xf] %vm406_vm0, %v358_v61  ;;  %v362_v9 = vpack.c.bf16 %v298_v63, %v298_v63  ;;  %v363_v10 = vpack.c.bf16 %v299_v0, %v299_v0  ;;  %v525_v11 = vunpack.c.l.bf16 %v614_v60  ;;  %v526_v12 = vunpack.c.h.bf16 %v614_v60 }
  0x20   :  { %424 = vst.msk [vmem:[%s1149_s3 + $0x44] sm:$0xf] %vm406_vm0, %v359_v62  ;;  %v364_v14 = vpack.c.bf16 %v300_v6, %v300_v6  ;;  %v365_v15 = vpack.c.bf16 %v301_v7, %v301_v7  ;;  %v529_v16 = vunpack.c.l.bf16 %v615_v2  ;;  %v530_v17 = vunpack.c.h.bf16 %v615_v2 }
  0x21   :  { %425 = vst.msk [vmem:[%s1149_s3 + $0x48] sm:$0xf] %vm406_vm0, %v360_v4  ;;  %v170_v18 = vmul.f32 %v662_v1, %v525_v11  ;;  %v171_v19 = vmul.f32 %v662_v1, %v526_v12  ;;  %v533_v20 = vunpack.c.l.bf16 %v616_v8  ;;  %v534_v21 = vunpack.c.h.bf16 %v616_v8 }
  0x22   :  { %426 = vst.msk [vmem:[%s1149_s3 + $0x4c] sm:$0xf] %vm406_vm0, %v361_v5  ;;  %v172_v22 = vmul.f32 %v662_v1, %v529_v16  ;;  %v173_v23 = vmul.f32 %v662_v1, %v530_v17  ;;  %v537_v24 = vunpack.c.l.bf16 %v617_v13  ;;  %v538_v25 = vunpack.c.h.bf16 %v617_v13 }
  0x23   :  { %427 = vst.msk [vmem:[%s1149_s3 + $0x50] sm:$0xf] %vm406_vm0, %v362_v9  ;;  %v238_v26 = vadd.f32 %v667_v3, %v170_v18  ;;  %v239_v27 = vadd.f32 %v667_v3, %v171_v19  ;;  %v174_v28 = vmul.f32 %v662_v1, %v533_v20  ;;  %v175_v29 = vmul.f32 %v662_v1, %v534_v21 }
  0x24   :  { %428 = vst.msk [vmem:[%s1149_s3 + $0x54] sm:$0xf] %vm406_vm0, %v363_v10  ;;  %v240_v30 = vadd.f32 %v667_v3, %v172_v22  ;;  %v241_v31 = vadd.f32 %v667_v3, %v173_v23  ;;  %v176_v32 = vmul.f32 %v662_v1, %v537_v24  ;;  %v177_v33 = vmul.f32 %v662_v1, %v538_v25  ;;  %v622_v24 = vld [vmem:[%s1146_s0 + $0xa0] sm:$0xff]  }
  0x25   :  { %429 = vst.msk [vmem:[%s1149_s3 + $0x58] sm:$0xf] %vm406_vm0, %v364_v14  ;;  %v302_v34 = vmax.f32 %v238_v26, 0.0  ;;  %v303_v35 = vmax.f32 %v239_v27, 0.0  ;;  %v242_v36 = vadd.f32 %v667_v3, %v174_v28  ;;  %v243_v37 = vadd.f32 %v667_v3, %v175_v29  ;;  %v623_v29 = vld [vmem:[%s1146_s0 + $0xa8] sm:$0xff]  }
  0x26   :  { %430 = vst.msk [vmem:[%s1149_s3 + $0x5c] sm:$0xf] %vm406_vm0, %v365_v15  ;;  %v304_v38 = vmax.f32 %v240_v30, 0.0  ;;  %v305_v39 = vmax.f32 %v241_v31, 0.0  ;;  %v244_v40 = vadd.f32 %v667_v3, %v176_v32  ;;  %v245_v41 = vadd.f32 %v667_v3, %v177_v33 }
  0x27   :  { %v366_v43 = vpack.c.bf16 %v302_v34, %v302_v34  ;;  %v367_v44 = vpack.c.bf16 %v303_v35, %v303_v35  ;;  %v306_v45 = vmax.f32 %v242_v36, 0.0  ;;  %v307_v46 = vmax.f32 %v243_v37, 0.0  ;;  %v624_v34 = vld [vmem:[%s1146_s0 + $0xb0] sm:$0xff]  }
  0x28   :  { %v368_v48 = vpack.c.bf16 %v304_v38, %v304_v38  ;;  %v369_v49 = vpack.c.bf16 %v305_v39, %v305_v39  ;;  %v308_v50 = vmax.f32 %v244_v40, 0.0  ;;  %v309_v51 = vmax.f32 %v245_v41, 0.0  ;;  %v625_v39 = vld [vmem:[%s1146_s0 + $0xb8] sm:$0xff]  }
  0x29   :  { %431 = vst.msk [vmem:[%s1149_s3 + $0x60] sm:$0xf] %vm406_vm0, %v366_v43  ;;  %v370_v53 = vpack.c.bf16 %v306_v45, %v306_v45  ;;  %v371_v54 = vpack.c.bf16 %v307_v46, %v307_v46  ;;  %v541_v55 = vunpack.c.l.bf16 %v618_v42  ;;  %v542_v56 = vunpack.c.h.bf16 %v618_v42 }
  0x2a   :  { %432 = vst.msk [vmem:[%s1149_s3 + $0x64] sm:$0xf] %vm406_vm0, %v367_v44  ;;  %v372_v58 = vpack.c.bf16 %v308_v50, %v308_v50  ;;  %v373_v59 = vpack.c.bf16 %v309_v51, %v309_v51  ;;  %v545_v60 = vunpack.c.l.bf16 %v619_v47  ;;  %v546_v61 = vunpack.c.h.bf16 %v619_v47 }
  0x2b   :  { %433 = vst.msk [vmem:[%s1149_s3 + $0x68] sm:$0xf] %vm406_vm0, %v368_v48  ;;  %v178_v62 = vmul.f32 %v662_v1, %v541_v55  ;;  %v179_v63 = vmul.f32 %v662_v1, %v542_v56  ;;  %v549_v0 = vunpack.c.l.bf16 %v620_v52  ;;  %v550_v2 = vunpack.c.h.bf16 %v620_v52 }
  0x2c   :  { %434 = vst.msk [vmem:[%s1149_s3 + $0x6c] sm:$0xf] %vm406_vm0, %v369_v49  ;;  %v180_v4 = vmul.f32 %v662_v1, %v545_v60  ;;  %v181_v5 = vmul.f32 %v662_v1, %v546_v61  ;;  %v553_v6 = vunpack.c.l.bf16 %v621_v57  ;;  %v554_v7 = vunpack.c.h.bf16 %v621_v57 }
  0x2d   :  { %435 = vst.msk [vmem:[%s1149_s3 + $0x70] sm:$0xf] %vm406_vm0, %v370_v53  ;;  %v246_v8 = vadd.f32 %v667_v3, %v178_v62  ;;  %v247_v9 = vadd.f32 %v667_v3, %v179_v63  ;;  %v182_v10 = vmul.f32 %v662_v1, %v549_v0  ;;  %v183_v11 = vmul.f32 %v662_v1, %v550_v2 }
  0x2e   :  { %436 = vst.msk [vmem:[%s1149_s3 + $0x74] sm:$0xf] %vm406_vm0, %v371_v54  ;;  %v248_v12 = vadd.f32 %v667_v3, %v180_v4  ;;  %v249_v13 = vadd.f32 %v667_v3, %v181_v5  ;;  %v184_v14 = vmul.f32 %v662_v1, %v553_v6  ;;  %v185_v15 = vmul.f32 %v662_v1, %v554_v7  ;;  %v626_v6 = vld [vmem:[%s1146_s0 + $0xc0] sm:$0xff]  }
  0x2f   :  { %437 = vst.msk [vmem:[%s1149_s3 + $0x78] sm:$0xf] %vm406_vm0, %v372_v58  ;;  %v310_v16 = vmax.f32 %v246_v8, 0.0  ;;  %v311_v17 = vmax.f32 %v247_v9, 0.0  ;;  %v250_v18 = vadd.f32 %v667_v3, %v182_v10  ;;  %v251_v19 = vadd.f32 %v667_v3, %v183_v11  ;;  %v627_v11 = vld [vmem:[%s1146_s0 + $0xc8] sm:$0xff]  }
  0x30   :  { %438 = vst.msk [vmem:[%s1149_s3 + $0x7c] sm:$0xf] %vm406_vm0, %v373_v59  ;;  %v312_v20 = vmax.f32 %v248_v12, 0.0  ;;  %v313_v21 = vmax.f32 %v249_v13, 0.0  ;;  %v252_v22 = vadd.f32 %v667_v3, %v184_v14  ;;  %v253_v23 = vadd.f32 %v667_v3, %v185_v15 }
  0x31   :  { %v374_v25 = vpack.c.bf16 %v310_v16, %v310_v16  ;;  %v375_v26 = vpack.c.bf16 %v311_v17, %v311_v17  ;;  %v314_v27 = vmax.f32 %v250_v18, 0.0  ;;  %v315_v28 = vmax.f32 %v251_v19, 0.0  ;;  %v628_v16 = vld [vmem:[%s1146_s0 + $0xd0] sm:$0xff]  }
  0x32   :  { %v376_v30 = vpack.c.bf16 %v312_v20, %v312_v20  ;;  %v377_v31 = vpack.c.bf16 %v313_v21, %v313_v21  ;;  %v316_v32 = vmax.f32 %v252_v22, 0.0  ;;  %v317_v33 = vmax.f32 %v253_v23, 0.0  ;;  %v629_v21 = vld [vmem:[%s1146_s0 + $0xd8] sm:$0xff]  }
  0x33   :  { %439 = vst.msk [vmem:[%s1149_s3 + $0x80] sm:$0xf] %vm406_vm0, %v374_v25  ;;  %v378_v35 = vpack.c.bf16 %v314_v27, %v314_v27  ;;  %v379_v36 = vpack.c.bf16 %v315_v28, %v315_v28  ;;  %v557_v37 = vunpack.c.l.bf16 %v622_v24  ;;  %v558_v38 = vunpack.c.h.bf16 %v622_v24 }
  0x34   :  { %440 = vst.msk [vmem:[%s1149_s3 + $0x84] sm:$0xf] %vm406_vm0, %v375_v26  ;;  %v380_v40 = vpack.c.bf16 %v316_v32, %v316_v32  ;;  %v381_v41 = vpack.c.bf16 %v317_v33, %v317_v33  ;;  %v561_v42 = vunpack.c.l.bf16 %v623_v29  ;;  %v562_v43 = vunpack.c.h.bf16 %v623_v29 }
  0x35   :  { %441 = vst.msk [vmem:[%s1149_s3 + $0x88] sm:$0xf] %vm406_vm0, %v376_v30  ;;  %v186_v44 = vmul.f32 %v662_v1, %v557_v37  ;;  %v187_v45 = vmul.f32 %v662_v1, %v558_v38  ;;  %v565_v46 = vunpack.c.l.bf16 %v624_v34  ;;  %v566_v47 = vunpack.c.h.bf16 %v624_v34 }
  0x36   :  { %442 = vst.msk [vmem:[%s1149_s3 + $0x8c] sm:$0xf] %vm406_vm0, %v377_v31  ;;  %v188_v48 = vmul.f32 %v662_v1, %v561_v42  ;;  %v189_v49 = vmul.f32 %v662_v1, %v562_v43  ;;  %v569_v50 = vunpack.c.l.bf16 %v625_v39  ;;  %v570_v51 = vunpack.c.h.bf16 %v625_v39 }
  0x37   :  { %443 = vst.msk [vmem:[%s1149_s3 + $0x90] sm:$0xf] %vm406_vm0, %v378_v35  ;;  %v254_v52 = vadd.f32 %v667_v3, %v186_v44  ;;  %v255_v53 = vadd.f32 %v667_v3, %v187_v45  ;;  %v190_v54 = vmul.f32 %v662_v1, %v565_v46  ;;  %v191_v55 = vmul.f32 %v662_v1, %v566_v47 }
  0x38   :  { %444 = vst.msk [vmem:[%s1149_s3 + $0x94] sm:$0xf] %vm406_vm0, %v379_v36  ;;  %v256_v56 = vadd.f32 %v667_v3, %v188_v48  ;;  %v257_v57 = vadd.f32 %v667_v3, %v189_v49  ;;  %v192_v58 = vmul.f32 %v662_v1, %v569_v50  ;;  %v193_v59 = vmul.f32 %v662_v1, %v570_v51  ;;  %v630_v50 = vld [vmem:[%s1146_s0 + $0xe0] sm:$0xff]  }
  0x39   :  { %445 = vst.msk [vmem:[%s1149_s3 + $0x98] sm:$0xf] %vm406_vm0, %v380_v40  ;;  %v318_v60 = vmax.f32 %v254_v52, 0.0  ;;  %v319_v61 = vmax.f32 %v255_v53, 0.0  ;;  %v258_v62 = vadd.f32 %v667_v3, %v190_v54  ;;  %v259_v63 = vadd.f32 %v667_v3, %v191_v55  ;;  %v631_v55 = vld [vmem:[%s1146_s0 + $0xe8] sm:$0xff]  }
  0x3a   :  { %446 = vst.msk [vmem:[%s1149_s3 + $0x9c] sm:$0xf] %vm406_vm0, %v381_v41  ;;  %v320_v0 = vmax.f32 %v256_v56, 0.0  ;;  %v321_v2 = vmax.f32 %v257_v57, 0.0  ;;  %v260_v4 = vadd.f32 %v667_v3, %v192_v58  ;;  %v261_v5 = vadd.f32 %v667_v3, %v193_v59 }
  0x3b   :  { %v382_v7 = vpack.c.bf16 %v318_v60, %v318_v60  ;;  %v383_v8 = vpack.c.bf16 %v319_v61, %v319_v61  ;;  %v322_v9 = vmax.f32 %v258_v62, 0.0  ;;  %v323_v10 = vmax.f32 %v259_v63, 0.0  ;;  %v632_v60 = vld [vmem:[%s1146_s0 + $0xf0] sm:$0xff]  }
  0x3c   :  { %v384_v12 = vpack.c.bf16 %v320_v0, %v320_v0  ;;  %v385_v13 = vpack.c.bf16 %v321_v2, %v321_v2  ;;  %v324_v14 = vmax.f32 %v260_v4, 0.0  ;;  %v325_v15 = vmax.f32 %v261_v5, 0.0  ;;  %v633_v2 = vld [vmem:[%s1146_s0 + $0xf8] sm:$0xff]  }
  0x3d   :  { %447 = vst.msk [vmem:[%s1149_s3 + $0xa0] sm:$0xf] %vm406_vm0, %v382_v7  ;;  %v386_v17 = vpack.c.bf16 %v322_v9, %v322_v9  ;;  %v387_v18 = vpack.c.bf16 %v323_v10, %v323_v10  ;;  %v573_v19 = vunpack.c.l.bf16 %v626_v6  ;;  %v574_v20 = vunpack.c.h.bf16 %v626_v6 }
  0x3e   :  { %448 = vst.msk [vmem:[%s1149_s3 + $0xa4] sm:$0xf] %vm406_vm0, %v383_v8  ;;  %v388_v22 = vpack.c.bf16 %v324_v14, %v324_v14  ;;  %v389_v23 = vpack.c.bf16 %v325_v15, %v325_v15  ;;  %v577_v24 = vunpack.c.l.bf16 %v627_v11  ;;  %v578_v25 = vunpack.c.h.bf16 %v627_v11 }
  0x3f   :  { %449 = vst.msk [vmem:[%s1149_s3 + $0xa8] sm:$0xf] %vm406_vm0, %v384_v12  ;;  %v194_v26 = vmul.f32 %v662_v1, %v573_v19  ;;  %v195_v27 = vmul.f32 %v662_v1, %v574_v20  ;;  %v581_v28 = vunpack.c.l.bf16 %v628_v16  ;;  %v582_v29 = vunpack.c.h.bf16 %v628_v16 }
  0x40   :  { %450 = vst.msk [vmem:[%s1149_s3 + $0xac] sm:$0xf] %vm406_vm0, %v385_v13  ;;  %v196_v30 = vmul.f32 %v662_v1, %v577_v24  ;;  %v197_v31 = vmul.f32 %v662_v1, %v578_v25  ;;  %v585_v32 = vunpack.c.l.bf16 %v629_v21  ;;  %v586_v33 = vunpack.c.h.bf16 %v629_v21 }
  0x41   :  { %451 = vst.msk [vmem:[%s1149_s3 + $0xb0] sm:$0xf] %vm406_vm0, %v386_v17  ;;  %v262_v34 = vadd.f32 %v667_v3, %v194_v26  ;;  %v263_v35 = vadd.f32 %v667_v3, %v195_v27  ;;  %v198_v36 = vmul.f32 %v662_v1, %v581_v28  ;;  %v199_v37 = vmul.f32 %v662_v1, %v582_v29 }
  0x42   :  { %452 = vst.msk [vmem:[%s1149_s3 + $0xb4] sm:$0xf] %vm406_vm0, %v387_v18  ;;  %v264_v38 = vadd.f32 %v667_v3, %v196_v30  ;;  %v265_v39 = vadd.f32 %v667_v3, %v197_v31  ;;  %v200_v40 = vmul.f32 %v662_v1, %v585_v32  ;;  %v201_v41 = vmul.f32 %v662_v1, %v586_v33 }
  0x43   :  { %453 = vst.msk [vmem:[%s1149_s3 + $0xb8] sm:$0xf] %vm406_vm0, %v388_v22  ;;  %v326_v42 = vmax.f32 %v262_v34, 0.0  ;;  %v327_v43 = vmax.f32 %v263_v35, 0.0  ;;  %v266_v44 = vadd.f32 %v667_v3, %v198_v36  ;;  %v267_v45 = vadd.f32 %v667_v3, %v199_v37 }
  0x44   :  { %454 = vst.msk [vmem:[%s1149_s3 + $0xbc] sm:$0xf] %vm406_vm0, %v389_v23  ;;  %v328_v46 = vmax.f32 %v264_v38, 0.0  ;;  %v329_v47 = vmax.f32 %v265_v39, 0.0  ;;  %v268_v48 = vadd.f32 %v667_v3, %v200_v40  ;;  %v269_v49 = vadd.f32 %v667_v3, %v201_v41 }
  0x45   :  { %v390_v51 = vpack.c.bf16 %v326_v42, %v326_v42  ;;  %v391_v52 = vpack.c.bf16 %v327_v43, %v327_v43  ;;  %v330_v53 = vmax.f32 %v266_v44, 0.0  ;;  %v331_v54 = vmax.f32 %v267_v45, 0.0 }
  0x46   :  { %v392_v56 = vpack.c.bf16 %v328_v46, %v328_v46  ;;  %v393_v57 = vpack.c.bf16 %v329_v47, %v329_v47  ;;  %v332_v58 = vmax.f32 %v268_v48, 0.0  ;;  %v333_v59 = vmax.f32 %v269_v49, 0.0 }
  0x47   :  { %455 = vst.msk [vmem:[%s1149_s3 + $0xc0] sm:$0xf] %vm406_vm0, %v390_v51  ;;  %v394_v61 = vpack.c.bf16 %v330_v53, %v330_v53  ;;  %v395_v62 = vpack.c.bf16 %v331_v54, %v331_v54  ;;  %v589_v63 = vunpack.c.l.bf16 %v630_v50  ;;  %v590_v0 = vunpack.c.h.bf16 %v630_v50 }
  0x48   :  { %456 = vst.msk [vmem:[%s1149_s3 + $0xc4] sm:$0xf] %vm406_vm0, %v391_v52  ;;  %v396_v4 = vpack.c.bf16 %v332_v58, %v332_v58  ;;  %v397_v5 = vpack.c.bf16 %v333_v59, %v333_v59  ;;  %v593_v6 = vunpack.c.l.bf16 %v631_v55  ;;  %v594_v7 = vunpack.c.h.bf16 %v631_v55 }
  0x49   :  { %457 = vst.msk [vmem:[%s1149_s3 + $0xc8] sm:$0xf] %vm406_vm0, %v392_v56  ;;  %v202_v8 = vmul.f32 %v662_v1, %v589_v63  ;;  %v203_v9 = vmul.f32 %v662_v1, %v590_v0  ;;  %v597_v10 = vunpack.c.l.bf16 %v632_v60  ;;  %v598_v11 = vunpack.c.h.bf16 %v632_v60 }
  0x4a   :  { %458 = vst.msk [vmem:[%s1149_s3 + $0xcc] sm:$0xf] %vm406_vm0, %v393_v57  ;;  %v204_v12 = vmul.f32 %v662_v1, %v593_v6  ;;  %v205_v13 = vmul.f32 %v662_v1, %v594_v7  ;;  %v601_v14 = vunpack.c.l.bf16 %v633_v2  ;;  %v602_v15 = vunpack.c.h.bf16 %v633_v2 }
  0x4b   :  { %459 = vst.msk [vmem:[%s1149_s3 + $0xd0] sm:$0xf] %vm406_vm0, %v394_v61  ;;  %v270_v16 = vadd.f32 %v667_v3, %v202_v8  ;;  %v271_v17 = vadd.f32 %v667_v3, %v203_v9  ;;  %v206_v18 = vmul.f32 %v662_v1, %v597_v10  ;;  %v207_v19 = vmul.f32 %v662_v1, %v598_v11 }
  0x4c   :  { %460 = vst.msk [vmem:[%s1149_s3 + $0xd4] sm:$0xf] %vm406_vm0, %v395_v62  ;;  %v272_v20 = vadd.f32 %v667_v3, %v204_v12  ;;  %v273_v21 = vadd.f32 %v667_v3, %v205_v13  ;;  %v208_v22 = vmul.f32 %v662_v1, %v601_v14  ;;  %v209_v23 = vmul.f32 %v662_v1, %v602_v15 }
  0x4d   :  { %461 = vst.msk [vmem:[%s1149_s3 + $0xd8] sm:$0xf] %vm406_vm0, %v396_v4  ;;  %v334_v24 = vmax.f32 %v270_v16, 0.0  ;;  %v335_v25 = vmax.f32 %v271_v17, 0.0  ;;  %v274_v26 = vadd.f32 %v667_v3, %v206_v18  ;;  %v275_v27 = vadd.f32 %v667_v3, %v207_v19 }
  0x4e   :  { %462 = vst.msk [vmem:[%s1149_s3 + $0xdc] sm:$0xf] %vm406_vm0, %v397_v5  ;;  %v336_v28 = vmax.f32 %v272_v20, 0.0  ;;  %v337_v29 = vmax.f32 %v273_v21, 0.0  ;;  %v276_v1 = vadd.f32 %v667_v3, %v208_v22  ;;  %v277_v30 = vadd.f32 %v667_v3, %v209_v23 }
  0x4f   :  { %v398_v31 = vpack.c.bf16 %v334_v24, %v334_v24  ;;  %v399_v32 = vpack.c.bf16 %v335_v25, %v335_v25  ;;  %v338_v33 = vmax.f32 %v274_v26, 0.0  ;;  %v339_v34 = vmax.f32 %v275_v27, 0.0 }
  0x50   :  { %v400_v35 = vpack.c.bf16 %v336_v28, %v336_v28  ;;  %v401_v36 = vpack.c.bf16 %v337_v29, %v337_v29  ;;  %v340_v37 = vmax.f32 %v276_v1, 0.0  ;;  %v341_v38 = vmax.f32 %v277_v30, 0.0 }
  0x51   :  { %463 = vst.msk [vmem:[%s1149_s3 + $0xe0] sm:$0xf] %vm406_vm0, %v398_v31  ;;  %v402_v39 = vpack.c.bf16 %v338_v33, %v338_v33  ;;  %v403_v3 = vpack.c.bf16 %v339_v34, %v339_v34 }
  0x52   :  { %464 = vst.msk [vmem:[%s1149_s3 + $0xe4] sm:$0xf] %vm406_vm0, %v399_v32  ;;  %v404_v40 = vpack.c.bf16 %v340_v37, %v340_v37  ;;  %v405_v41 = vpack.c.bf16 %v341_v38, %v341_v38 }
  0x53   :  { %465 = vst.msk [vmem:[%s1149_s3 + $0xe8] sm:$0xf] %vm406_vm0, %v400_v35 }
  0x54   :  { %466 = vst.msk [vmem:[%s1149_s3 + $0xec] sm:$0xf] %vm406_vm0, %v401_v36 }
  0x55   :  { %467 = vst.msk [vmem:[%s1149_s3 + $0xf0] sm:$0xf] %vm406_vm0, %v402_v39 }
  0x56   :  { %468 = vst.msk [vmem:[%s1149_s3 + $0xf4] sm:$0xf] %vm406_vm0, %v403_v3 }
  0x57   :  { %469 = vst.msk [vmem:[%s1149_s3 + $0xf8] sm:$0xf] %vm406_vm0, %v404_v40 }
  0x58   :  { %470 = vst.msk [vmem:[%s1149_s3 + $0xfc] sm:$0xf] %vm406_vm0, %v405_v41 }

// kernel: resnet_forward.23
= control target key start
LH: loop header
LB: loop body
LE: loop exit
PB: predicated region body
PF: predicated region fallthrough
CT: control target
= control target key end

     0   :  { %vm673_vm0 = vcmask 1040384   ;;  %vm674_vm1 = vcmask 1041408   ;;  %v2103_v2 = vmov 65535   ;;  %vm576_vm2 = vcmask 154624   ;;  %s3441_s1 = inlined_call_operand.vmem [shape: bf16[147,64], index: 1, kind: input, shape index: {}]   ;;  %s3442_s0 = inlined_call_operand.vmem [shape: bf16[512,147], index: 0, kind: input, shape index: {}]   ;;  %s3443_s2 = inlined_call_operand.vmem [shape: bf16[512,64], index: 2, kind: output, shape index: {0}]   ;;  %s3444_s3 = inlined_call_operand.vmem [shape: f32[1,1,64], index: 3, kind: output, shape index: {1}]   ;;  %s3445_s4 = inlined_call_operand.vmem [shape: f32[1,1,64], index: 4, kind: output, shape index: {2}]  }
   0x1   :  { %v2083_v0 = vld [vmem:[%s3441_s1 + $0x38] sm:$0xff]  ;;  %v230_v1 = vld [vmem:[%s3441_s1 + $0x48] sm:$0x3]  ;;  %v675_v3 = vsel %vm673_vm0, 4294967295, %v2103_v2  ;;  %v2082_v5 = vld [vmem:[%s3441_s1 + $0x30] sm:$0xff]  ;;  %vm19_vm3 = vcmask 523264  }
   0x2   :  { %v556_v4 = vunpack.c.l.b16 %v230_v1  ;;  %680 = vmatpush.bf16.msra.mxu0 %v2083_v0  ;;  %v676_v6 = vsel %vm674_vm1, %v675_v3, 0  ;;  %2085 = vmatpush.bf16.msra.mxu2 %v2083_v0  ;;  %v2081_v9 = vld [vmem:[%s3441_s1 + $0x28] sm:$0xff]  ;;  %v2084_v10 = vld [vmem:[%s3441_s1 + $0x40] sm:$0xff]  ;;  %v2079_v15 = vld [vmem:[%s3441_s1 + $0x18] sm:$0xff]  ;;  %vm1278_vm4 = vcmask 519168   ;;  %vm1476_vm5 = vcmask 516096  }
   0x3   :  { %v2012_v11 = vld [vmem:[%s3442_s0 + $0x4] sm:$0xf]  ;;  %v1692_v12 = vld [vmem:[%s3442_s0 + $0x8] sm:$0xf0]  ;;  %v2078_v16 = vld [vmem:[%s3441_s1 + $0x10] sm:$0xff] }
   0x4   :  { %v566_v7 = vpack.c.b16 %v556_v4, %v556_v4  ;;  %v1695_v13 = vor.u32 %v2012_v11, %v1692_v12  ;;  %v2080_v14 = vld [vmem:[%s3441_s1 + $0x20] sm:$0xff]  ;;  %v2077_v17 = vld [vmem:[%s3441_s1 + $0x8] sm:$0xff]  ;;  %v2014_v18 = vld [vmem:[%s3442_s0 + $0x14] sm:$0xf] }
   0x5   :  { %v1700_v19 = vld [vmem:[%s3442_s0 + $0x18] sm:$0xf0]  ;;  %v2076_v21 = vld [vmem:[%s3441_s1] sm:$0xff]  ;;  %v2013_v23 = vld [vmem:[%s3442_s0 + $0x4] sm:$0xf0] }
   0x6   :  { %v678_v8 = vand.u32 %v676_v6, %v566_v7  ;;  %681 = vmatpush.bf16.msra.mxu0 %v2082_v5  ;;  %2086 = vmatpush.bf16.msra.mxu2 %v2082_v5  ;;  %v1703_v20 = vor.u32 %v2014_v18, %v1700_v19  ;;  %v1690_v22 = vld [vmem:[%s3442_s0] sm:$0xf]  ;;  %v2016_v25 = vld [vmem:[%s3442_s0 + $0x24] sm:$0xf]  ;;  %v1708_v26 = vld [vmem:[%s3442_s0 + $0x28] sm:$0xf0] }
   0x7   :  { %v1691_v24 = vor.u32 %v2013_v23, %v1690_v22  ;;  %v1711_v27 = vor.u32 %v2016_v25, %v1708_v26  ;;  %v1698_v28 = vld [vmem:[%s3442_s0 + $0x10] sm:$0xf]  ;;  %v2015_v29 = vld [vmem:[%s3442_s0 + $0x14] sm:$0xf0]  ;;  %v1818_v31 = vld [vmem:[%s3442_s0 + $0x100] sm:$0xf] }
   0x8   :  { %855 = vmatpush.bf16.msra.mxu1 %v678_v8  ;;  %2093 = vmatpush.bf16.msra.mxu3 %v678_v8  ;;  %v1699_v30 = vor.u32 %v2015_v29, %v1698_v28  ;;  %v2045_v32 = vld [vmem:[%s3442_s0 + $0x104] sm:$0xf0]  ;;  %v2018_v34 = vld [vmem:[%s3442_s0 + $0x34] sm:$0xf]  ;;  %v1716_v35 = vld [vmem:[%s3442_s0 + $0x38] sm:$0xf0] }
   0x9   :  { %v1819_v33 = vor.u32 %v2045_v32, %v1818_v31  ;;  %v1719_v36 = vor.u32 %v2018_v34, %v1716_v35  ;;  %v1706_v37 = vld [vmem:[%s3442_s0 + $0x20] sm:$0xf]  ;;  %v2017_v38 = vld [vmem:[%s3442_s0 + $0x24] sm:$0xf0]  ;;  %v1826_v40 = vld [vmem:[%s3442_s0 + $0x110] sm:$0xf] }
   0xa   :  { %682 = vmatpush.bf16.msra.mxu0 %v2081_v9  ;;  %2087 = vmatpush.bf16.msra.mxu2 %v2081_v9  ;;  %v1707_v39 = vor.u32 %v2017_v38, %v1706_v37  ;;  %v2047_v41 = vld [vmem:[%s3442_s0 + $0x114] sm:$0xf0]  ;;  %v2046_v42 = vld [vmem:[%s3442_s0 + $0x114] sm:$0xf]  ;;  %v1828_v44 = vld [vmem:[%s3442_s0 + $0x118] sm:$0xf0] }
   0xb   :  { %v1827_v43 = vor.u32 %v2047_v41, %v1826_v40  ;;  %v1831_v45 = vor.u32 %v2046_v42, %v1828_v44  ;;  %v2020_v46 = vld [vmem:[%s3442_s0 + $0x44] sm:$0xf]  ;;  %v1724_v47 = vld [vmem:[%s3442_s0 + $0x48] sm:$0xf0]  ;;  %v1714_v49 = vld [vmem:[%s3442_s0 + $0x30] sm:$0xf] }
   0xc   :  { %856 = vmatpush.bf16.msra.mxu1 %v2084_v10  ;;  %2094 = vmatpush.bf16.msra.mxu3 %v2084_v10  ;;  %v1727_v48 = vor.u32 %v2020_v46, %v1724_v47  ;;  %v2019_v50 = vld [vmem:[%s3442_s0 + $0x34] sm:$0xf0]  ;;  %v1834_v52 = vld [vmem:[%s3442_s0 + $0x120] sm:$0xf]  ;;  %v2049_v53 = vld [vmem:[%s3442_s0 + $0x124] sm:$0xf0] }
   0xd   :  { %v1715_v51 = vor.u32 %v2019_v50, %v1714_v49  ;;  %v2048_v54 = vld [vmem:[%s3442_s0 + $0x124] sm:$0xf]  ;;  %v1835_v55 = vor.u32 %v2049_v53, %v1834_v52  ;;  %v1836_v56 = vld [vmem:[%s3442_s0 + $0x128] sm:$0xf0]  ;;  %v2022_v58 = vld [vmem:[%s3442_s0 + $0x54] sm:$0xf] }
   0xe   :  { %683 = vmatpush.bf16.msra.mxu0 %v2080_v14  ;;  %2088 = vmatpush.bf16.msra.mxu2 %v2080_v14  ;;  %v1839_v57 = vor.u32 %v2048_v54, %v1836_v56  ;;  %v1732_v59 = vld [vmem:[%s3442_s0 + $0x58] sm:$0xf0]  ;;  %v1722_v61 = vld [vmem:[%s3442_s0 + $0x40] sm:$0xf]  ;;  %v2021_v62 = vld [vmem:[%s3442_s0 + $0x44] sm:$0xf0] }
   0xf   :  { %1980 = vmatmul.msk.bf16.vlgmr.msra.gmra.mxu1 %vm576_vm2, %v1695_v13  ;;  %1997 = vmatmul.msk.bf16.vlgmr.msra.gmra.mxu3 %vm576_vm2, %v1831_v45  ;;  %v1735_v60 = vor.u32 %v2022_v58, %v1732_v59  ;;  %v1723_v63 = vor.u32 %v2021_v62, %v1722_v61  ;;  %v1842_v0 = vld [vmem:[%s3442_s0 + $0x130] sm:$0xf]  ;;  %v2051_v1 = vld [vmem:[%s3442_s0 + $0x134] sm:$0xf0]  ;;  %v2050_v2 = vld [vmem:[%s3442_s0 + $0x134] sm:$0xf] }
  0x10   :  { %v1843_v3 = vor.u32 %v2051_v1, %v1842_v0  ;;  %v1844_v4 = vld [vmem:[%s3442_s0 + $0x138] sm:$0xf0]  ;;  %v2024_v6 = vld [vmem:[%s3442_s0 + $0x64] sm:$0xf]  ;;  %v1740_v7 = vld [vmem:[%s3442_s0 + $0x68] sm:$0xf0] }
  0x11   :  { %v1847_v5 = vor.u32 %v2050_v2, %v1844_v4  ;;  %v1743_v8 = vor.u32 %v2024_v6, %v1740_v7  ;;  %v1730_v9 = vld [vmem:[%s3442_s0 + $0x50] sm:$0xf]  ;;  %v2023_v10 = vld [vmem:[%s3442_s0 + $0x54] sm:$0xf0]  ;;  %v1850_v12 = vld [vmem:[%s3442_s0 + $0x140] sm:$0xf] }
  0x12   :  { %684 = vmatpush.bf16.msra.mxu0 %v2079_v15  ;;  %2089 = vmatpush.bf16.msra.mxu2 %v2079_v15  ;;  %v1731_v11 = vor.u32 %v2023_v10, %v1730_v9  ;;  %v2053_v13 = vld [vmem:[%s3442_s0 + $0x144] sm:$0xf0]  ;;  %v2052_v14 = vld [vmem:[%s3442_s0 + $0x144] sm:$0xf]  ;;  %v2026_v18 = vld [vmem:[%s3442_s0 + $0x74] sm:$0xf] }
  0x13   :  { %v1851_v15 = vor.u32 %v2053_v13, %v1850_v12  ;;  %v1748_v19 = vld [vmem:[%s3442_s0 + $0x78] sm:$0xf0]  ;;  %v1738_v22 = vld [vmem:[%s3442_s0 + $0x60] sm:$0xf]  ;;  %v2025_v23 = vld [vmem:[%s3442_s0 + $0x64] sm:$0xf0] }
  0x14   :  { %v1858_v25 = vld [vmem:[%s3442_s0 + $0x150] sm:$0xf]  ;;  %v2055_v26 = vld [vmem:[%s3442_s0 + $0x154] sm:$0xf0]  ;;  %v2054_v28 = vld [vmem:[%s3442_s0 + $0x154] sm:$0xf] }
  0x15   :  { %v1860_v29 = vld [vmem:[%s3442_s0 + $0x158] sm:$0xf0]  ;;  %v2028_v31 = vld [vmem:[%s3442_s0 + $0x84] sm:$0xf]  ;;  %v1756_v32 = vld [vmem:[%s3442_s0 + $0x88] sm:$0xf0] }
  0x16   :  { %685 = vmatpush.bf16.msra.mxu0 %v2078_v16  ;;  %2090 = vmatpush.bf16.msra.mxu2 %v2078_v16  ;;  %v1852_v16 = vld [vmem:[%s3442_s0 + $0x148] sm:$0xf0]  ;;  %v1746_v34 = vld [vmem:[%s3442_s0 + $0x70] sm:$0xf]  ;;  %v2027_v35 = vld [vmem:[%s3442_s0 + $0x74] sm:$0xf0] }
  0x17   :  { %v1747_v37 = vor.u32 %v2027_v35, %v1746_v34  ;;  %v1764_v40 = vld [vmem:[%s3442_s0 + $0x98] sm:$0xf0]  ;;  %v1754_v42 = vld [vmem:[%s3442_s0 + $0x80] sm:$0xf]  ;;  %v2057_v50 = vld [vmem:[%s3442_s0 + $0x164] sm:$0xf0] }
  0x18   :  { %v1866_v49 = vld [vmem:[%s3442_s0 + $0x160] sm:$0xf]  ;;  %v2056_v53 = vld [vmem:[%s3442_s0 + $0x164] sm:$0xf]  ;;  %v1868_v54 = vld [vmem:[%s3442_s0 + $0x168] sm:$0xf0] }
  0x19   :  { %v1867_v52 = vor.u32 %v2057_v50, %v1866_v49  ;;  %v2032_v58 = vld [vmem:[%s3442_s0 + $0xa4] sm:$0xf]  ;;  %v1772_v59 = vld [vmem:[%s3442_s0 + $0xa8] sm:$0xf0]  ;;  %v1762_v62 = vld [vmem:[%s3442_s0 + $0x90] sm:$0xf] }
  0x1a   :  { %686 = vmatpush.bf16.msra.mxu0 %v2077_v17  ;;  %2091 = vmatpush.bf16.msra.mxu2 %v2077_v17  ;;  %v1855_v17 = vor.u32 %v2052_v14, %v1852_v16  ;;  %v1775_v61 = vor.u32 %v2032_v58, %v1772_v59  ;;  %v1874_v4 = vld [vmem:[%s3442_s0 + $0x170] sm:$0xf]  ;;  %v2058_v7 = vld [vmem:[%s3442_s0 + $0x174] sm:$0xf]  ;;  %v2060_v34 = vld [vmem:[%s3442_s0 + $0x184] sm:$0xf] }
  0x1b   :  { %v1884_v35 = vld [vmem:[%s3442_s0 + $0x188] sm:$0xf0] }
  0x1e   :  { %687 = vmatpush.bf16.msra.mxu0 %v2076_v21  ;;  %2092 = vmatpush.bf16.msra.mxu2 %v2076_v21  ;;  %v1751_v21 = vor.u32 %v2026_v18, %v1748_v19  ;;  %v2034_v19 = vld [vmem:[%s3442_s0 + $0xb4] sm:$0xf] }
  0x1f   :  { %1981 = vmatmul.msk.bf16.gmra.mxu1 %vm576_vm2, %v1703_v20  ;;  %1998 = vmatmul.msk.bf16.gmra.mxu3 %vm576_vm2, %v1839_v57  ;;  %v2104_v20 = vmov 0.0  }
  0x20   :  { %20 = vst.msk [vmem:[#allocation2] sm:$0xff] %vm19_vm3, %v2104_v20 }
  0x21   :  { %688 = vmatmul.bf16.vlgmr.msra.gmra.mxu0 %v1691_v24  ;;  %768 = vmatmul.bf16.vlgmr.msra.gmra.mxu2 %v1819_v33  ;;  %21 = vst.msk [vmem:[#allocation2 + $0x8] sm:$0xff] %vm19_vm3, %v2104_v20  ;;  %v1739_v24 = vor.u32 %v2025_v23, %v1738_v22  ;;  %v1759_v33 = vor.u32 %v2028_v31, %v1756_v32 }
  0x22   :  { %22 = vst.msk [vmem:[#allocation2 + $0x10] sm:$0xff] %vm19_vm3, %v2104_v20 }
  0x23   :  { %23 = vst.msk [vmem:[#allocation2 + $0x18] sm:$0xff] %vm19_vm3, %v2104_v20 }
  0x24   :  { %24 = vst.msk [vmem:[#allocation2 + $0x20] sm:$0xff] %vm19_vm3, %v2104_v20 }
  0x25   :  { %25 = vst.msk [vmem:[#allocation2 + $0x28] sm:$0xff] %vm19_vm3, %v2104_v20 }
  0x26   :  { %26 = vst.msk [vmem:[#allocation2 + $0x30] sm:$0xff] %vm19_vm3, %v2104_v20 }
  0x27   :  { %27 = vst.msk [vmem:[#allocation2 + $0x38] sm:$0xff] %vm19_vm3, %v2104_v20  ;;  %v84_v46 = vld [vmem:[#allocation2] sm:$0xff] }
  0x28   :  { %28 = vst.msk [vmem:[#allocation2 + $0x40] sm:$0xff] %vm19_vm3, %v2104_v20  ;;  %v85_v12 = vld [vmem:[#allocation2 + $0x8] sm:$0xff] }
  0x29   :  { %29 = vst.msk [vmem:[#allocation2 + $0x48] sm:$0xff] %vm19_vm3, %v2104_v20  ;;  %v86_v14 = vld [vmem:[#allocation2 + $0x10] sm:$0xff] }
  0x2a   :  { %30 = vst.msk [vmem:[#allocation2 + $0x50] sm:$0xff] %vm19_vm3, %v2104_v20 }
  0x2b   :  { %31 = vst.msk [vmem:[#allocation2 + $0x58] sm:$0xff] %vm19_vm3, %v2104_v20 }
  0x2c   :  { %32 = vst.msk [vmem:[#allocation2 + $0x60] sm:$0xff] %vm19_vm3, %v2104_v20  ;;  %v89_v59 = vld [vmem:[#allocation2 + $0x28] sm:$0xff] }
  0x2d   :  { %33 = vst.msk [vmem:[#allocation2 + $0x68] sm:$0xff] %vm19_vm3, %v2104_v20 }
  0x2e   :  { %34 = vst.msk [vmem:[#allocation2 + $0x70] sm:$0xff] %vm19_vm3, %v2104_v20 }
  0x2f   :  { %1982 = vmatmul.msk.bf16.gmra.mxu1 %vm576_vm2, %v1711_v27  ;;  %1999 = vmatmul.msk.bf16.gmra.mxu3 %vm576_vm2, %v1847_v5  ;;  %v1859_v27 = vor.u32 %v2055_v26, %v1858_v25  ;;  %35 = vst.msk [vmem:[#allocation2 + $0x78] sm:$0xff] %vm19_vm3, %v2104_v20  ;;  %v2059_v5 = vld [vmem:[%s3442_s0 + $0x174] sm:$0xf0]  ;;  %v1770_v25 = vld [vmem:[%s3442_s0 + $0xa0] sm:$0xf] }
  0x30   :  { %36 = vst.msk [vmem:[#allocation2 + $0x80] sm:$0xff] %vm19_vm3, %v2104_v20  ;;  %v1875_v6 = vor.u32 %v2059_v5, %v1874_v4  ;;  %v2033_v26 = vld [vmem:[%s3442_s0 + $0xa4] sm:$0xf0] }
  0x31   :  { %693 = vmatmul.bf16.gmra.mxu0 %v1699_v30  ;;  %773 = vmatmul.bf16.gmra.mxu2 %v1827_v43  ;;  %v1863_v30 = vor.u32 %v2054_v28, %v1860_v29  ;;  %37 = vst.msk [vmem:[#allocation2 + $0x88] sm:$0xff] %vm19_vm3, %v2104_v20  ;;  %v2029_v43 = vld [vmem:[%s3442_s0 + $0x84] sm:$0xf0]  ;;  %v1771_v28 = vor.u32 %v2033_v26, %v1770_v25  ;;  %v2062_v25 = vld [vmem:[%s3442_s0 + $0x194] sm:$0xf] }
  0x32   :  { %38 = vst.msk [vmem:[#allocation2 + $0x90] sm:$0xff] %vm19_vm3, %v2104_v20  ;;  %v1755_v45 = vor.u32 %v2029_v43, %v1754_v42  ;;  %v1892_v26 = vld [vmem:[%s3442_s0 + $0x198] sm:$0xf0] }
  0x33   :  { %39 = vst.msk [vmem:[#allocation2 + $0x98] sm:$0xff] %vm19_vm3, %v2104_v20 }
  0x34   :  { %40 = vst.msk [vmem:[#allocation2 + $0xa0] sm:$0xff] %vm19_vm3, %v2104_v20 }
  0x35   :  { %41 = vst.msk [vmem:[#allocation2 + $0xa8] sm:$0xff] %vm19_vm3, %v2104_v20 }
  0x36   :  { %42 = vst.msk [vmem:[#allocation2 + $0xb0] sm:$0xff] %vm19_vm3, %v2104_v20 }
  0x37   :  { %43 = vst.msk [vmem:[#allocation2 + $0xb8] sm:$0xff] %vm19_vm3, %v2104_v20 }
  0x38   :  { %44 = vst.msk [vmem:[#allocation2 + $0xc0] sm:$0xff] %vm19_vm3, %v2104_v20 }
  0x39   :  { %45 = vst.msk [vmem:[#allocation2 + $0xc8] sm:$0xff] %vm19_vm3, %v2104_v20 }
  0x3a   :  { %46 = vst.msk [vmem:[#allocation2 + $0xd0] sm:$0xff] %vm19_vm3, %v2104_v20 }
  0x3b   :  { %47 = vst.msk [vmem:[#allocation2 + $0xd8] sm:$0xff] %vm19_vm3, %v2104_v20 }
  0x3c   :  { %48 = vst.msk [vmem:[#allocation2 + $0xe0] sm:$0xff] %vm19_vm3, %v2104_v20 }
  0x3d   :  { %49 = vst.msk [vmem:[#allocation2 + $0xe8] sm:$0xff] %vm19_vm3, %v2104_v20 }
  0x3e   :  { %50 = vst.msk [vmem:[#allocation2 + $0xf0] sm:$0xff] %vm19_vm3, %v2104_v20 }
  0x3f   :  { %1983 = vmatmul.msk.bf16.gmra.mxu1 %vm576_vm2, %v1719_v36  ;;  %2000 = vmatmul.msk.bf16.gmra.mxu3 %vm576_vm2, %v1855_v17  ;;  %51 = vst.msk [vmem:[#allocation2 + $0xf8] sm:$0xff] %vm19_vm3, %v2104_v20 }
  0x40   :  { %52 = vst.msk [vmem:[#allocation2 + $0x100] sm:$0xff] %vm19_vm3, %v2104_v20 }
  0x41   :  { %698 = vmatmul.bf16.gmra.mxu0 %v1707_v39  ;;  %778 = vmatmul.bf16.gmra.mxu2 %v1835_v55  ;;  %v2030_v39 = vld [vmem:[%s3442_s0 + $0x94] sm:$0xf]  ;;  %53 = vst.msk [vmem:[#allocation2 + $0x108] sm:$0xff] %vm19_vm3, %v2104_v20  ;;  %v1871_v55 = vor.u32 %v2056_v53, %v1868_v54 }
  0x42   :  { %v1767_v41 = vor.u32 %v2030_v39, %v1764_v40  ;;  %54 = vst.msk [vmem:[#allocation2 + $0x110] sm:$0xff] %vm19_vm3, %v2104_v20 }
  0x43   :  { %55 = vst.msk [vmem:[#allocation2 + $0x118] sm:$0xff] %vm19_vm3, %v2104_v20 }
  0x44   :  { %56 = vst.msk [vmem:[#allocation2 + $0x120] sm:$0xff] %vm19_vm3, %v2104_v20 }
  0x45   :  { %57 = vst.msk [vmem:[#allocation2 + $0x128] sm:$0xff] %vm19_vm3, %v2104_v20 }
  0x46   :  { %58 = vst.msk [vmem:[#allocation2 + $0x130] sm:$0xff] %vm19_vm3, %v2104_v20 }
  0x47   :  { %59 = vst.msk [vmem:[#allocation2 + $0x138] sm:$0xff] %vm19_vm3, %v2104_v20 }
  0x48   :  { %60 = vst.msk [vmem:[#allocation2 + $0x140] sm:$0xff] %vm19_vm3, %v2104_v20 }
  0x49   :  { %61 = vst.msk [vmem:[#allocation2 + $0x148] sm:$0xff] %vm19_vm3, %v2104_v20 }
  0x4a   :  { %62 = vst.msk [vmem:[#allocation2 + $0x150] sm:$0xff] %vm19_vm3, %v2104_v20 }
  0x4b   :  { %63 = vst.msk [vmem:[#allocation2 + $0x158] sm:$0xff] %vm19_vm3, %v2104_v20 }
  0x4c   :  { %64 = vst.msk [vmem:[#allocation2 + $0x160] sm:$0xff] %vm19_vm3, %v2104_v20 }
  0x4d   :  { %65 = vst.msk [vmem:[#allocation2 + $0x168] sm:$0xff] %vm19_vm3, %v2104_v20 }
  0x4e   :  { %66 = vst.msk [vmem:[#allocation2 + $0x170] sm:$0xff] %vm19_vm3, %v2104_v20 }
  0x4f   :  { %1984 = vmatmul.msk.bf16.gmra.mxu1 %vm576_vm2, %v1727_v48  ;;  %2001 = vmatmul.msk.bf16.gmra.mxu3 %vm576_vm2, %v1863_v30  ;;  %67 = vst.msk [vmem:[#allocation2 + $0x178] sm:$0xff] %vm19_vm3, %v2104_v20  ;;  %v1882_v30 = vld [vmem:[%s3442_s0 + $0x180] sm:$0xf] }
  0x50   :  { %68 = vst.msk [vmem:[#allocation2 + $0x180] sm:$0xff] %vm19_vm3, %v2104_v20 }
  0x51   :  { %703 = vmatmul.bf16.gmra.mxu0 %v1715_v51  ;;  %783 = vmatmul.bf16.gmra.mxu2 %v1843_v3  ;;  %69 = vst.msk [vmem:[#allocation2 + $0x188] sm:$0xff] %vm19_vm3, %v2104_v20 }
  0x52   :  { %70 = vst.msk [vmem:[#allocation2 + $0x190] sm:$0xff] %vm19_vm3, %v2104_v20 }
  0x53   :  { %71 = vst.msk [vmem:[#allocation2 + $0x198] sm:$0xff] %vm19_vm3, %v2104_v20 }
  0x54   :  { %72 = vst.msk [vmem:[#allocation2 + $0x1a0] sm:$0xff] %vm19_vm3, %v2104_v20 }
  0x55   :  { %73 = vst.msk [vmem:[#allocation2 + $0x1a8] sm:$0xff] %vm19_vm3, %v2104_v20 }
  0x56   :  { %74 = vst.msk [vmem:[#allocation2 + $0x1b0] sm:$0xff] %vm19_vm3, %v2104_v20 }
  0x57   :  { %75 = vst.msk [vmem:[#allocation2 + $0x1b8] sm:$0xff] %vm19_vm3, %v2104_v20 }
  0x58   :  { %76 = vst.msk [vmem:[#allocation2 + $0x1c0] sm:$0xff] %vm19_vm3, %v2104_v20 }
  0x59   :  { %77 = vst.msk [vmem:[#allocation2 + $0x1c8] sm:$0xff] %vm19_vm3, %v2104_v20 }
  0x5a   :  { %78 = vst.msk [vmem:[#allocation2 + $0x1d0] sm:$0xff] %vm19_vm3, %v2104_v20 }
  0x5b   :  { %79 = vst.msk [vmem:[#allocation2 + $0x1d8] sm:$0xff] %vm19_vm3, %v2104_v20 }
  0x5c   :  { %80 = vst.msk [vmem:[#allocation2 + $0x1e0] sm:$0xff] %vm19_vm3, %v2104_v20 }
  0x5d   :  { %81 = vst.msk [vmem:[#allocation2 + $0x1e8] sm:$0xff] %vm19_vm3, %v2104_v20 }
  0x5e   :  { %82 = vst.msk [vmem:[#allocation2 + $0x1f0] sm:$0xff] %vm19_vm3, %v2104_v20 }
  0x5f   :  { %1985 = vmatmul.msk.bf16.gmra.mxu1 %vm576_vm2, %v1735_v60  ;;  %2002 = vmatmul.msk.bf16.gmra.mxu3 %vm576_vm2, %v1871_v55  ;;  %83 = vst.msk [vmem:[#allocation2 + $0x1f8] sm:$0xff] %vm19_vm3, %v2104_v20  ;;  %v88_v20 = vld [vmem:[#allocation2 + $0x20] sm:$0xff] }
  0x61   :  { %708 = vmatmul.bf16.gmra.mxu0 %v1723_v63  ;;  %788 = vmatmul.bf16.gmra.mxu2 %v1851_v15  ;;  %v2031_v63 = vld [vmem:[%s3442_s0 + $0x94] sm:$0xf0] }
  0x62   :  { %v1763_v2 = vor.u32 %v2031_v63, %v1762_v62  ;;  %v87_v15 = vld [vmem:[#allocation2 + $0x18] sm:$0xff] }
  0x6f   :  { %1986 = vmatmul.msk.bf16.gmra.mxu1 %vm576_vm2, %v1743_v8  ;;  %v1876_v8 = vld [vmem:[%s3442_s0 + $0x178] sm:$0xf0] }
  0x70   :  { %v1879_v9 = vor.u32 %v2058_v7, %v1876_v8  ;;  %v1778_v8 = vld [vmem:[%s3442_s0 + $0xb0] sm:$0xf] }
  0x71   :  { %713 = vmatmul.bf16.gmra.mxu0 %v1731_v11  ;;  %793 = vmatmul.bf16.gmra.mxu2 %v1859_v27 }
  0x72   :  { %2003 = vmatmul.msk.bf16.gmra.mxu3 %vm576_vm2, %v1879_v9  ;;  %v2035_v9 = vld [vmem:[%s3442_s0 + $0xb4] sm:$0xf0] }
  0x7f   :  { %1987 = vmatmul.msk.bf16.gmra.mxu1 %vm576_vm2, %v1751_v21  ;;  %v1780_v21 = vld [vmem:[%s3442_s0 + $0xb8] sm:$0xf0] }
  0x81   :  { %718 = vmatmul.bf16.gmra.mxu0 %v1739_v24  ;;  %798 = vmatmul.bf16.gmra.mxu2 %v1867_v52  ;;  %v1783_v24 = vor.u32 %v2034_v19, %v1780_v21 }
  0x8c   :  { %v858_v36 = vpop.f32.mrf.mxu1 }
  0x8f   :  { %1988 = vmatmul.msk.bf16.gmra.mxu1 %vm576_vm2, %v1759_v33  ;;  %v2061_v33 = vld [vmem:[%s3442_s0 + $0x184] sm:$0xf0] }
  0x91   :  { %723 = vmatmul.bf16.gmra.mxu0 %v1747_v37  ;;  %803 = vmatmul.bf16.gmra.mxu2 %v1875_v6  ;;  %v1887_v37 = vor.u32 %v2060_v34, %v1884_v35 }
  0x93   :  { %2004 = vmatmul.msk.bf16.gmra.mxu3 %vm576_vm2, %v1887_v37  ;;  %v91_v37 = vld [vmem:[#allocation2 + $0x38] sm:$0xff] }
  0x94   :  { %v2394_v38 = vpop.f32.mrf.mxu1 }
  0x9c   :  { %v2424_v44 = vpop.f32.mrf.mxu1 }
  0x9e   :  { %v689_v47 = vpop.f32.mrf.mxu0 }
  0x9f   :  { %1989 = vmatmul.msk.bf16.gmra.mxu1 %vm576_vm2, %v1767_v41  ;;  %v859_v48 = vadd.f32 %v858_v36, %v689_v47  ;;  %v1883_v36 = vor.u32 %v2061_v33, %v1882_v30 }
  0xa1   :  { %v1018_v51 = vadd.f32 %v859_v48, %v84_v46  ;;  %728 = vmatmul.bf16.gmra.mxu0 %v1755_v45  ;;  %808 = vmatmul.bf16.gmra.mxu2 %v1883_v36 }
  0xa3   :  { %1083 = vst.msk [vmem:[#allocation2] sm:$0xff] %vm19_vm3, %v1018_v51 }
  0xa4   :  { %v865_v56 = vpop.f32.mrf.mxu1  ;;  %v2594_v62 = vpop.f32.mrf.mxu2 }
  0xa6   :  { %v691_v57 = vpop.f32.mrf.mxu0 }
  0xa7   :  { %v861_v10 = vadd.f32 %v2394_v38, %v691_v57 }
  0xa9   :  { %v1019_v17 = vadd.f32 %v861_v10, %v85_v12 }
  0xaa   :  { %v2475_v60 = vld [vmem:[#allocation2] sm:$0xff] }
  0xab   :  { %v1214_v0 = vpack.c.bf16 %v2475_v60, %v2475_v60  ;;  %1084 = vst.msk [vmem:[#allocation2 + $0x8] sm:$0xff] %vm19_vm3, %v1019_v17  ;;  %v1478_v31 = vmul.f32 %v2475_v60, %v2475_v60  ;;  %v1343_v39 = vsel %vm19_vm3, %v2475_v60, 0.0 }
  0xac   :  { %v868_v1 = vpop.f32.mrf.mxu1  ;;  %v2619_v21 = vpop.f32.mrf.mxu2 }
  0xad   :  { %1279 = vst.msk [vmem:[%s3443_s2] sm:$0xf] %vm1278_vm4, %v1214_v0  ;;  %v1542_v41 = vsel %vm19_vm3, %v1478_v31, 0.0 }
  0xae   :  { %v694_v3 = vpop.f32.mrf.mxu0 }
  0xaf   :  { %1990 = vmatmul.msk.bf16.gmra.mxu1 %vm576_vm2, %v1775_v61  ;;  %v864_v13 = vadd.f32 %v2424_v44, %v694_v3  ;;  %v2036_v61 = vld [vmem:[%s3442_s0 + $0xc4] sm:$0xf] }
  0xb1   :  { %733 = vmatmul.bf16.gmra.mxu0 %v1763_v2  ;;  %v1020_v22 = vadd.f32 %v864_v13, %v86_v14 }
  0xb2   :  { %v1151_v40 = vld [vmem:[#allocation2 + $0x8] sm:$0xff] }
  0xb3   :  { %1085 = vst.msk [vmem:[#allocation2 + $0x10] sm:$0xff] %vm19_vm3, %v1020_v22  ;;  %v1215_v42 = vpack.c.bf16 %v1151_v40, %v1151_v40  ;;  %v1344_v43 = vsel %vm19_vm3, %v1151_v40, 0.0  ;;  %v1479_v44 = vmul.f32 %v1151_v40, %v1151_v40  ;;  %v1890_v22 = vld [vmem:[%s3442_s0 + $0x190] sm:$0xf] }
  0xb4   :  { %v2521_v11 = vpop.f32.mrf.mxu1  ;;  %v1345_v47 = vadd.f32 %v1344_v43, %v1343_v39  ;;  %v774_v39 = vpop.f32.mrf.mxu2  ;;  %v118_v43 = vld [vmem:[#allocation2 + $0x110] sm:$0xff] }
  0xb5   :  { %1280 = vst.msk [vmem:[%s3443_s2 + $0x4] sm:$0xf] %vm1278_vm4, %v1215_v42  ;;  %v1543_v52 = vsel %vm19_vm3, %v1479_v44, 0.0  ;;  %v1796_v42 = vld [vmem:[%s3442_s0 + $0xd8] sm:$0xf0]  ;;  %v943_v44 = vpop.f32.mrf.mxu3 }
  0xb6   :  { %v696_v16 = vpop.f32.mrf.mxu0 }
  0xb7   :  { %v866_v18 = vadd.f32 %v865_v56, %v696_v16  ;;  %v1544_v56 = vadd.f32 %v1543_v52, %v1542_v41  ;;  %v1779_v16 = vor.u32 %v2035_v9, %v1778_v8  ;;  %v2038_v41 = vld [vmem:[%s3442_s0 + $0xd4] sm:$0xf]  ;;  %v1900_v8 = vld [vmem:[%s3442_s0 + $0x1a8] sm:$0xf0] }
  0xb9   :  { %v1021_v23 = vadd.f32 %v866_v18, %v87_v15  ;;  %v90_v18 = vld [vmem:[#allocation2 + $0x30] sm:$0xff] }
  0xba   :  { %v1152_v45 = vld [vmem:[#allocation2 + $0x10] sm:$0xff] }
  0xbb   :  { %1086 = vst.msk [vmem:[#allocation2 + $0x18] sm:$0xff] %vm19_vm3, %v1021_v23  ;;  %v1216_v48 = vpack.c.bf16 %v1152_v45, %v1152_v45  ;;  %v1346_v49 = vsel %vm19_vm3, %v1152_v45, 0.0  ;;  %v1480_v50 = vmul.f32 %v1152_v45, %v1152_v45  ;;  %v944_v45 = vadd.f32 %v943_v44, %v774_v39 }
  0xbc   :  { %v2552_v27 = vpop.f32.mrf.mxu1  ;;  %v1347_v57 = vadd.f32 %v1346_v49, %v1345_v47  ;;  %v1799_v49 = vor.u32 %v2038_v41, %v1796_v42 }
  0xbd   :  { %1281 = vst.msk [vmem:[%s3443_s2 + $0x8] sm:$0xf] %vm1278_vm4, %v1216_v48  ;;  %v1545_v58 = vsel %vm19_vm3, %v1480_v50, 0.0  ;;  %v1786_v50 = vld [vmem:[%s3442_s0 + $0xc0] sm:$0xf] }
  0xbe   :  { %v699_v29 = vpop.f32.mrf.mxu0  ;;  %v1546_v2 = vadd.f32 %v1545_v58, %v1544_v56 }
  0xbf   :  { %1991 = vmatmul.msk.bf16.gmra.mxu1 %vm576_vm2, %v1783_v24  ;;  %v869_v32 = vadd.f32 %v868_v1, %v699_v29  ;;  %v1788_v1 = vld [vmem:[%s3442_s0 + $0xc8] sm:$0xf0]  ;;  %v2063_v24 = vld [vmem:[%s3442_s0 + $0x194] sm:$0xf0] }
  0xc0   :  { %v1791_v7 = vor.u32 %v2036_v61, %v1788_v1 }
  0xc1   :  { %v1022_v38 = vadd.f32 %v869_v32, %v88_v20  ;;  %738 = vmatmul.bf16.gmra.mxu0 %v1771_v28  ;;  %v1891_v28 = vor.u32 %v2063_v24, %v1890_v22  ;;  %v1895_v20 = vor.u32 %v2062_v25, %v1892_v26  ;;  %v93_v24 = vld [vmem:[#allocation2 + $0x48] sm:$0xff] }
  0xc2   :  { %v1153_v51 = vld [vmem:[#allocation2 + $0x18] sm:$0xff] }
  0xc3   :  { %1087 = vst.msk [vmem:[#allocation2 + $0x20] sm:$0xff] %vm19_vm3, %v1022_v38  ;;  %v1217_v53 = vpack.c.bf16 %v1153_v51, %v1153_v51  ;;  %v1348_v54 = vsel %vm19_vm3, %v1153_v51, 0.0  ;;  %v1481_v55 = vmul.f32 %v1153_v51, %v1153_v51  ;;  %813 = vmatmul.bf16.gmra.mxu2 %v1891_v28  ;;  %2005 = vmatmul.msk.bf16.gmra.mxu3 %vm576_vm2, %v1895_v20  ;;  %v2040_v20 = vld [vmem:[%s3442_s0 + $0xe4] sm:$0xf] }
  0xc4   :  { %v2576_v46 = vpop.f32.mrf.mxu1  ;;  %v1349_v3 = vadd.f32 %v1348_v54, %v1347_v57  ;;  %v1052_v51 = vadd.f32 %v944_v45, %v118_v43 }
  0xc5   :  { %1282 = vst.msk [vmem:[%s3443_s2 + $0xc] sm:$0xf] %vm1278_vm4, %v1217_v53  ;;  %v1547_v63 = vsel %vm19_vm3, %v1481_v55, 0.0 }
  0xc6   :  { %v701_v60 = vpop.f32.mrf.mxu0  ;;  %v1548_v5 = vadd.f32 %v1547_v63, %v1546_v2  ;;  %1117 = vst.msk [vmem:[#allocation2 + $0x110] sm:$0xff] %vm19_vm3, %v1052_v51  ;;  %v776_v63 = vpop.f32.mrf.mxu2 }
  0xc7   :  { %v871_v0 = vadd.f32 %v2521_v11, %v701_v60  ;;  %v92_v60 = vld [vmem:[#allocation2 + $0x40] sm:$0xff]  ;;  %v945_v2 = vpop.f32.mrf.mxu3 }
  0xc9   :  { %v1023_v4 = vadd.f32 %v871_v0, %v89_v59  ;;  %v119_v0 = vld [vmem:[#allocation2 + $0x118] sm:$0xff] }
  0xca   :  { %v1154_v6 = vld [vmem:[#allocation2 + $0x20] sm:$0xff] }
  0xcb   :  { %v1218_v10 = vpack.c.bf16 %v1154_v6, %v1154_v6  ;;  %v1350_v11 = vsel %vm19_vm3, %v1154_v6, 0.0  ;;  %v1482_v12 = vmul.f32 %v1154_v6, %v1154_v6  ;;  %1088 = vst.msk [vmem:[#allocation2 + $0x28] sm:$0xff] %vm19_vm3, %v1023_v4  ;;  %v2065_v4 = vld [vmem:[%s3442_s0 + $0x1a4] sm:$0xf0]  ;;  %v946_v6 = vadd.f32 %v945_v2, %v776_v63 }
  0xcc   :  { %v878_v13 = vpop.f32.mrf.mxu1  ;;  %v1351_v14 = vadd.f32 %v1350_v11, %v1349_v3  ;;  %v1898_v3 = vld [vmem:[%s3442_s0 + $0x1a0] sm:$0xf] }
  0xcd   :  { %1283 = vst.msk [vmem:[%s3443_s2 + $0x10] sm:$0xf] %vm1278_vm4, %v1218_v10  ;;  %v1549_v15 = vsel %vm19_vm3, %v1482_v12, 0.0  ;;  %v1053_v12 = vadd.f32 %v946_v6, %v119_v0 }
  0xce   :  { %v1550_v17 = vadd.f32 %v1549_v15, %v1548_v5  ;;  %v704_v19 = vpop.f32.mrf.mxu0  ;;  %v2064_v5 = vld [vmem:[%s3442_s0 + $0x1a4] sm:$0xf]  ;;  %v779_v26 = vpop.f32.mrf.mxu2 }
  0xcf   :  { %1992 = vmatmul.msk.bf16.gmra.mxu1 %vm576_vm2, %v1791_v7  ;;  %v874_v23 = vadd.f32 %v2552_v27, %v704_v19  ;;  %v1899_v7 = vor.u32 %v2065_v4, %v1898_v3  ;;  %v1903_v10 = vor.u32 %v2064_v5, %v1900_v8  ;;  %1118 = vst.msk [vmem:[#allocation2 + $0x118] sm:$0xff] %vm19_vm3, %v1053_v12 }
  0xd1   :  { %v1024_v29 = vadd.f32 %v874_v23, %v90_v18  ;;  %743 = vmatmul.bf16.gmra.mxu0 %v1779_v16 }
  0xd2   :  { %v1155_v30 = vld [vmem:[#allocation2 + $0x28] sm:$0xff] }
  0xd3   :  { %v1219_v31 = vpack.c.bf16 %v1155_v30, %v1155_v30  ;;  %v1352_v27 = vsel %vm19_vm3, %v1155_v30, 0.0  ;;  %v1483_v32 = vmul.f32 %v1155_v30, %v1155_v30  ;;  %1089 = vst.msk [vmem:[#allocation2 + $0x30] sm:$0xff] %vm19_vm3, %v1024_v29  ;;  %818 = vmatmul.bf16.gmra.mxu2 %v1899_v7  ;;  %2006 = vmatmul.msk.bf16.gmra.mxu3 %vm576_vm2, %v1903_v10  ;;  %v1804_v29 = vld [vmem:[%s3442_s0 + $0xe8] sm:$0xf0]  ;;  %v120_v30 = vld [vmem:[#allocation2 + $0x120] sm:$0xff]  ;;  %v95_v10 = vld [vmem:[#allocation2 + $0x58] sm:$0xff] }
  0xd4   :  { %v2636_v33 = vpop.f32.mrf.mxu1  ;;  %v1353_v34 = vadd.f32 %v1352_v27, %v1351_v14 }
  0xd5   :  { %1284 = vst.msk [vmem:[%s3443_s2 + $0x14] sm:$0xf] %vm1278_vm4, %v1219_v31  ;;  %v1551_v35 = vsel %vm19_vm3, %v1483_v32, 0.0  ;;  %v948_v31 = vpop.f32.mrf.mxu3 }
  0xd6   :  { %v1552_v36 = vadd.f32 %v1551_v35, %v1550_v17  ;;  %v706_v38 = vpop.f32.mrf.mxu0  ;;  %v1184_v17 = vld [vmem:[#allocation2 + $0x110] sm:$0xff]  ;;  %v949_v27 = vadd.f32 %v948_v31, %v779_v26  ;;  %v1807_v35 = vor.u32 %v2040_v20, %v1804_v29  ;;  %v1185_v42 = vld [vmem:[#allocation2 + $0x118] sm:$0xff] }
  0xd7   :  { %v876_v40 = vadd.f32 %v2576_v46, %v706_v38  ;;  %v2037_v46 = vld [vmem:[%s3442_s0 + $0xc4] sm:$0xf0]  ;;  %v1248_v19 = vpack.c.bf16 %v1184_v17, %v1184_v17  ;;  %v1249_v44 = vpack.c.bf16 %v1185_v42, %v1185_v42  ;;  %v122_v17 = vld [vmem:[#allocation2 + $0x130] sm:$0xff] }
  0xd8   :  { %v1787_v58 = vor.u32 %v2037_v46, %v1786_v50  ;;  %v781_v46 = vpop.f32.mrf.mxu2 }
  0xd9   :  { %v1025_v47 = vadd.f32 %v876_v40, %v91_v37  ;;  %1313 = vst.msk [vmem:[%s3443_s2 + $0x88] sm:$0xf] %vm1278_vm4, %v1248_v19  ;;  %v1054_v37 = vadd.f32 %v949_v27, %v120_v30 }
  0xda   :  { %v1156_v48 = vld [vmem:[#allocation2 + $0x30] sm:$0xff]  ;;  %1314 = vst.msk [vmem:[%s3443_s2 + $0x8c] sm:$0xf] %vm1278_vm4, %v1249_v44  ;;  %v2069_v44 = vld [vmem:[%s3442_s0 + $0x1c4] sm:$0xf0] }
  0xdb   :  { %v1220_v52 = vpack.c.bf16 %v1156_v48, %v1156_v48  ;;  %v1354_v53 = vsel %vm19_vm3, %v1156_v48, 0.0  ;;  %v1484_v54 = vmul.f32 %v1156_v48, %v1156_v48  ;;  %1090 = vst.msk [vmem:[#allocation2 + $0x38] sm:$0xff] %vm19_vm3, %v1025_v47 }
  0xdc   :  { %v2659_v55 = vpop.f32.mrf.mxu1  ;;  %v1355_v56 = vadd.f32 %v1354_v53, %v1353_v34  ;;  %1119 = vst.msk [vmem:[#allocation2 + $0x120] sm:$0xff] %vm19_vm3, %v1054_v37 }
  0xdd   :  { %1285 = vst.msk [vmem:[%s3443_s2 + $0x18] sm:$0xf] %vm1278_vm4, %v1220_v52  ;;  %v1553_v57 = vsel %vm19_vm3, %v1484_v54, 0.0  ;;  %v121_v52 = vld [vmem:[#allocation2 + $0x128] sm:$0xff]  ;;  %v950_v53 = vpop.f32.mrf.mxu3  ;;  %v1906_v54 = vld [vmem:[%s3442_s0 + $0x1b0] sm:$0xf] }
  0xde   :  { %v1554_v59 = vadd.f32 %v1553_v57, %v1552_v36  ;;  %v709_v61 = vpop.f32.mrf.mxu0  ;;  %v1794_v36 = vld [vmem:[%s3442_s0 + $0xd0] sm:$0xf]  ;;  %v951_v57 = vadd.f32 %v950_v53, %v781_v46 }
  0xdf   :  { %1993 = vmatmul.msk.bf16.gmra.mxu1 %vm576_vm2, %v1799_v49  ;;  %v879_v1 = vadd.f32 %v878_v13, %v709_v61  ;;  %v94_v49 = vld [vmem:[#allocation2 + $0x50] sm:$0xff] }
  0xe0   :  { %v1055_v0 = vadd.f32 %v951_v57, %v121_v52  ;;  %v784_v12 = vpop.f32.mrf.mxu2 }
  0xe1   :  { %v1026_v9 = vadd.f32 %v879_v1, %v92_v60  ;;  %748 = vmatmul.bf16.gmra.mxu0 %v1787_v58 }
  0xe2   :  { %v1157_v11 = vld [vmem:[#allocation2 + $0x38] sm:$0xff]  ;;  %1120 = vst.msk [vmem:[#allocation2 + $0x128] sm:$0xff] %vm19_vm3, %v1055_v0 }
  0xe3   :  { %v1221_v13 = vpack.c.bf16 %v1157_v11, %v1157_v11  ;;  %v1356_v14 = vsel %vm19_vm3, %v1157_v11, 0.0  ;;  %v1485_v15 = vmul.f32 %v1157_v11, %v1157_v11  ;;  %1091 = vst.msk [vmem:[#allocation2 + $0x40] sm:$0xff] %vm19_vm3, %v1026_v9  ;;  %v1186_v5 = vld [vmem:[#allocation2 + $0x120] sm:$0xff] }
  0xe4   :  { %v2682_v16 = vpop.f32.mrf.mxu1  ;;  %v1357_v18 = vadd.f32 %v1356_v14, %v1355_v56  ;;  %v2067_v56 = vld [vmem:[%s3442_s0 + $0x1b4] sm:$0xf0]  ;;  %v1250_v7 = vpack.c.bf16 %v1186_v5, %v1186_v5  ;;  %v2042_v14 = vld [vmem:[%s3442_s0 + $0xf4] sm:$0xf]  ;;  %v124_v5 = vld [vmem:[#allocation2 + $0x140] sm:$0xff] }
  0xe5   :  { %1286 = vst.msk [vmem:[%s3443_s2 + $0x1c] sm:$0xf] %vm1278_vm4, %v1221_v13  ;;  %v1555_v22 = vsel %vm19_vm3, %v1485_v15, 0.0  ;;  %v1907_v58 = vor.u32 %v2067_v56, %v1906_v54  ;;  %v1812_v15 = vld [vmem:[%s3442_s0 + $0xf8] sm:$0xf0] }
  0xe6   :  { %v1556_v23 = vadd.f32 %v1555_v22, %v1554_v59  ;;  %v711_v25 = vpop.f32.mrf.mxu0  ;;  %v2066_v59 = vld [vmem:[%s3442_s0 + $0x1b4] sm:$0xf]  ;;  %1315 = vst.msk [vmem:[%s3443_s2 + $0x90] sm:$0xf] %vm1278_vm4, %v1250_v7 }
  0xe7   :  { %v881_v28 = vadd.f32 %v2636_v33, %v711_v25  ;;  %v2039_v33 = vld [vmem:[%s3442_s0 + $0xd4] sm:$0xf0]  ;;  %823 = vmatmul.bf16.gmra.mxu2 %v1907_v58  ;;  %v1802_v25 = vld [vmem:[%s3442_s0 + $0xe0] sm:$0xf] }
  0xe8   :  { %v1795_v47 = vor.u32 %v2039_v33, %v1794_v36  ;;  %v96_v33 = vld [vmem:[#allocation2 + $0x60] sm:$0xff] }
  0xe9   :  { %v1027_v32 = vadd.f32 %v881_v28, %v93_v24  ;;  %v1815_v24 = vor.u32 %v2042_v14, %v1812_v15  ;;  %v1187_v31 = vld [vmem:[#allocation2 + $0x128] sm:$0xff] }
  0xea   :  { %v1158_v34 = vld [vmem:[#allocation2 + $0x40] sm:$0xff] }
  0xeb   :  { %v1222_v38 = vpack.c.bf16 %v1158_v34, %v1158_v34  ;;  %v1358_v39 = vsel %vm19_vm3, %v1158_v34, 0.0  ;;  %v1486_v40 = vmul.f32 %v1158_v34, %v1158_v34  ;;  %1092 = vst.msk [vmem:[#allocation2 + $0x48] sm:$0xff] %vm19_vm3, %v1027_v32  ;;  %v1251_v32 = vpack.c.bf16 %v1187_v31, %v1187_v31 }
  0xec   :  { %v2710_v41 = vpop.f32.mrf.mxu1  ;;  %v1359_v43 = vadd.f32 %v1358_v39, %v1357_v18  ;;  %v953_v18 = vpop.f32.mrf.mxu3 }
  0xed   :  { %1287 = vst.msk [vmem:[%s3443_s2 + $0x20] sm:$0xf] %vm1278_vm4, %v1222_v38  ;;  %v1557_v45 = vsel %vm19_vm3, %v1486_v40, 0.0  ;;  %v954_v19 = vadd.f32 %v953_v18, %v784_v12  ;;  %v786_v38 = vpop.f32.mrf.mxu2  ;;  %v123_v40 = vld [vmem:[#allocation2 + $0x138] sm:$0xff] }
  0xee   :  { %v1558_v48 = vadd.f32 %v1557_v45, %v1556_v23  ;;  %v714_v50 = vpop.f32.mrf.mxu0  ;;  %1316 = vst.msk [vmem:[%s3443_s2 + $0x94] sm:$0xf] %vm1278_vm4, %v1251_v32  ;;  %v2071_v32 = vld [vmem:[%s3442_s0 + $0x1d4] sm:$0xf0] }
  0xef   :  { %1994 = vmatmul.msk.bf16.gmra.mxu1 %vm576_vm2, %v1807_v35  ;;  %v884_v51 = vadd.f32 %v2659_v55, %v714_v50  ;;  %v1908_v55 = vld [vmem:[%s3442_s0 + $0x1b8] sm:$0xf0]  ;;  %v1056_v26 = vadd.f32 %v954_v19, %v122_v17 }
  0xf0   :  { %v1911_v61 = vor.u32 %v2066_v59, %v1908_v55 }
  0xf1   :  { %v1028_v60 = vadd.f32 %v884_v51, %v94_v49  ;;  %753 = vmatmul.bf16.gmra.mxu0 %v1795_v47  ;;  %1121 = vst.msk [vmem:[#allocation2 + $0x130] sm:$0xff] %vm19_vm3, %v1056_v26 }
  0xf2   :  { %v1159_v63 = vld [vmem:[#allocation2 + $0x48] sm:$0xff]  ;;  %2007 = vmatmul.msk.bf16.gmra.mxu3 %vm576_vm2, %v1911_v61 }
  0xf3   :  { %v1223_v1 = vpack.c.bf16 %v1159_v63, %v1159_v63  ;;  %v1360_v2 = vsel %vm19_vm3, %v1159_v63, 0.0  ;;  %v1487_v3 = vmul.f32 %v1159_v63, %v1159_v63  ;;  %1093 = vst.msk [vmem:[#allocation2 + $0x50] sm:$0xff] %vm19_vm3, %v1028_v60  ;;  %v97_v61 = vld [vmem:[#allocation2 + $0x68] sm:$0xff] }
  0xf4   :  { %v2738_v4 = vpop.f32.mrf.mxu1  ;;  %v1361_v6 = vadd.f32 %v1360_v2, %v1359_v43  ;;  %v955_v42 = vpop.f32.mrf.mxu3  ;;  %v1914_v43 = vld [vmem:[%s3442_s0 + $0x1c0] sm:$0xf]  ;;  %v2044_v2 = vld [vmem:[%s3442_s0 + $0x104] sm:$0xf] }
  0xf5   :  { %1288 = vst.msk [vmem:[%s3443_s2 + $0x24] sm:$0xf] %vm1278_vm4, %v1223_v1  ;;  %v1559_v8 = vsel %vm19_vm3, %v1487_v3, 0.0  ;;  %v956_v45 = vadd.f32 %v955_v42, %v786_v38  ;;  %v1915_v47 = vor.u32 %v2069_v44, %v1914_v43  ;;  %v789_v0 = vpop.f32.mrf.mxu2  ;;  %v1820_v3 = vld [vmem:[%s3442_s0 + $0x108] sm:$0xf0] }
  0xf6   :  { %v1560_v9 = vadd.f32 %v1559_v8, %v1558_v48  ;;  %v716_v11 = vpop.f32.mrf.mxu0  ;;  %v2068_v48 = vld [vmem:[%s3442_s0 + $0x1c4] sm:$0xf] }
  0xf7   :  { %v886_v13 = vadd.f32 %v2682_v16, %v716_v11  ;;  %v2041_v16 = vld [vmem:[%s3442_s0 + $0xe4] sm:$0xf0]  ;;  %v1057_v51 = vadd.f32 %v956_v45, %v123_v40  ;;  %828 = vmatmul.bf16.gmra.mxu2 %v1915_v47  ;;  %v1810_v11 = vld [vmem:[%s3442_s0 + $0xf0] sm:$0xf] }
  0xf8   :  { %v1803_v35 = vor.u32 %v2041_v16, %v1802_v25  ;;  %v1188_v57 = vld [vmem:[#allocation2 + $0x130] sm:$0xff] }
  0xf9   :  { %v1029_v22 = vadd.f32 %v886_v13, %v95_v10  ;;  %v1252_v59 = vpack.c.bf16 %v1188_v57, %v1188_v57  ;;  %1122 = vst.msk [vmem:[#allocation2 + $0x138] sm:$0xff] %vm19_vm3, %v1057_v51  ;;  %v1823_v10 = vor.u32 %v2044_v2, %v1820_v3  ;;  %v98_v16 = vld [vmem:[#allocation2 + $0x70] sm:$0xff] }
  0xfa   :  { %v1160_v23 = vld [vmem:[#allocation2 + $0x50] sm:$0xff] }
  0xfb   :  { %v1224_v28 = vpack.c.bf16 %v1160_v23, %v1160_v23  ;;  %v1362_v20 = vsel %vm19_vm3, %v1160_v23, 0.0  ;;  %v1488_v29 = vmul.f32 %v1160_v23, %v1160_v23  ;;  %1094 = vst.msk [vmem:[#allocation2 + $0x58] sm:$0xff] %vm19_vm3, %v1029_v22 }
  0xfc   :  { %v2766_v30 = vpop.f32.mrf.mxu1  ;;  %v1363_v27 = vadd.f32 %v1362_v20, %v1361_v6  ;;  %1317 = vst.msk [vmem:[%s3443_s2 + $0x98] sm:$0xf] %vm1278_vm4, %v1252_v59  ;;  %v958_v6 = vpop.f32.mrf.mxu3  ;;  %v125_v20 = vld [vmem:[#allocation2 + $0x148] sm:$0xff] }
  0xfd   :  { %1289 = vst.msk [vmem:[%s3443_s2 + $0x28] sm:$0xf] %vm1278_vm4, %v1224_v28  ;;  %v1561_v34 = vsel %vm19_vm3, %v1488_v29, 0.0  ;;  %v959_v7 = vadd.f32 %v958_v6, %v789_v0  ;;  %v791_v28 = vpop.f32.mrf.mxu2  ;;  %v1922_v29 = vld [vmem:[%s3442_s0 + $0x1d0] sm:$0xf]  ;;  %v100_v6 = vld [vmem:[#allocation2 + $0x80] sm:$0xff] }
  0xfe   :  { %v1562_v36 = vadd.f32 %v1561_v34, %v1560_v9  ;;  %v719_v37 = vpop.f32.mrf.mxu0  ;;  %v2070_v34 = vld [vmem:[%s3442_s0 + $0x1d4] sm:$0xf] }
  0xff   :  { %1995 = vmatmul.msk.bf16.gmra.mxu1 %vm576_vm2, %v1815_v24  ;;  %v889_v39 = vadd.f32 %v2710_v41, %v719_v37  ;;  %v1916_v41 = vld [vmem:[%s3442_s0 + $0x1c8] sm:$0xf0]  ;;  %v1058_v12 = vadd.f32 %v959_v7, %v124_v5 }
 0x100   :  { %v1919_v50 = vor.u32 %v2068_v48, %v1916_v41  ;;  %v1189_v18 = vld [vmem:[#allocation2 + $0x138] sm:$0xff] }
 0x101   :  { %v1030_v49 = vadd.f32 %v889_v39, %v96_v33  ;;  %758 = vmatmul.bf16.gmra.mxu0 %v1803_v35  ;;  %v1253_v22 = vpack.c.bf16 %v1189_v18, %v1189_v18  ;;  %1123 = vst.msk [vmem:[#allocation2 + $0x140] sm:$0xff] %vm19_vm3, %v1058_v12  ;;  %v1924_v35 = vld [vmem:[%s3442_s0 + $0x1d8] sm:$0xf0]  ;;  %v1923_v33 = vor.u32 %v2071_v32, %v1922_v29  ;;  %v2073_v12 = vld [vmem:[%s3442_s0 + $0x1e4] sm:$0xf0] }
 0x102   :  { %v1161_v46 = vld [vmem:[#allocation2 + $0x58] sm:$0xff]  ;;  %2008 = vmatmul.msk.bf16.gmra.mxu3 %vm576_vm2, %v1919_v50  ;;  %v1927_v37 = vor.u32 %v2070_v34, %v1924_v35  ;;  %v101_v32 = vld [vmem:[#allocation2 + $0x88] sm:$0xff] }
 0x103   :  { %v1225_v52 = vpack.c.bf16 %v1161_v46, %v1161_v46  ;;  %v1364_v53 = vsel %vm19_vm3, %v1161_v46, 0.0  ;;  %v1489_v54 = vmul.f32 %v1161_v46, %v1161_v46  ;;  %1095 = vst.msk [vmem:[#allocation2 + $0x60] sm:$0xff] %vm19_vm3, %v1030_v49  ;;  %v99_v50 = vld [vmem:[#allocation2 + $0x78] sm:$0xff] }
 0x104   :  { %v2794_v56 = vpop.f32.mrf.mxu1  ;;  %v1365_v58 = vadd.f32 %v1364_v53, %v1363_v27  ;;  %1318 = vst.msk [vmem:[%s3443_s2 + $0x9c] sm:$0xf] %vm1278_vm4, %v1253_v22  ;;  %v960_v27 = vpop.f32.mrf.mxu3  ;;  %v126_v53 = vld [vmem:[#allocation2 + $0x150] sm:$0xff] }
 0x105   :  { %1290 = vst.msk [vmem:[%s3443_s2 + $0x2c] sm:$0xf] %vm1278_vm4, %v1225_v52  ;;  %v1563_v55 = vsel %vm19_vm3, %v1489_v54, 0.0  ;;  %v794_v51 = vpop.f32.mrf.mxu2 }
 0x106   :  { %v1564_v60 = vadd.f32 %v1563_v55, %v1562_v36  ;;  %v721_v63 = vpop.f32.mrf.mxu0  ;;  %v961_v36 = vadd.f32 %v960_v27, %v791_v28 }
 0x107   :  { %v891_v1 = vadd.f32 %v2738_v4, %v721_v63  ;;  %v2043_v4 = vld [vmem:[%s3442_s0 + $0xf4] sm:$0xf0]  ;;  %833 = vmatmul.bf16.gmra.mxu2 %v1923_v33  ;;  %v128_v33 = vld [vmem:[#allocation2 + $0x160] sm:$0xff] }
 0x108   :  { %v1811_v24 = vor.u32 %v2043_v4, %v1810_v11  ;;  %v2852_v45 = vld [vmem:[#allocation2 + $0x140] sm:$0xff] }
 0x109   :  { %v1031_v8 = vadd.f32 %v891_v1, %v97_v61  ;;  %v1254_v48 = vpack.c.bf16 %v2852_v45, %v2852_v45 }
 0x10a   :  { %v1162_v9 = vld [vmem:[#allocation2 + $0x60] sm:$0xff] }
 0x10b   :  { %v1226_v13 = vpack.c.bf16 %v1162_v9, %v1162_v9  ;;  %v1366_v14 = vsel %vm19_vm3, %v1162_v9, 0.0  ;;  %v1490_v15 = vmul.f32 %v1162_v9, %v1162_v9  ;;  %1096 = vst.msk [vmem:[#allocation2 + $0x68] sm:$0xff] %vm19_vm3, %v1031_v8  ;;  %v127_v9 = vld [vmem:[#allocation2 + $0x158] sm:$0xff] }
 0x10c   :  { %v2822_v17 = vpop.f32.mrf.mxu1  ;;  %v1367_v19 = vadd.f32 %v1366_v14, %v1365_v58  ;;  %1319 = vst.msk [vmem:[%s3443_s2 + $0xa0] sm:$0xf] %vm1278_vm4, %v1254_v48  ;;  %v963_v54 = vpop.f32.mrf.mxu3  ;;  %v1932_v14 = vld [vmem:[%s3442_s0 + $0x1e8] sm:$0xf0] }
 0x10d   :  { %1291 = vst.msk [vmem:[%s3443_s2 + $0x30] sm:$0xf] %vm1278_vm4, %v1226_v13  ;;  %v1565_v23 = vsel %vm19_vm3, %v1490_v15, 0.0  ;;  %v964_v57 = vadd.f32 %v963_v54, %v794_v51  ;;  %v796_v8 = vpop.f32.mrf.mxu2  ;;  %v2072_v13 = vld [vmem:[%s3442_s0 + $0x1e4] sm:$0xf]  ;;  %v102_v51 = vld [vmem:[#allocation2 + $0x90] sm:$0xff] }
 0x10e   :  { %v1566_v25 = vadd.f32 %v1565_v23, %v1564_v60  ;;  %v724_v26 = vpop.f32.mrf.mxu0  ;;  %v129_v54 = vld [vmem:[#allocation2 + $0x168] sm:$0xff] }
 0x10f   :  { %1996 = vmatmul.msk.bf16.gmra.mxu1 %vm576_vm2, %v1823_v10  ;;  %v894_v31 = vadd.f32 %v2766_v30, %v724_v26  ;;  %v1059_v30 = vadd.f32 %v961_v36, %v125_v20  ;;  %v1060_v55 = vadd.f32 %v964_v57, %v126_v53  ;;  %v1930_v10 = vld [vmem:[%s3442_s0 + $0x1e0] sm:$0xf]  ;;  %v1938_v57 = vld [vmem:[%s3442_s0 + $0x1f0] sm:$0xf] }
 0x110   :  { %v1931_v18 = vor.u32 %v2073_v12, %v1930_v10 }
 0x111   :  { %v1032_v38 = vadd.f32 %v894_v31, %v98_v16  ;;  %763 = vmatmul.bf16.gmra.mxu0 %v1811_v24  ;;  %1124 = vst.msk [vmem:[#allocation2 + $0x148] sm:$0xff] %vm19_vm3, %v1059_v30 }
 0x112   :  { %v1163_v39 = vld [vmem:[#allocation2 + $0x68] sm:$0xff]  ;;  %2009 = vmatmul.msk.bf16.gmra.mxu3 %vm576_vm2, %v1927_v37  ;;  %1125 = vst.msk [vmem:[#allocation2 + $0x150] sm:$0xff] %vm19_vm3, %v1060_v55  ;;  %v2075_v55 = vld [vmem:[%s3442_s0 + $0x1f4] sm:$0xf0] }
 0x113   :  { %v1227_v40 = vpack.c.bf16 %v1163_v39, %v1163_v39  ;;  %v1368_v42 = vsel %vm19_vm3, %v1163_v39, 0.0  ;;  %v1491_v43 = vmul.f32 %v1163_v39, %v1163_v39  ;;  %1097 = vst.msk [vmem:[#allocation2 + $0x70] sm:$0xff] %vm19_vm3, %v1032_v38 }
 0x114   :  { %v2850_v44 = vpop.f32.mrf.mxu1  ;;  %v1369_v47 = vadd.f32 %v1368_v42, %v1367_v19  ;;  %v965_v4 = vpop.f32.mrf.mxu3  ;;  %v1935_v19 = vor.u32 %v2072_v13, %v1932_v14  ;;  %v103_v14 = vld [vmem:[#allocation2 + $0x98] sm:$0xff] }
 0x115   :  { %1292 = vst.msk [vmem:[%s3443_s2 + $0x34] sm:$0xf] %vm1278_vm4, %v1227_v40  ;;  %v1567_v41 = vsel %vm19_vm3, %v1491_v43, 0.0  ;;  %v966_v15 = vadd.f32 %v965_v4, %v796_v8  ;;  %v799_v35 = vpop.f32.mrf.mxu2 }
 0x116   :  { %v1568_v49 = vadd.f32 %v1567_v41, %v1566_v25  ;;  %v726_v46 = vpop.f32.mrf.mxu0 }
 0x117   :  { %v896_v52 = vadd.f32 %v2794_v56, %v726_v46  ;;  %v1061_v24 = vadd.f32 %v966_v15, %v127_v9  ;;  %838 = vmatmul.bf16.gmra.mxu2 %v1931_v18 }
 0x118   :  { %v2872_v1 = vld [vmem:[#allocation2 + $0x148] sm:$0xff] }
 0x119   :  { %v1033_v58 = vadd.f32 %v896_v52, %v99_v50  ;;  %v1255_v56 = vpack.c.bf16 %v2872_v1, %v2872_v1  ;;  %v2903_v28 = vld [vmem:[#allocation2 + $0x150] sm:$0xff]  ;;  %1126 = vst.msk [vmem:[#allocation2 + $0x158] sm:$0xff] %vm19_vm3, %v1061_v24 }
 0x11a   :  { %v1164_v59 = vld [vmem:[#allocation2 + $0x70] sm:$0xff]  ;;  %v1256_v29 = vpack.c.bf16 %v2903_v28, %v2903_v28 }
 0x11b   :  { %v1228_v60 = vpack.c.bf16 %v1164_v59, %v1164_v59  ;;  %v1370_v61 = vsel %vm19_vm3, %v1164_v59, 0.0  ;;  %v1492_v63 = vmul.f32 %v1164_v59, %v1164_v59  ;;  %1098 = vst.msk [vmem:[#allocation2 + $0x78] sm:$0xff] %vm19_vm3, %v1033_v58 }
 0x11c   :  { %v2870_v0 = vpop.f32.mrf.mxu1  ;;  %v1371_v2 = vadd.f32 %v1370_v61, %v1369_v47  ;;  %1320 = vst.msk [vmem:[%s3443_s2 + $0xa4] sm:$0xf] %vm1278_vm4, %v1255_v56  ;;  %v968_v37 = vpop.f32.mrf.mxu3  ;;  %v1940_v61 = vld [vmem:[%s3442_s0 + $0x1f8] sm:$0xf0] }
 0x11d   :  { %1293 = vst.msk [vmem:[%s3443_s2 + $0x38] sm:$0xf] %vm1278_vm4, %v1228_v60  ;;  %v1569_v3 = vsel %vm19_vm3, %v1492_v63, 0.0  ;;  %v969_v38 = vadd.f32 %v968_v37, %v799_v35  ;;  %v801_v53 = vpop.f32.mrf.mxu2  ;;  %v2074_v60 = vld [vmem:[%s3442_s0 + $0x1f4] sm:$0xf] }
 0x11e   :  { %v1570_v5 = vadd.f32 %v1569_v3, %v1568_v49  ;;  %v729_v7 = vpop.f32.mrf.mxu0  ;;  %1321 = vst.msk [vmem:[%s3443_s2 + $0xa8] sm:$0xf] %vm1278_vm4, %v1256_v29  ;;  %v1943_v56 = vor.u32 %v2074_v60, %v1940_v61  ;;  %v132_v61 = vld [vmem:[#allocation2 + $0x180] sm:$0xff] }
 0x11f   :  { %v899_v11 = vadd.f32 %v2822_v17, %v729_v7  ;;  %v1062_v40 = vadd.f32 %v969_v38, %v128_v33  ;;  %v104_v33 = vld [vmem:[#allocation2 + $0xa0] sm:$0xff] }
 0x120   :  { %v2923_v41 = vld [vmem:[#allocation2 + $0x158] sm:$0xff] }
 0x121   :  { %v1034_v22 = vadd.f32 %v899_v11, %v100_v6  ;;  %1127 = vst.msk [vmem:[#allocation2 + $0x160] sm:$0xff] %vm19_vm3, %v1062_v40 }
 0x122   :  { %v1165_v23 = vld [vmem:[#allocation2 + $0x78] sm:$0xff]  ;;  %2010 = vmatmul.msk.bf16.gmra.mxu3 %vm576_vm2, %v1935_v19 }
 0x123   :  { %v1229_v17 = vpack.c.bf16 %v1165_v23, %v1165_v23  ;;  %v1372_v25 = vsel %vm19_vm3, %v1165_v23, 0.0  ;;  %v1493_v16 = vmul.f32 %v1165_v23, %v1165_v23  ;;  %1099 = vst.msk [vmem:[#allocation2 + $0x80] sm:$0xff] %vm19_vm3, %v1034_v22  ;;  %v130_v22 = vld [vmem:[#allocation2 + $0x170] sm:$0xff] }
 0x124   :  { %v2901_v26 = vpop.f32.mrf.mxu1  ;;  %v1373_v20 = vadd.f32 %v1372_v25, %v1371_v2  ;;  %v970_v59 = vpop.f32.mrf.mxu3  ;;  %v1939_v2 = vor.u32 %v2075_v55, %v1938_v57 }
 0x125   :  { %1294 = vst.msk [vmem:[%s3443_s2 + $0x3c] sm:$0xf] %vm1278_vm4, %v1229_v17  ;;  %v1571_v31 = vsel %vm19_vm3, %v1493_v16, 0.0  ;;  %v971_v63 = vadd.f32 %v970_v59, %v801_v53  ;;  %v804_v18 = vpop.f32.mrf.mxu2 }
 0x126   :  { %v1572_v27 = vadd.f32 %v1571_v31, %v1570_v5  ;;  %v731_v34 = vpop.f32.mrf.mxu0 }
 0x127   :  { %v901_v36 = vadd.f32 %v2850_v44, %v731_v34  ;;  %v1257_v44 = vpack.c.bf16 %v2923_v41, %v2923_v41  ;;  %v1063_v6 = vadd.f32 %v971_v63, %v129_v54  ;;  %843 = vmatmul.bf16.gmra.mxu2 %v1939_v2 }
 0x128   :  { %v2952_v10 = vld [vmem:[#allocation2 + $0x160] sm:$0xff] }
 0x129   :  { %v1035_v39 = vadd.f32 %v901_v36, %v101_v32  ;;  %1322 = vst.msk [vmem:[%s3443_s2 + $0xac] sm:$0xf] %vm1278_vm4, %v1257_v44  ;;  %v1258_v4 = vpack.c.bf16 %v2952_v10, %v2952_v10 }
 0x12a   :  { %v1166_v30 = vld [vmem:[#allocation2 + $0x80] sm:$0xff]  ;;  %1128 = vst.msk [vmem:[#allocation2 + $0x168] sm:$0xff] %vm19_vm3, %v1063_v6 }
 0x12b   :  { %v1230_v42 = vpack.c.bf16 %v1166_v30, %v1166_v30  ;;  %v1374_v43 = vsel %vm19_vm3, %v1166_v30, 0.0  ;;  %v1494_v47 = vmul.f32 %v1166_v30, %v1166_v30  ;;  %1100 = vst.msk [vmem:[#allocation2 + $0x88] sm:$0xff] %vm19_vm3, %v1035_v39  ;;  %v131_v30 = vld [vmem:[#allocation2 + $0x178] sm:$0xff] }
 0x12c   :  { %v2921_v48 = vpop.f32.mrf.mxu1  ;;  %v1375_v49 = vadd.f32 %v1374_v43, %v1373_v20  ;;  %1323 = vst.msk [vmem:[%s3443_s2 + $0xb0] sm:$0xf] %vm1278_vm4, %v1258_v4  ;;  %v973_v23 = vpop.f32.mrf.mxu3 }
 0x12d   :  { %1295 = vst.msk [vmem:[%s3443_s2 + $0x40] sm:$0xf] %vm1278_vm4, %v1230_v42  ;;  %v1573_v50 = vsel %vm19_vm3, %v1494_v47, 0.0  ;;  %v974_v24 = vadd.f32 %v973_v23, %v804_v18  ;;  %v806_v38 = vpop.f32.mrf.mxu2 }
 0x12e   :  { %v1574_v46 = vadd.f32 %v1573_v50, %v1572_v27  ;;  %v734_v52 = vpop.f32.mrf.mxu0 }
 0x12f   :  { %v904_v58 = vadd.f32 %v2870_v0, %v734_v52  ;;  %v1064_v16 = vadd.f32 %v974_v24, %v130_v22  ;;  %v133_v22 = vld [vmem:[#allocation2 + $0x188] sm:$0xff] }
 0x131   :  { %v1036_v3 = vadd.f32 %v904_v58, %v102_v51  ;;  %v2970_v32 = vld [vmem:[#allocation2 + $0x168] sm:$0xff]  ;;  %1129 = vst.msk [vmem:[#allocation2 + $0x170] sm:$0xff] %vm19_vm3, %v1064_v16 }
 0x132   :  { %v1167_v5 = vld [vmem:[#allocation2 + $0x88] sm:$0xff]  ;;  %2011 = vmatmul.msk.bf16.gmra.mxu3 %vm576_vm2, %v1943_v56  ;;  %v1259_v35 = vpack.c.bf16 %v2970_v32, %v2970_v32 }
 0x133   :  { %v1231_v0 = vpack.c.bf16 %v1167_v5, %v1167_v5  ;;  %v1376_v7 = vsel %vm19_vm3, %v1167_v5, 0.0  ;;  %v1495_v8 = vmul.f32 %v1167_v5, %v1167_v5  ;;  %1101 = vst.msk [vmem:[#allocation2 + $0x90] sm:$0xff] %vm19_vm3, %v1036_v3  ;;  %v105_v58 = vld [vmem:[#allocation2 + $0xa8] sm:$0xff] }
 0x134   :  { %v910_v9 = vpop.f32.mrf.mxu1  ;;  %v1377_v11 = vadd.f32 %v1376_v7, %v1375_v49  ;;  %1324 = vst.msk [vmem:[%s3443_s2 + $0xb4] sm:$0xf] %vm1278_vm4, %v1259_v35  ;;  %v975_v40 = vpop.f32.mrf.mxu3 }
 0x135   :  { %1296 = vst.msk [vmem:[%s3443_s2 + $0x44] sm:$0xf] %vm1278_vm4, %v1231_v0  ;;  %v1575_v12 = vsel %vm19_vm3, %v1495_v8, 0.0  ;;  %v976_v42 = vadd.f32 %v975_v40, %v806_v38  ;;  %v809_v55 = vpop.f32.mrf.mxu2 }
 0x136   :  { %v1576_v13 = vadd.f32 %v1575_v12, %v1574_v46  ;;  %v736_v15 = vpop.f32.mrf.mxu0 }
 0x137   :  { %v906_v19 = vadd.f32 %v2901_v26, %v736_v15  ;;  %v1065_v49 = vadd.f32 %v976_v42, %v131_v30 }
 0x138   :  { %v2987_v52 = vld [vmem:[#allocation2 + $0x170] sm:$0xff] }
 0x139   :  { %v1037_v17 = vadd.f32 %v906_v19, %v103_v14  ;;  %v1260_v54 = vpack.c.bf16 %v2987_v52, %v2987_v52  ;;  %1130 = vst.msk [vmem:[#allocation2 + $0x178] sm:$0xff] %vm19_vm3, %v1065_v49  ;;  %v106_v14 = vld [vmem:[#allocation2 + $0xb0] sm:$0xff] }
 0x13a   :  { %v1168_v25 = vld [vmem:[#allocation2 + $0x90] sm:$0xff] }
 0x13b   :  { %v1232_v20 = vpack.c.bf16 %v1168_v25, %v1168_v25  ;;  %v1378_v29 = vsel %vm19_vm3, %v1168_v25, 0.0  ;;  %v1496_v31 = vmul.f32 %v1168_v25, %v1168_v25  ;;  %1102 = vst.msk [vmem:[#allocation2 + $0x98] sm:$0xff] %vm19_vm3, %v1037_v17 }
 0x13c   :  { %v913_v27 = vpop.f32.mrf.mxu1  ;;  %v1379_v34 = vadd.f32 %v1378_v29, %v1377_v11  ;;  %1325 = vst.msk [vmem:[%s3443_s2 + $0xb8] sm:$0xf] %vm1278_vm4, %v1260_v54  ;;  %v978_v63 = vpop.f32.mrf.mxu3 }
 0x13d   :  { %1297 = vst.msk [vmem:[%s3443_s2 + $0x48] sm:$0xf] %vm1278_vm4, %v1232_v20  ;;  %v1577_v26 = vsel %vm19_vm3, %v1496_v31, 0.0  ;;  %v979_v2 = vadd.f32 %v978_v63, %v809_v55  ;;  %v811_v18 = vpop.f32.mrf.mxu2 }
 0x13e   :  { %v1578_v36 = vadd.f32 %v1577_v26, %v1576_v13  ;;  %v739_v37 = vpop.f32.mrf.mxu0 }
 0x13f   :  { %v909_v39 = vadd.f32 %v2921_v48, %v739_v37  ;;  %v1066_v5 = vadd.f32 %v979_v2, %v132_v61  ;;  %v109_v2 = vld [vmem:[#allocation2 + $0xc8] sm:$0xff] }
 0x140   :  { %v3003_v11 = vld [vmem:[#allocation2 + $0x178] sm:$0xff] }
 0x141   :  { %v1038_v43 = vadd.f32 %v909_v39, %v104_v33  ;;  %1131 = vst.msk [vmem:[#allocation2 + $0x180] sm:$0xff] %vm19_vm3, %v1066_v5  ;;  %v134_v33 = vld [vmem:[#allocation2 + $0x190] sm:$0xff] }
 0x142   :  { %v1169_v47 = vld [vmem:[#allocation2 + $0x98] sm:$0xff] }
 0x143   :  { %v1233_v44 = vpack.c.bf16 %v1169_v47, %v1169_v47  ;;  %v1380_v50 = vsel %vm19_vm3, %v1169_v47, 0.0  ;;  %v1497_v46 = vmul.f32 %v1169_v47, %v1169_v47  ;;  %1103 = vst.msk [vmem:[#allocation2 + $0xa0] sm:$0xff] %vm19_vm3, %v1038_v43 }
 0x144   :  { %v915_v51 = vpop.f32.mrf.mxu1  ;;  %v1381_v53 = vadd.f32 %v1380_v50, %v1379_v34  ;;  %v980_v23 = vpop.f32.mrf.mxu3 }
 0x145   :  { %1298 = vst.msk [vmem:[%s3443_s2 + $0x4c] sm:$0xf] %vm1278_vm4, %v1233_v44  ;;  %v1579_v48 = vsel %vm19_vm3, %v1497_v46, 0.0  ;;  %v981_v24 = vadd.f32 %v980_v23, %v811_v18  ;;  %v108_v44 = vld [vmem:[#allocation2 + $0xc0] sm:$0xff] }
 0x146   :  { %v1580_v57 = vadd.f32 %v1579_v48, %v1578_v36  ;;  %v741_v59 = vpop.f32.mrf.mxu0  ;;  %v814_v26 = vpop.f32.mrf.mxu2 }
 0x147   :  { %v911_v60 = vadd.f32 %v910_v9, %v741_v59  ;;  %v1261_v9 = vpack.c.bf16 %v3003_v11, %v3003_v11  ;;  %v1067_v16 = vadd.f32 %v981_v24, %v133_v22  ;;  %v110_v22 = vld [vmem:[#allocation2 + $0xd0] sm:$0xff] }
 0x148   :  { %v3026_v31 = vld [vmem:[#allocation2 + $0x180] sm:$0xff] }
 0x149   :  { %v1039_v56 = vadd.f32 %v911_v60, %v105_v58  ;;  %1326 = vst.msk [vmem:[%s3443_s2 + $0xbc] sm:$0xf] %vm1278_vm4, %v1261_v9  ;;  %v1262_v34 = vpack.c.bf16 %v3026_v31, %v3026_v31 }
 0x14a   :  { %v1170_v3 = vld [vmem:[#allocation2 + $0xa0] sm:$0xff]  ;;  %1132 = vst.msk [vmem:[#allocation2 + $0x188] sm:$0xff] %vm19_vm3, %v1067_v16  ;;  %v137_v16 = vld [vmem:[#allocation2 + $0x1a8] sm:$0xff] }
 0x14b   :  { %v1234_v6 = vpack.c.bf16 %v1170_v3, %v1170_v3  ;;  %v1382_v0 = vsel %vm19_vm3, %v1170_v3, 0.0  ;;  %v1498_v7 = vmul.f32 %v1170_v3, %v1170_v3  ;;  %1104 = vst.msk [vmem:[#allocation2 + $0xa8] sm:$0xff] %vm19_vm3, %v1039_v56 }
 0x14c   :  { %v918_v8 = vpop.f32.mrf.mxu1  ;;  %v3005_v4 = vadd.f32 %v1382_v0, %v1381_v53  ;;  %1327 = vst.msk [vmem:[%s3443_s2 + $0xc0] sm:$0xf] %vm1278_vm4, %v1262_v34  ;;  %v983_v37 = vpop.f32.mrf.mxu3  ;;  %v135_v53 = vld [vmem:[#allocation2 + $0x198] sm:$0xff] }
 0x14d   :  { %1299 = vst.msk [vmem:[%s3443_s2 + $0x50] sm:$0xf] %vm1278_vm4, %v1234_v6  ;;  %v1581_v12 = vsel %vm19_vm3, %v1498_v7, 0.0  ;;  %v984_v38 = vadd.f32 %v983_v37, %v814_v26  ;;  %v136_v6 = vld [vmem:[#allocation2 + $0x1a0] sm:$0xff] }
 0x14e   :  { %v3015_v13 = vadd.f32 %v1581_v12, %v1580_v57  ;;  %v744_v15 = vpop.f32.mrf.mxu0  ;;  %v816_v46 = vpop.f32.mrf.mxu2 }
 0x14f   :  { %v914_v19 = vadd.f32 %v913_v27, %v744_v15  ;;  %v107_v27 = vld [vmem:[#allocation2 + $0xb8] sm:$0xff]  ;;  %v1068_v40 = vadd.f32 %v984_v38, %v134_v33 }
 0x150   :  { %v111_v38 = vld [vmem:[#allocation2 + $0xd8] sm:$0xff] }
 0x151   :  { %v1040_v17 = vadd.f32 %v914_v19, %v106_v14  ;;  %v3044_v47 = vld [vmem:[#allocation2 + $0x188] sm:$0xff]  ;;  %1133 = vst.msk [vmem:[#allocation2 + $0x190] sm:$0xff] %vm19_vm3, %v1068_v40 }
 0x152   :  { %v3021_v25 = vld [vmem:[#allocation2 + $0xa8] sm:$0xff]  ;;  %v1263_v49 = vpack.c.bf16 %v3044_v47, %v3044_v47 }
 0x153   :  { %v1235_v20 = vpack.c.bf16 %v3021_v25, %v3021_v25  ;;  %1105 = vst.msk [vmem:[#allocation2 + $0xb0] sm:$0xff] %vm19_vm3, %v1040_v17 }
 0x154   :  { %v920_v29 = vpop.f32.mrf.mxu1  ;;  %1328 = vst.msk [vmem:[%s3443_s2 + $0xc4] sm:$0xf] %vm1278_vm4, %v1263_v49  ;;  %v985_v54 = vpop.f32.mrf.mxu3 }
 0x155   :  { %1300 = vst.msk [vmem:[%s3443_s2 + $0x54] sm:$0xf] %vm1278_vm4, %v1235_v20  ;;  %v986_v48 = vadd.f32 %v985_v54, %v816_v46 }
 0x156   :  { %v746_v35 = vpop.f32.mrf.mxu0  ;;  %v819_v3 = vpop.f32.mrf.mxu2 }
 0x157   :  { %v916_v36 = vadd.f32 %v915_v51, %v746_v35  ;;  %v1069_v59 = vadd.f32 %v986_v48, %v135_v53 }
 0x158   :  { %v3062_v61 = vld [vmem:[#allocation2 + $0x190] sm:$0xff] }
 0x159   :  { %v1041_v39 = vadd.f32 %v916_v36, %v107_v27  ;;  %v1264_v63 = vpack.c.bf16 %v3062_v61, %v3062_v61  ;;  %1134 = vst.msk [vmem:[#allocation2 + $0x198] sm:$0xff] %vm19_vm3, %v1069_v59  ;;  %v112_v59 = vld [vmem:[#allocation2 + $0xe0] sm:$0xff] }
 0x15a   :  { %v3039_v30 = vld [vmem:[#allocation2 + $0xb0] sm:$0xff] }
 0x15b   :  { %v1236_v42 = vpack.c.bf16 %v3039_v30, %v3039_v30  ;;  %1106 = vst.msk [vmem:[#allocation2 + $0xb8] sm:$0xff] %vm19_vm3, %v1041_v39 }
 0x15c   :  { %v923_v43 = vpop.f32.mrf.mxu1  ;;  %1329 = vst.msk [vmem:[%s3443_s2 + $0xc8] sm:$0xf] %vm1278_vm4, %v1264_v63  ;;  %v988_v0 = vpop.f32.mrf.mxu3 }
 0x15d   :  { %1301 = vst.msk [vmem:[%s3443_s2 + $0x58] sm:$0xf] %vm1278_vm4, %v1236_v42  ;;  %v989_v7 = vadd.f32 %v988_v0, %v819_v3 }
 0x15e   :  { %v749_v50 = vpop.f32.mrf.mxu0  ;;  %v821_v24 = vpop.f32.mrf.mxu2 }
 0x15f   :  { %v919_v51 = vadd.f32 %v918_v8, %v749_v50  ;;  %v1070_v12 = vadd.f32 %v989_v7, %v136_v6 }
 0x160   :  { %v3080_v18 = vld [vmem:[#allocation2 + $0x198] sm:$0xff] }
 0x161   :  { %v1042_v57 = vadd.f32 %v919_v51, %v108_v44  ;;  %v1265_v19 = vpack.c.bf16 %v3080_v18, %v3080_v18  ;;  %1135 = vst.msk [vmem:[#allocation2 + $0x1a0] sm:$0xff] %vm19_vm3, %v1070_v12 }
 0x162   :  { %v3057_v58 = vld [vmem:[#allocation2 + $0xb8] sm:$0xff] }
 0x163   :  { %v1237_v55 = vpack.c.bf16 %v3057_v58, %v3057_v58  ;;  %1107 = vst.msk [vmem:[#allocation2 + $0xc0] sm:$0xff] %vm19_vm3, %v1042_v57 }
 0x164   :  { %v925_v60 = vpop.f32.mrf.mxu1  ;;  %1330 = vst.msk [vmem:[%s3443_s2 + $0xcc] sm:$0xf] %vm1278_vm4, %v1265_v19  ;;  %v990_v20 = vpop.f32.mrf.mxu3 }
 0x165   :  { %1302 = vst.msk [vmem:[%s3443_s2 + $0x5c] sm:$0xf] %vm1278_vm4, %v1237_v55 }
 0x166   :  { %v751_v56 = vpop.f32.mrf.mxu0 }
 0x167   :  { %v921_v5 = vadd.f32 %v920_v29, %v751_v56  ;;  %v991_v29 = vadd.f32 %v990_v20, %v821_v24 }
 0x168   :  { %v3098_v33 = vld [vmem:[#allocation2 + $0x1a0] sm:$0xff] }
 0x169   :  { %v1043_v8 = vadd.f32 %v921_v5, %v109_v2  ;;  %v1071_v35 = vadd.f32 %v991_v29, %v137_v16  ;;  %v1266_v37 = vpack.c.bf16 %v3098_v33, %v3098_v33  ;;  %v139_v2 = vld [vmem:[#allocation2 + $0x1b8] sm:$0xff]  ;;  %v1499_v16 = vmul.f32 %v3021_v25, %v3021_v25 }
 0x16a   :  { %v3075_v9 = vld [vmem:[#allocation2 + $0xc0] sm:$0xff]  ;;  %v824_v40 = vpop.f32.mrf.mxu2 }
 0x16b   :  { %v1238_v14 = vpack.c.bf16 %v3075_v9, %v3075_v9  ;;  %1108 = vst.msk [vmem:[#allocation2 + $0xc8] sm:$0xff] %vm19_vm3, %v1043_v8 }
 0x16c   :  { %v928_v15 = vpop.f32.mrf.mxu1  ;;  %1136 = vst.msk [vmem:[#allocation2 + $0x1a8] sm:$0xff] %vm19_vm3, %v1071_v35 }
 0x16d   :  { %1303 = vst.msk [vmem:[%s3443_s2 + $0x60] sm:$0xf] %vm1278_vm4, %v1238_v14 }
 0x16e   :  { %v754_v23 = vpop.f32.mrf.mxu0  ;;  %1331 = vst.msk [vmem:[%s3443_s2 + $0xd0] sm:$0xf] %vm1278_vm4, %v1266_v37  ;;  %v1500_v37 = vmul.f32 %v3039_v30, %v3039_v30 }
 0x16f   :  { %v924_v17 = vadd.f32 %v923_v43, %v754_v23  ;;  %v138_v43 = vld [vmem:[#allocation2 + $0x1b0] sm:$0xff] }
 0x171   :  { %v1044_v34 = vadd.f32 %v924_v17, %v110_v22 }
 0x172   :  { %v3093_v27 = vld [vmem:[#allocation2 + $0xc8] sm:$0xff] }
 0x173   :  { %v1239_v26 = vpack.c.bf16 %v3093_v27, %v3093_v27  ;;  %1109 = vst.msk [vmem:[#allocation2 + $0xd0] sm:$0xff] %vm19_vm3, %v1044_v34  ;;  %v3116_v48 = vld [vmem:[#allocation2 + $0x1a8] sm:$0xff]  ;;  %v116_v34 = vld [vmem:[#allocation2 + $0x100] sm:$0xff] }
 0x174   :  { %v930_v36 = vpop.f32.mrf.mxu1  ;;  %v1267_v57 = vpack.c.bf16 %v3116_v48, %v3116_v48 }
 0x175   :  { %1304 = vst.msk [vmem:[%s3443_s2 + $0x64] sm:$0xf] %vm1278_vm4, %v1239_v26  ;;  %v993_v49 = vpop.f32.mrf.mxu3 }
 0x176   :  { %v756_v39 = vpop.f32.mrf.mxu0  ;;  %v994_v44 = vadd.f32 %v993_v49, %v824_v40  ;;  %1332 = vst.msk [vmem:[%s3443_s2 + $0xd4] sm:$0xf] %vm1278_vm4, %v1267_v57  ;;  %v1583_v40 = vsel %vm19_vm3, %v1499_v16, 0.0  ;;  %v1392_v16 = vsel %vm19_vm3, %v3093_v27, 0.0 }
 0x177   :  { %v926_v42 = vadd.f32 %v925_v60, %v756_v39  ;;  %v826_v60 = vpop.f32.mrf.mxu2  ;;  %v1384_v39 = vsel %vm19_vm3, %v3021_v25, 0.0  ;;  %v1501_v25 = vmul.f32 %v3057_v58, %v3057_v58 }
 0x178   :  { %v1072_v51 = vadd.f32 %v994_v44, %v138_v43  ;;  %v114_v43 = vld [vmem:[#allocation2 + $0xf0] sm:$0xff]  ;;  %v1386_v44 = vsel %vm19_vm3, %v3039_v30, 0.0  ;;  %v1385_v57 = vadd.f32 %v1384_v39, %v3005_v4  ;;  %v1502_v30 = vmul.f32 %v3075_v9, %v3075_v9 }
 0x179   :  { %v1045_v50 = vadd.f32 %v926_v42, %v111_v38 }
 0x17a   :  { %v3111_v46 = vld [vmem:[#allocation2 + $0xd0] sm:$0xff]  ;;  %1137 = vst.msk [vmem:[#allocation2 + $0x1b0] sm:$0xff] %vm19_vm3, %v1072_v51 }
 0x17b   :  { %v1240_v53 = vpack.c.bf16 %v3111_v46, %v3111_v46  ;;  %1110 = vst.msk [vmem:[#allocation2 + $0xd8] sm:$0xff] %vm19_vm3, %v1045_v50 }
 0x17c   :  { %v933_v54 = vpop.f32.mrf.mxu1 }
 0x17d   :  { %1305 = vst.msk [vmem:[%s3443_s2 + $0x68] sm:$0xf] %vm1278_vm4, %v1240_v53  ;;  %v995_v56 = vpop.f32.mrf.mxu3 }
 0x17e   :  { %v759_v55 = vpop.f32.mrf.mxu0  ;;  %v996_v3 = vadd.f32 %v995_v56, %v826_v60  ;;  %v141_v60 = vld [vmem:[#allocation2 + $0x1c8] sm:$0xff] }
 0x17f   :  { %v929_v63 = vadd.f32 %v928_v15, %v759_v55  ;;  %v113_v15 = vld [vmem:[#allocation2 + $0xe8] sm:$0xff]  ;;  %v829_v22 = vpop.f32.mrf.mxu2  ;;  %v140_v55 = vld [vmem:[#allocation2 + $0x1c0] sm:$0xff] }
 0x180   :  { %v1073_v0 = vadd.f32 %v996_v3, %v139_v2  ;;  %v1388_v2 = vsel %vm19_vm3, %v3057_v58, 0.0  ;;  %v117_v58 = vld [vmem:[#allocation2 + $0x108] sm:$0xff] }
 0x181   :  { %v1046_v5 = vadd.f32 %v929_v63, %v112_v59  ;;  %v3136_v12 = vld [vmem:[#allocation2 + $0x1b0] sm:$0xff]  ;;  %v1585_v59 = vsel %vm19_vm3, %v1500_v37, 0.0  ;;  %v115_v37 = vld [vmem:[#allocation2 + $0xf8] sm:$0xff] }
 0x182   :  { %v3129_v6 = vld [vmem:[#allocation2 + $0xd8] sm:$0xff]  ;;  %v1268_v14 = vpack.c.bf16 %v3136_v12, %v3136_v12  ;;  %1138 = vst.msk [vmem:[#allocation2 + $0x1b8] sm:$0xff] %vm19_vm3, %v1073_v0 }
 0x183   :  { %v1241_v7 = vpack.c.bf16 %v3129_v6, %v3129_v6  ;;  %1111 = vst.msk [vmem:[#allocation2 + $0xe0] sm:$0xff] %vm19_vm3, %v1046_v5  ;;  %v1387_v5 = vadd.f32 %v1386_v44, %v1385_v57  ;;  %v1505_v39 = vmul.f32 %v3129_v6, %v3129_v6 }
 0x184   :  { %v3134_v8 = vpop.f32.mrf.mxu1  ;;  %1333 = vst.msk [vmem:[%s3443_s2 + $0xd8] sm:$0xf] %vm1278_vm4, %v1268_v14  ;;  %v1390_v14 = vsel %vm19_vm3, %v3075_v9, 0.0  ;;  %v1504_v9 = vmul.f32 %v3111_v46, %v3111_v46 }
 0x185   :  { %1306 = vst.msk [vmem:[%s3443_s2 + $0x6c] sm:$0xf] %vm1278_vm4, %v1241_v7  ;;  %v998_v24 = vpop.f32.mrf.mxu3  ;;  %v1587_v7 = vsel %vm19_vm3, %v1501_v25, 0.0 }
 0x186   :  { %v761_v19 = vpop.f32.mrf.mxu0  ;;  %v999_v51 = vadd.f32 %v998_v24, %v829_v22  ;;  %v1389_v24 = vadd.f32 %v1388_v2, %v1387_v5  ;;  %v1593_v25 = vsel %vm19_vm3, %v1504_v9, 0.0  ;;  %v143_v9 = vld [vmem:[#allocation2 + $0x1d8] sm:$0xff] }
 0x187   :  { %v931_v23 = vadd.f32 %v930_v36, %v761_v19 }
 0x188   :  { %v1074_v3 = vadd.f32 %v999_v51, %v140_v55 }
 0x189   :  { %v1047_v17 = vadd.f32 %v931_v23, %v113_v15  ;;  %v3156_v26 = vld [vmem:[#allocation2 + $0x1b8] sm:$0xff]  ;;  %v1503_v15 = vmul.f32 %v3093_v27, %v3093_v27  ;;  %v1394_v27 = vsel %vm19_vm3, %v3111_v46, 0.0 }
 0x18a   :  { %v3151_v20 = vld [vmem:[#allocation2 + $0xe0] sm:$0xff]  ;;  %v1269_v38 = vpack.c.bf16 %v3156_v26, %v3156_v26  ;;  %1139 = vst.msk [vmem:[#allocation2 + $0x1c0] sm:$0xff] %vm19_vm3, %v1074_v3 }
 0x18b   :  { %v1242_v29 = vpack.c.bf16 %v3151_v20, %v3151_v20  ;;  %1112 = vst.msk [vmem:[#allocation2 + $0xe8] sm:$0xff] %vm19_vm3, %v1047_v17  ;;  %v1589_v17 = vsel %vm19_vm3, %v1502_v30, 0.0  ;;  %v1506_v46 = vmul.f32 %v3151_v20, %v3151_v20  ;;  %v1398_v55 = vsel %vm19_vm3, %v3151_v20, 0.0 }
 0x18c   :  { %v938_v35 = vpop.f32.mrf.mxu1  ;;  %1334 = vst.msk [vmem:[%s3443_s2 + $0xdc] sm:$0xf] %vm1278_vm4, %v1269_v38  ;;  %v1591_v38 = vsel %vm19_vm3, %v1503_v15, 0.0 }
 0x18d   :  { %v939_v36 = vadd.f32 %v938_v35, %v2594_v62  ;;  %1307 = vst.msk [vmem:[%s3443_s2 + $0x70] sm:$0xf] %vm1278_vm4, %v1242_v29  ;;  %v831_v62 = vpop.f32.mrf.mxu2  ;;  %v1000_v53 = vpop.f32.mrf.mxu3  ;;  %v1597_v3 = vsel %vm19_vm3, %v1506_v46, 0.0 }
 0x18e   :  { %v764_v49 = vpop.f32.mrf.mxu0  ;;  %v1001_v63 = vadd.f32 %v1000_v53, %v831_v62 }
 0x18f   :  { %v1050_v42 = vadd.f32 %v939_v36, %v116_v34  ;;  %v934_v50 = vadd.f32 %v933_v54, %v764_v49  ;;  %v1584_v54 = vadd.f32 %v1583_v40, %v3015_v13  ;;  %v1391_v34 = vadd.f32 %v1390_v14, %v1389_v24 }
 0x190   :  { %v1075_v4 = vadd.f32 %v1001_v63, %v141_v60 }
 0x191   :  { %1115 = vst.msk [vmem:[#allocation2 + $0x100] sm:$0xff] %vm19_vm3, %v1050_v42  ;;  %v1048_v56 = vadd.f32 %v934_v50, %v114_v43  ;;  %v1586_v23 = vadd.f32 %v1585_v59, %v1584_v54  ;;  %v1393_v62 = vadd.f32 %v1392_v16, %v1391_v34  ;;  %v1396_v50 = vsel %vm19_vm3, %v3129_v6, 0.0  ;;  %v3224_v6 = vld [vmem:[#allocation2 + $0x1c0] sm:$0xff]  ;;  %v142_v16 = vld [vmem:[#allocation2 + $0x1d0] sm:$0xff] }
 0x192   :  { %v1179_v0 = vld [vmem:[#allocation2 + $0xe8] sm:$0xff]  ;;  %1140 = vst.msk [vmem:[#allocation2 + $0x1c8] sm:$0xff] %vm19_vm3, %v1075_v4  ;;  %v1595_v59 = vsel %vm19_vm3, %v1505_v39, 0.0 }
 0x193   :  { %v1243_v19 = vpack.c.bf16 %v1179_v0, %v1179_v0  ;;  %1113 = vst.msk [vmem:[#allocation2 + $0xf0] sm:$0xff] %vm19_vm3, %v1048_v56  ;;  %v1588_v29 = vadd.f32 %v1587_v7, %v1586_v23  ;;  %v1395_v57 = vadd.f32 %v1394_v27, %v1393_v62  ;;  %v1507_v60 = vmul.f32 %v1179_v0, %v1179_v0 }
 0x194   :  { %v940_v22 = vpop.f32.mrf.mxu1  ;;  %v1270_v56 = vpack.c.bf16 %v3224_v6, %v3224_v6  ;;  %v1400_v54 = vsel %vm19_vm3, %v1179_v0, 0.0 }
 0x195   :  { %v941_v13 = vadd.f32 %v940_v22, %v2619_v21  ;;  %1308 = vst.msk [vmem:[%s3443_s2 + $0x74] sm:$0xf] %vm1278_vm4, %v1243_v19  ;;  %v834_v36 = vpop.f32.mrf.mxu2  ;;  %v1003_v43 = vpop.f32.mrf.mxu3  ;;  %v1590_v49 = vadd.f32 %v1589_v17, %v1588_v29  ;;  %v1397_v30 = vadd.f32 %v1396_v50, %v1395_v57  ;;  %v1599_v0 = vsel %vm19_vm3, %v1507_v60, 0.0  ;;  %v2097_v57 = vld [vmem:[#allocation2 + $0x110] sm:$0xff] }
 0x196   :  { %v766_v21 = vpop.f32.mrf.mxu0  ;;  %1335 = vst.msk [vmem:[%s3443_s2 + $0xe0] sm:$0xf] %vm1278_vm4, %v1270_v56  ;;  %v1004_v22 = vadd.f32 %v1003_v43, %v834_v36 }
 0x197   :  { %v1051_v35 = vadd.f32 %v941_v13, %v117_v58  ;;  %v936_v42 = vadd.f32 %v3134_v8, %v766_v21  ;;  %v1592_v53 = vadd.f32 %v1591_v38, %v1590_v49  ;;  %v1399_v7 = vadd.f32 %v1398_v55, %v1397_v30  ;;  %v2098_v30 = vld [vmem:[#allocation2 + $0x118] sm:$0xff] }
 0x198   :  { %v1182_v40 = vld [vmem:[#allocation2 + $0x100] sm:$0xff]  ;;  %v1513_v56 = vmul.f32 %v2098_v30, %v2098_v30 }
 0x199   :  { %v1246_v44 = vpack.c.bf16 %v1182_v40, %v1182_v40  ;;  %1116 = vst.msk [vmem:[#allocation2 + $0x108] sm:$0xff] %vm19_vm3, %v1051_v35  ;;  %v1049_v51 = vadd.f32 %v936_v42, %v115_v37  ;;  %v1594_v2 = vadd.f32 %v1593_v25, %v1592_v53  ;;  %v3234_v5 = vld [vmem:[#allocation2 + $0x1c8] sm:$0xff]  ;;  %v1401_v13 = vadd.f32 %v1400_v54, %v1399_v7 }
 0x19a   :  { %v1180_v8 = vld [vmem:[#allocation2 + $0xf0] sm:$0xff]  ;;  %v1271_v14 = vpack.c.bf16 %v3234_v5, %v3234_v5  ;;  %v1076_v35 = vadd.f32 %v1004_v22, %v142_v16  ;;  %v1510_v27 = vmul.f32 %v1182_v40, %v1182_v40  ;;  %v2100_v16 = vld [vmem:[#allocation2 + $0x128] sm:$0xff] }
 0x19b   :  { %1311 = vst.msk [vmem:[%s3443_s2 + $0x80] sm:$0xf] %vm1278_vm4, %v1246_v44  ;;  %v1244_v63 = vpack.c.bf16 %v1180_v8, %v1180_v8  ;;  %v1508_v20 = vmul.f32 %v1180_v8, %v1180_v8  ;;  %v1596_v4 = vadd.f32 %v1595_v59, %v1594_v2  ;;  %v1402_v19 = vsel %vm19_vm3, %v1180_v8, 0.0 }
 0x19c   :  { %1114 = vst.msk [vmem:[#allocation2 + $0xf8] sm:$0xff] %vm19_vm3, %v1049_v51  ;;  %v1403_v21 = vadd.f32 %v1402_v19, %v1401_v13  ;;  %v1406_v44 = vsel %vm19_vm3, %v1182_v40, 0.0  ;;  %v1512_v8 = vmul.f32 %v2097_v57, %v2097_v57  ;;  %v1605_v59 = vsel %vm19_vm3, %v1510_v27, 0.0 }
 0x19d   :  { %1309 = vst.msk [vmem:[%s3443_s2 + $0x78] sm:$0xf] %vm1278_vm4, %v1244_v63  ;;  %v836_v15 = vpop.f32.mrf.mxu2  ;;  %v1005_v23 = vpop.f32.mrf.mxu3  ;;  %v1598_v24 = vadd.f32 %v1597_v3, %v1596_v4  ;;  %v1601_v34 = vsel %vm19_vm3, %v1508_v20, 0.0  ;;  %v1410_v2 = vsel %vm19_vm3, %v2097_v57, 0.0  ;;  %v1611_v13 = vsel %vm19_vm3, %v1513_v56, 0.0 }
 0x19e   :  { %1336 = vst.msk [vmem:[%s3443_s2 + $0xe4] sm:$0xf] %vm1278_vm4, %v1271_v14  ;;  %v1006_v29 = vadd.f32 %v1005_v23, %v836_v15  ;;  %v1609_v7 = vsel %vm19_vm3, %v1512_v8, 0.0  ;;  %v1412_v14 = vsel %vm19_vm3, %v2098_v30, 0.0  ;;  %v2099_v15 = vld [vmem:[#allocation2 + $0x120] sm:$0xff]  ;;  %v1422_v56 = vsel %vm19_vm3, %v2852_v45, 0.0 }
 0x19f   :  { %v1600_v37 = vadd.f32 %v1599_v0, %v1598_v24  ;;  %1141 = vst.msk [vmem:[#allocation2 + $0x1d0] sm:$0xff] %vm19_vm3, %v1076_v35  ;;  %v1514_v0 = vmul.f32 %v2099_v15, %v2099_v15 }
 0x1a0   :  { %v1183_v58 = vld [vmem:[#allocation2 + $0x108] sm:$0xff]  ;;  %v1077_v38 = vadd.f32 %v1006_v29, %v143_v9  ;;  %v1515_v9 = vmul.f32 %v2100_v16, %v2100_v16 }
 0x1a1   :  { %v1247_v17 = vpack.c.bf16 %v1183_v58, %v1183_v58  ;;  %v1602_v49 = vadd.f32 %v1601_v34, %v1600_v37  ;;  %v1511_v25 = vmul.f32 %v1183_v58, %v1183_v58  ;;  %v1408_v55 = vsel %vm19_vm3, %v1183_v58, 0.0 }
 0x1a2   :  { %1142 = vst.msk [vmem:[#allocation2 + $0x1d8] sm:$0xff] %vm19_vm3, %v1077_v38  ;;  %v1613_v37 = vsel %vm19_vm3, %v1514_v0, 0.0  ;;  %v1520_v0 = vmul.f32 %v2903_v28, %v2903_v28 }
 0x1a3   :  { %1312 = vst.msk [vmem:[%s3443_s2 + $0x84] sm:$0xf] %vm1278_vm4, %v1247_v17  ;;  %v1181_v36 = vld [vmem:[#allocation2 + $0xf8] sm:$0xff]  ;;  %v1607_v3 = vsel %vm19_vm3, %v1511_v25, 0.0  ;;  %v1414_v17 = vsel %vm19_vm3, %v2099_v15, 0.0  ;;  %v1615_v25 = vsel %vm19_vm3, %v1515_v9, 0.0 }
 0x1a4   :  { %v1245_v39 = vpack.c.bf16 %v1181_v36, %v1181_v36  ;;  %v1404_v42 = vsel %vm19_vm3, %v1181_v36, 0.0  ;;  %v1509_v43 = vmul.f32 %v1181_v36, %v1181_v36  ;;  %v2101_v36 = vld [vmem:[#allocation2 + $0x130] sm:$0xff]  ;;  %v1424_v15 = vsel %vm19_vm3, %v2872_v1, 0.0 }
 0x1a5   :  { %v1405_v62 = vadd.f32 %v1404_v42, %v1403_v21  ;;  %v839_v53 = vpop.f32.mrf.mxu2  ;;  %v1008_v60 = vpop.f32.mrf.mxu3  ;;  %v1416_v21 = vsel %vm19_vm3, %v2100_v16, 0.0  ;;  %v1516_v38 = vmul.f32 %v2101_v36, %v2101_v36 }
 0x1a6   :  { %1310 = vst.msk [vmem:[%s3443_s2 + $0x7c] sm:$0xf] %vm1278_vm4, %v1245_v39  ;;  %v1603_v50 = vsel %vm19_vm3, %v1509_v43, 0.0  ;;  %v3266_v4 = vld [vmem:[#allocation2 + $0x1d0] sm:$0xff]  ;;  %v1009_v27 = vadd.f32 %v1008_v60, %v839_v53  ;;  %v1518_v60 = vmul.f32 %v2852_v45, %v2852_v45  ;;  %v1426_v45 = vsel %vm19_vm3, %v2903_v28, 0.0 }
 0x1a7   :  { %v1407_v46 = vadd.f32 %v1406_v44, %v1405_v62  ;;  %v1604_v51 = vadd.f32 %v1603_v50, %v1602_v49  ;;  %v1272_v19 = vpack.c.bf16 %v3266_v4, %v3266_v4  ;;  %v144_v49 = vld [vmem:[#allocation2 + $0x1e0] sm:$0xff]  ;;  %v145_v62 = vld [vmem:[#allocation2 + $0x1e8] sm:$0xff]  ;;  %v1418_v50 = vsel %vm19_vm3, %v2101_v36, 0.0 }
 0x1a8   :  { %v1078_v57 = vadd.f32 %v1009_v27, %v144_v49  ;;  %v1430_v27 = vsel %vm19_vm3, %v2952_v10, 0.0 }
 0x1a9   :  { %v1409_v63 = vadd.f32 %v1408_v55, %v1407_v46  ;;  %v1606_v40 = vadd.f32 %v1605_v59, %v1604_v51  ;;  %v3272_v58 = vld [vmem:[#allocation2 + $0x1d8] sm:$0xff]  ;;  %1337 = vst.msk [vmem:[%s3443_s2 + $0xe8] sm:$0xf] %vm1278_vm4, %v1272_v19 }
 0x1aa   :  { %v1273_v24 = vpack.c.bf16 %v3272_v58, %v3272_v58  ;;  %v2102_v46 = vld [vmem:[#allocation2 + $0x138] sm:$0xff]  ;;  %1143 = vst.msk [vmem:[#allocation2 + $0x1e0] sm:$0xff] %vm19_vm3, %v1078_v57 }
 0x1ab   :  { %v1411_v54 = vadd.f32 %v1410_v2, %v1409_v63  ;;  %v1608_v20 = vadd.f32 %v1607_v3, %v1606_v40  ;;  %v1517_v51 = vmul.f32 %v2102_v46, %v2102_v46  ;;  %v1617_v63 = vsel %vm19_vm3, %v1516_v38, 0.0  ;;  %v147_v57 = vld [vmem:[#allocation2 + $0x1f8] sm:$0xff] }
 0x1ac   :  { %1338 = vst.msk [vmem:[%s3443_s2 + $0xec] sm:$0xf] %vm1278_vm4, %v1273_v24  ;;  %v1420_v53 = vsel %vm19_vm3, %v2102_v46, 0.0  ;;  %v1519_v3 = vmul.f32 %v2872_v1, %v2872_v1  ;;  %v1625_v1 = vsel %vm19_vm3, %v1520_v0, 0.0  ;;  %v1440_v0 = vsel %vm19_vm3, %v3044_v47, 0.0 }
 0x1ad   :  { %v1413_v22 = vadd.f32 %v1412_v14, %v1411_v54  ;;  %v1610_v23 = vadd.f32 %v1609_v7, %v1608_v20  ;;  %v841_v35 = vpop.f32.mrf.mxu2  ;;  %v1010_v39 = vpop.f32.mrf.mxu3  ;;  %v1619_v30 = vsel %vm19_vm3, %v1517_v51, 0.0  ;;  %v1621_v14 = vsel %vm19_vm3, %v1518_v60, 0.0  ;;  %v146_v51 = vld [vmem:[#allocation2 + $0x1f0] sm:$0xff] }
 0x1ae   :  { %v1011_v44 = vadd.f32 %v1010_v39, %v841_v35  ;;  %v1623_v24 = vsel %vm19_vm3, %v1519_v3, 0.0 }
 0x1af   :  { %v1415_v29 = vadd.f32 %v1414_v17, %v1413_v22  ;;  %v1612_v34 = vadd.f32 %v1611_v13, %v1610_v23  ;;  %v1521_v13 = vmul.f32 %v2923_v41, %v2923_v41 }
 0x1b0   :  { %v1079_v55 = vadd.f32 %v1011_v44, %v145_v62  ;;  %v1524_v62 = vmul.f32 %v2987_v52, %v2987_v52 }
 0x1b1   :  { %v1417_v42 = vadd.f32 %v1416_v21, %v1415_v29  ;;  %v1614_v43 = vadd.f32 %v1613_v37, %v1612_v34  ;;  %v3311_v9 = vld [vmem:[#allocation2 + $0x1e0] sm:$0xff]  ;;  %v1428_v29 = vsel %vm19_vm3, %v2923_v41, 0.0  ;;  %v1522_v34 = vmul.f32 %v2952_v10, %v2952_v10 }
 0x1b2   :  { %1144 = vst.msk [vmem:[#allocation2 + $0x1e8] sm:$0xff] %vm19_vm3, %v1079_v55  ;;  %v1274_v35 = vpack.c.bf16 %v3311_v9, %v3311_v9  ;;  %v1627_v38 = vsel %vm19_vm3, %v1521_v13, 0.0  ;;  %v1523_v41 = vmul.f32 %v2970_v32, %v2970_v32  ;;  %v1432_v10 = vsel %vm19_vm3, %v2970_v32, 0.0 }
 0x1b3   :  { %v1419_v8 = vadd.f32 %v1418_v50, %v1417_v42  ;;  %v1616_v59 = vadd.f32 %v1615_v25, %v1614_v43  ;;  %v1629_v49 = vsel %vm19_vm3, %v1522_v34, 0.0  ;;  %v1434_v55 = vsel %vm19_vm3, %v2987_v52, 0.0 }
 0x1b4   :  { %1339 = vst.msk [vmem:[%s3443_s2 + $0xf0] sm:$0xf] %vm1278_vm4, %v1274_v35 }
 0x1b5   :  { %v1421_v40 = vadd.f32 %v1420_v53, %v1419_v8  ;;  %v1618_v2 = vadd.f32 %v1617_v63, %v1616_v59  ;;  %v844_v7 = vpop.f32.mrf.mxu2  ;;  %v1013_v19 = vpop.f32.mrf.mxu3  ;;  %v1631_v59 = vsel %vm19_vm3, %v1523_v41, 0.0  ;;  %v1525_v63 = vmul.f32 %v3003_v11, %v3003_v11 }
 0x1b6   :  { %v1014_v44 = vadd.f32 %v1013_v19, %v844_v7  ;;  %v1527_v7 = vmul.f32 %v3044_v47, %v3044_v47  ;;  %v1528_v19 = vmul.f32 %v3062_v61, %v3062_v61  ;;  %v1444_v47 = vsel %vm19_vm3, %v3080_v18, 0.0 }
 0x1b7   :  { %v1423_v54 = vadd.f32 %v1422_v56, %v1421_v40  ;;  %v1620_v20 = vadd.f32 %v1619_v30, %v1618_v2  ;;  %v1633_v2 = vsel %vm19_vm3, %v1524_v62, 0.0  ;;  %v1436_v30 = vsel %vm19_vm3, %v3003_v11, 0.0 }
 0x1b8   :  { %v1080_v53 = vadd.f32 %v1014_v44, %v146_v51  ;;  %v1526_v56 = vmul.f32 %v3026_v31, %v3026_v31  ;;  %v1635_v52 = vsel %vm19_vm3, %v1525_v63, 0.0  ;;  %v1450_v62 = vsel %vm19_vm3, %v3136_v12, 0.0 }
 0x1b9   :  { %v1425_v22 = vadd.f32 %v1424_v15, %v1423_v54  ;;  %v1622_v23 = vadd.f32 %v1621_v14, %v1620_v20  ;;  %v3320_v37 = vld [vmem:[#allocation2 + $0x1e8] sm:$0xff]  ;;  %v1438_v20 = vsel %vm19_vm3, %v3026_v31, 0.0  ;;  %v1442_v31 = vsel %vm19_vm3, %v3062_v61, 0.0 }
 0x1ba   :  { %v1275_v36 = vpack.c.bf16 %v3320_v37, %v3320_v37  ;;  %1145 = vst.msk [vmem:[#allocation2 + $0x1f0] sm:$0xff] %vm19_vm3, %v1080_v53  ;;  %v1637_v11 = vsel %vm19_vm3, %v1526_v56, 0.0  ;;  %v1533_v44 = vmul.f32 %v3156_v26, %v3156_v26  ;;  %v1534_v51 = vmul.f32 %v3224_v6, %v3224_v6 }
 0x1bb   :  { %v1427_v17 = vadd.f32 %v1426_v45, %v1425_v22  ;;  %v1624_v16 = vadd.f32 %v1623_v24, %v1622_v23  ;;  %v1639_v24 = vsel %vm19_vm3, %v1527_v7, 0.0  ;;  %v1529_v45 = vmul.f32 %v3080_v18, %v3080_v18 }
 0x1bc   :  { %1340 = vst.msk [vmem:[%s3443_s2 + $0xf4] sm:$0xf] %vm1278_vm4, %v1275_v36  ;;  %v1537_v56 = vmul.f32 %v3272_v58, %v3272_v58 }
 0x1bd   :  { %v1429_v28 = vadd.f32 %v1428_v29, %v1427_v17  ;;  %v1626_v21 = vadd.f32 %v1625_v1, %v1624_v16  ;;  %v846_v43 = vpop.f32.mrf.mxu2  ;;  %v1015_v25 = vpop.f32.mrf.mxu3  ;;  %v1641_v1 = vsel %vm19_vm3, %v1528_v19, 0.0  ;;  %v1530_v29 = vmul.f32 %v3098_v33, %v3098_v33 }
 0x1be   :  { %v1016_v8 = vadd.f32 %v1015_v25, %v846_v43  ;;  %v1643_v61 = vsel %vm19_vm3, %v1529_v45, 0.0 }
 0x1bf   :  { %v1628_v39 = vadd.f32 %v1627_v38, %v1626_v21  ;;  %v1431_v42 = vadd.f32 %v1430_v27, %v1429_v28  ;;  %v1446_v38 = vsel %vm19_vm3, %v3098_v33, 0.0  ;;  %v1531_v27 = vmul.f32 %v3116_v48, %v3116_v48 }
 0x1c0   :  { %v1081_v40 = vadd.f32 %v1016_v8, %v147_v57  ;;  %v1448_v33 = vsel %vm19_vm3, %v3116_v48, 0.0  ;;  %v1452_v48 = vsel %vm19_vm3, %v3156_v26, 0.0  ;;  %v1456_v26 = vsel %vm19_vm3, %v3234_v5, 0.0 }
 0x1c1   :  { %v1433_v50 = vadd.f32 %v1432_v10, %v1431_v42  ;;  %v1630_v46 = vadd.f32 %v1629_v49, %v1628_v39  ;;  %v1212_v16 = vld [vmem:[#allocation2 + $0x1f0] sm:$0xff]  ;;  %v1645_v39 = vsel %vm19_vm3, %v1530_v29, 0.0  ;;  %v1532_v42 = vmul.f32 %v3136_v12, %v3136_v12 }
 0x1c2   :  { %1146 = vst.msk [vmem:[#allocation2 + $0x1f8] sm:$0xff] %vm19_vm3, %v1081_v40  ;;  %v1276_v34 = vpack.c.bf16 %v1212_v16, %v1212_v16  ;;  %v1647_v10 = vsel %vm19_vm3, %v1531_v27, 0.0  ;;  %v1454_v12 = vsel %vm19_vm3, %v3224_v6, 0.0  ;;  %v1458_v6 = vsel %vm19_vm3, %v3266_v4, 0.0 }
 0x1c3   :  { %v1435_v32 = vadd.f32 %v1434_v55, %v1433_v50  ;;  %v1632_v60 = vadd.f32 %v1631_v59, %v1630_v46  ;;  %v1649_v46 = vsel %vm19_vm3, %v1532_v42, 0.0  ;;  %v1651_v59 = vsel %vm19_vm3, %v1533_v44, 0.0 }
 0x1c4   :  { %1341 = vst.msk [vmem:[%s3443_s2 + $0xf8] sm:$0xf] %vm1278_vm4, %v1276_v34  ;;  %v1535_v55 = vmul.f32 %v3234_v5, %v3234_v5  ;;  %v1460_v5 = vsel %vm19_vm3, %v3272_v58, 0.0  ;;  %v1464_v58 = vsel %vm19_vm3, %v3320_v37, 0.0 }
 0x1c5   :  { %v1437_v3 = vadd.f32 %v1436_v30, %v1435_v32  ;;  %v1634_v54 = vadd.f32 %v1633_v2, %v1632_v60  ;;  %v1653_v32 = vsel %vm19_vm3, %v1534_v51, 0.0  ;;  %v1536_v60 = vmul.f32 %v3266_v4, %v3266_v4 }
 0x1c6   :  { %v1655_v30 = vsel %vm19_vm3, %v1535_v55, 0.0  ;;  %v1462_v4 = vsel %vm19_vm3, %v3311_v9, 0.0 }
 0x1c7   :  { %v1439_v14 = vadd.f32 %v1438_v20, %v1437_v3  ;;  %v1636_v15 = vadd.f32 %v1635_v52, %v1634_v54  ;;  %v1657_v52 = vsel %vm19_vm3, %v1536_v60, 0.0  ;;  %v1538_v20 = vmul.f32 %v3311_v9, %v3311_v9 }
 0x1c9   :  { %v1441_v22 = vadd.f32 %v1440_v0, %v1439_v14  ;;  %v1638_v23 = vadd.f32 %v1637_v11, %v1636_v15  ;;  %v1213_v35 = vld [vmem:[#allocation2 + $0x1f8] sm:$0xff]  ;;  %v1659_v15 = vsel %vm19_vm3, %v1537_v56, 0.0  ;;  %v1539_v11 = vmul.f32 %v3320_v37, %v3320_v37 }
 0x1ca   :  { %v1277_v36 = vpack.c.bf16 %v1213_v35, %v1213_v35  ;;  %v1468_v29 = vsel %vm19_vm3, %v1213_v35, 0.0 }
 0x1cb   :  { %v1443_v13 = vadd.f32 %v1442_v31, %v1441_v22  ;;  %v1640_v17 = vadd.f32 %v1639_v24, %v1638_v23  ;;  %v1661_v22 = vsel %vm19_vm3, %v1538_v20, 0.0  ;;  %v1540_v23 = vmul.f32 %v1212_v16, %v1212_v16 }
 0x1cc   :  { %1342 = vst.msk [vmem:[%s3443_s2 + $0xfc] sm:$0xf] %vm1278_vm4, %v1277_v36  ;;  %v1663_v45 = vsel %vm19_vm3, %v1539_v11, 0.0 }
 0x1cd   :  { %v1445_v28 = vadd.f32 %v1444_v47, %v1443_v13  ;;  %v1642_v21 = vadd.f32 %v1641_v1, %v1640_v17  ;;  %v1466_v13 = vsel %vm19_vm3, %v1212_v16, 0.0  ;;  %v1541_v17 = vmul.f32 %v1213_v35, %v1213_v35 }
 0x1ce   :  { %v1665_v47 = vsel %vm19_vm3, %v1540_v23, 0.0 }
 0x1cf   :  { %v1447_v18 = vadd.f32 %v1446_v38, %v1445_v28  ;;  %v1644_v41 = vadd.f32 %v1643_v61, %v1642_v21  ;;  %v1667_v21 = vsel %vm19_vm3, %v1541_v17, 0.0 }
 0x1d1   :  { %v1449_v43 = vadd.f32 %v1448_v33, %v1447_v18  ;;  %v1646_v49 = vadd.f32 %v1645_v39, %v1644_v41 }
 0x1d3   :  { %v1451_v25 = vadd.f32 %v1450_v62, %v1449_v43  ;;  %v1648_v50 = vadd.f32 %v1647_v10, %v1646_v49 }
 0x1d5   :  { %v1453_v57 = vadd.f32 %v1452_v48, %v1451_v25  ;;  %v1650_v8 = vadd.f32 %v1649_v46, %v1648_v50 }
 0x1d7   :  { %v1455_v63 = vadd.f32 %v1454_v12, %v1453_v57  ;;  %v1652_v53 = vadd.f32 %v1651_v59, %v1650_v8 }
 0x1d9   :  { %v1654_v40 = vadd.f32 %v1653_v32, %v1652_v53  ;;  %v1457_v2 = vadd.f32 %v1456_v26, %v1455_v63 }
 0x1db   :  { %v1656_v3 = vadd.f32 %v1655_v30, %v1654_v40  ;;  %v1459_v54 = vadd.f32 %v1458_v6, %v1457_v2 }
 0x1dd   :  { %v1658_v7 = vadd.f32 %v1657_v52, %v1656_v3  ;;  %v1461_v14 = vadd.f32 %v1460_v5, %v1459_v54 }
 0x1df   :  { %v1660_v0 = vadd.f32 %v1659_v15, %v1658_v7  ;;  %v1463_v19 = vadd.f32 %v1462_v4, %v1461_v14 }
 0x1e1   :  { %v1662_v24 = vadd.f32 %v1661_v22, %v1660_v0  ;;  %v1465_v31 = vadd.f32 %v1464_v58, %v1463_v19 }
 0x1e3   :  { %v1664_v1 = vadd.f32 %v1663_v45, %v1662_v24  ;;  %v1467_v9 = vadd.f32 %v1466_v13, %v1465_v31 }
 0x1e5   :  { %v1666_v34 = vadd.f32 %v1665_v47, %v1664_v1  ;;  %v1469_v28 = vadd.f32 %v1468_v29, %v1467_v9 }
 0x1e7   :  { %v1470_v36 = vrot.slane %v1469_v28, 4  ;;  %v1668_v37 = vadd.f32 %v1667_v21, %v1666_v34 }
 0x1e9   :  { %v1471_v61 = vadd.f32 %v1470_v36, %v1469_v28  ;;  %v1669_v38 = vrot.slane %v1668_v37, 4 }
 0x1eb   :  { %v1472_v27 = vrot.slane %v1471_v61, 2  ;;  %v1670_v18 = vadd.f32 %v1669_v38, %v1668_v37 }
 0x1ed   :  { %v1473_v41 = vadd.f32 %v1472_v27, %v1471_v61  ;;  %v1671_v39 = vrot.slane %v1670_v18, 2 }
 0x1ef   :  { %v1474_v16 = vrot.slane %v1473_v41, 1  ;;  %v1672_v33 = vadd.f32 %v1671_v39, %v1670_v18 }
 0x1f1   :  { %v1475_v42 = vadd.f32 %v1474_v16, %v1473_v41  ;;  %v1673_v43 = vrot.slane %v1672_v33, 1 }
 0x1f3   :  { %1477 = vst.msk [vmem:[%s3444_s3] sm:$0x1] %vm1476_vm5, %v1475_v42  ;;  %v1674_v35 = vadd.f32 %v1673_v43, %v1672_v33 }
 0x1f5   :  { %1675 = vst.msk [vmem:[%s3445_s4] sm:$0x1] %vm1476_vm5, %v1674_v35 }

// kernel: resnet_forward.25
= control target key start
LH: loop header
LB: loop body
LE: loop exit
PB: predicated region body
PF: predicated region fallthrough
CT: control target
= control target key end

     0   :  { %vm19_vm0 = vcmask 523264   ;;  %vm925_vm1 = vcmask 519168   ;;  %vm979_vm2 = vcmask 516096   ;;  %s2067_s1 = inlined_call_operand.vmem [shape: bf16[576,64], index: 1, kind: input, shape index: {}]   ;;  %s2068_s0 = inlined_call_operand.vmem [shape: bf16[128,576], index: 0, kind: input, shape index: {}]   ;;  %s2069_s2 = inlined_call_operand.vmem [shape: bf16[128,64], index: 2, kind: output, shape index: {0}]   ;;  %s2070_s3 = inlined_call_operand.vmem [shape: f32[1,1,64], index: 3, kind: output, shape index: {1}]   ;;  %s2071_s4 = inlined_call_operand.vmem [shape: f32[1,1,64], index: 4, kind: output, shape index: {2}]  }
   0x1   :  { %v1406_v0 = vld [vmem:[%s2067_s1 + $0x38] sm:$0xff]  ;;  %v1405_v1 = vld [vmem:[%s2067_s1 + $0x30] sm:$0xff]  ;;  %v1404_v2 = vld [vmem:[%s2067_s1 + $0x28] sm:$0xff] }
   0x2   :  { %1435 = vmatpush.bf16.msra.mxu1 %v1406_v0  ;;  %1436 = vmatpush.bf16.msra.mxu2 %v1406_v0  ;;  %v1403_v3 = vld [vmem:[%s2067_s1 + $0x20] sm:$0xff]  ;;  %v1402_v4 = vld [vmem:[%s2067_s1 + $0x18] sm:$0xff]  ;;  %v1401_v5 = vld [vmem:[%s2067_s1 + $0x10] sm:$0xff] }
   0x3   :  { %1437 = vmatpush.bf16.msra.mxu3 %v1406_v0  ;;  %613 = vmatpush.bf16.msra.mxu0 %v1406_v0  ;;  %v1400_v6 = vld [vmem:[%s2067_s1 + $0x8] sm:$0xff]  ;;  %v1399_v7 = vld [vmem:[%s2067_s1] sm:$0xff]  ;;  %v1089_v8 = vld [vmem:[%s2068_s0 + $0x50] sm:$0xf] }
   0x4   :  { %v1371_v9 = vld [vmem:[%s2068_s0 + $0x60] sm:$0xf0]  ;;  %v1129_v10 = vld [vmem:[%s2068_s0 + $0xa0] sm:$0xf]  ;;  %v1381_v11 = vld [vmem:[%s2068_s0 + $0xb0] sm:$0xf0] }
   0x5   :  { %v1169_v12 = vld [vmem:[%s2068_s0 + $0xf0] sm:$0xf]  ;;  %v1391_v13 = vld [vmem:[%s2068_s0 + $0x100] sm:$0xf0]  ;;  %v1049_v14 = vld [vmem:[%s2068_s0] sm:$0xf]  ;;  %v1090_v18 = vor.u32 %v1371_v9, %v1089_v8  ;;  %v1130_v19 = vor.u32 %v1381_v11, %v1129_v10 }
   0x6   :  { %1438 = vmatpush.bf16.msra.mxu1 %v1405_v1  ;;  %1439 = vmatpush.bf16.msra.mxu2 %v1405_v1  ;;  %v1361_v15 = vld [vmem:[%s2068_s0 + $0x10] sm:$0xf0]  ;;  %v1422_v16 = vld [vmem:[%s2067_s1 + $0xb8] sm:$0xff]  ;;  %v1170_v20 = vor.u32 %v1391_v13, %v1169_v12  ;;  %v1420_v28 = vld [vmem:[%s2067_s1 + $0xa8] sm:$0xff] }
   0x7   :  { %1440 = vmatpush.bf16.msra.mxu3 %v1405_v1  ;;  %614 = vmatpush.bf16.msra.mxu0 %v1405_v1  ;;  %v1414_v17 = vld [vmem:[%s2067_s1 + $0x78] sm:$0xff]  ;;  %v1050_v21 = vor.u32 %v1361_v15, %v1049_v14  ;;  %v1421_v24 = vld [vmem:[%s2067_s1 + $0xb0] sm:$0xff]  ;;  %v1412_v29 = vld [vmem:[%s2067_s1 + $0x68] sm:$0xff] }
   0x8   :  { %v1430_v22 = vld [vmem:[%s2067_s1 + $0xf8] sm:$0xff]  ;;  %v1413_v25 = vld [vmem:[%s2067_s1 + $0x70] sm:$0xff]  ;;  %v1428_v30 = vld [vmem:[%s2067_s1 + $0xe8] sm:$0xff] }
   0x9   :  { %v1434_v23 = vld [vmem:[%s2067_s1 + $0x118] sm:$0xff]  ;;  %v1429_v26 = vld [vmem:[%s2067_s1 + $0xf0] sm:$0xff]  ;;  %v1432_v31 = vld [vmem:[%s2067_s1 + $0x108] sm:$0xff] }
   0xa   :  { %1441 = vmatpush.bf16.msra.mxu1 %v1404_v2  ;;  %1442 = vmatpush.bf16.msra.mxu2 %v1404_v2  ;;  %v1433_v27 = vld [vmem:[%s2067_s1 + $0x110] sm:$0xff]  ;;  %v1419_v32 = vld [vmem:[%s2067_s1 + $0xa0] sm:$0xff]  ;;  %v1109_v35 = vld [vmem:[%s2068_s0 + $0x78] sm:$0xf] }
   0xb   :  { %1443 = vmatpush.bf16.msra.mxu3 %v1404_v2  ;;  %615 = vmatpush.bf16.msra.mxu0 %v1404_v2  ;;  %v1411_v33 = vld [vmem:[%s2067_s1 + $0x60] sm:$0xff]  ;;  %v1376_v36 = vld [vmem:[%s2068_s0 + $0x88] sm:$0xf0]  ;;  %v1149_v37 = vld [vmem:[%s2068_s0 + $0xc8] sm:$0xf] }
   0xc   :  { %v1427_v34 = vld [vmem:[%s2067_s1 + $0xe0] sm:$0xff]  ;;  %v1386_v38 = vld [vmem:[%s2068_s0 + $0xd8] sm:$0xf0]  ;;  %v1189_v39 = vld [vmem:[%s2068_s0 + $0x118] sm:$0xf]  ;;  %v1110_v46 = vor.u32 %v1376_v36, %v1109_v35 }
   0xd   :  { %v1396_v40 = vld [vmem:[%s2068_s0 + $0x128] sm:$0xf0]  ;;  %v1069_v41 = vld [vmem:[%s2068_s0 + $0x28] sm:$0xf]  ;;  %v1366_v42 = vld [vmem:[%s2068_s0 + $0x38] sm:$0xf0]  ;;  %v1150_v47 = vor.u32 %v1386_v38, %v1149_v37 }
   0xe   :  { %1444 = vmatpush.bf16.msra.mxu1 %v1403_v3  ;;  %1445 = vmatpush.bf16.msra.mxu2 %v1403_v3  ;;  %v1431_v43 = vld [vmem:[%s2067_s1 + $0x100] sm:$0xff]  ;;  %v1418_v44 = vld [vmem:[%s2067_s1 + $0x98] sm:$0xff]  ;;  %v1190_v48 = vor.u32 %v1396_v40, %v1189_v39  ;;  %v1070_v49 = vor.u32 %v1366_v42, %v1069_v41  ;;  %v1417_v51 = vld [vmem:[%s2067_s1 + $0x90] sm:$0xff] }
   0xf   :  { %1446 = vmatpush.bf16.msra.mxu3 %v1403_v3  ;;  %616 = vmatpush.bf16.msra.mxu0 %v1403_v3  ;;  %v1410_v45 = vld [vmem:[%s2067_s1 + $0x58] sm:$0xff]  ;;  %v1409_v52 = vld [vmem:[%s2067_s1 + $0x50] sm:$0xff]  ;;  %v1416_v54 = vld [vmem:[%s2067_s1 + $0x88] sm:$0xff] }
  0x10   :  { %v1426_v50 = vld [vmem:[%s2067_s1 + $0xd8] sm:$0xff]  ;;  %v1425_v53 = vld [vmem:[%s2067_s1 + $0xd0] sm:$0xff]  ;;  %v1408_v55 = vld [vmem:[%s2067_s1 + $0x48] sm:$0xff] }
  0x11   :  { %v1424_v56 = vld [vmem:[%s2067_s1 + $0xc8] sm:$0xff]  ;;  %v1415_v57 = vld [vmem:[%s2067_s1 + $0x80] sm:$0xff]  ;;  %v1051_v61 = vld [vmem:[%s2068_s0 + $0x14] sm:$0xf0] }
  0x12   :  { %1447 = vmatpush.bf16.msra.mxu1 %v1402_v4  ;;  %1448 = vmatpush.bf16.msra.mxu2 %v1402_v4  ;;  %v1407_v58 = vld [vmem:[%s2067_s1 + $0x40] sm:$0xff]  ;;  %v1057_v62 = vld [vmem:[%s2068_s0 + $0x8] sm:$0xf]  ;;  %v1362_v63 = vld [vmem:[%s2068_s0 + $0x18] sm:$0xf0] }
  0x13   :  { %1449 = vmatpush.bf16.msra.mxu3 %v1402_v4  ;;  %617 = vmatpush.bf16.msra.mxu0 %v1402_v4  ;;  %v1423_v59 = vld [vmem:[%s2067_s1 + $0xc0] sm:$0xff]  ;;  %v1360_v0 = vld [vmem:[%s2068_s0 + $0xc] sm:$0xf]  ;;  %v1065_v2 = vld [vmem:[%s2068_s0 + $0x10] sm:$0xf] }
  0x14   :  { %v1359_v60 = vld [vmem:[%s2068_s0 + $0x4] sm:$0xf]  ;;  %v1059_v1 = vld [vmem:[%s2068_s0 + $0x1c] sm:$0xf0]  ;;  %v1364_v8 = vld [vmem:[%s2068_s0 + $0x2c] sm:$0xf] }
  0x15   :  { %v1363_v3 = vld [vmem:[%s2068_s0 + $0x20] sm:$0xf0]  ;;  %v1054_v4 = vor.u32 %v1359_v60, %v1051_v61  ;;  %v1071_v9 = vld [vmem:[%s2068_s0 + $0x3c] sm:$0xf0]  ;;  %v1077_v10 = vld [vmem:[%s2068_s0 + $0x30] sm:$0xf] }
  0x16   :  { %1450 = vmatpush.bf16.msra.mxu1 %v1401_v5  ;;  %1451 = vmatpush.bf16.msra.mxu2 %v1401_v5  ;;  %v1367_v11 = vld [vmem:[%s2068_s0 + $0x40] sm:$0xf0]  ;;  %v1365_v12 = vld [vmem:[%s2068_s0 + $0x34] sm:$0xf]  ;;  %v1079_v13 = vld [vmem:[%s2068_s0 + $0x44] sm:$0xf0] }
  0x17   :  { %1452 = vmatpush.bf16.msra.mxu3 %v1401_v5  ;;  %618 = vmatpush.bf16.msra.mxu0 %v1401_v5  ;;  %v1058_v5 = vor.u32 %v1362_v63, %v1057_v62  ;;  %v1085_v14 = vld [vmem:[%s2068_s0 + $0x38] sm:$0xf]  ;;  %v1368_v15 = vld [vmem:[%s2068_s0 + $0x48] sm:$0xf0]  ;;  %v1377_v35 = vld [vmem:[%s2068_s0 + $0x90] sm:$0xf0] }
  0x18   :  { %v1375_v36 = vld [vmem:[%s2068_s0 + $0x84] sm:$0xf]  ;;  %v1119_v37 = vld [vmem:[%s2068_s0 + $0x94] sm:$0xf0]  ;;  %v1125_v38 = vld [vmem:[%s2068_s0 + $0x88] sm:$0xf] }
  0x19   :  { %v1378_v39 = vld [vmem:[%s2068_s0 + $0x98] sm:$0xf0]  ;;  %v1122_v42 = vor.u32 %v1375_v36, %v1119_v37  ;;  %v1385_v60 = vld [vmem:[%s2068_s0 + $0xd4] sm:$0xf]  ;;  %v1159_v61 = vld [vmem:[%s2068_s0 + $0xe4] sm:$0xf0] }
  0x1a   :  { %1453 = vmatpush.bf16.msra.mxu1 %v1400_v6  ;;  %1454 = vmatpush.bf16.msra.mxu2 %v1400_v6  ;;  %v1165_v62 = vld [vmem:[%s2068_s0 + $0xd8] sm:$0xf]  ;;  %v1388_v63 = vld [vmem:[%s2068_s0 + $0xe8] sm:$0xf0] }
  0x1b   :  { %1455 = vmatpush.bf16.msra.mxu3 %v1400_v6  ;;  %619 = vmatpush.bf16.msra.mxu0 %v1400_v6  ;;  %v1062_v6 = vor.u32 %v1360_v0, %v1059_v1 }
  0x1e   :  { %1456 = vmatpush.bf16.msra.mxu1 %v1399_v7  ;;  %1457 = vmatpush.bf16.msra.mxu2 %v1399_v7 }
  0x1f   :  { %1458 = vmatpush.bf16.msra.mxu3 %v1399_v7  ;;  %620 = vmatpush.bf16.msra.mxu0 %v1399_v7  ;;  %v1066_v7 = vor.u32 %v1363_v3, %v1065_v2  ;;  %v1162_v2 = vor.u32 %v1385_v60, %v1159_v61  ;;  %v1166_v3 = vor.u32 %v1388_v63, %v1165_v62 }
  0x21   :  { %631 = vmatmul.bf16.vlgmr.msra.gmra.mxu1 %v1090_v18  ;;  %641 = vmatmul.bf16.vlgmr.msra.gmra.mxu2 %v1130_v19  ;;  %v1082_v18 = vor.u32 %v1365_v12, %v1079_v13  ;;  %v1086_v19 = vor.u32 %v1368_v15, %v1085_v14 }
  0x22   :  { %711 = vmatpush.bf16.msrb.mxu2 %v1422_v16  ;;  %662 = vmatpush.bf16.msrb.mxu1 %v1414_v17  ;;  %v1074_v16 = vor.u32 %v1364_v8, %v1071_v9  ;;  %v1078_v17 = vor.u32 %v1367_v11, %v1077_v10  ;;  %v1390_v8 = vld [vmem:[%s2068_s0 + $0xfc] sm:$0xf]  ;;  %v1179_v9 = vld [vmem:[%s2068_s0 + $0x10c] sm:$0xf0]  ;;  %v1185_v10 = vld [vmem:[%s2068_s0 + $0x100] sm:$0xf] }
  0x23   :  { %651 = vmatmul.bf16.vlgmr.msra.gmra.mxu3 %v1170_v20  ;;  %621 = vmatmul.bf16.vlgmr.msra.gmra.mxu0 %v1050_v21  ;;  %v1369_v20 = vld [vmem:[%s2068_s0 + $0x54] sm:$0xf]  ;;  %v1091_v21 = vld [vmem:[%s2068_s0 + $0x64] sm:$0xf0]  ;;  %v1182_v15 = vor.u32 %v1390_v8, %v1179_v9 }
  0x24   :  { %760 = vmatpush.bf16.msrb.mxu3 %v1430_v22  ;;  %813 = vmatpush.bf16.msrb.mxu0 %v1434_v23  ;;  %v1097_v22 = vld [vmem:[%s2068_s0 + $0x58] sm:$0xf]  ;;  %v1372_v23 = vld [vmem:[%s2068_s0 + $0x68] sm:$0xf0]  ;;  %v1393_v11 = vld [vmem:[%s2068_s0 + $0x110] sm:$0xf0] }
  0x26   :  { %712 = vmatpush.bf16.msrb.mxu2 %v1421_v24  ;;  %663 = vmatpush.bf16.msrb.mxu1 %v1413_v25  ;;  %v1370_v24 = vld [vmem:[%s2068_s0 + $0x5c] sm:$0xf]  ;;  %v1099_v25 = vld [vmem:[%s2068_s0 + $0x6c] sm:$0xf0] }
  0x28   :  { %761 = vmatpush.bf16.msrb.mxu3 %v1429_v26  ;;  %814 = vmatpush.bf16.msrb.mxu0 %v1433_v27  ;;  %v1105_v26 = vld [vmem:[%s2068_s0 + $0x60] sm:$0xf]  ;;  %v1373_v27 = vld [vmem:[%s2068_s0 + $0x70] sm:$0xf0] }
  0x2a   :  { %713 = vmatpush.bf16.msrb.mxu2 %v1420_v28  ;;  %664 = vmatpush.bf16.msrb.mxu1 %v1412_v29  ;;  %v1094_v28 = vor.u32 %v1369_v20, %v1091_v21  ;;  %v1098_v29 = vor.u32 %v1372_v23, %v1097_v22  ;;  %v1394_v23 = vld [vmem:[%s2068_s0 + $0x11c] sm:$0xf] }
  0x2c   :  { %762 = vmatpush.bf16.msrb.mxu3 %v1428_v30  ;;  %815 = vmatpush.bf16.msrb.mxu0 %v1432_v31  ;;  %v1102_v30 = vor.u32 %v1370_v24, %v1099_v25  ;;  %v1106_v31 = vor.u32 %v1373_v27, %v1105_v26  ;;  %v1191_v24 = vld [vmem:[%s2068_s0 + $0x12c] sm:$0xf0]  ;;  %v1197_v25 = vld [vmem:[%s2068_s0 + $0x120] sm:$0xf]  ;;  %v1397_v26 = vld [vmem:[%s2068_s0 + $0x130] sm:$0xf0] }
  0x2d   :  { %v1395_v27 = vld [vmem:[%s2068_s0 + $0x124] sm:$0xf] }
  0x2e   :  { %714 = vmatpush.bf16.msrb.mxu2 %v1419_v32  ;;  %665 = vmatpush.bf16.msrb.mxu1 %v1411_v33  ;;  %v1374_v32 = vld [vmem:[%s2068_s0 + $0x7c] sm:$0xf]  ;;  %v1111_v33 = vld [vmem:[%s2068_s0 + $0x8c] sm:$0xf0] }
  0x2f   :  { %v1114_v40 = vor.u32 %v1374_v32, %v1111_v33  ;;  %v1194_v33 = vor.u32 %v1394_v23, %v1191_v24 }
  0x30   :  { %763 = vmatpush.bf16.msrb.mxu3 %v1427_v34  ;;  %816 = vmatpush.bf16.msrb.mxu0 %v1431_v43  ;;  %v1117_v34 = vld [vmem:[%s2068_s0 + $0x80] sm:$0xf]  ;;  %v1126_v43 = vor.u32 %v1378_v39, %v1125_v38 }
  0x31   :  { %636 = vmatmul.bf16.gmra.mxu1 %v1110_v46  ;;  %646 = vmatmul.bf16.gmra.mxu2 %v1150_v47  ;;  %v1118_v41 = vor.u32 %v1377_v35, %v1117_v34  ;;  %v1137_v46 = vld [vmem:[%s2068_s0 + $0xa8] sm:$0xf]  ;;  %v1382_v47 = vld [vmem:[%s2068_s0 + $0xb8] sm:$0xf0]  ;;  %v1198_v34 = vor.u32 %v1397_v26, %v1197_v25 }
  0x32   :  { %715 = vmatpush.bf16.msrb.mxu2 %v1418_v44  ;;  %666 = vmatpush.bf16.msrb.mxu1 %v1410_v45  ;;  %v1379_v44 = vld [vmem:[%s2068_s0 + $0xa4] sm:$0xf]  ;;  %v1131_v45 = vld [vmem:[%s2068_s0 + $0xb4] sm:$0xf0] }
  0x33   :  { %656 = vmatmul.bf16.gmra.mxu3 %v1190_v48  ;;  %626 = vmatmul.bf16.gmra.mxu0 %v1070_v49  ;;  %v1380_v48 = vld [vmem:[%s2068_s0 + $0xac] sm:$0xf]  ;;  %v1139_v49 = vld [vmem:[%s2068_s0 + $0xbc] sm:$0xf0] }
  0x34   :  { %764 = vmatpush.bf16.msrb.mxu3 %v1426_v50  ;;  %v1145_v50 = vld [vmem:[%s2068_s0 + $0xb0] sm:$0xf] }
  0x36   :  { %716 = vmatpush.bf16.msrb.mxu2 %v1417_v51  ;;  %667 = vmatpush.bf16.msrb.mxu1 %v1409_v52  ;;  %v1383_v51 = vld [vmem:[%s2068_s0 + $0xc0] sm:$0xf0]  ;;  %v1134_v52 = vor.u32 %v1379_v44, %v1131_v45 }
  0x38   :  { %765 = vmatpush.bf16.msrb.mxu3 %v1425_v53  ;;  %v1138_v53 = vor.u32 %v1382_v47, %v1137_v46 }
  0x3a   :  { %717 = vmatpush.bf16.msrb.mxu2 %v1416_v54  ;;  %668 = vmatpush.bf16.msrb.mxu1 %v1408_v55  ;;  %v1142_v54 = vor.u32 %v1380_v48, %v1139_v49  ;;  %v1146_v55 = vor.u32 %v1383_v51, %v1145_v50 }
  0x3c   :  { %766 = vmatpush.bf16.msrb.mxu3 %v1424_v56  ;;  %v1384_v56 = vld [vmem:[%s2068_s0 + $0xcc] sm:$0xf] }
  0x3e   :  { %718 = vmatpush.bf16.msrb.mxu2 %v1415_v57  ;;  %669 = vmatpush.bf16.msrb.mxu1 %v1407_v58  ;;  %v1151_v57 = vld [vmem:[%s2068_s0 + $0xdc] sm:$0xf0]  ;;  %v1157_v58 = vld [vmem:[%s2068_s0 + $0xd0] sm:$0xf] }
  0x3f   :  { %v1154_v0 = vor.u32 %v1384_v56, %v1151_v57 }
  0x40   :  { %767 = vmatpush.bf16.msrb.mxu3 %v1423_v59  ;;  %v1387_v59 = vld [vmem:[%s2068_s0 + $0xe0] sm:$0xf0] }
  0x41   :  { %670 = vmatmul.bf16.vlgmr.msrb.gmra.mxu1 %v1054_v4  ;;  %719 = vmatmul.bf16.vlgmr.msrb.gmra.mxu2 %v1058_v5  ;;  %v1158_v1 = vor.u32 %v1387_v59, %v1157_v58  ;;  %v1389_v4 = vld [vmem:[%s2068_s0 + $0xf4] sm:$0xf]  ;;  %v1171_v5 = vld [vmem:[%s2068_s0 + $0x104] sm:$0xf0] }
  0x42   :  { %v1174_v12 = vor.u32 %v1389_v4, %v1171_v5 }
  0x43   :  { %768 = vmatmul.bf16.vlgmr.msrb.gmra.mxu3 %v1062_v6  ;;  %1351 = vmatmul.msk.bf16.vlgmr.msrb.gmra.mxu0 %vm19_vm0, %v1066_v7  ;;  %v1177_v6 = vld [vmem:[%s2068_s0 + $0xf8] sm:$0xf]  ;;  %v1392_v7 = vld [vmem:[%s2068_s0 + $0x108] sm:$0xf0] }
  0x44   :  { %v1178_v13 = vor.u32 %v1392_v7, %v1177_v6 }
  0x51   :  { %675 = vmatmul.bf16.gmra.mxu1 %v1074_v16  ;;  %724 = vmatmul.bf16.gmra.mxu2 %v1078_v17  ;;  %v1186_v16 = vor.u32 %v1393_v11, %v1185_v10 }
  0x53   :  { %773 = vmatmul.bf16.gmra.mxu3 %v1082_v18  ;;  %1352 = vmatmul.msk.bf16.gmra.mxu0 %vm19_vm0, %v1086_v19  ;;  %v1460_v19 = vmov 0.0  }
  0x54   :  { %20 = vst.msk [vmem:[#allocation2] sm:$0xff] %vm19_vm0, %v1460_v19 }
  0x55   :  { %21 = vst.msk [vmem:[#allocation2 + $0x8] sm:$0xff] %vm19_vm0, %v1460_v19 }
  0x56   :  { %22 = vst.msk [vmem:[#allocation2 + $0x10] sm:$0xff] %vm19_vm0, %v1460_v19 }
  0x57   :  { %23 = vst.msk [vmem:[#allocation2 + $0x18] sm:$0xff] %vm19_vm0, %v1460_v19 }
  0x58   :  { %24 = vst.msk [vmem:[#allocation2 + $0x20] sm:$0xff] %vm19_vm0, %v1460_v19 }
  0x59   :  { %25 = vst.msk [vmem:[#allocation2 + $0x28] sm:$0xff] %vm19_vm0, %v1460_v19 }
  0x5a   :  { %26 = vst.msk [vmem:[#allocation2 + $0x30] sm:$0xff] %vm19_vm0, %v1460_v19 }
  0x5b   :  { %27 = vst.msk [vmem:[#allocation2 + $0x38] sm:$0xff] %vm19_vm0, %v1460_v19 }
  0x5c   :  { %28 = vst.msk [vmem:[#allocation2 + $0x40] sm:$0xff] %vm19_vm0, %v1460_v19 }
  0x5d   :  { %29 = vst.msk [vmem:[#allocation2 + $0x48] sm:$0xff] %vm19_vm0, %v1460_v19 }
  0x5e   :  { %30 = vst.msk [vmem:[#allocation2 + $0x50] sm:$0xff] %vm19_vm0, %v1460_v19 }
  0x5f   :  { %31 = vst.msk [vmem:[#allocation2 + $0x58] sm:$0xff] %vm19_vm0, %v1460_v19 }
  0x60   :  { %32 = vst.msk [vmem:[#allocation2 + $0x60] sm:$0xff] %vm19_vm0, %v1460_v19 }
  0x61   :  { %680 = vmatmul.bf16.gmra.mxu1 %v1094_v28  ;;  %729 = vmatmul.bf16.gmra.mxu2 %v1098_v29  ;;  %v1199_v28 = vld [vmem:[%s2068_s0 + $0x134] sm:$0xf0]  ;;  %v1205_v29 = vld [vmem:[%s2068_s0 + $0x128] sm:$0xf]  ;;  %33 = vst.msk [vmem:[#allocation2 + $0x68] sm:$0xff] %vm19_vm0, %v1460_v19 }
  0x62   :  { %v1202_v36 = vor.u32 %v1395_v27, %v1199_v28  ;;  %34 = vst.msk [vmem:[#allocation2 + $0x70] sm:$0xff] %vm19_vm0, %v1460_v19 }
  0x63   :  { %778 = vmatmul.bf16.gmra.mxu3 %v1102_v30  ;;  %1353 = vmatmul.msk.bf16.gmra.mxu0 %vm19_vm0, %v1106_v31  ;;  %v1398_v30 = vld [vmem:[%s2068_s0 + $0x138] sm:$0xf0]  ;;  %35 = vst.msk [vmem:[#allocation2 + $0x78] sm:$0xff] %vm19_vm0, %v1460_v19 }
  0x64   :  { %v1206_v37 = vor.u32 %v1398_v30, %v1205_v29 }
  0x71   :  { %685 = vmatmul.bf16.gmra.mxu1 %v1114_v40  ;;  %734 = vmatmul.bf16.gmra.mxu2 %v1118_v41 }
  0x73   :  { %783 = vmatmul.bf16.gmra.mxu3 %v1122_v42  ;;  %1354 = vmatmul.msk.bf16.gmra.mxu0 %vm19_vm0, %v1126_v43 }
  0x81   :  { %690 = vmatmul.bf16.gmra.mxu1 %v1134_v52  ;;  %739 = vmatmul.bf16.gmra.mxu2 %v1138_v53 }
  0x83   :  { %788 = vmatmul.bf16.gmra.mxu3 %v1142_v54  ;;  %1355 = vmatmul.msk.bf16.gmra.mxu0 %vm19_vm0, %v1146_v55  ;;  %v36_v54 = vld [vmem:[#allocation2] sm:$0xff] }
  0x91   :  { %695 = vmatmul.bf16.gmra.mxu1 %v1154_v0  ;;  %744 = vmatmul.bf16.gmra.mxu2 %v1158_v1  ;;  %v37_v0 = vld [vmem:[#allocation2 + $0x8] sm:$0xff] }
  0x93   :  { %793 = vmatmul.bf16.gmra.mxu3 %v1162_v2  ;;  %1356 = vmatmul.msk.bf16.gmra.mxu0 %vm19_vm0, %v1166_v3 }
  0x9e   :  { %v1816_v14 = vpop.f32.mrf.mxu1 }
  0xa0   :  { %v622_v17 = vpop.f32.mrf.mxu0 }
  0xa1   :  { %700 = vmatmul.bf16.gmra.mxu1 %v1174_v12  ;;  %749 = vmatmul.bf16.gmra.mxu2 %v1178_v13  ;;  %v38_v12 = vld [vmem:[#allocation2 + $0x10] sm:$0xff] }
  0xa3   :  { %798 = vmatmul.bf16.gmra.mxu3 %v1182_v15  ;;  %1357 = vmatmul.msk.bf16.gmra.mxu0 %vm19_vm0, %v1186_v16 }
  0xa4   :  { %v1819_v18 = vpop.f32.mrf.mxu2 }
  0xa6   :  { %v1822_v20 = vpop.f32.mrf.mxu3  ;;  %v1825_v21 = vpop.f32.mrf.mxu1 }
  0xa8   :  { %v624_v22 = vpop.f32.mrf.mxu0 }
  0xac   :  { %v1857_v31 = vpop.f32.mrf.mxu2 }
  0xae   :  { %v1860_v32 = vpop.f32.mrf.mxu3  ;;  %v1863_v35 = vpop.f32.mrf.mxu1 }
  0xb0   :  { %v627_v38 = vpop.f32.mrf.mxu0 }
  0xb1   :  { %705 = vmatmul.bf16.gmra.mxu1 %v1194_v33  ;;  %754 = vmatmul.bf16.gmra.mxu2 %v1198_v34 }
  0xb3   :  { %803 = vmatmul.bf16.gmra.mxu3 %v1202_v36  ;;  %1358 = vmatmul.msk.bf16.gmra.mxu0 %vm19_vm0, %v1206_v37 }
  0xb4   :  { %v1872_v39 = vpop.f32.mrf.mxu2 }
  0xb6   :  { %v1874_v40 = vpop.f32.mrf.mxu3  ;;  %v1876_v41 = vpop.f32.mrf.mxu1 }
  0xb8   :  { %v629_v42 = vpop.f32.mrf.mxu0 }
  0xbc   :  { %v1878_v43 = vpop.f32.mrf.mxu2 }
  0xbe   :  { %v1880_v44 = vpop.f32.mrf.mxu3  ;;  %v671_v45 = vpop.f32.mrf.mxu1 }
  0xbf   :  { %v672_v47 = vadd.f32 %v671_v45, %v622_v17 }
  0xc0   :  { %v818_v46 = vpop.f32.mrf.mxu0 }
  0xc4   :  { %v720_v48 = vpop.f32.mrf.mxu2 }
  0xc5   :  { %v721_v49 = vadd.f32 %v720_v48, %v672_v47 }
  0xc6   :  { %v769_v50 = vpop.f32.mrf.mxu3  ;;  %v673_v51 = vpop.f32.mrf.mxu1 }
  0xc7   :  { %v770_v52 = vadd.f32 %v769_v50, %v721_v49  ;;  %v674_v57 = vadd.f32 %v673_v51, %v624_v22 }
  0xc8   :  { %v820_v53 = vpop.f32.mrf.mxu0 }
  0xc9   :  { %v819_v55 = vadd.f32 %v818_v46, %v770_v52 }
  0xcb   :  { %v858_v56 = vadd.f32 %v819_v55, %v36_v54 }
  0xcc   :  { %v722_v58 = vpop.f32.mrf.mxu2 }
  0xcd   :  { %874 = vst.msk [vmem:[#allocation2] sm:$0xff] %vm19_vm0, %v858_v56  ;;  %v723_v59 = vadd.f32 %v722_v58, %v674_v57 }
  0xce   :  { %v771_v60 = vpop.f32.mrf.mxu3  ;;  %v676_v61 = vpop.f32.mrf.mxu1 }
  0xcf   :  { %v772_v62 = vadd.f32 %v771_v60, %v723_v59  ;;  %v677_v3 = vadd.f32 %v676_v61, %v627_v38  ;;  %v40_v60 = vld [vmem:[#allocation2 + $0x20] sm:$0xff] }
  0xd0   :  { %v823_v63 = vpop.f32.mrf.mxu0 }
  0xd1   :  { %v821_v1 = vadd.f32 %v820_v53, %v772_v62 }
  0xd3   :  { %v859_v2 = vadd.f32 %v821_v1, %v37_v0 }
  0xd4   :  { %v893_v4 = vld [vmem:[#allocation2] sm:$0xff]  ;;  %v725_v5 = vpop.f32.mrf.mxu2 }
  0xd5   :  { %v909_v6 = vpack.c.bf16 %v893_v4, %v893_v4  ;;  %875 = vst.msk [vmem:[#allocation2 + $0x8] sm:$0xff] %vm19_vm0, %v859_v2  ;;  %v726_v7 = vadd.f32 %v725_v5, %v677_v3  ;;  %v981_v15 = vmul.f32 %v893_v4, %v893_v4  ;;  %v942_v19 = vsel %vm19_vm0, %v893_v4, 0.0 }
  0xd6   :  { %v774_v8 = vpop.f32.mrf.mxu3  ;;  %v678_v9 = vpop.f32.mrf.mxu1 }
  0xd7   :  { %926 = vst.msk [vmem:[%s2069_s2] sm:$0xf] %vm925_vm1, %v909_v6  ;;  %v775_v10 = vadd.f32 %v774_v8, %v726_v7  ;;  %v679_v17 = vadd.f32 %v678_v9, %v629_v42  ;;  %v997_v33 = vsel %vm19_vm0, %v981_v15, 0.0  ;;  %v39_v42 = vld [vmem:[#allocation2 + $0x18] sm:$0xff] }
  0xd8   :  { %v825_v11 = vpop.f32.mrf.mxu0 }
  0xd9   :  { %v824_v13 = vadd.f32 %v823_v63, %v775_v10 }
  0xdb   :  { %v860_v16 = vadd.f32 %v824_v13, %v38_v12  ;;  %v41_v12 = vld [vmem:[#allocation2 + $0x28] sm:$0xff] }
  0xdc   :  { %v894_v22 = vld [vmem:[#allocation2 + $0x8] sm:$0xff]  ;;  %v727_v23 = vpop.f32.mrf.mxu2 }
  0xdd   :  { %v910_v24 = vpack.c.bf16 %v894_v22, %v894_v22  ;;  %v943_v25 = vsel %vm19_vm0, %v894_v22, 0.0  ;;  %v982_v26 = vmul.f32 %v894_v22, %v894_v22  ;;  %876 = vst.msk [vmem:[#allocation2 + $0x10] sm:$0xff] %vm19_vm0, %v860_v16  ;;  %v728_v27 = vadd.f32 %v727_v23, %v679_v17 }
  0xde   :  { %v776_v28 = vpop.f32.mrf.mxu3  ;;  %v944_v29 = vadd.f32 %v943_v25, %v942_v19  ;;  %v681_v30 = vpop.f32.mrf.mxu1 }
  0xdf   :  { %927 = vst.msk [vmem:[%s2069_s2 + $0x4] sm:$0xf] %vm925_vm1, %v910_v24  ;;  %v998_v34 = vsel %vm19_vm0, %v982_v26, 0.0  ;;  %v777_v36 = vadd.f32 %v776_v28, %v728_v27  ;;  %v682_v47 = vadd.f32 %v681_v30, %v1816_v14 }
  0xe0   :  { %v828_v37 = vpop.f32.mrf.mxu0  ;;  %v999_v38 = vadd.f32 %v998_v34, %v997_v33  ;;  %v42_v34 = vld [vmem:[#allocation2 + $0x30] sm:$0xff] }
  0xe1   :  { %v826_v45 = vadd.f32 %v825_v11, %v777_v36 }
  0xe3   :  { %v861_v46 = vadd.f32 %v826_v45, %v39_v42 }
  0xe4   :  { %v895_v48 = vld [vmem:[#allocation2 + $0x10] sm:$0xff]  ;;  %v730_v49 = vpop.f32.mrf.mxu2 }
  0xe5   :  { %v911_v50 = vpack.c.bf16 %v895_v48, %v895_v48  ;;  %v945_v51 = vsel %vm19_vm0, %v895_v48, 0.0  ;;  %v983_v52 = vmul.f32 %v895_v48, %v895_v48  ;;  %877 = vst.msk [vmem:[#allocation2 + $0x18] sm:$0xff] %vm19_vm0, %v861_v46  ;;  %v731_v53 = vadd.f32 %v730_v49, %v682_v47 }
  0xe6   :  { %v779_v54 = vpop.f32.mrf.mxu3  ;;  %v946_v55 = vadd.f32 %v945_v51, %v944_v29  ;;  %v683_v56 = vpop.f32.mrf.mxu1 }
  0xe7   :  { %928 = vst.msk [vmem:[%s2069_s2 + $0x8] sm:$0xf] %vm925_vm1, %v911_v50  ;;  %v1000_v57 = vsel %vm19_vm0, %v983_v52, 0.0  ;;  %v780_v14 = vadd.f32 %v779_v54, %v731_v53  ;;  %v684_v63 = vadd.f32 %v683_v56, %v1825_v21  ;;  %v43_v52 = vld [vmem:[#allocation2 + $0x38] sm:$0xff] }
  0xe8   :  { %v830_v58 = vpop.f32.mrf.mxu0  ;;  %v1001_v59 = vadd.f32 %v1000_v57, %v999_v38 }
  0xe9   :  { %v829_v61 = vadd.f32 %v828_v37, %v780_v14 }
  0xeb   :  { %v862_v62 = vadd.f32 %v829_v61, %v40_v60 }
  0xec   :  { %v896_v0 = vld [vmem:[#allocation2 + $0x18] sm:$0xff]  ;;  %v732_v1 = vpop.f32.mrf.mxu2 }
  0xed   :  { %v912_v2 = vpack.c.bf16 %v896_v0, %v896_v0  ;;  %v947_v3 = vsel %vm19_vm0, %v896_v0, 0.0  ;;  %v984_v4 = vmul.f32 %v896_v0, %v896_v0  ;;  %878 = vst.msk [vmem:[#allocation2 + $0x20] sm:$0xff] %vm19_vm0, %v862_v62  ;;  %v733_v5 = vadd.f32 %v732_v1, %v684_v63  ;;  %v44_v62 = vld [vmem:[#allocation2 + $0x40] sm:$0xff] }
  0xee   :  { %v781_v6 = vpop.f32.mrf.mxu3  ;;  %v948_v7 = vadd.f32 %v947_v3, %v946_v55  ;;  %v686_v8 = vpop.f32.mrf.mxu1 }
  0xef   :  { %929 = vst.msk [vmem:[%s2069_s2 + $0xc] sm:$0xf] %vm925_vm1, %v912_v2  ;;  %v1002_v9 = vsel %vm19_vm0, %v984_v4, 0.0  ;;  %v782_v21 = vadd.f32 %v781_v6, %v733_v5  ;;  %v687_v16 = vadd.f32 %v686_v8, %v1863_v35 }
  0xf0   :  { %v833_v10 = vpop.f32.mrf.mxu0  ;;  %v1003_v11 = vadd.f32 %v1002_v9, %v1001_v59  ;;  %v45_v9 = vld [vmem:[#allocation2 + $0x48] sm:$0xff] }
  0xf1   :  { %v831_v13 = vadd.f32 %v830_v58, %v782_v21 }
  0xf3   :  { %v863_v15 = vadd.f32 %v831_v13, %v41_v12 }
  0xf4   :  { %v897_v17 = vld [vmem:[#allocation2 + $0x20] sm:$0xff]  ;;  %v735_v19 = vpop.f32.mrf.mxu2 }
  0xf5   :  { %v913_v22 = vpack.c.bf16 %v897_v17, %v897_v17  ;;  %v949_v23 = vsel %vm19_vm0, %v897_v17, 0.0  ;;  %v985_v24 = vmul.f32 %v897_v17, %v897_v17  ;;  %879 = vst.msk [vmem:[#allocation2 + $0x28] sm:$0xff] %vm19_vm0, %v863_v15  ;;  %v736_v25 = vadd.f32 %v735_v19, %v687_v16 }
  0xf6   :  { %v784_v26 = vpop.f32.mrf.mxu3  ;;  %v1916_v27 = vadd.f32 %v949_v23, %v948_v7  ;;  %v688_v28 = vpop.f32.mrf.mxu1 }
  0xf7   :  { %930 = vst.msk [vmem:[%s2069_s2 + $0x10] sm:$0xf] %vm925_vm1, %v913_v22  ;;  %v1004_v35 = vsel %vm19_vm0, %v985_v24, 0.0  ;;  %v785_v29 = vadd.f32 %v784_v26, %v736_v25  ;;  %v689_v38 = vadd.f32 %v688_v28, %v1876_v41  ;;  %v46_v22 = vld [vmem:[#allocation2 + $0x50] sm:$0xff] }
  0xf8   :  { %v835_v30 = vpop.f32.mrf.mxu0  ;;  %v1923_v33 = vadd.f32 %v1004_v35, %v1003_v11 }
  0xf9   :  { %v834_v36 = vadd.f32 %v833_v10, %v785_v29 }
  0xfb   :  { %v864_v37 = vadd.f32 %v834_v36, %v42_v34 }
  0xfc   :  { %v1926_v42 = vld [vmem:[#allocation2 + $0x28] sm:$0xff]  ;;  %v737_v45 = vpop.f32.mrf.mxu2 }
  0xfd   :  { %v914_v46 = vpack.c.bf16 %v1926_v42, %v1926_v42  ;;  %880 = vst.msk [vmem:[#allocation2 + $0x30] sm:$0xff] %vm19_vm0, %v864_v37  ;;  %v738_v47 = vadd.f32 %v737_v45, %v689_v38  ;;  %v47_v37 = vld [vmem:[#allocation2 + $0x58] sm:$0xff] }
  0xfe   :  { %v786_v48 = vpop.f32.mrf.mxu3  ;;  %v691_v49 = vpop.f32.mrf.mxu1 }
  0xff   :  { %931 = vst.msk [vmem:[%s2069_s2 + $0x14] sm:$0xf] %vm925_vm1, %v914_v46  ;;  %v787_v50 = vadd.f32 %v786_v48, %v738_v47  ;;  %v692_v54 = vadd.f32 %v691_v49, %v1819_v18 }
 0x100   :  { %v838_v51 = vpop.f32.mrf.mxu0 }
 0x101   :  { %v836_v41 = vadd.f32 %v835_v30, %v787_v50 }
 0x103   :  { %v865_v53 = vadd.f32 %v836_v41, %v43_v52 }
 0x104   :  { %v1936_v55 = vld [vmem:[#allocation2 + $0x30] sm:$0xff]  ;;  %v740_v56 = vpop.f32.mrf.mxu2 }
 0x105   :  { %v915_v57 = vpack.c.bf16 %v1936_v55, %v1936_v55  ;;  %881 = vst.msk [vmem:[#allocation2 + $0x38] sm:$0xff] %vm19_vm0, %v865_v53  ;;  %v741_v14 = vadd.f32 %v740_v56, %v692_v54  ;;  %v48_v53 = vld [vmem:[#allocation2 + $0x60] sm:$0xff] }
 0x106   :  { %v789_v58 = vpop.f32.mrf.mxu3  ;;  %v693_v59 = vpop.f32.mrf.mxu1 }
 0x107   :  { %932 = vst.msk [vmem:[%s2069_s2 + $0x18] sm:$0xf] %vm925_vm1, %v915_v57  ;;  %v790_v60 = vadd.f32 %v789_v58, %v741_v14  ;;  %v694_v0 = vadd.f32 %v693_v59, %v1857_v31 }
 0x108   :  { %v840_v61 = vpop.f32.mrf.mxu0 }
 0x109   :  { %v839_v18 = vadd.f32 %v838_v51, %v790_v60 }
 0x10b   :  { %v866_v63 = vadd.f32 %v839_v18, %v44_v62 }
 0x10c   :  { %v1946_v1 = vld [vmem:[#allocation2 + $0x38] sm:$0xff]  ;;  %v742_v2 = vpop.f32.mrf.mxu2 }
 0x10d   :  { %v916_v3 = vpack.c.bf16 %v1946_v1, %v1946_v1  ;;  %882 = vst.msk [vmem:[#allocation2 + $0x40] sm:$0xff] %vm19_vm0, %v866_v63  ;;  %v743_v4 = vadd.f32 %v742_v2, %v694_v0  ;;  %v49_v63 = vld [vmem:[#allocation2 + $0x68] sm:$0xff] }
 0x10e   :  { %v791_v5 = vpop.f32.mrf.mxu3  ;;  %v696_v6 = vpop.f32.mrf.mxu1 }
 0x10f   :  { %933 = vst.msk [vmem:[%s2069_s2 + $0x1c] sm:$0xf] %vm925_vm1, %v916_v3  ;;  %v792_v7 = vadd.f32 %v791_v5, %v743_v4  ;;  %v697_v10 = vadd.f32 %v696_v6, %v1872_v39  ;;  %v986_v5 = vmul.f32 %v1926_v42, %v1926_v42 }
 0x110   :  { %v843_v8 = vpop.f32.mrf.mxu0 }
 0x111   :  { %v841_v31 = vadd.f32 %v840_v61, %v792_v7 }
 0x113   :  { %v867_v21 = vadd.f32 %v841_v31, %v45_v9  ;;  %v987_v9 = vmul.f32 %v1936_v55, %v1936_v55 }
 0x114   :  { %v1956_v11 = vld [vmem:[#allocation2 + $0x40] sm:$0xff]  ;;  %v745_v12 = vpop.f32.mrf.mxu2 }
 0x115   :  { %v917_v13 = vpack.c.bf16 %v1956_v11, %v1956_v11  ;;  %883 = vst.msk [vmem:[#allocation2 + $0x48] sm:$0xff] %vm19_vm0, %v867_v21  ;;  %v746_v15 = vadd.f32 %v745_v12, %v697_v10  ;;  %v951_v21 = vsel %vm19_vm0, %v1926_v42, 0.0  ;;  %v988_v10 = vmul.f32 %v1946_v1, %v1946_v1  ;;  %v50_v12 = vld [vmem:[#allocation2 + $0x70] sm:$0xff] }
 0x116   :  { %v794_v16 = vpop.f32.mrf.mxu3  ;;  %v698_v17 = vpop.f32.mrf.mxu1  ;;  %v1008_v42 = vsel %vm19_vm0, %v987_v9, 0.0 }
 0x117   :  { %934 = vst.msk [vmem:[%s2069_s2 + $0x20] sm:$0xf] %vm925_vm1, %v917_v13  ;;  %v795_v19 = vadd.f32 %v794_v16, %v746_v15  ;;  %v699_v25 = vadd.f32 %v698_v17, %v1878_v43  ;;  %v1006_v15 = vsel %vm19_vm0, %v986_v5, 0.0  ;;  %v953_v16 = vsel %vm19_vm0, %v1936_v55, 0.0 }
 0x118   :  { %v845_v23 = vpop.f32.mrf.mxu0 }
 0x119   :  { %v844_v39 = vadd.f32 %v843_v8, %v795_v19  ;;  %v952_v19 = vadd.f32 %v951_v21, %v1916_v27  ;;  %v957_v27 = vsel %vm19_vm0, %v1956_v11, 0.0 }
 0x11b   :  { %v868_v24 = vadd.f32 %v844_v39, %v46_v22  ;;  %v955_v22 = vsel %vm19_vm0, %v1946_v1, 0.0 }
 0x11c   :  { %v1966_v26 = vld [vmem:[#allocation2 + $0x48] sm:$0xff]  ;;  %v747_v28 = vpop.f32.mrf.mxu2 }
 0x11d   :  { %v918_v35 = vpack.c.bf16 %v1966_v26, %v1966_v26  ;;  %884 = vst.msk [vmem:[#allocation2 + $0x50] sm:$0xff] %vm19_vm0, %v868_v24  ;;  %v748_v29 = vadd.f32 %v747_v28, %v699_v25  ;;  %v1007_v25 = vadd.f32 %v1006_v15, %v1923_v33  ;;  %v954_v28 = vadd.f32 %v953_v16, %v952_v19 }
 0x11e   :  { %v796_v30 = vpop.f32.mrf.mxu3  ;;  %v701_v34 = vpop.f32.mrf.mxu1 }
 0x11f   :  { %935 = vst.msk [vmem:[%s2069_s2 + $0x24] sm:$0xf] %vm925_vm1, %v918_v35  ;;  %v797_v36 = vadd.f32 %v796_v30, %v748_v29  ;;  %v702_v46 = vadd.f32 %v701_v34, %v1822_v20  ;;  %v1010_v35 = vsel %vm19_vm0, %v988_v10, 0.0  ;;  %v990_v30 = vmul.f32 %v1966_v26, %v1966_v26 }
 0x120   :  { %v848_v43 = vpop.f32.mrf.mxu0 }
 0x121   :  { %v846_v38 = vadd.f32 %v845_v23, %v797_v36  ;;  %v989_v23 = vmul.f32 %v1956_v11, %v1956_v11  ;;  %v1009_v36 = vadd.f32 %v1008_v42, %v1007_v25 }
 0x123   :  { %v869_v45 = vadd.f32 %v846_v38, %v47_v37  ;;  %v956_v37 = vadd.f32 %v955_v22, %v954_v28  ;;  %v1012_v33 = vsel %vm19_vm0, %v989_v23, 0.0  ;;  %v959_v38 = vsel %vm19_vm0, %v1966_v26, 0.0 }
 0x124   :  { %v1976_v47 = vld [vmem:[#allocation2 + $0x50] sm:$0xff]  ;;  %v750_v48 = vpop.f32.mrf.mxu2 }
 0x125   :  { %v919_v49 = vpack.c.bf16 %v1976_v47, %v1976_v47  ;;  %885 = vst.msk [vmem:[#allocation2 + $0x58] sm:$0xff] %vm19_vm0, %v869_v45  ;;  %v751_v50 = vadd.f32 %v750_v48, %v702_v46  ;;  %v1011_v45 = vadd.f32 %v1010_v35, %v1009_v36  ;;  %v958_v46 = vadd.f32 %v957_v27, %v956_v37 }
 0x126   :  { %v799_v51 = vpop.f32.mrf.mxu3  ;;  %v703_v52 = vpop.f32.mrf.mxu1 }
 0x127   :  { %936 = vst.msk [vmem:[%s2069_s2 + $0x28] sm:$0xf] %vm925_vm1, %v919_v49  ;;  %v800_v41 = vadd.f32 %v799_v51, %v751_v50  ;;  %v704_v56 = vadd.f32 %v703_v52, %v1860_v32  ;;  %v51_v49 = vld [vmem:[#allocation2 + $0x78] sm:$0xff]  ;;  %v1014_v50 = vsel %vm19_vm0, %v990_v30, 0.0  ;;  %v961_v51 = vsel %vm19_vm0, %v1976_v47, 0.0 }
 0x128   :  { %v850_v14 = vpop.f32.mrf.mxu0 }
 0x129   :  { %v849_v54 = vadd.f32 %v848_v43, %v800_v41  ;;  %v991_v43 = vmul.f32 %v1976_v47, %v1976_v47  ;;  %v1013_v41 = vadd.f32 %v1012_v33, %v1011_v45 }
 0x12b   :  { %v870_v20 = vadd.f32 %v849_v54, %v48_v53  ;;  %v960_v53 = vadd.f32 %v959_v38, %v958_v46  ;;  %v1016_v54 = vsel %vm19_vm0, %v991_v43, 0.0 }
 0x12c   :  { %v1986_v57 = vld [vmem:[#allocation2 + $0x58] sm:$0xff]  ;;  %v752_v58 = vpop.f32.mrf.mxu2 }
 0x12d   :  { %v920_v59 = vpack.c.bf16 %v1986_v57, %v1986_v57  ;;  %886 = vst.msk [vmem:[#allocation2 + $0x60] sm:$0xff] %vm19_vm0, %v870_v20  ;;  %v753_v60 = vadd.f32 %v752_v58, %v704_v56  ;;  %v992_v26 = vmul.f32 %v1986_v57, %v1986_v57  ;;  %v963_v20 = vsel %vm19_vm0, %v1986_v57, 0.0 }
 0x12e   :  { %v801_v61 = vpop.f32.mrf.mxu3  ;;  %v706_v62 = vpop.f32.mrf.mxu1  ;;  %v1015_v58 = vadd.f32 %v1014_v50, %v1013_v41 }
 0x12f   :  { %937 = vst.msk [vmem:[%s2069_s2 + $0x2c] sm:$0xf] %vm925_vm1, %v920_v59  ;;  %v802_v18 = vadd.f32 %v801_v61, %v753_v60  ;;  %v707_v2 = vadd.f32 %v706_v62, %v1874_v40  ;;  %v962_v59 = vadd.f32 %v961_v51, %v960_v53  ;;  %v1018_v61 = vsel %vm19_vm0, %v992_v26, 0.0 }
 0x130   :  { %v853_v31 = vpop.f32.mrf.mxu0 }
 0x131   :  { %v851_v32 = vadd.f32 %v850_v14, %v802_v18 }
 0x133   :  { %v871_v0 = vadd.f32 %v851_v32, %v49_v63  ;;  %v1017_v63 = vadd.f32 %v1016_v54, %v1015_v58  ;;  %v964_v32 = vadd.f32 %v963_v20, %v962_v59 }
 0x134   :  { %v905_v3 = vld [vmem:[#allocation2 + $0x60] sm:$0xff]  ;;  %v755_v4 = vpop.f32.mrf.mxu2 }
 0x135   :  { %v921_v6 = vpack.c.bf16 %v905_v3, %v905_v3  ;;  %887 = vst.msk [vmem:[#allocation2 + $0x68] sm:$0xff] %vm19_vm0, %v871_v0  ;;  %v756_v7 = vadd.f32 %v755_v4, %v707_v2  ;;  %v993_v56 = vmul.f32 %v905_v3, %v905_v3  ;;  %v965_v47 = vsel %vm19_vm0, %v905_v3, 0.0 }
 0x136   :  { %v804_v8 = vpop.f32.mrf.mxu3  ;;  %v708_v13 = vpop.f32.mrf.mxu1  ;;  %v1019_v4 = vadd.f32 %v1018_v61, %v1017_v63  ;;  %v966_v5 = vadd.f32 %v965_v47, %v964_v32 }
 0x137   :  { %938 = vst.msk [vmem:[%s2069_s2 + $0x30] sm:$0xf] %vm925_vm1, %v921_v6  ;;  %v805_v40 = vadd.f32 %v804_v8, %v756_v7  ;;  %v709_v24 = vadd.f32 %v708_v13, %v1880_v44  ;;  %v1020_v0 = vsel %vm19_vm0, %v993_v56, 0.0 }
 0x138   :  { %v855_v48 = vpop.f32.mrf.mxu0  ;;  %v1021_v7 = vadd.f32 %v1020_v0, %v1019_v4 }
 0x139   :  { %v854_v17 = vadd.f32 %v853_v31, %v805_v40 }
 0x13b   :  { %v872_v39 = vadd.f32 %v854_v17, %v50_v12 }
 0x13c   :  { %v906_v55 = vld [vmem:[#allocation2 + $0x68] sm:$0xff]  ;;  %v757_v29 = vpop.f32.mrf.mxu2 }
 0x13d   :  { %v922_v1 = vpack.c.bf16 %v906_v55, %v906_v55  ;;  %888 = vst.msk [vmem:[#allocation2 + $0x70] sm:$0xff] %vm19_vm0, %v872_v39  ;;  %v758_v34 = vadd.f32 %v757_v29, %v709_v24  ;;  %v994_v62 = vmul.f32 %v906_v55, %v906_v55  ;;  %v967_v2 = vsel %vm19_vm0, %v906_v55, 0.0 }
 0x13e   :  { %v806_v44 = vpop.f32.mrf.mxu3  ;;  %v968_v8 = vadd.f32 %v967_v2, %v966_v5 }
 0x13f   :  { %939 = vst.msk [vmem:[%s2069_s2 + $0x34] sm:$0xf] %vm925_vm1, %v922_v1  ;;  %v807_v11 = vadd.f32 %v806_v44, %v758_v34  ;;  %v1022_v3 = vsel %vm19_vm0, %v994_v62, 0.0 }
 0x140   :  { %v1023_v31 = vadd.f32 %v1022_v3, %v1021_v7 }
 0x141   :  { %v856_v52 = vadd.f32 %v855_v48, %v807_v11 }
 0x143   :  { %v873_v14 = vadd.f32 %v856_v52, %v51_v49 }
 0x144   :  { %v907_v60 = vld [vmem:[#allocation2 + $0x70] sm:$0xff] }
 0x145   :  { %v923_v18 = vpack.c.bf16 %v907_v60, %v907_v60  ;;  %889 = vst.msk [vmem:[#allocation2 + $0x78] sm:$0xff] %vm19_vm0, %v873_v14  ;;  %v995_v57 = vmul.f32 %v907_v60, %v907_v60  ;;  %v969_v6 = vsel %vm19_vm0, %v907_v60, 0.0 }
 0x146   :  { %v970_v21 = vadd.f32 %v969_v6, %v968_v8 }
 0x147   :  { %940 = vst.msk [vmem:[%s2069_s2 + $0x38] sm:$0xf] %vm925_vm1, %v923_v18  ;;  %v1024_v9 = vsel %vm19_vm0, %v995_v57, 0.0 }
 0x148   :  { %v1025_v15 = vadd.f32 %v1024_v9, %v1023_v31 }
 0x14c   :  { %v908_v40 = vld [vmem:[#allocation2 + $0x78] sm:$0xff] }
 0x14d   :  { %v924_v10 = vpack.c.bf16 %v908_v40, %v908_v40  ;;  %v971_v12 = vsel %vm19_vm0, %v908_v40, 0.0  ;;  %v996_v13 = vmul.f32 %v908_v40, %v908_v40 }
 0x14e   :  { %v972_v16 = vadd.f32 %v971_v12, %v970_v21 }
 0x14f   :  { %941 = vst.msk [vmem:[%s2069_s2 + $0x3c] sm:$0xf] %vm925_vm1, %v924_v10  ;;  %v1026_v17 = vsel %vm19_vm0, %v996_v13, 0.0 }
 0x150   :  { %v973_v19 = vrot.slane %v972_v16, 4  ;;  %v1027_v42 = vadd.f32 %v1026_v17, %v1025_v15 }
 0x152   :  { %v974_v22 = vadd.f32 %v973_v19, %v972_v16  ;;  %v1028_v23 = vrot.slane %v1027_v42, 4 }
 0x154   :  { %v975_v39 = vrot.slane %v974_v22, 2  ;;  %v1029_v24 = vadd.f32 %v1028_v23, %v1027_v42 }
 0x156   :  { %v976_v25 = vadd.f32 %v975_v39, %v974_v22  ;;  %v1030_v28 = vrot.slane %v1029_v24, 2 }
 0x158   :  { %v977_v35 = vrot.slane %v976_v25, 1  ;;  %v1031_v55 = vadd.f32 %v1030_v28, %v1029_v24 }
 0x15a   :  { %v978_v29 = vadd.f32 %v977_v35, %v976_v25  ;;  %v1032_v27 = vrot.slane %v1031_v55, 1 }
 0x15c   :  { %980 = vst.msk [vmem:[%s2070_s3] sm:$0x1] %vm979_vm2, %v978_v29  ;;  %v1033_v30 = vadd.f32 %v1032_v27, %v1031_v55 }
 0x15e   :  { %1034 = vst.msk [vmem:[%s2071_s4] sm:$0x1] %vm979_vm2, %v1033_v30 }

// kernel: resnet_forward.26
= control target key start
LH: loop header
LB: loop body
LE: loop exit
PB: predicated region body
PF: predicated region fallthrough
CT: control target
= control target key end

     0   :  { %vm118_vm0 = vcmask 519168   ;;  %s330_s0 = inlined_call_operand.vmem [shape: bf16[128,64], index: 0, kind: input, shape index: {}]   ;;  %s331_s1 = inlined_call_operand.vmem [shape: f32[1,64], index: 1, kind: input, shape index: {}]   ;;  %s332_s2 = inlined_call_operand.vmem [shape: f32[1,64], index: 2, kind: input, shape index: {}]   ;;  %s333_s3 = inlined_call_operand.vmem [shape: bf16[128,64], index: 3, kind: output, shape index: {}]  }
   0x1   :  { %v140_v0 = vld [vmem:[%s330_s0] sm:$0xff]   ;;  %v171_v5 = vld [vmem:[%s330_s0 + $0x8] sm:$0xff]   ;;  %v172_v8 = vld [vmem:[%s330_s0 + $0x10] sm:$0xff]  }
   0x2   :  { %v206_v1 = vld [vmem:[%s331_s1] ss:$0 sm:$0xff]  ;;  %v141_v2 = vunpack.c.l.bf16 %v140_v0  ;;  %v142_v4 = vunpack.c.h.bf16 %v140_v0  ;;  %v145_v6 = vunpack.c.l.bf16 %v171_v5  ;;  %v146_v7 = vunpack.c.h.bf16 %v171_v5  ;;  %v173_v9 = vld [vmem:[%s330_s0 + $0x18] sm:$0xff]   ;;  %v175_v39 = vld [vmem:[%s330_s0 + $0x28] sm:$0xff]  }
   0x3   :  { %v211_v3 = vld [vmem:[%s332_s2] ss:$0 sm:$0xff]  ;;  %v149_v12 = vunpack.c.l.bf16 %v172_v8  ;;  %v150_v13 = vunpack.c.h.bf16 %v172_v8  ;;  %v153_v16 = vunpack.c.l.bf16 %v173_v9  ;;  %v154_v17 = vunpack.c.h.bf16 %v173_v9  ;;  %v176_v44 = vld [vmem:[%s330_s0 + $0x30] sm:$0xff]   ;;  %v177_v49 = vld [vmem:[%s330_s0 + $0x38] sm:$0xff]  }
   0x4   :  { %v50_v10 = vmul.f32 %v206_v1, %v141_v2  ;;  %v51_v11 = vmul.f32 %v206_v1, %v142_v4  ;;  %v52_v14 = vmul.f32 %v206_v1, %v145_v6  ;;  %v53_v15 = vmul.f32 %v206_v1, %v146_v7  ;;  %v174_v34 = vld [vmem:[%s330_s0 + $0x20] sm:$0xff]  }
   0x5   :  { %v54_v20 = vmul.f32 %v206_v1, %v149_v12  ;;  %v55_v21 = vmul.f32 %v206_v1, %v150_v13  ;;  %v56_v24 = vmul.f32 %v206_v1, %v153_v16  ;;  %v57_v25 = vmul.f32 %v206_v1, %v154_v17 }
   0x6   :  { %v70_v18 = vadd.f32 %v211_v3, %v50_v10  ;;  %v71_v19 = vadd.f32 %v211_v3, %v51_v11  ;;  %v72_v22 = vadd.f32 %v211_v3, %v52_v14  ;;  %v73_v23 = vadd.f32 %v211_v3, %v53_v15 }
   0x7   :  { %v74_v28 = vadd.f32 %v211_v3, %v54_v20  ;;  %v75_v29 = vadd.f32 %v211_v3, %v55_v21  ;;  %v76_v32 = vadd.f32 %v211_v3, %v56_v24  ;;  %v77_v33 = vadd.f32 %v211_v3, %v57_v25 }
   0x8   :  { %v86_v26 = vmax.f32 %v70_v18, 0.0  ;;  %v87_v27 = vmax.f32 %v71_v19, 0.0  ;;  %v88_v30 = vmax.f32 %v72_v22, 0.0  ;;  %v89_v31 = vmax.f32 %v73_v23, 0.0 }
   0x9   :  { %v90_v37 = vmax.f32 %v74_v28, 0.0  ;;  %v91_v38 = vmax.f32 %v75_v29, 0.0  ;;  %v92_v42 = vmax.f32 %v76_v32, 0.0  ;;  %v93_v43 = vmax.f32 %v77_v33, 0.0 }
   0xa   :  { %v102_v35 = vpack.c.bf16 %v86_v26, %v86_v26  ;;  %v103_v36 = vpack.c.bf16 %v87_v27, %v87_v27  ;;  %v104_v40 = vpack.c.bf16 %v88_v30, %v88_v30  ;;  %v105_v41 = vpack.c.bf16 %v89_v31, %v89_v31 }
   0xb   :  { %v106_v45 = vpack.c.bf16 %v90_v37, %v90_v37  ;;  %v107_v46 = vpack.c.bf16 %v91_v38, %v91_v38  ;;  %v157_v47 = vunpack.c.l.bf16 %v174_v34  ;;  %v158_v48 = vunpack.c.h.bf16 %v174_v34 }
   0xc   :  { %119 = vst.msk [vmem:[%s333_s3] sm:$0xf] %vm118_vm0, %v102_v35  ;;  %v108_v50 = vpack.c.bf16 %v92_v42, %v92_v42  ;;  %v109_v51 = vpack.c.bf16 %v93_v43, %v93_v43  ;;  %v161_v52 = vunpack.c.l.bf16 %v175_v39  ;;  %v162_v53 = vunpack.c.h.bf16 %v175_v39 }
   0xd   :  { %120 = vst.msk [vmem:[%s333_s3 + $0x4] sm:$0xf] %vm118_vm0, %v103_v36  ;;  %v58_v54 = vmul.f32 %v206_v1, %v157_v47  ;;  %v59_v55 = vmul.f32 %v206_v1, %v158_v48  ;;  %v165_v56 = vunpack.c.l.bf16 %v176_v44  ;;  %v166_v57 = vunpack.c.h.bf16 %v176_v44 }
   0xe   :  { %121 = vst.msk [vmem:[%s333_s3 + $0x8] sm:$0xf] %vm118_vm0, %v104_v40  ;;  %v60_v58 = vmul.f32 %v206_v1, %v161_v52  ;;  %v61_v59 = vmul.f32 %v206_v1, %v162_v53  ;;  %v169_v60 = vunpack.c.l.bf16 %v177_v49  ;;  %v170_v61 = vunpack.c.h.bf16 %v177_v49 }
   0xf   :  { %122 = vst.msk [vmem:[%s333_s3 + $0xc] sm:$0xf] %vm118_vm0, %v105_v41  ;;  %v78_v62 = vadd.f32 %v211_v3, %v58_v54  ;;  %v79_v63 = vadd.f32 %v211_v3, %v59_v55  ;;  %v62_v0 = vmul.f32 %v206_v1, %v165_v56  ;;  %v63_v2 = vmul.f32 %v206_v1, %v166_v57 }
  0x10   :  { %123 = vst.msk [vmem:[%s333_s3 + $0x10] sm:$0xf] %vm118_vm0, %v106_v45  ;;  %v80_v4 = vadd.f32 %v211_v3, %v60_v58  ;;  %v81_v5 = vadd.f32 %v211_v3, %v61_v59  ;;  %v64_v6 = vmul.f32 %v206_v1, %v169_v60  ;;  %v65_v7 = vmul.f32 %v206_v1, %v170_v61 }
  0x11   :  { %124 = vst.msk [vmem:[%s333_s3 + $0x14] sm:$0xf] %vm118_vm0, %v107_v46  ;;  %v94_v8 = vmax.f32 %v78_v62, 0.0  ;;  %v95_v9 = vmax.f32 %v79_v63, 0.0  ;;  %v82_v10 = vadd.f32 %v211_v3, %v62_v0  ;;  %v83_v11 = vadd.f32 %v211_v3, %v63_v2 }
  0x12   :  { %125 = vst.msk [vmem:[%s333_s3 + $0x18] sm:$0xf] %vm118_vm0, %v108_v50  ;;  %v96_v12 = vmax.f32 %v80_v4, 0.0  ;;  %v97_v13 = vmax.f32 %v81_v5, 0.0  ;;  %v84_v1 = vadd.f32 %v211_v3, %v64_v6  ;;  %v85_v14 = vadd.f32 %v211_v3, %v65_v7 }
  0x13   :  { %126 = vst.msk [vmem:[%s333_s3 + $0x1c] sm:$0xf] %vm118_vm0, %v109_v51  ;;  %v110_v15 = vpack.c.bf16 %v94_v8, %v94_v8  ;;  %v111_v16 = vpack.c.bf16 %v95_v9, %v95_v9  ;;  %v98_v17 = vmax.f32 %v82_v10, 0.0  ;;  %v99_v18 = vmax.f32 %v83_v11, 0.0 }
  0x14   :  { %v112_v19 = vpack.c.bf16 %v96_v12, %v96_v12  ;;  %v113_v20 = vpack.c.bf16 %v97_v13, %v97_v13  ;;  %v100_v21 = vmax.f32 %v84_v1, 0.0  ;;  %v101_v22 = vmax.f32 %v85_v14, 0.0 }
  0x15   :  { %127 = vst.msk [vmem:[%s333_s3 + $0x20] sm:$0xf] %vm118_vm0, %v110_v15  ;;  %v114_v23 = vpack.c.bf16 %v98_v17, %v98_v17  ;;  %v115_v3 = vpack.c.bf16 %v99_v18, %v99_v18 }
  0x16   :  { %128 = vst.msk [vmem:[%s333_s3 + $0x24] sm:$0xf] %vm118_vm0, %v111_v16  ;;  %v116_v24 = vpack.c.bf16 %v100_v21, %v100_v21  ;;  %v117_v25 = vpack.c.bf16 %v101_v22, %v101_v22 }
  0x17   :  { %129 = vst.msk [vmem:[%s333_s3 + $0x28] sm:$0xf] %vm118_vm0, %v112_v19 }
  0x18   :  { %130 = vst.msk [vmem:[%s333_s3 + $0x2c] sm:$0xf] %vm118_vm0, %v113_v20 }
  0x19   :  { %131 = vst.msk [vmem:[%s333_s3 + $0x30] sm:$0xf] %vm118_vm0, %v114_v23 }
  0x1a   :  { %132 = vst.msk [vmem:[%s333_s3 + $0x34] sm:$0xf] %vm118_vm0, %v115_v3 }
  0x1b   :  { %133 = vst.msk [vmem:[%s333_s3 + $0x38] sm:$0xf] %vm118_vm0, %v116_v24 }
  0x1c   :  { %134 = vst.msk [vmem:[%s333_s3 + $0x3c] sm:$0xf] %vm118_vm0, %v117_v25 }

// kernel: resnet_forward.28
= control target key start
LH: loop header
LB: loop body
LE: loop exit
PB: predicated region body
PF: predicated region fallthrough
CT: control target
= control target key end

     0   :  { %vm169_vm0 = vcmask 519168   ;;  %s449_s0 = inlined_call_operand.vmem [shape: bf16[128,64], index: 0, kind: input, shape index: {}]   ;;  %s450_s1 = inlined_call_operand.vmem [shape: f32[1,64], index: 1, kind: input, shape index: {}]   ;;  %s451_s2 = inlined_call_operand.vmem [shape: f32[1,64], index: 2, kind: input, shape index: {}]   ;;  %s452_s3 = inlined_call_operand.vmem [shape: bf16[128,64], index: 3, kind: input, shape index: {}]   ;;  %s453_s4 = inlined_call_operand.vmem [shape: bf16[128,64], index: 4, kind: output, shape index: {}]  }
   0x1   :  { %v191_v0 = vld [vmem:[%s449_s0] sm:$0xff]   ;;  %v254_v8 = vld [vmem:[%s449_s0 + $0x8] sm:$0xff]   ;;  %v255_v10 = vld [vmem:[%s449_s0 + $0x10] sm:$0xff]  }
   0x2   :  { %v301_v1 = vld [vmem:[%s450_s1] ss:$0 sm:$0xff]  ;;  %v192_v2 = vunpack.c.l.bf16 %v191_v0  ;;  %v193_v5 = vunpack.c.h.bf16 %v191_v0  ;;  %v261_v9 = vld [vmem:[%s452_s3 + $0x8] sm:$0xff]   ;;  %v196_v13 = vunpack.c.l.bf16 %v254_v8  ;;  %v262_v15 = vld [vmem:[%s452_s3 + $0x10] sm:$0xff]   ;;  %v197_v17 = vunpack.c.h.bf16 %v254_v8 }
   0x3   :  { %v306_v3 = vld [vmem:[%s451_s2] ss:$0 sm:$0xff]  ;;  %v228_v14 = vunpack.c.l.bf16 %v261_v9  ;;  %v256_v16 = vld [vmem:[%s449_s0 + $0x18] sm:$0xff]   ;;  %v229_v18 = vunpack.c.h.bf16 %v261_v9  ;;  %v200_v19 = vunpack.c.l.bf16 %v255_v10  ;;  %v232_v20 = vunpack.c.l.bf16 %v262_v15  ;;  %v258_v60 = vld [vmem:[%s449_s0 + $0x28] sm:$0xff]  }
   0x4   :  { %v223_v4 = vld [vmem:[%s452_s3] sm:$0xff]   ;;  %v53_v11 = vmul.f32 %v301_v1, %v192_v2  ;;  %v54_v12 = vmul.f32 %v301_v1, %v193_v5  ;;  %v55_v23 = vmul.f32 %v301_v1, %v196_v13  ;;  %v201_v24 = vunpack.c.h.bf16 %v255_v10  ;;  %v263_v25 = vld [vmem:[%s452_s3 + $0x18] sm:$0xff]   ;;  %v265_v2 = vld [vmem:[%s452_s3 + $0x28] sm:$0xff]  }
   0x5   :  { %v224_v6 = vunpack.c.l.bf16 %v223_v4  ;;  %v225_v7 = vunpack.c.h.bf16 %v223_v4  ;;  %v56_v26 = vmul.f32 %v301_v1, %v197_v17  ;;  %v57_v27 = vmul.f32 %v301_v1, %v200_v19  ;;  %v257_v46 = vld [vmem:[%s449_s0 + $0x20] sm:$0xff]   ;;  %v259_v8 = vld [vmem:[%s449_s0 + $0x30] sm:$0xff]  }
   0x6   :  { %v73_v21 = vadd.f32 %v306_v3, %v53_v11  ;;  %v74_v22 = vadd.f32 %v306_v3, %v54_v12  ;;  %v233_v28 = vunpack.c.h.bf16 %v262_v15  ;;  %v204_v29 = vunpack.c.l.bf16 %v256_v16  ;;  %v264_v55 = vld [vmem:[%s452_s3 + $0x20] sm:$0xff]   ;;  %v266_v13 = vld [vmem:[%s452_s3 + $0x30] sm:$0xff]  }
   0x7   :  { %v75_v32 = vadd.f32 %v306_v3, %v55_v23  ;;  %v58_v33 = vmul.f32 %v301_v1, %v201_v24  ;;  %v76_v34 = vadd.f32 %v306_v3, %v56_v26  ;;  %v77_v35 = vadd.f32 %v306_v3, %v57_v27  ;;  %v260_v26 = vld [vmem:[%s449_s0 + $0x38] sm:$0xff]  }
   0x8   :  { %v121_v30 = vadd.f32 %v224_v6, %v73_v21  ;;  %v122_v31 = vadd.f32 %v225_v7, %v74_v22  ;;  %v59_v36 = vmul.f32 %v301_v1, %v204_v29  ;;  %v236_v37 = vunpack.c.l.bf16 %v263_v25 }
   0x9   :  { %v123_v40 = vadd.f32 %v228_v14, %v75_v32  ;;  %v78_v41 = vadd.f32 %v306_v3, %v58_v33  ;;  %v124_v42 = vadd.f32 %v229_v18, %v76_v34  ;;  %v125_v43 = vadd.f32 %v232_v20, %v77_v35 }
   0xa   :  { %v137_v38 = vmax.f32 %v121_v30, 0.0  ;;  %v138_v39 = vmax.f32 %v122_v31, 0.0  ;;  %v79_v44 = vadd.f32 %v306_v3, %v59_v36  ;;  %v205_v45 = vunpack.c.h.bf16 %v256_v16  ;;  %v267_v31 = vld [vmem:[%s452_s3 + $0x38] sm:$0xff]  }
   0xb   :  { %v139_v49 = vmax.f32 %v123_v40, 0.0  ;;  %v126_v50 = vadd.f32 %v233_v28, %v78_v41  ;;  %v140_v51 = vmax.f32 %v124_v42, 0.0  ;;  %v141_v52 = vmax.f32 %v125_v43, 0.0 }
   0xc   :  { %v153_v47 = vpack.c.bf16 %v137_v38, %v137_v38  ;;  %v154_v48 = vpack.c.bf16 %v138_v39, %v138_v39  ;;  %v127_v53 = vadd.f32 %v236_v37, %v79_v44  ;;  %v60_v54 = vmul.f32 %v301_v1, %v205_v45 }
   0xd   :  { %v155_v56 = vpack.c.bf16 %v139_v49, %v139_v49  ;;  %v142_v57 = vmax.f32 %v126_v50, 0.0  ;;  %v237_v58 = vunpack.c.h.bf16 %v263_v25  ;;  %v208_v59 = vunpack.c.l.bf16 %v257_v46 }
   0xe   :  { %170 = vst.msk [vmem:[%s453_s4] sm:$0xf] %vm169_vm0, %v153_v47  ;;  %v156_v61 = vpack.c.bf16 %v140_v51, %v140_v51  ;;  %v157_v62 = vpack.c.bf16 %v141_v52, %v141_v52  ;;  %v143_v63 = vmax.f32 %v127_v53, 0.0  ;;  %v80_v0 = vadd.f32 %v306_v3, %v60_v54 }
   0xf   :  { %171 = vst.msk [vmem:[%s453_s4 + $0x4] sm:$0xf] %vm169_vm0, %v154_v48  ;;  %v158_v4 = vpack.c.bf16 %v142_v57, %v142_v57  ;;  %v61_v5 = vmul.f32 %v301_v1, %v208_v59  ;;  %v240_v6 = vunpack.c.l.bf16 %v264_v55  ;;  %v209_v7 = vunpack.c.h.bf16 %v257_v46 }
  0x10   :  { %172 = vst.msk [vmem:[%s453_s4 + $0x8] sm:$0xf] %vm169_vm0, %v155_v56  ;;  %v159_v9 = vpack.c.bf16 %v143_v63, %v143_v63  ;;  %v128_v10 = vadd.f32 %v237_v58, %v80_v0  ;;  %v241_v11 = vunpack.c.h.bf16 %v264_v55  ;;  %v212_v12 = vunpack.c.l.bf16 %v258_v60 }
  0x11   :  { %173 = vst.msk [vmem:[%s453_s4 + $0xc] sm:$0xf] %vm169_vm0, %v156_v61  ;;  %v81_v14 = vadd.f32 %v306_v3, %v61_v5  ;;  %v62_v15 = vmul.f32 %v301_v1, %v209_v7  ;;  %v244_v16 = vunpack.c.l.bf16 %v265_v2  ;;  %v213_v17 = vunpack.c.h.bf16 %v258_v60 }
  0x12   :  { %174 = vst.msk [vmem:[%s453_s4 + $0x10] sm:$0xf] %vm169_vm0, %v157_v62  ;;  %v144_v18 = vmax.f32 %v128_v10, 0.0  ;;  %v63_v19 = vmul.f32 %v301_v1, %v212_v12  ;;  %v245_v20 = vunpack.c.h.bf16 %v265_v2  ;;  %v216_v21 = vunpack.c.l.bf16 %v259_v8 }
  0x13   :  { %175 = vst.msk [vmem:[%s453_s4 + $0x14] sm:$0xf] %vm169_vm0, %v158_v4  ;;  %v129_v22 = vadd.f32 %v240_v6, %v81_v14  ;;  %v82_v23 = vadd.f32 %v306_v3, %v62_v15  ;;  %v64_v24 = vmul.f32 %v301_v1, %v213_v17  ;;  %v248_v25 = vunpack.c.l.bf16 %v266_v13 }
  0x14   :  { %176 = vst.msk [vmem:[%s453_s4 + $0x18] sm:$0xf] %vm169_vm0, %v159_v9  ;;  %v160_v27 = vpack.c.bf16 %v144_v18, %v144_v18  ;;  %v83_v28 = vadd.f32 %v306_v3, %v63_v19  ;;  %v65_v29 = vmul.f32 %v301_v1, %v216_v21  ;;  %v217_v30 = vunpack.c.h.bf16 %v259_v8 }
  0x15   :  { %v145_v32 = vmax.f32 %v129_v22, 0.0  ;;  %v130_v33 = vadd.f32 %v241_v11, %v82_v23  ;;  %v84_v34 = vadd.f32 %v306_v3, %v64_v24  ;;  %v249_v35 = vunpack.c.h.bf16 %v266_v13 }
  0x16   :  { %177 = vst.msk [vmem:[%s453_s4 + $0x1c] sm:$0xf] %vm169_vm0, %v160_v27  ;;  %v131_v36 = vadd.f32 %v244_v16, %v83_v28  ;;  %v85_v37 = vadd.f32 %v306_v3, %v65_v29  ;;  %v66_v38 = vmul.f32 %v301_v1, %v217_v30  ;;  %v220_v39 = vunpack.c.l.bf16 %v260_v26 }
  0x17   :  { %v161_v40 = vpack.c.bf16 %v145_v32, %v145_v32  ;;  %v146_v41 = vmax.f32 %v130_v33, 0.0  ;;  %v132_v42 = vadd.f32 %v245_v20, %v84_v34  ;;  %v252_v43 = vunpack.c.l.bf16 %v267_v31 }
  0x18   :  { %v147_v44 = vmax.f32 %v131_v36, 0.0  ;;  %v133_v45 = vadd.f32 %v248_v25, %v85_v37  ;;  %v86_v46 = vadd.f32 %v306_v3, %v66_v38  ;;  %v67_v47 = vmul.f32 %v301_v1, %v220_v39 }
  0x19   :  { %178 = vst.msk [vmem:[%s453_s4 + $0x20] sm:$0xf] %vm169_vm0, %v161_v40  ;;  %v162_v48 = vpack.c.bf16 %v146_v41, %v146_v41  ;;  %v148_v49 = vmax.f32 %v132_v42, 0.0  ;;  %v221_v50 = vunpack.c.h.bf16 %v260_v26  ;;  %v253_v57 = vunpack.c.h.bf16 %v267_v31 }
  0x1a   :  { %v163_v51 = vpack.c.bf16 %v147_v44, %v147_v44  ;;  %v149_v52 = vmax.f32 %v133_v45, 0.0  ;;  %v134_v53 = vadd.f32 %v249_v35, %v86_v46  ;;  %v87_v54 = vadd.f32 %v306_v3, %v67_v47 }
  0x1b   :  { %179 = vst.msk [vmem:[%s453_s4 + $0x24] sm:$0xf] %vm169_vm0, %v162_v48  ;;  %v164_v55 = vpack.c.bf16 %v148_v49, %v148_v49  ;;  %v68_v56 = vmul.f32 %v301_v1, %v221_v50 }
  0x1c   :  { %180 = vst.msk [vmem:[%s453_s4 + $0x28] sm:$0xf] %vm169_vm0, %v163_v51  ;;  %v165_v58 = vpack.c.bf16 %v149_v52, %v149_v52  ;;  %v150_v59 = vmax.f32 %v134_v53, 0.0  ;;  %v135_v60 = vadd.f32 %v252_v43, %v87_v54 }
  0x1d   :  { %181 = vst.msk [vmem:[%s453_s4 + $0x2c] sm:$0xf] %vm169_vm0, %v164_v55  ;;  %v88_v61 = vadd.f32 %v306_v3, %v68_v56 }
  0x1e   :  { %182 = vst.msk [vmem:[%s453_s4 + $0x30] sm:$0xf] %vm169_vm0, %v165_v58  ;;  %v166_v1 = vpack.c.bf16 %v150_v59, %v150_v59  ;;  %v151_v62 = vmax.f32 %v135_v60, 0.0 }
  0x1f   :  { %v136_v63 = vadd.f32 %v253_v57, %v88_v61 }
  0x20   :  { %183 = vst.msk [vmem:[%s453_s4 + $0x34] sm:$0xf] %vm169_vm0, %v166_v1  ;;  %v167_v0 = vpack.c.bf16 %v151_v62, %v151_v62 }
  0x21   :  { %v152_v2 = vmax.f32 %v136_v63, 0.0 }
  0x22   :  { %184 = vst.msk [vmem:[%s453_s4 + $0x38] sm:$0xf] %vm169_vm0, %v167_v0 }
  0x23   :  { %v168_v3 = vpack.c.bf16 %v152_v2, %v152_v2 }
  0x25   :  { %185 = vst.msk [vmem:[%s453_s4 + $0x3c] sm:$0xf] %vm169_vm0, %v168_v3 }

// kernel: resnet_forward.32
= control target key start
LH: loop header
LB: loop body
LE: loop exit
PB: predicated region body
PF: predicated region fallthrough
CT: control target
= control target key end

     0   :  { %vm73_vm0 = vcmask 523264   ;;  %s260_s1 = inlined_call_operand.vmem [shape: bf16[64,128], index: 1, kind: input, shape index: {}]   ;;  %s261_s0 = inlined_call_operand.vmem [shape: bf16[32,64], index: 0, kind: input, shape index: {}]   ;;  %s262_s2 = inlined_call_operand.vmem [shape: bf16[32,128], index: 2, kind: output, shape index: {0}]   ;;  %s263_s3 = inlined_call_operand.vmem [shape: f32[1,1,128], index: 3, kind: output, shape index: {1}]   ;;  %s264_s4 = inlined_call_operand.vmem [shape: f32[1,1,128], index: 4, kind: output, shape index: {2}]  }
   0x1   :  { %v189_v0 = vld [vmem:[%s260_s1 + $0x18] sm:$0xff]  ;;  %v188_v1 = vld [vmem:[%s260_s1 + $0x10] sm:$0xff]  ;;  %v187_v2 = vld [vmem:[%s260_s1 + $0x8] sm:$0xff] }
   0x2   :  { %84 = vmatpush.bf16.msra.mxu0 %v189_v0  ;;  %201 = vmatpush.bf16.msra.mxu1 %v189_v0  ;;  %v186_v3 = vld [vmem:[%s260_s1] sm:$0xff]  ;;  %v185_v5 = vld [vmem:[%s261_s0 + $0x8] sm:$0xff] }
   0x3   :  { %v184_v4 = vld [vmem:[%s261_s0] sm:$0xff] }
   0x6   :  { %85 = vmatpush.bf16.msra.mxu0 %v188_v1  ;;  %202 = vmatpush.bf16.msra.mxu1 %v188_v1 }
   0xa   :  { %86 = vmatpush.bf16.msra.mxu0 %v187_v2  ;;  %203 = vmatpush.bf16.msra.mxu1 %v187_v2 }
   0xe   :  { %87 = vmatpush.bf16.msra.mxu0 %v186_v3  ;;  %204 = vmatpush.bf16.msra.mxu1 %v186_v3 }
  0x11   :  { %182 = vmatmul.msk.bf16.vlgmr.msra.gmra.mxu0 %vm73_vm0, %v184_v4  ;;  %183 = vmatmul.msk.bf16.vlgmr.msra.gmra.mxu1 %vm73_vm0, %v185_v5 }
  0x8e   :  { %v89_v6 = vpop.f32.mrf.mxu0  ;;  %v94_v7 = vpop.f32.mrf.mxu1 }
  0x8f   :  { %v132_v8 = vmul.f32 %v89_v6, %v89_v6  ;;  %v134_v15 = vmul.f32 %v94_v7, %v94_v7 }
  0x96   :  { %v91_v9 = vpop.f32.mrf.mxu0  ;;  %v96_v10 = vpop.f32.mrf.mxu1 }
  0x97   :  { %v193_v11 = vpack.c.bf16 %v91_v9, %v89_v6  ;;  %v122_v12 = vadd.f32 %v91_v9, %v89_v6  ;;  %v133_v13 = vmul.f32 %v91_v9, %v91_v9  ;;  %v198_v14 = vpack.c.bf16 %v96_v10, %v94_v7 }
  0x98   :  { %v135_v19 = vmul.f32 %v96_v10, %v96_v10 }
  0x99   :  { %194 = vst [vmem:[%s262_s2] sm:$0xff] %v193_v11   ;;  %v136_v16 = vadd.f32 %v133_v13, %v132_v8  ;;  %v123_v17 = vadd.f32 %v122_v12, %v94_v7 }
  0x9a   :  { %200 = vst [vmem:[%s262_s2 + $0x8] sm:$0xff] %v198_v14  }
  0x9b   :  { %v124_v18 = vadd.f32 %v123_v17, %v96_v10  ;;  %v137_v20 = vadd.f32 %v136_v16, %v134_v15 }
  0x9d   :  { %v125_v21 = vrot.slane %v124_v18, 4  ;;  %v138_v22 = vadd.f32 %v137_v20, %v135_v19 }
  0x9f   :  { %v126_v23 = vadd.f32 %v125_v21, %v124_v18  ;;  %v139_v24 = vrot.slane %v138_v22, 4 }
  0xa1   :  { %v127_v25 = vrot.slane %v126_v23, 2  ;;  %v140_v26 = vadd.f32 %v139_v24, %v138_v22 }
  0xa3   :  { %v128_v27 = vadd.f32 %v127_v25, %v126_v23  ;;  %v141_v28 = vrot.slane %v140_v26, 2 }
  0xa5   :  { %v129_v29 = vrot.slane %v128_v27, 1  ;;  %v142_v30 = vadd.f32 %v141_v28, %v140_v26 }
  0xa7   :  { %v130_v31 = vadd.f32 %v129_v29, %v128_v27  ;;  %v143_v32 = vrot.slane %v142_v30, 1 }
  0xa9   :  { %131 = vst [vmem:[%s263_s3] sm:$0x1] %v130_v31  ;;  %v144_v33 = vadd.f32 %v143_v32, %v142_v30 }
  0xab   :  { %145 = vst [vmem:[%s264_s4] sm:$0x1] %v144_v33 }

// kernel: resnet_forward.30
= control target key start
LH: loop header
LB: loop body
LE: loop exit
PB: predicated region body
PF: predicated region fallthrough
CT: control target
= control target key end

     0   :  { %s114_s0 = inlined_call_operand.vmem [shape: bf16[32,128], index: 0, kind: input, shape index: {}]   ;;  %s115_s1 = inlined_call_operand.vmem [shape: f32[1,128], index: 1, kind: input, shape index: {}]   ;;  %s116_s2 = inlined_call_operand.vmem [shape: f32[1,128], index: 2, kind: input, shape index: {}]   ;;  %s117_s3 = inlined_call_operand.vmem [shape: bf16[32,128], index: 3, kind: output, shape index: {}]  }
   0x1   :  { %v55_v0 = vld [vmem:[%s114_s0] sm:$0xff]   ;;  %v72_v5 = vld [vmem:[%s114_s0 + $0x8] sm:$0xff]  }
   0x2   :  { %v74_v1 = vld [vmem:[%s115_s1] ss:$0 sm:$0xff]  ;;  %v56_v2 = vunpack.c.l.bf16 %v55_v0  ;;  %v57_v3 = vunpack.c.h.bf16 %v55_v0  ;;  %v60_v6 = vunpack.c.l.bf16 %v72_v5  ;;  %v61_v7 = vunpack.c.h.bf16 %v72_v5 }
   0x3   :  { %v75_v4 = vld [vmem:[%s116_s2] ss:$0 sm:$0xff] }
   0x4   :  { %v26_v8 = vmul.f32 %v74_v1, %v56_v2  ;;  %v27_v9 = vmul.f32 %v74_v1, %v57_v3  ;;  %v28_v10 = vmul.f32 %v74_v1, %v60_v6  ;;  %v29_v11 = vmul.f32 %v74_v1, %v61_v7 }
   0x6   :  { %v34_v12 = vadd.f32 %v75_v4, %v26_v8  ;;  %v35_v13 = vadd.f32 %v75_v4, %v27_v9  ;;  %v36_v14 = vadd.f32 %v75_v4, %v28_v10  ;;  %v37_v15 = vadd.f32 %v75_v4, %v29_v11 }
   0x8   :  { %v38_v16 = vmax.f32 %v34_v12, 0.0  ;;  %v39_v17 = vmax.f32 %v35_v13, 0.0  ;;  %v40_v18 = vmax.f32 %v36_v14, 0.0  ;;  %v41_v19 = vmax.f32 %v37_v15, 0.0 }
   0xa   :  { %v65_v20 = vpack.c.bf16 %v39_v17, %v38_v16  ;;  %v70_v21 = vpack.c.bf16 %v41_v19, %v40_v18 }
   0xc   :  { %66 = vst [vmem:[%s117_s3] sm:$0xff] %v65_v20  }
   0xd   :  { %73 = vst [vmem:[%s117_s3 + $0x8] sm:$0xff] %v70_v21  }

// kernel: resnet_forward.29
= control target key start
LH: loop header
LB: loop body
LE: loop exit
PB: predicated region body
PF: predicated region fallthrough
CT: control target
= control target key end

     0   :  { %10 = vsyncpa [#allocation4], 0  ;;  %s831_s18 = smov [#allocation3]   ;;  %s832_s20 = smov 64   ;;  %s934_s0 = inlined_call_operand.vmem [shape: bf16[32,576], index: 0, kind: input, shape index: {}]   ;;  %s935_s1 = inlined_call_operand.hbm [shape: bf16[576,128], index: 1, kind: input, shape index: {}]   ;;  %s936_s2 = inlined_call_operand.vmem [shape: bf16[32,128], index: 2, kind: output, shape index: {0}]   ;;  %s937_s3 = inlined_call_operand.vmem [shape: f32[1,1,128], index: 3, kind: output, shape index: {1}]   ;;  %s938_s4 = inlined_call_operand.vmem [shape: f32[1,1,128], index: 4, kind: output, shape index: {2}]  }
   0x1   :  { %s17_s17 = sshll.u32 %s935_s1, 4  ;;  %s19_s19 = sshll.u32 %s831_s18, 4  ;;  %s18_s17 = int_to_ptr.hbm [resolvable:$true] %s17_s17  ;;  %s20_s19 = int_to_ptr.vmem [resolvable:$true] %s19_s19 }
   0x2   :  { %s833_s21 = smov 4  }
   0x3   :  { %25 = dma.hbm_to_vmem [thread:$0]  %s18_s17, 4608, %s20_s19, [#allocation4], %s832_s20, %s832_s20, %s833_s21  }
   0x4   :  { %829 = dma.done.wait [#allocation4], 4608  }
   0x5   :  { %830 = vsyncadd [#allocation4], 4294962688  ;;  %v758_v0 = vld [vmem:[#allocation3 + $0x38] sm:$0xff]  ;;  %v757_v4 = vld [vmem:[#allocation3 + $0x30] sm:$0xff]  ;;  %vm393_vm0 = vcmask 523264  }
   0x6   :  { %v766_v1 = vld [vmem:[#allocation3 + $0x78] sm:$0xff]  ;;  %400 = vmatpush.bf16.msra.mxu0 %v758_v0  ;;  %v765_v5 = vld [vmem:[#allocation3 + $0x70] sm:$0xff]  ;;  %v756_v8 = vld [vmem:[#allocation3 + $0x28] sm:$0xff] }
   0x7   :  { %v774_v2 = vld [vmem:[#allocation3 + $0xb8] sm:$0xff]  ;;  %419 = vmatpush.bf16.msra.mxu1 %v766_v1  ;;  %v773_v6 = vld [vmem:[#allocation3 + $0xb0] sm:$0xff]  ;;  %v764_v9 = vld [vmem:[#allocation3 + $0x68] sm:$0xff] }
   0x8   :  { %v782_v3 = vld [vmem:[#allocation3 + $0xf8] sm:$0xff]  ;;  %438 = vmatpush.bf16.msra.mxu2 %v774_v2  ;;  %v781_v7 = vld [vmem:[#allocation3 + $0xf0] sm:$0xff]  ;;  %v772_v10 = vld [vmem:[#allocation3 + $0xa8] sm:$0xff] }
   0x9   :  { %457 = vmatpush.bf16.msra.mxu3 %v782_v3  ;;  %v780_v11 = vld [vmem:[#allocation3 + $0xe8] sm:$0xff]  ;;  %v755_v12 = vld [vmem:[#allocation3 + $0x20] sm:$0xff]  ;;  %v754_v16 = vld [vmem:[#allocation3 + $0x18] sm:$0xff] }
   0xa   :  { %401 = vmatpush.bf16.msra.mxu0 %v757_v4  ;;  %v763_v13 = vld [vmem:[#allocation3 + $0x60] sm:$0xff]  ;;  %v762_v17 = vld [vmem:[#allocation3 + $0x58] sm:$0xff]  ;;  %v753_v20 = vld [vmem:[#allocation3 + $0x10] sm:$0xff] }
   0xb   :  { %420 = vmatpush.bf16.msra.mxu1 %v765_v5  ;;  %v771_v14 = vld [vmem:[#allocation3 + $0xa0] sm:$0xff]  ;;  %v770_v18 = vld [vmem:[#allocation3 + $0x98] sm:$0xff]  ;;  %v761_v21 = vld [vmem:[#allocation3 + $0x50] sm:$0xff] }
   0xc   :  { %439 = vmatpush.bf16.msra.mxu2 %v773_v6  ;;  %v779_v15 = vld [vmem:[#allocation3 + $0xe0] sm:$0xff]  ;;  %v778_v19 = vld [vmem:[#allocation3 + $0xd8] sm:$0xff]  ;;  %v769_v22 = vld [vmem:[#allocation3 + $0x90] sm:$0xff] }
   0xd   :  { %458 = vmatpush.bf16.msra.mxu3 %v781_v7  ;;  %v777_v23 = vld [vmem:[#allocation3 + $0xd0] sm:$0xff]  ;;  %v752_v24 = vld [vmem:[#allocation3 + $0x8] sm:$0xff]  ;;  %v751_v28 = vld [vmem:[#allocation3] sm:$0xff] }
   0xe   :  { %402 = vmatpush.bf16.msra.mxu0 %v756_v8  ;;  %v760_v25 = vld [vmem:[#allocation3 + $0x48] sm:$0xff]  ;;  %v759_v29 = vld [vmem:[#allocation3 + $0x40] sm:$0xff]  ;;  %v743_v33 = vld [vmem:[%s934_s0 + $0x10] sm:$0xf0] }
   0xf   :  { %421 = vmatpush.bf16.msra.mxu1 %v764_v9  ;;  %v768_v26 = vld [vmem:[#allocation3 + $0x88] sm:$0xff]  ;;  %v767_v30 = vld [vmem:[#allocation3 + $0x80] sm:$0xff]  ;;  %v559_v35 = vld [vmem:[%s934_s0 + $0x14] sm:$0xf0] }
  0x10   :  { %440 = vmatpush.bf16.msra.mxu2 %v772_v10  ;;  %v776_v27 = vld [vmem:[#allocation3 + $0xc8] sm:$0xff]  ;;  %v775_v31 = vld [vmem:[#allocation3 + $0xc0] sm:$0xff]  ;;  %v744_v37 = vld [vmem:[%s934_s0 + $0x18] sm:$0xf0] }
  0x11   :  { %459 = vmatpush.bf16.msra.mxu3 %v780_v11  ;;  %v557_v32 = vld [vmem:[%s934_s0] sm:$0xf]  ;;  %v741_v34 = vld [vmem:[%s934_s0 + $0x4] sm:$0xf]  ;;  %v565_v36 = vld [vmem:[%s934_s0 + $0x8] sm:$0xf] }
  0x12   :  { %403 = vmatpush.bf16.msra.mxu0 %v755_v12  ;;  %v742_v38 = vld [vmem:[%s934_s0 + $0xc] sm:$0xf]  ;;  %v567_v39 = vld [vmem:[%s934_s0 + $0x1c] sm:$0xf0]  ;;  %v786_v40 = vld [vmem:[#allocation3 + $0x118] sm:$0xff]  ;;  %v558_v41 = vor.u32 %v743_v33, %v557_v32  ;;  %v562_v42 = vor.u32 %v741_v34, %v559_v35  ;;  %v566_v43 = vor.u32 %v744_v37, %v565_v36 }
  0x13   :  { %422 = vmatpush.bf16.msra.mxu1 %v763_v13  ;;  %v570_v44 = vor.u32 %v742_v38, %v567_v39  ;;  %v785_v45 = vld [vmem:[#allocation3 + $0x110] sm:$0xff]  ;;  %v784_v46 = vld [vmem:[#allocation3 + $0x108] sm:$0xff]  ;;  %v783_v47 = vld [vmem:[#allocation3 + $0x100] sm:$0xff] }
  0x14   :  { %441 = vmatpush.bf16.msra.mxu2 %v771_v14  ;;  %v577_v48 = vld [vmem:[%s934_s0 + $0x28] sm:$0xf]  ;;  %v748_v49 = vld [vmem:[%s934_s0 + $0x38] sm:$0xf0]  ;;  %v746_v50 = vld [vmem:[%s934_s0 + $0x2c] sm:$0xf] }
  0x15   :  { %460 = vmatpush.bf16.msra.mxu3 %v779_v15  ;;  %v579_v51 = vld [vmem:[%s934_s0 + $0x3c] sm:$0xf0]  ;;  %v585_v52 = vld [vmem:[%s934_s0 + $0x30] sm:$0xf]  ;;  %v749_v53 = vld [vmem:[%s934_s0 + $0x40] sm:$0xf0]  ;;  %v578_v56 = vor.u32 %v748_v49, %v577_v48 }
  0x16   :  { %404 = vmatpush.bf16.msra.mxu0 %v754_v16  ;;  %v747_v54 = vld [vmem:[%s934_s0 + $0x34] sm:$0xf]  ;;  %v587_v55 = vld [vmem:[%s934_s0 + $0x44] sm:$0xf0]  ;;  %v582_v57 = vor.u32 %v746_v50, %v579_v51  ;;  %v586_v58 = vor.u32 %v749_v53, %v585_v52  ;;  %v573_v60 = vld [vmem:[%s934_s0 + $0x10] sm:$0xf] }
  0x17   :  { %423 = vmatpush.bf16.msra.mxu1 %v762_v17  ;;  %v590_v59 = vor.u32 %v747_v54, %v587_v55  ;;  %v745_v61 = vld [vmem:[%s934_s0 + $0x20] sm:$0xf0]  ;;  %v593_v62 = vld [vmem:[%s934_s0 + $0x38] sm:$0xf]  ;;  %v750_v63 = vld [vmem:[%s934_s0 + $0x48] sm:$0xf0] }
  0x18   :  { %442 = vmatpush.bf16.msra.mxu2 %v770_v18  ;;  %v574_v0 = vor.u32 %v745_v61, %v573_v60  ;;  %v594_v1 = vor.u32 %v750_v63, %v593_v62 }
  0x19   :  { %461 = vmatpush.bf16.msra.mxu3 %v778_v19 }
  0x1a   :  { %405 = vmatpush.bf16.msra.mxu0 %v753_v20 }
  0x1b   :  { %424 = vmatpush.bf16.msra.mxu1 %v761_v21 }
  0x1c   :  { %443 = vmatpush.bf16.msra.mxu2 %v769_v22 }
  0x1d   :  { %462 = vmatpush.bf16.msra.mxu3 %v777_v23 }
  0x1e   :  { %406 = vmatpush.bf16.msra.mxu0 %v752_v24 }
  0x1f   :  { %425 = vmatpush.bf16.msra.mxu1 %v760_v25 }
  0x20   :  { %444 = vmatpush.bf16.msra.mxu2 %v768_v26 }
  0x21   :  { %463 = vmatpush.bf16.msra.mxu3 %v776_v27 }
  0x22   :  { %407 = vmatpush.bf16.msra.mxu0 %v751_v28 }
  0x23   :  { %426 = vmatpush.bf16.msra.mxu1 %v759_v29 }
  0x24   :  { %445 = vmatpush.bf16.msra.mxu2 %v767_v30 }
  0x25   :  { %464 = vmatpush.bf16.msra.mxu3 %v775_v31  ;;  %408 = vmatmul.bf16.vlgmr.msra.gmra.mxu0 %v558_v41 }
  0x26   :  { %480 = vmatpush.bf16.msrb.mxu0 %v786_v40  ;;  %427 = vmatmul.bf16.vlgmr.msra.gmra.mxu1 %v562_v42 }
  0x27   :  { %798 = vmatpush.bf16.msrb.mxu1 %v786_v40  ;;  %446 = vmatmul.bf16.vlgmr.msra.gmra.mxu2 %v566_v43 }
  0x28   :  { %465 = vmatmul.bf16.vlgmr.msra.gmra.mxu3 %v570_v44 }
  0x2a   :  { %481 = vmatpush.bf16.msrb.mxu0 %v785_v45 }
  0x2b   :  { %799 = vmatpush.bf16.msrb.mxu1 %v785_v45 }
  0x2e   :  { %482 = vmatpush.bf16.msrb.mxu0 %v784_v46 }
  0x2f   :  { %800 = vmatpush.bf16.msrb.mxu1 %v784_v46 }
  0x32   :  { %483 = vmatpush.bf16.msrb.mxu0 %v783_v47 }
  0x33   :  { %801 = vmatpush.bf16.msrb.mxu1 %v783_v47 }
  0x35   :  { %413 = vmatmul.bf16.gmra.mxu0 %v578_v56 }
  0x36   :  { %432 = vmatmul.bf16.gmra.mxu1 %v582_v57 }
  0x37   :  { %451 = vmatmul.bf16.gmra.mxu2 %v586_v58 }
  0x38   :  { %470 = vmatmul.bf16.gmra.mxu3 %v590_v59 }
  0x45   :  { %739 = vmatmul.msk.bf16.vlgmr.msrb.gmra.mxu0 %vm393_vm0, %v574_v0 }
  0x46   :  { %740 = vmatmul.msk.bf16.vlgmr.msrb.gmra.mxu1 %vm393_vm0, %v594_v1 }
  0xa2   :  { %v409_v2 = vpop.f32.mrf.mxu0 }
  0xa3   :  { %v428_v3 = vpop.f32.mrf.mxu1 }
  0xa4   :  { %v429_v16 = vadd.f32 %v428_v3, %v409_v2 }
  0xaa   :  { %v447_v4 = vpop.f32.mrf.mxu2  ;;  %v411_v6 = vpop.f32.mrf.mxu0 }
  0xab   :  { %v466_v5 = vpop.f32.mrf.mxu3  ;;  %v430_v7 = vpop.f32.mrf.mxu1  ;;  %v448_v18 = vadd.f32 %v447_v4, %v429_v16 }
  0xac   :  { %v431_v21 = vadd.f32 %v430_v7, %v411_v6 }
  0xad   :  { %v467_v27 = vadd.f32 %v466_v5, %v448_v18 }
  0xb2   :  { %v449_v8 = vpop.f32.mrf.mxu2  ;;  %v414_v10 = vpop.f32.mrf.mxu0 }
  0xb3   :  { %v468_v9 = vpop.f32.mrf.mxu3  ;;  %v433_v11 = vpop.f32.mrf.mxu1  ;;  %v450_v24 = vadd.f32 %v449_v8, %v431_v21 }
  0xb4   :  { %v434_v22 = vadd.f32 %v433_v11, %v414_v10 }
  0xb5   :  { %v469_v30 = vadd.f32 %v468_v9, %v450_v24 }
  0xba   :  { %v452_v12 = vpop.f32.mrf.mxu2  ;;  %v416_v13 = vpop.f32.mrf.mxu0 }
  0xbb   :  { %v435_v14 = vpop.f32.mrf.mxu1  ;;  %v471_v15 = vpop.f32.mrf.mxu3  ;;  %v453_v25 = vadd.f32 %v452_v12, %v434_v22 }
  0xbc   :  { %v436_v23 = vadd.f32 %v435_v14, %v416_v13 }
  0xbd   :  { %v472_v31 = vadd.f32 %v471_v15, %v453_v25 }
  0xc2   :  { %v454_v17 = vpop.f32.mrf.mxu2  ;;  %v485_v19 = vpop.f32.mrf.mxu0 }
  0xc3   :  { %v490_v20 = vpop.f32.mrf.mxu1  ;;  %v455_v26 = vadd.f32 %v454_v17, %v436_v23  ;;  %v473_v28 = vpop.f32.mrf.mxu3  ;;  %v486_v29 = vadd.f32 %v485_v19, %v467_v27 }
  0xc4   :  { %v491_v35 = vadd.f32 %v490_v20, %v472_v31 }
  0xc5   :  { %v474_v32 = vadd.f32 %v473_v28, %v455_v26  ;;  %v528_v38 = vmul.f32 %v486_v29, %v486_v29 }
  0xc6   :  { %v530_v43 = vmul.f32 %v491_v35, %v491_v35 }
  0xca   :  { %v487_v33 = vpop.f32.mrf.mxu0 }
  0xcb   :  { %v492_v34 = vpop.f32.mrf.mxu1  ;;  %v488_v36 = vadd.f32 %v487_v33, %v469_v30 }
  0xcc   :  { %v493_v37 = vadd.f32 %v492_v34, %v474_v32 }
  0xcd   :  { %v790_v39 = vpack.c.bf16 %v488_v36, %v486_v29  ;;  %v518_v40 = vadd.f32 %v488_v36, %v486_v29  ;;  %v529_v41 = vmul.f32 %v488_v36, %v488_v36 }
  0xce   :  { %v795_v42 = vpack.c.bf16 %v493_v37, %v491_v35  ;;  %v531_v47 = vmul.f32 %v493_v37, %v493_v37 }
  0xcf   :  { %791 = vst [vmem:[%s936_s2] sm:$0xff] %v790_v39   ;;  %v532_v44 = vadd.f32 %v529_v41, %v528_v38  ;;  %v519_v45 = vadd.f32 %v518_v40, %v491_v35 }
  0xd0   :  { %797 = vst [vmem:[%s936_s2 + $0x8] sm:$0xff] %v795_v42  }
  0xd1   :  { %v520_v46 = vadd.f32 %v519_v45, %v493_v37  ;;  %v533_v48 = vadd.f32 %v532_v44, %v530_v43 }
  0xd3   :  { %v521_v49 = vrot.slane %v520_v46, 4  ;;  %v534_v50 = vadd.f32 %v533_v48, %v531_v47 }
  0xd5   :  { %v522_v51 = vadd.f32 %v521_v49, %v520_v46  ;;  %v535_v52 = vrot.slane %v534_v50, 4 }
  0xd7   :  { %v523_v53 = vrot.slane %v522_v51, 2  ;;  %v536_v54 = vadd.f32 %v535_v52, %v534_v50 }
  0xd9   :  { %v524_v55 = vadd.f32 %v523_v53, %v522_v51  ;;  %v537_v56 = vrot.slane %v536_v54, 2 }
  0xdb   :  { %v525_v57 = vrot.slane %v524_v55, 1  ;;  %v538_v58 = vadd.f32 %v537_v56, %v536_v54 }
  0xdd   :  { %v526_v59 = vadd.f32 %v525_v57, %v524_v55  ;;  %v539_v60 = vrot.slane %v538_v58, 1 }
  0xdf   :  { %527 = vst [vmem:[%s937_s3] sm:$0x1] %v526_v59  ;;  %v540_v61 = vadd.f32 %v539_v60, %v538_v58 }
  0xe1   :  { %541 = vst [vmem:[%s938_s4] sm:$0x1] %v540_v61 }
  0xe2   :  { %554 = vsyncpa [#allocation4], 1 }

// kernel: resnet_forward.33
= control target key start
LH: loop header
LB: loop body
LE: loop exit
PB: predicated region body
PF: predicated region fallthrough
CT: control target
= control target key end

     0   :  { %s189_s0 = inlined_call_operand.vmem [shape: bf16[32,128], index: 0, kind: input, shape index: {}]   ;;  %s190_s1 = inlined_call_operand.vmem [shape: f32[1,128], index: 1, kind: input, shape index: {}]   ;;  %s191_s2 = inlined_call_operand.vmem [shape: f32[1,128], index: 2, kind: input, shape index: {}]   ;;  %s192_s3 = inlined_call_operand.vmem [shape: bf16[32,128], index: 3, kind: input, shape index: {}]   ;;  %s193_s4 = inlined_call_operand.vmem [shape: f32[1,128], index: 4, kind: input, shape index: {}]   ;;  %s194_s5 = inlined_call_operand.vmem [shape: f32[1,128], index: 5, kind: input, shape index: {}]   ;;  %s195_s6 = inlined_call_operand.vmem [shape: bf16[32,128], index: 6, kind: output, shape index: {}]  }
   0x1   :  { %v92_v0 = vld [vmem:[%s189_s0] sm:$0xff]   ;;  %v117_v12 = vld [vmem:[%s189_s0 + $0x8] sm:$0xff]  }
   0x2   :  { %v120_v1 = vld [vmem:[%s190_s1] ss:$0 sm:$0xff]  ;;  %v93_v2 = vunpack.c.l.bf16 %v92_v0  ;;  %v94_v3 = vunpack.c.h.bf16 %v92_v0  ;;  %v118_v13 = vld [vmem:[%s192_s3 + $0x8] sm:$0xff]   ;;  %v97_v16 = vunpack.c.l.bf16 %v117_v12  ;;  %v98_v17 = vunpack.c.h.bf16 %v117_v12 }
   0x3   :  { %v121_v4 = vld [vmem:[%s191_s2] ss:$0 sm:$0xff]  ;;  %v105_v20 = vunpack.c.l.bf16 %v118_v13  ;;  %v106_v21 = vunpack.c.h.bf16 %v118_v13 }
   0x4   :  { %v100_v5 = vld [vmem:[%s192_s3] sm:$0xff]   ;;  %v35_v9 = vmul.f32 %v120_v1, %v93_v2  ;;  %v36_v10 = vmul.f32 %v120_v1, %v94_v3  ;;  %v37_v24 = vmul.f32 %v120_v1, %v97_v16  ;;  %v38_v25 = vmul.f32 %v120_v1, %v98_v17 }
   0x5   :  { %v101_v6 = vunpack.c.l.bf16 %v100_v5  ;;  %v102_v7 = vunpack.c.h.bf16 %v100_v5  ;;  %v122_v8 = vld [vmem:[%s193_s4] ss:$0 sm:$0xff] }
   0x6   :  { %v123_v11 = vld [vmem:[%s194_s5] ss:$0 sm:$0xff]  ;;  %v43_v18 = vadd.f32 %v121_v4, %v35_v9  ;;  %v44_v19 = vadd.f32 %v121_v4, %v36_v10  ;;  %v61_v26 = vmul.f32 %v122_v8, %v105_v20  ;;  %v62_v27 = vmul.f32 %v122_v8, %v106_v21 }
   0x7   :  { %v59_v14 = vmul.f32 %v122_v8, %v101_v6  ;;  %v60_v15 = vmul.f32 %v122_v8, %v102_v7  ;;  %v45_v30 = vadd.f32 %v121_v4, %v37_v24  ;;  %v46_v31 = vadd.f32 %v121_v4, %v38_v25 }
   0x8   :  { %v69_v32 = vadd.f32 %v123_v11, %v61_v26  ;;  %v70_v33 = vadd.f32 %v123_v11, %v62_v27 }
   0x9   :  { %v67_v22 = vadd.f32 %v123_v11, %v59_v14  ;;  %v68_v23 = vadd.f32 %v123_v11, %v60_v15 }
   0xa   :  { %v73_v36 = vadd.f32 %v69_v32, %v45_v30  ;;  %v74_v37 = vadd.f32 %v70_v33, %v46_v31 }
   0xb   :  { %v71_v28 = vadd.f32 %v67_v22, %v43_v18  ;;  %v72_v29 = vadd.f32 %v68_v23, %v44_v19 }
   0xc   :  { %v77_v39 = vmax.f32 %v73_v36, 0.0  ;;  %v78_v40 = vmax.f32 %v74_v37, 0.0 }
   0xd   :  { %v75_v34 = vmax.f32 %v71_v28, 0.0  ;;  %v76_v35 = vmax.f32 %v72_v29, 0.0 }
   0xe   :  { %v115_v41 = vpack.c.bf16 %v78_v40, %v77_v39 }
   0xf   :  { %v110_v38 = vpack.c.bf16 %v76_v35, %v75_v34 }
  0x10   :  { %119 = vst [vmem:[%s195_s6 + $0x8] sm:$0xff] %v115_v41  }
  0x11   :  { %111 = vst [vmem:[%s195_s6] sm:$0xff] %v110_v38  }

// kernel: resnet_forward.31
= control target key start
LH: loop header
LB: loop body
LE: loop exit
PB: predicated region body
PF: predicated region fallthrough
CT: control target
= control target key end

     0   :  { %s867_s15 = smov 0   ;;  %s869_s16 = smov 0   ;;  %s963_s0 = inlined_call_operand.vmem [shape: bf16[32,1152], index: 0, kind: input, shape index: {}]   ;;  %s964_s1 = inlined_call_operand.vmem [shape: bf16[1152,128], index: 1, kind: input, shape index: {}]   ;;  %s965_s2 = inlined_call_operand.vmem [shape: bf16[32,128], index: 2, kind: output, shape index: {0}]   ;;  %s966_s3 = inlined_call_operand.vmem [shape: f32[1,1,128], index: 3, kind: output, shape index: {1}]   ;;  %s967_s4 = inlined_call_operand.vmem [shape: f32[1,1,128], index: 4, kind: output, shape index: {2}]  }
   0x1   :  { %s871_s17 = smov 0   ;;  %s873_s18 = smov 0  }
   0x2   :  { %s875_s19 = smov 0  }
   0x3 LB: > { %s27_s20 = sadd.s32 1, %s835_s18  ;;  %p50_p1 = scmp.ne.s32.totalorder %s827_s16, %s823_s15  ;;  %s839_s19 = sphi %s875_s19, %s15_s19   ;;  %s835_s18 = sphi %s873_s18, %s971_s18   ;;  %s831_s17 = sphi %s871_s17, %s970_s17   ;;  %s827_s16 = sphi %s869_s16, %s969_s16   ;;  %s823_s15 = sphi %s867_s15, %s968_s15  }
   0x4   : > { %p28_p0 = scmp.ge.s32.totalorder %s27_s20, 9  ;;  %p51_p2 = scmp.eq.s32.totalorder %s839_s19, 0 }
   0x5   : > { %s43_s22 = sadd.s32 1, %s827_s16  ;;  %p676_p5 = scmp.ge.s32.totalorder %s839_s19, 9 }
   0x6   : > { %s973_s20 = smov (%p28_p0, %s27_s20), 0  ;;  %p52_p3 = por %p51_p2, %p50_p1 }
   0x7   : > { %s39_s21 = ssub.s32 %s835_s18, %s973_s20  ;;  %188 = sbr.rel (%p676_p5) target bundleno = 20 (0x14), region = 16 }
   0x8   : > { %p41_p4 = scmp.eq.s32.totalorder %s39_s21, 0 }
   0xa   : > { %s902_s23 = scalar_select %p41_p4, %s827_s16, %s43_s22  }
   0xc   : > { %191 = sbr.rel (!%p52_p3) target bundleno = 20 (0x14), region = 20  ;;  %s193_s24 = sand.u32 (%p52_p3), 1, %s827_s16  }
   0xd   : > { %s678_s25 = sshll.u32 (%p52_p3), %s835_s18, 2  ;;  %s677_s26 = sshll.u32 (%p52_p3), %s193_s24, 4 }
   0xe   : > { %s200_s29 = scalar_lea.vmem (%p52_p3), %s963_s0, %s678_s25  ;;  %s195_s30 = scalar_lea.vmem (%p52_p3), [#allocation3], %s677_s26 }
   0xf   : > { %v217_v0 = vld [vmem:[%s200_s29] sm:$0xf] (%p52_p3)  ;;  %v219_v1 = vld [vmem:[%s200_s29 + $0x24] sm:$0xf] (%p52_p3)  ;;  %v221_v2 = vld [vmem:[%s200_s29 + $0x48] sm:$0xf] (%p52_p3) }
  0x10   : > { %218 = vst [vmem:[%s195_s30] sm:$0xf] (%p52_p3), %v217_v0  ;;  %v223_v3 = vld [vmem:[%s200_s29 + $0x6c] sm:$0xf] (%p52_p3) }
  0x11   : > { %220 = vst [vmem:[%s195_s30 + $0x4] sm:$0xf] %v219_v1 }
  0x12   : > { %222 = vst [vmem:[%s195_s30 + $0x8] sm:$0xf] %v221_v2 }
  0x13   : > { %224 = vst [vmem:[%s195_s30 + $0xc] sm:$0xf] %v223_v3 }
  0x14 PF: > { %p679_p6 = scmp.ge.s32.totalorder %s839_s19, 1  ;;  %p267_p7 = scmp.lt.s32.totalorder %s839_s19, 10 }
  0x16   : > { %p268_p8 = pnand %p679_p6, %p267_p7 }
  0x17   : > { %s274_s5 = sand.u32 (!%p268_p8), 1, %s823_s15   ;;  %s681_s6 = sshll.u32 (!%p268_p8), %s831_s17, 4 }
  0x18   : > { %271 = sbr.rel (%p268_p8) target bundleno = 236 (0xec), region = 65  ;;  %s914_s7 = sshll.u32 (!%p268_p8), %s274_s5, 4 }
  0x19   : > { %p324_p9 = scmp.lt.s32.totalorder (!%p268_p8), %s681_s6, 143  ;;  %s276_s12 = scalar_lea.vmem (!%p268_p8), [#allocation3], %s914_s7 }
  0x1a   : > { %p683_p10 = scmp.ne.s32.totalorder (!%p268_p8), %s831_s17, 0 }
  0x1d   : > { %s975_s6 = smov (!%p324_p9, %s681_s6), 143  ;;  %356 = sbr.rel (%p683_p10) target bundleno = 39 (0x27), region = 73 }
  0x1e   : > { %s682_s8 = sshll.u32 %s975_s6, 2 }
  0x1f   : > { %s919_s11 = scalar_lea.vmem %s964_s1, %s682_s8 }
  0x22   : > { %v841_v4 = vmov 0.0  }
  0x23   : > { %357 = vst [vmem:[#allocation2 + $0x10] sm:$0xff] %v841_v4 }
  0x24   : > { %358 = vst [vmem:[#allocation2] sm:$0xff] %v841_v4 }
  0x25   : > { %359 = vst [vmem:[#allocation2 + $0x18] sm:$0xff] %v841_v4 }
  0x26   : > { %360 = vst [vmem:[#allocation2 + $0x8] sm:$0xff] %v841_v4 }
  0x27 PF: > { %v740_v5 = vld [vmem:[%s919_s11 + $0x38] sm:$0xff]  ;;  %v739_v6 = vld [vmem:[%s919_s11 + $0x30] sm:$0xff]  ;;  %v738_v7 = vld [vmem:[%s919_s11 + $0x28] sm:$0xff]  ;;  %p724_p11 = scmp.ne.s32.totalorder %s831_s17, 8 }
  0x28   : > { %445 = vmatpush.bf16.msra.mxu0 %v740_v5  ;;  %752 = vmatpush.bf16.msra.mxu1 %v740_v5  ;;  %v737_v8 = vld [vmem:[%s919_s11 + $0x20] sm:$0xff]  ;;  %v736_v9 = vld [vmem:[%s919_s11 + $0x18] sm:$0xff]  ;;  %v735_v10 = vld [vmem:[%s919_s11 + $0x10] sm:$0xff] }
  0x29   : > { %v734_v11 = vld [vmem:[%s919_s11 + $0x8] sm:$0xff]  ;;  %v733_v12 = vld [vmem:[%s919_s11] sm:$0xff] }
  0x2a   : > { %v731_v13 = vld [vmem:[%s276_s12] sm:$0xff]  ;;  %v732_v14 = vld [vmem:[%s276_s12 + $0x8] sm:$0xff] }
  0x2b   : > { %v361_v15 = vld [vmem:[#allocation2 + $0x10] sm:$0xff]  ;;  %v362_v21 = vld [vmem:[#allocation2] sm:$0xff] }
  0x2c   : > { %446 = vmatpush.bf16.msra.mxu0 %v739_v6  ;;  %753 = vmatpush.bf16.msra.mxu1 %v739_v6  ;;  %v363_v16 = vld [vmem:[#allocation2 + $0x18] sm:$0xff] }
  0x2d   : > { %v364_v22 = vld [vmem:[#allocation2 + $0x8] sm:$0xff] }
  0x30   : > { %447 = vmatpush.bf16.msra.mxu0 %v738_v7  ;;  %754 = vmatpush.bf16.msra.mxu1 %v738_v7 }
  0x34   : > { %448 = vmatpush.bf16.msra.mxu0 %v737_v8  ;;  %755 = vmatpush.bf16.msra.mxu1 %v737_v8 }
  0x38   : > { %449 = vmatpush.bf16.msra.mxu0 %v736_v9  ;;  %756 = vmatpush.bf16.msra.mxu1 %v736_v9 }
  0x3c   : > { %450 = vmatpush.bf16.msra.mxu0 %v735_v10  ;;  %757 = vmatpush.bf16.msra.mxu1 %v735_v10 }
  0x40   : > { %451 = vmatpush.bf16.msra.mxu0 %v734_v11  ;;  %758 = vmatpush.bf16.msra.mxu1 %v734_v11 }
  0x44   : > { %452 = vmatpush.bf16.msra.mxu0 %v733_v12  ;;  %759 = vmatpush.bf16.msra.mxu1 %v733_v12 }
  0x47   : > { %453 = vmatmul.bf16.vlgmr.msra.gmra.mxu0 %v731_v13  ;;  %458 = vmatmul.bf16.vlgmr.msra.gmra.mxu1 %v732_v14 }
  0xc4   : > { %v454_v17 = vpop.f32.mrf.mxu0  ;;  %v459_v18 = vpop.f32.mrf.mxu1 }
  0xc5   : > { %v464_v19 = vadd.f32 %v454_v17, %v361_v15  ;;  %v466_v20 = vadd.f32 %v459_v18, %v363_v16 }
  0xc7   : > { %468 = vst [vmem:[#allocation2 + $0x10] sm:$0xff] %v464_v19 }
  0xc8   : > { %470 = vst [vmem:[#allocation2 + $0x18] sm:$0xff] %v466_v20 }
  0xcc   : > { %v456_v23 = vpop.f32.mrf.mxu0  ;;  %v461_v24 = vpop.f32.mrf.mxu1  ;;  %475 = sbr.rel (%p724_p11) target bundleno = 236 (0xec), region = 77 }
  0xcd   : > { %v465_v25 = vadd.f32 %v456_v23, %v362_v21  ;;  %v467_v26 = vadd.f32 %v461_v24, %v364_v22 }
  0xcf   : > { %469 = vst [vmem:[#allocation2] sm:$0xff] %v465_v25 }
  0xd0   : > { %471 = vst [vmem:[#allocation2 + $0x8] sm:$0xff] %v467_v26 }
  0xd1   : > { %v476_v27 = vld [vmem:[#allocation2 + $0x10] sm:$0xff]  ;;  %v478_v29 = vld [vmem:[#allocation2 + $0x18] sm:$0xff] }
  0xd2   : > { %v498_v32 = vmul.f32 %v476_v27, %v476_v27  ;;  %v500_v36 = vmul.f32 %v478_v29, %v478_v29 }
  0xd6   : > { %v477_v28 = vld [vmem:[#allocation2] sm:$0xff] }
  0xd7   : > { %v744_v30 = vpack.c.bf16 %v477_v28, %v476_v27  ;;  %v488_v31 = vadd.f32 %v477_v28, %v476_v27  ;;  %v499_v33 = vmul.f32 %v477_v28, %v477_v28  ;;  %v479_v34 = vld [vmem:[#allocation2 + $0x8] sm:$0xff] }
  0xd8   : > { %v749_v35 = vpack.c.bf16 %v479_v34, %v478_v29  ;;  %v501_v39 = vmul.f32 %v479_v34, %v479_v34 }
  0xd9   : > { %745 = vst [vmem:[%s965_s2] sm:$0xff] %v744_v30   ;;  %v502_v37 = vadd.f32 %v499_v33, %v498_v32  ;;  %v489_v38 = vadd.f32 %v488_v31, %v478_v29 }
  0xda   : > { %751 = vst [vmem:[%s965_s2 + $0x8] sm:$0xff] %v749_v35  }
  0xdb   : > { %v490_v40 = vadd.f32 %v489_v38, %v479_v34  ;;  %v503_v41 = vadd.f32 %v502_v37, %v500_v36 }
  0xdd   : > { %v491_v42 = vrot.slane %v490_v40, 4  ;;  %v504_v43 = vadd.f32 %v503_v41, %v501_v39 }
  0xdf   : > { %v492_v44 = vadd.f32 %v491_v42, %v490_v40  ;;  %v505_v45 = vrot.slane %v504_v43, 4 }
  0xe1   : > { %v493_v46 = vrot.slane %v492_v44, 2  ;;  %v506_v47 = vadd.f32 %v505_v45, %v504_v43 }
  0xe3   : > { %v494_v48 = vadd.f32 %v493_v46, %v492_v44  ;;  %v507_v49 = vrot.slane %v506_v47, 2 }
  0xe5   : > { %v495_v50 = vrot.slane %v494_v48, 1  ;;  %v508_v51 = vadd.f32 %v507_v49, %v506_v47 }
  0xe7   : > { %v496_v52 = vadd.f32 %v495_v50, %v494_v48  ;;  %v509_v53 = vrot.slane %v508_v51, 1 }
  0xe9   : > { %497 = vst [vmem:[%s966_s3] sm:$0x1] %v496_v52  ;;  %v510_v54 = vadd.f32 %v509_v53, %v508_v51 }
  0xeb   : > { %511 = vst [vmem:[%s967_s4] sm:$0x1] %v510_v54 }
  0xec PF: > { %s15_s19 = sadd.s32 1, %s839_s19   ;;  %s968_s15 = smov %s827_s16 }
  0xed   : > { %p12_p12 = scmp.ge.s32.totalorder %s15_s19, 11   ;;  %s969_s16 = smov %s902_s23 }
  0xee   : > { %s970_s17 = smov %s835_s18  ;;  %s971_s18 = smov %s973_s20 }
  0xef   :  { %14 = sbr.rel (!%p12_p12) target bundleno = 3 (0x3), region = 139 }

// kernel: resnet_forward.37
= control target key start
LH: loop header
LB: loop body
LE: loop exit
PB: predicated region body
PF: predicated region fallthrough
CT: control target
= control target key end

     0   :  { %10 = vsyncpa [#allocation4], 0  ;;  %s337_s18 = smov [#allocation3]   ;;  %s338_s20 = smov 128   ;;  %s380_s0 = inlined_call_operand.vmem [shape: bf16[8,128], index: 0, kind: input, shape index: {}]   ;;  %s381_s1 = inlined_call_operand.hbm [shape: bf16[128,256], index: 1, kind: input, shape index: {}]   ;;  %s382_s2 = inlined_call_operand.vmem [shape: bf16[8,256], index: 2, kind: output, shape index: {0}]   ;;  %s383_s3 = inlined_call_operand.vmem [shape: f32[1,1,256], index: 3, kind: output, shape index: {1}]   ;;  %s384_s4 = inlined_call_operand.vmem [shape: f32[1,1,256], index: 4, kind: output, shape index: {2}]  }
   0x1   :  { %s17_s17 = sshll.u32 %s381_s1, 4  ;;  %s19_s19 = sshll.u32 %s337_s18, 4  ;;  %s18_s17 = int_to_ptr.hbm [resolvable:$true] %s17_s17  ;;  %s20_s19 = int_to_ptr.vmem [resolvable:$true] %s19_s19 }
   0x2   :  { %s339_s21 = smov 8  }
   0x3   :  { %25 = dma.hbm_to_vmem [thread:$0]  %s18_s17, 2048, %s20_s19, [#allocation4], %s338_s20, %s338_s20, %s339_s21  }
   0x4   :  { %335 = dma.done.wait [#allocation4], 2048  }
   0x5   :  { %336 = vsyncadd [#allocation4], 4294965248  ;;  %v286_v0 = vld [vmem:[#allocation3 + $0x70] sm:$0xf]  ;;  %v307_v1 = vld [vmem:[#allocation3 + $0x74] sm:$0xf0] }
   0x6   :  { %v306_v2 = vld [vmem:[#allocation3 + $0x74] sm:$0xf]  ;;  %v287_v3 = vor.u32 %v307_v1, %v286_v0  ;;  %v288_v4 = vld [vmem:[#allocation3 + $0x78] sm:$0xf0]  ;;  %v278_v5 = vld [vmem:[#allocation3 + $0x60] sm:$0xf] }
   0x7   :  { %v305_v6 = vld [vmem:[#allocation3 + $0x64] sm:$0xf0]  ;;  %v291_v7 = vor.u32 %v306_v2, %v288_v4  ;;  %v304_v8 = vld [vmem:[#allocation3 + $0x64] sm:$0xf]  ;;  %v280_v9 = vld [vmem:[#allocation3 + $0x68] sm:$0xf0] }
   0x8   :  { %135 = vmatpush.bf16.msra.mxu0 %v287_v3  ;;  %v279_v10 = vor.u32 %v305_v6, %v278_v5  ;;  %v283_v11 = vor.u32 %v304_v8, %v280_v9  ;;  %v270_v12 = vld [vmem:[#allocation3 + $0x50] sm:$0xf]  ;;  %v303_v13 = vld [vmem:[#allocation3 + $0x54] sm:$0xf0]  ;;  %v302_v14 = vld [vmem:[#allocation3 + $0x54] sm:$0xf]  ;;  %v190_v9 = vlaneseq }
   0x9   :  { %148 = vmatpush.bf16.msra.mxu1 %v291_v7  ;;  %v272_v15 = vld [vmem:[#allocation3 + $0x58] sm:$0xf0]  ;;  %v271_v16 = vor.u32 %v303_v13, %v270_v12  ;;  %v262_v18 = vld [vmem:[#allocation3 + $0x40] sm:$0xf]  ;;  %v301_v19 = vld [vmem:[#allocation3 + $0x44] sm:$0xf0] }
   0xa   :  { %v275_v17 = vor.u32 %v302_v14, %v272_v15  ;;  %v300_v20 = vld [vmem:[#allocation3 + $0x44] sm:$0xf]  ;;  %v264_v21 = vld [vmem:[#allocation3 + $0x48] sm:$0xf0]  ;;  %v263_v22 = vor.u32 %v301_v19, %v262_v18  ;;  %v254_v24 = vld [vmem:[#allocation3 + $0x30] sm:$0xf] }
   0xb   :  { %v267_v23 = vor.u32 %v300_v20, %v264_v21  ;;  %v299_v25 = vld [vmem:[#allocation3 + $0x34] sm:$0xf0]  ;;  %v298_v26 = vld [vmem:[#allocation3 + $0x34] sm:$0xf]  ;;  %v256_v27 = vld [vmem:[#allocation3 + $0x38] sm:$0xf0] }
   0xc   :  { %136 = vmatpush.bf16.msra.mxu0 %v279_v10  ;;  %v255_v28 = vor.u32 %v299_v25, %v254_v24  ;;  %v259_v29 = vor.u32 %v298_v26, %v256_v27  ;;  %v246_v30 = vld [vmem:[#allocation3 + $0x20] sm:$0xf]  ;;  %v297_v31 = vld [vmem:[#allocation3 + $0x24] sm:$0xf0]  ;;  %v296_v32 = vld [vmem:[#allocation3 + $0x24] sm:$0xf] }
   0xd   :  { %149 = vmatpush.bf16.msra.mxu1 %v283_v11  ;;  %v248_v33 = vld [vmem:[#allocation3 + $0x28] sm:$0xf0]  ;;  %v247_v34 = vor.u32 %v297_v31, %v246_v30  ;;  %v238_v36 = vld [vmem:[#allocation3 + $0x10] sm:$0xf]  ;;  %v295_v37 = vld [vmem:[#allocation3 + $0x14] sm:$0xf0] }
   0xe   :  { %v251_v35 = vor.u32 %v296_v32, %v248_v33  ;;  %v294_v38 = vld [vmem:[#allocation3 + $0x14] sm:$0xf]  ;;  %v240_v39 = vld [vmem:[#allocation3 + $0x18] sm:$0xf0]  ;;  %v239_v40 = vor.u32 %v295_v37, %v238_v36  ;;  %v230_v42 = vld [vmem:[#allocation3] sm:$0xf] }
   0xf   :  { %v243_v41 = vor.u32 %v294_v38, %v240_v39  ;;  %v293_v43 = vld [vmem:[#allocation3 + $0x4] sm:$0xf0]  ;;  %v292_v44 = vld [vmem:[#allocation3 + $0x4] sm:$0xf]  ;;  %v232_v45 = vld [vmem:[#allocation3 + $0x8] sm:$0xf0] }
  0x10   :  { %137 = vmatpush.bf16.msra.mxu0 %v271_v16  ;;  %v231_v46 = vor.u32 %v293_v43, %v230_v42  ;;  %v235_v47 = vor.u32 %v292_v44, %v232_v45  ;;  %v38_v48 = vld [vmem:[%s380_s0] sm:$0xf]  ;;  %vm187_vm0 = vcmask 1040384   ;;  %vm192_vm1 = vcmp.lt.s32.totalorder %v190_v9, 256 }
  0x11   :  { %150 = vmatpush.bf16.msra.mxu1 %v275_v17 }
  0x14   :  { %138 = vmatpush.bf16.msra.mxu0 %v263_v22 }
  0x15   :  { %151 = vmatpush.bf16.msra.mxu1 %v267_v23 }
  0x18   :  { %139 = vmatpush.bf16.msra.mxu0 %v255_v28 }
  0x19   :  { %152 = vmatpush.bf16.msra.mxu1 %v259_v29 }
  0x1c   :  { %140 = vmatpush.bf16.msra.mxu0 %v247_v34 }
  0x1d   :  { %153 = vmatpush.bf16.msra.mxu1 %v251_v35 }
  0x20   :  { %141 = vmatpush.bf16.msra.mxu0 %v239_v40 }
  0x21   :  { %154 = vmatpush.bf16.msra.mxu1 %v243_v41 }
  0x24   :  { %142 = vmatpush.bf16.msra.mxu0 %v231_v46 }
  0x25   :  { %155 = vmatpush.bf16.msra.mxu1 %v235_v47 }
  0x27   :  { %143 = vmatmul.bf16.vlgmr.msra.gmra.mxu0 %v38_v48 }
  0x28   :  { %156 = vmatmul.bf16.vlgmr.msra.gmra.mxu1 %v38_v48 }
  0xa4   :  { %v144_v49 = vpop.f32.mrf.mxu0 }
  0xa5   :  { %v172_v50 = vrot.slane %v144_v49, 4  ;;  %v195_v51 = vmul.f32 %v144_v49, %v144_v49  ;;  %v157_v52 = vpop.f32.mrf.mxu1 }
  0xa6   :  { %v170_v53 = vpack.c.bf16 %v157_v52, %v144_v49  ;;  %v178_v54 = vrot.slane %v157_v52, 4  ;;  %v196_v55 = vmul.f32 %v157_v52, %v157_v52 }
  0xa7   :  { %v173_v56 = vadd.f32 %v172_v50, %v144_v49  ;;  %v197_v57 = vrot.slane %v195_v51, 4 }
  0xa8   :  { %171 = vst [vmem:[%s382_s2] sm:$0xff] %v170_v53  ;;  %v179_v58 = vadd.f32 %v178_v54, %v157_v52  ;;  %v203_v59 = vrot.slane %v196_v55, 4 }
  0xa9   :  { %v174_v60 = vrot.slane %v173_v56, 2  ;;  %v198_v61 = vadd.f32 %v197_v57, %v195_v51 }
  0xaa   :  { %v180_v62 = vrot.slane %v179_v58, 2  ;;  %v204_v63 = vadd.f32 %v203_v59, %v196_v55 }
  0xab   :  { %v175_v0 = vadd.f32 %v174_v60, %v173_v56  ;;  %v199_v1 = vrot.slane %v198_v61, 2 }
  0xac   :  { %v181_v2 = vadd.f32 %v180_v62, %v179_v58  ;;  %v205_v3 = vrot.slane %v204_v63, 2  ;;  %v146_v4 = vpop.f32.mrf.mxu0 }
  0xad   :  { %v200_v5 = vadd.f32 %v199_v1, %v198_v61  ;;  %v159_v6 = vpop.f32.mrf.mxu1  ;;  %v176_v7 = vrot.slane %v175_v0, 1 }
  0xae   :  { %v182_v8 = vrot.slane %v181_v2, 1  ;;  %v206_v10 = vadd.f32 %v205_v3, %v204_v63 }
  0xaf   :  { %v201_v11 = vrot.slane %v200_v5, 1  ;;  %v177_v14 = vadd.f32 %v176_v7, %v175_v0 }
  0xb0   :  { %v183_v12 = vadd.f32 %v182_v8, %v181_v2  ;;  %v207_v13 = vrot.slane %v206_v10, 1 }
  0xb1   :  { %v202_v17 = vadd.f32 %v201_v11, %v200_v5 }
  0xb2   :  { %v186_v15 = vrot.slane %v183_v12, 7  ;;  %v208_v16 = vadd.f32 %v207_v13, %v206_v10 }
  0xb4   :  { %v188_v18 = vsel %vm187_vm0, %v177_v14, %v186_v15  ;;  %v211_v19 = vrot.slane %v208_v16, 7 }
  0xb5   :  { %194 = vst.msk [vmem:[%s383_s3] sm:$0x3] %vm192_vm1, %v188_v18 }
  0xb6   :  { %v212_v20 = vsel %vm187_vm0, %v202_v17, %v211_v19 }
  0xb7   :  { %214 = vst.msk [vmem:[%s384_s4] sm:$0x3] %vm192_vm1, %v212_v20 }
  0xb8   :  { %227 = vsyncpa [#allocation4], 1 }

// kernel: resnet_forward.35
= control target key start
LH: loop header
LB: loop body
LE: loop exit
PB: predicated region body
PF: predicated region fallthrough
CT: control target
= control target key end

     0   :  { %s73_s0 = inlined_call_operand.vmem [shape: bf16[8,256], index: 0, kind: input, shape index: {}]   ;;  %s74_s1 = inlined_call_operand.vmem [shape: f32[1,256], index: 1, kind: input, shape index: {}]   ;;  %s75_s2 = inlined_call_operand.vmem [shape: f32[1,256], index: 2, kind: input, shape index: {}]   ;;  %s76_s3 = inlined_call_operand.vmem [shape: bf16[8,256], index: 3, kind: output, shape index: {}]  }
   0x1   :  { %v14_v0 = vld [vmem:[%s73_s0] sm:$0xff] }
   0x2   :  { %v17_v1 = vld [vmem:[%s74_s1] sm:$0x3]  ;;  %v15_v3 = vunpack.c.l.bf16 %v14_v0  ;;  %v16_v4 = vunpack.c.h.bf16 %v14_v0 }
   0x3   :  { %v25_v2 = vld [vmem:[%s75_s2] sm:$0x3]  ;;  %v19_v5 = vperm.slane %v17_v1, 0  ;;  %v20_v6 = vperm.slane %v17_v1, 1 }
   0x4   :  { %v27_v7 = vperm.slane %v25_v2, 0  ;;  %v28_v8 = vperm.slane %v25_v2, 1 }
   0x5   :  { %v23_v9 = vmul.f32 %v19_v5, %v15_v3  ;;  %v24_v10 = vmul.f32 %v20_v6, %v16_v4 }
   0x7   :  { %v31_v11 = vadd.f32 %v27_v7, %v23_v9  ;;  %v32_v12 = vadd.f32 %v28_v8, %v24_v10 }
   0x9   :  { %v33_v13 = vmax.f32 %v31_v11, 0.0  ;;  %v34_v14 = vmax.f32 %v32_v12, 0.0 }
   0xb   :  { %v35_v15 = vpack.c.bf16 %v34_v14, %v33_v13 }
   0xd   :  { %36 = vst [vmem:[%s76_s3] sm:$0xff] %v35_v15 }

// kernel: resnet_forward.34
= control target key start
LH: loop header
LB: loop body
LE: loop exit
PB: predicated region body
PF: predicated region fallthrough
CT: control target
= control target key end

     0   :  { %s870_s15 = smov 0   ;;  %s872_s16 = smov 0   ;;  %s956_s0 = inlined_call_operand.vmem [shape: bf16[8,1152], index: 0, kind: input, shape index: {}]   ;;  %s957_s1 = inlined_call_operand.vmem [shape: bf16[1152,256], index: 1, kind: input, shape index: {}]   ;;  %s958_s2 = inlined_call_operand.vmem [shape: bf16[8,256], index: 2, kind: output, shape index: {0}]   ;;  %s959_s3 = inlined_call_operand.vmem [shape: f32[1,1,256], index: 3, kind: output, shape index: {1}]   ;;  %s960_s4 = inlined_call_operand.vmem [shape: f32[1,1,256], index: 4, kind: output, shape index: {2}]  }
   0x1   :  { %s874_s17 = smov 0  }
   0x2 LB: > { %s27_s18 = sadd.s32 1, %s838_s16  ;;  %p699_p0 = scmp.ge.s32.totalorder %s842_s17, 1  ;;  %s842_s17 = sphi %s874_s17, %s15_s17   ;;  %s838_s16 = sphi %s872_s16, %s962_s16   ;;  %s834_s15 = sphi %s870_s15, %s961_s15  }
   0x3   : > { %p28_p1 = scmp.ge.s32.totalorder %s27_s18, 9  ;;  %p216_p2 = scmp.lt.s32.totalorder %s842_s17, 10 }
   0x5   : > { %s964_s18 = smov (%p28_p1, %s27_s18), 0  ;;  %p217_p3 = pnand %p699_p0, %p216_p2 }
   0x6   : > { %p277_p4 = scmp.lt.s32.totalorder (!%p217_p3), %s834_s15, 8  ;;  %s701_s19 = sshll.u32 (!%p217_p3), %s834_s15, 4 }
   0x7   : > { %220 = sbr.rel (%p217_p3) target bundleno = 210 (0xd2), region = 28  ;;  %p285_p5 = scmp.lt.s32.totalorder (!%p217_p3), %s701_s19, 143 }
   0x8   : > { %p704_p6 = scmp.ne.s32.totalorder (!%p217_p3), %s834_s15, 0 }
   0xc   : > { %s278_s20 = scalar_select %p277_p4, %s834_s15, 8 }
   0xd   : > { %s966_s19 = smov (!%p285_p5, %s701_s19), 143  ;;  %326 = sbr.rel (%p704_p6) target bundleno = 21 (0x15), region = 32 }
   0xe   : > { %s700_s21 = sshll.u32 %s278_s20, 2  ;;  %s778_s25 = sshll.u32 %s966_s19, 3 }
   0xf   : > { %s896_s24 = scalar_lea.vmem %s956_s0, %s700_s21  ;;  %s901_s28 = scalar_lea.vmem %s957_s1, %s778_s25 }
  0x12   : > { %v844_v0 = vmov 0.0  }
  0x13   : > { %327 = vst [vmem:[#allocation2] sm:$0xff] %v844_v0 }
  0x14   : > { %328 = vst [vmem:[#allocation2 + $0x8] sm:$0xff] %v844_v0 }
  0x15 PF: > { %v763_v1 = vld [vmem:[%s901_s28 + $0x70] sm:$0xf]  ;;  %v794_v2 = vld [vmem:[%s901_s28 + $0x74] sm:$0xf0]  ;;  %v793_v3 = vld [vmem:[%s901_s28 + $0x74] sm:$0xf] }
  0x16   : > { %v764_v4 = vor.u32 %v794_v2, %v763_v1  ;;  %v765_v5 = vld [vmem:[%s901_s28 + $0x78] sm:$0xf0]  ;;  %v755_v6 = vld [vmem:[%s901_s28 + $0x60] sm:$0xf]  ;;  %v792_v7 = vld [vmem:[%s901_s28 + $0x64] sm:$0xf0] }
  0x17   : > { %v768_v8 = vor.u32 %v793_v3, %v765_v5  ;;  %v791_v9 = vld [vmem:[%s901_s28 + $0x64] sm:$0xf]  ;;  %v757_v10 = vld [vmem:[%s901_s28 + $0x68] sm:$0xf0]  ;;  %v756_v11 = vor.u32 %v792_v7, %v755_v6  ;;  %v747_v13 = vld [vmem:[%s901_s28 + $0x50] sm:$0xf] }
  0x18   : > { %428 = vmatpush.bf16.msra.mxu0 %v764_v4  ;;  %v760_v12 = vor.u32 %v791_v9, %v757_v10  ;;  %v790_v14 = vld [vmem:[%s901_s28 + $0x54] sm:$0xf0]  ;;  %v789_v15 = vld [vmem:[%s901_s28 + $0x54] sm:$0xf]  ;;  %v749_v16 = vld [vmem:[%s901_s28 + $0x58] sm:$0xf0] }
  0x19   : > { %441 = vmatpush.bf16.msra.mxu1 %v768_v8  ;;  %v748_v17 = vor.u32 %v790_v14, %v747_v13  ;;  %v752_v18 = vor.u32 %v789_v15, %v749_v16  ;;  %v739_v19 = vld [vmem:[%s901_s28 + $0x40] sm:$0xf]  ;;  %v788_v20 = vld [vmem:[%s901_s28 + $0x44] sm:$0xf0]  ;;  %v787_v21 = vld [vmem:[%s901_s28 + $0x44] sm:$0xf] }
  0x1a   : > { %v741_v22 = vld [vmem:[%s901_s28 + $0x48] sm:$0xf0]  ;;  %v740_v23 = vor.u32 %v788_v20, %v739_v19  ;;  %v731_v25 = vld [vmem:[%s901_s28 + $0x30] sm:$0xf]  ;;  %v786_v26 = vld [vmem:[%s901_s28 + $0x34] sm:$0xf0] }
  0x1b   : > { %v744_v24 = vor.u32 %v787_v21, %v741_v22  ;;  %v785_v27 = vld [vmem:[%s901_s28 + $0x34] sm:$0xf]  ;;  %v733_v28 = vld [vmem:[%s901_s28 + $0x38] sm:$0xf0]  ;;  %v732_v29 = vor.u32 %v786_v26, %v731_v25  ;;  %v723_v31 = vld [vmem:[%s901_s28 + $0x20] sm:$0xf] }
  0x1c   : > { %429 = vmatpush.bf16.msra.mxu0 %v756_v11  ;;  %v736_v30 = vor.u32 %v785_v27, %v733_v28  ;;  %v784_v32 = vld [vmem:[%s901_s28 + $0x24] sm:$0xf0]  ;;  %v783_v33 = vld [vmem:[%s901_s28 + $0x24] sm:$0xf]  ;;  %v725_v34 = vld [vmem:[%s901_s28 + $0x28] sm:$0xf0] }
  0x1d   : > { %442 = vmatpush.bf16.msra.mxu1 %v760_v12  ;;  %v724_v35 = vor.u32 %v784_v32, %v723_v31  ;;  %v728_v36 = vor.u32 %v783_v33, %v725_v34  ;;  %v715_v37 = vld [vmem:[%s901_s28 + $0x10] sm:$0xf]  ;;  %v782_v38 = vld [vmem:[%s901_s28 + $0x14] sm:$0xf0]  ;;  %v781_v39 = vld [vmem:[%s901_s28 + $0x14] sm:$0xf] }
  0x1e   : > { %v717_v40 = vld [vmem:[%s901_s28 + $0x18] sm:$0xf0]  ;;  %v716_v41 = vor.u32 %v782_v38, %v715_v37  ;;  %v707_v43 = vld [vmem:[%s901_s28] sm:$0xf]  ;;  %v780_v44 = vld [vmem:[%s901_s28 + $0x4] sm:$0xf0] }
  0x1f   : > { %v720_v42 = vor.u32 %v781_v39, %v717_v40  ;;  %v779_v45 = vld [vmem:[%s901_s28 + $0x4] sm:$0xf]  ;;  %v709_v46 = vld [vmem:[%s901_s28 + $0x8] sm:$0xf0]  ;;  %v708_v47 = vor.u32 %v780_v44, %v707_v43  ;;  %v331_v49 = vld [vmem:[%s896_s24] sm:$0xf] }
  0x20   : > { %430 = vmatpush.bf16.msra.mxu0 %v748_v17  ;;  %v712_v48 = vor.u32 %v779_v45, %v709_v46  ;;  %v329_v50 = vld [vmem:[#allocation2] sm:$0xff]  ;;  %v330_v51 = vld [vmem:[#allocation2 + $0x8] sm:$0xff]  ;;  %p769_p7 = scmp.ne.s32.totalorder %s834_s15, 8 }
  0x21   : > { %443 = vmatpush.bf16.msra.mxu1 %v752_v18 }
  0x24   : > { %431 = vmatpush.bf16.msra.mxu0 %v740_v23 }
  0x25   : > { %444 = vmatpush.bf16.msra.mxu1 %v744_v24 }
  0x28   : > { %432 = vmatpush.bf16.msra.mxu0 %v732_v29 }
  0x29   : > { %445 = vmatpush.bf16.msra.mxu1 %v736_v30 }
  0x2c   : > { %433 = vmatpush.bf16.msra.mxu0 %v724_v35 }
  0x2d   : > { %446 = vmatpush.bf16.msra.mxu1 %v728_v36 }
  0x30   : > { %434 = vmatpush.bf16.msra.mxu0 %v716_v41 }
  0x31   : > { %447 = vmatpush.bf16.msra.mxu1 %v720_v42 }
  0x34   : > { %435 = vmatpush.bf16.msra.mxu0 %v708_v47 }
  0x35   : > { %448 = vmatpush.bf16.msra.mxu1 %v712_v48 }
  0x37   : > { %436 = vmatmul.bf16.vlgmr.msra.gmra.mxu0 %v331_v49 }
  0x38   : > { %449 = vmatmul.bf16.vlgmr.msra.gmra.mxu1 %v331_v49 }
  0xb4   : > { %v437_v52 = vpop.f32.mrf.mxu0 }
  0xb5   : > { %v454_v53 = vadd.f32 %v437_v52, %v329_v50  ;;  %v450_v54 = vpop.f32.mrf.mxu1 }
  0xb6   : > { %v455_v55 = vadd.f32 %v450_v54, %v330_v51 }
  0xb7   : > { %456 = vst [vmem:[#allocation2] sm:$0xff] %v454_v53 }
  0xb8   : > { %457 = vst [vmem:[#allocation2 + $0x8] sm:$0xff] %v455_v55 }
  0xb9   : > { %461 = sbr.rel (%p769_p7) target bundleno = 210 (0xd2), region = 36 }
  0xbc   : > { %v439_v56 = vpop.f32.mrf.mxu0 }
  0xbd   : > { %v452_v57 = vpop.f32.mrf.mxu1 }
  0xbe   : > { %v462_v58 = vld [vmem:[#allocation2] sm:$0xff]  ;;  %v484_v15 = vlaneseq  ;;  %vm481_vm0 = vcmask 1040384  }
  0xbf   : > { %v463_v59 = vld [vmem:[#allocation2 + $0x8] sm:$0xff]  ;;  %v466_v61 = vrot.slane %v462_v58, 4  ;;  %v489_v63 = vmul.f32 %v462_v58, %v462_v58 }
  0xc0   : > { %v464_v60 = vpack.c.bf16 %v463_v59, %v462_v58  ;;  %v472_v62 = vrot.slane %v463_v59, 4  ;;  %v490_v0 = vmul.f32 %v463_v59, %v463_v59  ;;  %vm486_vm1 = vcmp.lt.s32.totalorder %v484_v15, 256 }
  0xc1   : > { %v467_v1 = vadd.f32 %v466_v61, %v462_v58  ;;  %v491_v3 = vrot.slane %v489_v63, 4 }
  0xc2   : > { %465 = vst [vmem:[%s958_s2] sm:$0xff] %v464_v60  ;;  %v473_v2 = vadd.f32 %v472_v62, %v463_v59  ;;  %v497_v4 = vrot.slane %v490_v0, 4 }
  0xc3   : > { %v468_v5 = vrot.slane %v467_v1, 2  ;;  %v492_v7 = vadd.f32 %v491_v3, %v489_v63 }
  0xc4   : > { %v474_v6 = vrot.slane %v473_v2, 2  ;;  %v498_v8 = vadd.f32 %v497_v4, %v490_v0 }
  0xc5   : > { %v469_v9 = vadd.f32 %v468_v5, %v467_v1  ;;  %v493_v11 = vrot.slane %v492_v7, 2 }
  0xc6   : > { %v475_v10 = vadd.f32 %v474_v6, %v473_v2  ;;  %v499_v12 = vrot.slane %v498_v8, 2 }
  0xc7   : > { %v470_v13 = vrot.slane %v469_v9, 1  ;;  %v494_v16 = vadd.f32 %v493_v11, %v492_v7 }
  0xc8   : > { %v476_v14 = vrot.slane %v475_v10, 1  ;;  %v500_v17 = vadd.f32 %v499_v12, %v498_v8 }
  0xc9   : > { %v471_v18 = vadd.f32 %v470_v13, %v469_v9  ;;  %v495_v20 = vrot.slane %v494_v16, 1 }
  0xca   : > { %v477_v19 = vadd.f32 %v476_v14, %v475_v10  ;;  %v501_v21 = vrot.slane %v500_v17, 1 }
  0xcb   : > { %v496_v23 = vadd.f32 %v495_v20, %v494_v16 }
  0xcc   : > { %v480_v22 = vrot.slane %v477_v19, 7  ;;  %v502_v24 = vadd.f32 %v501_v21, %v500_v17 }
  0xce   : > { %v482_v25 = vsel %vm481_vm0, %v471_v18, %v480_v22  ;;  %v505_v26 = vrot.slane %v502_v24, 7 }
  0xcf   : > { %488 = vst.msk [vmem:[%s959_s3] sm:$0x3] %vm486_vm1, %v482_v25 }
  0xd0   : > { %v506_v27 = vsel %vm481_vm0, %v496_v23, %v505_v26 }
  0xd1   : > { %508 = vst.msk [vmem:[%s960_s4] sm:$0x3] %vm486_vm1, %v506_v27 }
  0xd2 PF: > { %s15_s17 = sadd.s32 1, %s842_s17   ;;  %s961_s15 = smov %s838_s16 }
  0xd3   : > { %p12_p8 = scmp.ge.s32.totalorder %s15_s17, 11   ;;  %s962_s16 = smov %s964_s18 }
  0xd5   :  { %14 = sbr.rel (!%p12_p8) target bundleno = 2 (0x2), region = 93 }

// kernel: resnet_forward.38
= control target key start
LH: loop header
LB: loop body
LE: loop exit
PB: predicated region body
PF: predicated region fallthrough
CT: control target
= control target key end

     0   :  { %s127_s0 = inlined_call_operand.vmem [shape: bf16[8,256], index: 0, kind: input, shape index: {}]   ;;  %s128_s1 = inlined_call_operand.vmem [shape: f32[1,256], index: 1, kind: input, shape index: {}]   ;;  %s129_s2 = inlined_call_operand.vmem [shape: f32[1,256], index: 2, kind: input, shape index: {}]   ;;  %s130_s3 = inlined_call_operand.vmem [shape: bf16[8,256], index: 3, kind: input, shape index: {}]   ;;  %s131_s4 = inlined_call_operand.vmem [shape: f32[1,256], index: 4, kind: input, shape index: {}]   ;;  %s132_s5 = inlined_call_operand.vmem [shape: f32[1,256], index: 5, kind: input, shape index: {}]   ;;  %s133_s6 = inlined_call_operand.vmem [shape: bf16[8,256], index: 6, kind: output, shape index: {}]  }
   0x1   :  { %v23_v0 = vld [vmem:[%s127_s0] sm:$0xff] }
   0x2   :  { %v26_v1 = vld [vmem:[%s128_s1] sm:$0x3]  ;;  %v24_v3 = vunpack.c.l.bf16 %v23_v0  ;;  %v25_v4 = vunpack.c.h.bf16 %v23_v0 }
   0x3   :  { %v34_v2 = vld [vmem:[%s129_s2] sm:$0x3]  ;;  %v28_v5 = vperm.slane %v26_v1, 0  ;;  %v29_v6 = vperm.slane %v26_v1, 1 }
   0x4   :  { %v42_v7 = vld [vmem:[%s130_s3] sm:$0xff]  ;;  %v36_v9 = vperm.slane %v34_v2, 0  ;;  %v37_v10 = vperm.slane %v34_v2, 1 }
   0x5   :  { %v45_v8 = vld [vmem:[%s131_s4] sm:$0x3]  ;;  %v43_v11 = vunpack.c.l.bf16 %v42_v7  ;;  %v44_v12 = vunpack.c.h.bf16 %v42_v7  ;;  %v32_v14 = vmul.f32 %v28_v5, %v24_v3  ;;  %v33_v15 = vmul.f32 %v29_v6, %v25_v4 }
   0x6   :  { %v53_v13 = vld [vmem:[%s132_s5] sm:$0x3]  ;;  %v47_v16 = vperm.slane %v45_v8, 0  ;;  %v48_v17 = vperm.slane %v45_v8, 1 }
   0x7   :  { %v55_v18 = vperm.slane %v53_v13, 0  ;;  %v56_v19 = vperm.slane %v53_v13, 1  ;;  %v40_v20 = vadd.f32 %v36_v9, %v32_v14  ;;  %v41_v21 = vadd.f32 %v37_v10, %v33_v15 }
   0x8   :  { %v51_v22 = vmul.f32 %v47_v16, %v43_v11  ;;  %v52_v23 = vmul.f32 %v48_v17, %v44_v12 }
   0xa   :  { %v59_v24 = vadd.f32 %v55_v18, %v51_v22  ;;  %v60_v25 = vadd.f32 %v56_v19, %v52_v23 }
   0xc   :  { %v61_v26 = vadd.f32 %v59_v24, %v40_v20  ;;  %v62_v27 = vadd.f32 %v60_v25, %v41_v21 }
   0xe   :  { %v63_v28 = vmax.f32 %v61_v26, 0.0  ;;  %v64_v29 = vmax.f32 %v62_v27, 0.0 }
  0x10   :  { %v65_v30 = vpack.c.bf16 %v64_v29, %v63_v28 }
  0x12   :  { %66 = vst [vmem:[%s133_s6] sm:$0xff] %v65_v30 }

// kernel: resnet_forward.36
= control target key start
LH: loop header
LB: loop body
LE: loop exit
PB: predicated region body
PF: predicated region fallthrough
CT: control target
= control target key end

     0   :  { %s1085_s15 = smov 0   ;;  %s1087_s16 = smov 0   ;;  %s1202_s0 = inlined_call_operand.vmem [shape: bf16[8,2304], index: 0, kind: input, shape index: {}]   ;;  %s1203_s1 = inlined_call_operand.vmem [shape: bf16[2304,256], index: 1, kind: input, shape index: {}]   ;;  %s1204_s2 = inlined_call_operand.vmem [shape: bf16[8,256], index: 2, kind: output, shape index: {0}]   ;;  %s1205_s3 = inlined_call_operand.vmem [shape: f32[1,1,256], index: 3, kind: output, shape index: {1}]   ;;  %s1206_s4 = inlined_call_operand.vmem [shape: f32[1,1,256], index: 4, kind: output, shape index: {2}]  }
   0x1   :  { %s1089_s17 = smov 0  }
   0x2 LB: > { %s27_s18 = sadd.s32 1, %s1053_s16  ;;  %p833_p0 = scmp.ge.s32.totalorder %s1057_s17, 1  ;;  %s1057_s17 = sphi %s1089_s17, %s15_s17   ;;  %s1053_s16 = sphi %s1087_s16, %s1208_s16   ;;  %s1049_s15 = sphi %s1085_s15, %s1207_s15  }
   0x3   : > { %p28_p1 = scmp.ge.s32.totalorder %s27_s18, 9  ;;  %p218_p2 = scmp.lt.s32.totalorder %s1057_s17, 10 }
   0x5   : > { %s1210_s18 = smov (%p28_p1, %s27_s18), 0  ;;  %p219_p3 = pnand %p833_p0, %p218_p2 }
   0x6   : > { %s834_s19 = sshll.u32 (!%p219_p3), %s1049_s15, 1  ;;  %s836_s20 = sshll.u32 (!%p219_p3), %s1049_s15, 5 }
   0x7   : > { %222 = sbr.rel (%p219_p3) target bundleno = 221 (0xdd), region = 28  ;;  %p281_p4 = scmp.lt.s32.totalorder (!%p219_p3), %s834_s19, 17 }
   0x8   : > { %p290_p5 = scmp.lt.s32.totalorder (!%p219_p3), %s836_s20, 287  ;;  %p839_p6 = scmp.ne.s32.totalorder (!%p219_p3), %s1049_s15, 0 }
   0xc   : > { %s1212_s19 = smov (!%p281_p4, %s834_s19), 17  ;;  %s1214_s20 = smov (!%p290_p5, %s836_s20), 287 }
   0xd   : > { %s835_s21 = sshll.u32 %s1212_s19, 2  ;;  %s977_s25 = sshll.u32 %s1214_s20, 3 }
   0xe   : > { %s1110_s24 = scalar_lea.vmem %s1202_s0, %s835_s21  ;;  %s1115_s28 = scalar_lea.vmem %s1203_s1, %s977_s25 }
   0xf   : > { %331 = sbr.rel (%p839_p6) target bundleno = 23 (0x17), region = 32 }
  0x14   : > { %v1059_v0 = vmov 0.0  }
  0x15   : > { %332 = vst [vmem:[#allocation2] sm:$0xff] %v1059_v0 }
  0x16   : > { %333 = vst [vmem:[#allocation2 + $0x8] sm:$0xff] %v1059_v0 }
  0x17 PF: > { %v898_v1 = vld [vmem:[%s1115_s28 + $0x70] sm:$0xf]  ;;  %v993_v2 = vld [vmem:[%s1115_s28 + $0x74] sm:$0xf0]  ;;  %v992_v6 = vld [vmem:[%s1115_s28 + $0x74] sm:$0xf] }
  0x18   : > { %v962_v3 = vld [vmem:[%s1115_s28 + $0xf0] sm:$0xf]  ;;  %v899_v4 = vor.u32 %v993_v2, %v898_v1  ;;  %v1009_v5 = vld [vmem:[%s1115_s28 + $0xf4] sm:$0xf0]  ;;  %v900_v7 = vld [vmem:[%s1115_s28 + $0x78] sm:$0xf0] }
  0x19   : > { %v963_v8 = vor.u32 %v1009_v5, %v962_v3  ;;  %v903_v9 = vor.u32 %v992_v6, %v900_v7  ;;  %v1008_v10 = vld [vmem:[%s1115_s28 + $0xf4] sm:$0xf]  ;;  %v964_v11 = vld [vmem:[%s1115_s28 + $0xf8] sm:$0xf0]  ;;  %v890_v12 = vld [vmem:[%s1115_s28 + $0x60] sm:$0xf] }
  0x1a   : > { %536 = vmatpush.bf16.msra.mxu0 %v899_v4  ;;  %v967_v13 = vor.u32 %v1008_v10, %v964_v11  ;;  %v991_v14 = vld [vmem:[%s1115_s28 + $0x64] sm:$0xf0]  ;;  %v954_v15 = vld [vmem:[%s1115_s28 + $0xe0] sm:$0xf]  ;;  %v990_v19 = vld [vmem:[%s1115_s28 + $0x64] sm:$0xf] }
  0x1b   : > { %v1007_v16 = vld [vmem:[%s1115_s28 + $0xe4] sm:$0xf0]  ;;  %549 = vmatpush.bf16.msra.mxu1 %v963_v8  ;;  %562 = vmatpush.bf16.msra.mxu2 %v903_v9  ;;  %v891_v17 = vor.u32 %v991_v14, %v890_v12  ;;  %v892_v20 = vld [vmem:[%s1115_s28 + $0x68] sm:$0xf0]  ;;  %v1006_v21 = vld [vmem:[%s1115_s28 + $0xe4] sm:$0xf] }
  0x1c   : > { %v955_v18 = vor.u32 %v1007_v16, %v954_v15  ;;  %575 = vmatpush.bf16.msra.mxu3 %v967_v13  ;;  %v895_v22 = vor.u32 %v990_v19, %v892_v20  ;;  %v956_v23 = vld [vmem:[%s1115_s28 + $0xe8] sm:$0xf0]  ;;  %v882_v24 = vld [vmem:[%s1115_s28 + $0x50] sm:$0xf]  ;;  %v989_v25 = vld [vmem:[%s1115_s28 + $0x54] sm:$0xf0] }
  0x1d   : > { %v959_v26 = vor.u32 %v1006_v21, %v956_v23  ;;  %v946_v27 = vld [vmem:[%s1115_s28 + $0xd0] sm:$0xf]  ;;  %v1005_v28 = vld [vmem:[%s1115_s28 + $0xd4] sm:$0xf0]  ;;  %v988_v29 = vld [vmem:[%s1115_s28 + $0x54] sm:$0xf]  ;;  %v883_v30 = vor.u32 %v989_v25, %v882_v24 }
  0x1e   : > { %537 = vmatpush.bf16.msra.mxu0 %v891_v17  ;;  %v884_v31 = vld [vmem:[%s1115_s28 + $0x58] sm:$0xf0]  ;;  %v1004_v32 = vld [vmem:[%s1115_s28 + $0xd4] sm:$0xf]  ;;  %v947_v34 = vor.u32 %v1005_v28, %v946_v27  ;;  %v874_v36 = vld [vmem:[%s1115_s28 + $0x40] sm:$0xf] }
  0x1f   : > { %v948_v33 = vld [vmem:[%s1115_s28 + $0xd8] sm:$0xf0]  ;;  %550 = vmatpush.bf16.msra.mxu1 %v955_v18  ;;  %563 = vmatpush.bf16.msra.mxu2 %v895_v22  ;;  %v887_v35 = vor.u32 %v988_v29, %v884_v31  ;;  %v987_v37 = vld [vmem:[%s1115_s28 + $0x44] sm:$0xf0]  ;;  %v938_v38 = vld [vmem:[%s1115_s28 + $0xc0] sm:$0xf] }
  0x20   : > { %576 = vmatpush.bf16.msra.mxu3 %v959_v26  ;;  %v951_v39 = vor.u32 %v1004_v32, %v948_v33  ;;  %v1003_v40 = vld [vmem:[%s1115_s28 + $0xc4] sm:$0xf0]  ;;  %v986_v41 = vld [vmem:[%s1115_s28 + $0x44] sm:$0xf]  ;;  %v876_v42 = vld [vmem:[%s1115_s28 + $0x48] sm:$0xf0]  ;;  %v875_v45 = vor.u32 %v987_v37, %v874_v36 }
  0x21   : > { %v1002_v43 = vld [vmem:[%s1115_s28 + $0xc4] sm:$0xf]  ;;  %v940_v44 = vld [vmem:[%s1115_s28 + $0xc8] sm:$0xf0]  ;;  %v939_v46 = vor.u32 %v1003_v40, %v938_v38  ;;  %v879_v47 = vor.u32 %v986_v41, %v876_v42  ;;  %v866_v48 = vld [vmem:[%s1115_s28 + $0x30] sm:$0xf] }
  0x22   : > { %538 = vmatpush.bf16.msra.mxu0 %v883_v30  ;;  %v985_v49 = vld [vmem:[%s1115_s28 + $0x34] sm:$0xf0]  ;;  %v930_v50 = vld [vmem:[%s1115_s28 + $0xb0] sm:$0xf]  ;;  %v943_v51 = vor.u32 %v1002_v43, %v940_v44  ;;  %v984_v53 = vld [vmem:[%s1115_s28 + $0x34] sm:$0xf] }
  0x23   : > { %551 = vmatpush.bf16.msra.mxu1 %v947_v34  ;;  %564 = vmatpush.bf16.msra.mxu2 %v887_v35  ;;  %v1001_v52 = vld [vmem:[%s1115_s28 + $0xb4] sm:$0xf0]  ;;  %v868_v54 = vld [vmem:[%s1115_s28 + $0x38] sm:$0xf0]  ;;  %v1000_v55 = vld [vmem:[%s1115_s28 + $0xb4] sm:$0xf]  ;;  %v867_v57 = vor.u32 %v985_v49, %v866_v48 }
  0x24   : > { %577 = vmatpush.bf16.msra.mxu3 %v951_v39  ;;  %v932_v56 = vld [vmem:[%s1115_s28 + $0xb8] sm:$0xf0]  ;;  %v931_v58 = vor.u32 %v1001_v52, %v930_v50  ;;  %v871_v59 = vor.u32 %v984_v53, %v868_v54  ;;  %v858_v60 = vld [vmem:[%s1115_s28 + $0x20] sm:$0xf]  ;;  %v983_v61 = vld [vmem:[%s1115_s28 + $0x24] sm:$0xf0] }
  0x25   : > { %v922_v62 = vld [vmem:[%s1115_s28 + $0xa0] sm:$0xf]  ;;  %v935_v63 = vor.u32 %v1000_v55, %v932_v56  ;;  %v999_v0 = vld [vmem:[%s1115_s28 + $0xa4] sm:$0xf0]  ;;  %v982_v1 = vld [vmem:[%s1115_s28 + $0x24] sm:$0xf]  ;;  %v859_v5 = vor.u32 %v983_v61, %v858_v60 }
  0x26   : > { %539 = vmatpush.bf16.msra.mxu0 %v875_v45  ;;  %v860_v2 = vld [vmem:[%s1115_s28 + $0x28] sm:$0xf0]  ;;  %v998_v3 = vld [vmem:[%s1115_s28 + $0xa4] sm:$0xf]  ;;  %v923_v6 = vor.u32 %v999_v0, %v922_v62  ;;  %v850_v8 = vld [vmem:[%s1115_s28 + $0x10] sm:$0xf] }
  0x27   : > { %552 = vmatpush.bf16.msra.mxu1 %v939_v46  ;;  %565 = vmatpush.bf16.msra.mxu2 %v879_v47  ;;  %v924_v4 = vld [vmem:[%s1115_s28 + $0xa8] sm:$0xf0]  ;;  %v863_v7 = vor.u32 %v982_v1, %v860_v2  ;;  %v981_v9 = vld [vmem:[%s1115_s28 + $0x14] sm:$0xf0]  ;;  %v914_v10 = vld [vmem:[%s1115_s28 + $0x90] sm:$0xf] }
  0x28   : > { %578 = vmatpush.bf16.msra.mxu3 %v943_v51  ;;  %v927_v11 = vor.u32 %v998_v3, %v924_v4  ;;  %v997_v12 = vld [vmem:[%s1115_s28 + $0x94] sm:$0xf0]  ;;  %v980_v13 = vld [vmem:[%s1115_s28 + $0x14] sm:$0xf]  ;;  %v852_v14 = vld [vmem:[%s1115_s28 + $0x18] sm:$0xf0]  ;;  %v851_v17 = vor.u32 %v981_v9, %v850_v8 }
  0x29   : > { %v996_v15 = vld [vmem:[%s1115_s28 + $0x94] sm:$0xf]  ;;  %v916_v16 = vld [vmem:[%s1115_s28 + $0x98] sm:$0xf0]  ;;  %v336_v18 = vld [vmem:[%s1110_s24] sm:$0xff]  ;;  %v915_v19 = vor.u32 %v997_v12, %v914_v10  ;;  %v855_v20 = vor.u32 %v980_v13, %v852_v14  ;;  %p968_p7 = scmp.ne.s32.totalorder %s1049_s15, 8 }
  0x2a   : > { %540 = vmatpush.bf16.msra.mxu0 %v867_v57  ;;  %v842_v21 = vld [vmem:[%s1115_s28] sm:$0xf]  ;;  %v979_v22 = vld [vmem:[%s1115_s28 + $0x4] sm:$0xf0]  ;;  %v919_v24 = vor.u32 %v996_v15, %v916_v16  ;;  %v978_v26 = vld [vmem:[%s1115_s28 + $0x4] sm:$0xf]  ;;  %v370_v30 = vunpack.c.l.b16 %v336_v18  ;;  %v371_v32 = vunpack.c.h.b16 %v336_v18 }
  0x2b   : > { %553 = vmatpush.bf16.msra.mxu1 %v931_v58  ;;  %566 = vmatpush.bf16.msra.mxu2 %v871_v59  ;;  %v906_v23 = vld [vmem:[%s1115_s28 + $0x80] sm:$0xf]  ;;  %v995_v25 = vld [vmem:[%s1115_s28 + $0x84] sm:$0xf0]  ;;  %v844_v27 = vld [vmem:[%s1115_s28 + $0x8] sm:$0xf0]  ;;  %v843_v31 = vor.u32 %v979_v22, %v842_v21 }
  0x2c   : > { %579 = vmatpush.bf16.msra.mxu3 %v935_v63  ;;  %v994_v28 = vld [vmem:[%s1115_s28 + $0x84] sm:$0xf]  ;;  %v908_v29 = vld [vmem:[%s1115_s28 + $0x88] sm:$0xf0]  ;;  %v907_v33 = vor.u32 %v995_v25, %v906_v23  ;;  %v847_v34 = vor.u32 %v978_v26, %v844_v27  ;;  %v372_v36 = vpack.c.b16 %v370_v30, %v370_v30  ;;  %v373_v37 = vpack.c.b16 %v371_v32, %v371_v32 }
  0x2d   : > { %v911_v35 = vor.u32 %v994_v28, %v908_v29  ;;  %v334_v39 = vld [vmem:[#allocation2] sm:$0xff]  ;;  %v335_v44 = vld [vmem:[#allocation2 + $0x8] sm:$0xff] }
  0x2e   : > { %541 = vmatpush.bf16.msra.mxu0 %v859_v5 }
  0x2f   : > { %554 = vmatpush.bf16.msra.mxu1 %v923_v6  ;;  %567 = vmatpush.bf16.msra.mxu2 %v863_v7 }
  0x30   : > { %580 = vmatpush.bf16.msra.mxu3 %v927_v11 }
  0x32   : > { %542 = vmatpush.bf16.msra.mxu0 %v851_v17 }
  0x33   : > { %555 = vmatpush.bf16.msra.mxu1 %v915_v19  ;;  %568 = vmatpush.bf16.msra.mxu2 %v855_v20 }
  0x34   : > { %581 = vmatpush.bf16.msra.mxu3 %v919_v24 }
  0x36   : > { %543 = vmatpush.bf16.msra.mxu0 %v843_v31 }
  0x37   : > { %556 = vmatpush.bf16.msra.mxu1 %v907_v33  ;;  %569 = vmatpush.bf16.msra.mxu2 %v847_v34 }
  0x38   : > { %582 = vmatpush.bf16.msra.mxu3 %v911_v35 }
  0x39   : > { %544 = vmatmul.bf16.vlgmr.msra.gmra.mxu0 %v372_v36 }
  0x3a   : > { %557 = vmatmul.bf16.vlgmr.msra.gmra.mxu1 %v373_v37  ;;  %570 = vmatmul.bf16.vlgmr.msra.gmra.mxu2 %v372_v36 }
  0x3b   : > { %583 = vmatmul.bf16.vlgmr.msra.gmra.mxu3 %v373_v37 }
  0xb6   : > { %v545_v38 = vpop.f32.mrf.mxu0 }
  0xb7   : > { %v558_v40 = vpop.f32.mrf.mxu1 }
  0xb8   : > { %v559_v41 = vadd.f32 %v558_v40, %v545_v38 }
  0xba   : > { %v588_v42 = vadd.f32 %v559_v41, %v334_v39 }
  0xbc   : > { %590 = vst [vmem:[#allocation2] sm:$0xff] %v588_v42 }
  0xbd   : > { %v571_v43 = vpop.f32.mrf.mxu2 }
  0xbe   : > { %v584_v45 = vpop.f32.mrf.mxu3  ;;  %v547_v46 = vpop.f32.mrf.mxu0 }
  0xbf   : > { %v585_v47 = vadd.f32 %v584_v45, %v571_v43  ;;  %v560_v48 = vpop.f32.mrf.mxu1 }
  0xc1   : > { %v589_v49 = vadd.f32 %v585_v47, %v335_v44 }
  0xc2   : > { %595 = sbr.rel (%p968_p7) target bundleno = 221 (0xdd), region = 36 }
  0xc3   : > { %591 = vst [vmem:[#allocation2 + $0x8] sm:$0xff] %v589_v49 }
  0xc5   : > { %v573_v50 = vpop.f32.mrf.mxu2 }
  0xc6   : > { %v586_v51 = vpop.f32.mrf.mxu3 }
  0xc7   : > { %v596_v52 = vld [vmem:[#allocation2] sm:$0xff]  ;;  %v618_v9 = vlaneseq  ;;  %vm615_vm0 = vcmask 1040384  }
  0xc8   : > { %v600_v55 = vrot.slane %v596_v52, 4  ;;  %v623_v57 = vmul.f32 %v596_v52, %v596_v52 }
  0xc9   : > { %vm620_vm1 = vcmp.lt.s32.totalorder %v618_v9, 256 }
  0xca   : > { %v597_v53 = vld [vmem:[#allocation2 + $0x8] sm:$0xff]  ;;  %v601_v59 = vadd.f32 %v600_v55, %v596_v52  ;;  %v625_v61 = vrot.slane %v623_v57, 4 }
  0xcb   : > { %v598_v54 = vpack.c.bf16 %v597_v53, %v596_v52  ;;  %v606_v56 = vrot.slane %v597_v53, 4  ;;  %v624_v58 = vmul.f32 %v597_v53, %v597_v53 }
  0xcc   : > { %v602_v63 = vrot.slane %v601_v59, 2  ;;  %v626_v1 = vadd.f32 %v625_v61, %v623_v57 }
  0xcd   : > { %599 = vst [vmem:[%s1204_s2] sm:$0xff] %v598_v54  ;;  %v607_v60 = vadd.f32 %v606_v56, %v597_v53  ;;  %v631_v62 = vrot.slane %v624_v58, 4 }
  0xce   : > { %v603_v3 = vadd.f32 %v602_v63, %v601_v59  ;;  %v627_v5 = vrot.slane %v626_v1, 2 }
  0xcf   : > { %v608_v0 = vrot.slane %v607_v60, 2  ;;  %v632_v2 = vadd.f32 %v631_v62, %v624_v58 }
  0xd0   : > { %v604_v7 = vrot.slane %v603_v3, 1  ;;  %v628_v10 = vadd.f32 %v627_v5, %v626_v1 }
  0xd1   : > { %v609_v4 = vadd.f32 %v608_v0, %v607_v60  ;;  %v633_v6 = vrot.slane %v632_v2, 2 }
  0xd2   : > { %v605_v12 = vadd.f32 %v604_v7, %v603_v3  ;;  %v629_v14 = vrot.slane %v628_v10, 1 }
  0xd3   : > { %v610_v8 = vrot.slane %v609_v4, 1  ;;  %v634_v11 = vadd.f32 %v633_v6, %v632_v2 }
  0xd4   : > { %v630_v17 = vadd.f32 %v629_v14, %v628_v10 }
  0xd5   : > { %v611_v13 = vadd.f32 %v610_v8, %v609_v4  ;;  %v635_v15 = vrot.slane %v634_v11, 1 }
  0xd7   : > { %v614_v16 = vrot.slane %v611_v13, 7  ;;  %v636_v18 = vadd.f32 %v635_v15, %v634_v11 }
  0xd9   : > { %v616_v19 = vsel %vm615_vm0, %v605_v12, %v614_v16  ;;  %v639_v20 = vrot.slane %v636_v18, 7 }
  0xda   : > { %622 = vst.msk [vmem:[%s1205_s3] sm:$0x3] %vm620_vm1, %v616_v19 }
  0xdb   : > { %v640_v21 = vsel %vm615_vm0, %v630_v17, %v639_v20 }
  0xdc   : > { %642 = vst.msk [vmem:[%s1206_s4] sm:$0x3] %vm620_vm1, %v640_v21 }
  0xdd PF: > { %s15_s17 = sadd.s32 1, %s1057_s17   ;;  %s1207_s15 = smov %s1053_s16 }
  0xde   : > { %p12_p8 = scmp.ge.s32.totalorder %s15_s17, 11   ;;  %s1208_s16 = smov %s1210_s18 }
  0xe0   :  { %14 = sbr.rel (!%p12_p8) target bundleno = 2 (0x2), region = 93 }

// kernel: resnet_forward.41
= control target key start
LH: loop header
LB: loop body
LE: loop exit
PB: predicated region body
PF: predicated region fallthrough
CT: control target
= control target key end

     0   :  { %10 = vsyncpa [#allocation4], 0  ;;  %s1398_s0 = inlined_call_operand.vmem [shape: bf16[2,256], index: 0, kind: input, shape index: {}]   ;;  %s1399_s1 = inlined_call_operand.hbm [shape: bf16[256,512], index: 1, kind: input, shape index: {}]   ;;  %s1400_s2 = inlined_call_operand.vmem [shape: bf16[2,512], index: 2, kind: output, shape index: {0}]   ;;  %s1401_s3 = inlined_call_operand.vmem [shape: f32[1,1,512], index: 3, kind: output, shape index: {1}]   ;;  %s1402_s4 = inlined_call_operand.vmem [shape: f32[1,1,512], index: 4, kind: output, shape index: {2}]  }
   0x1   :  { %12 = vsyncpa [#allocation4 + $0x1], 0  ;;  %s1215_s15 = smov 0   ;;  %s1217_s16 = smov 0  }
   0x2   :  { %s1219_s17 = smov 0   ;;  %s1221_s18 = smov 0  }
   0x3   :  { %s1223_s19 = smov 0   ;;  %s1225_s20 = smov 0  }
   0x4 LB: > { %s869_s21 = sadd.s32 4294967295, %s1184_s20   ;;  %s33_s22 = sadd.s32 1, %s1180_s19  ;;  %s1184_s20 = sphi %s1225_s20, %s18_s20   ;;  %s1180_s19 = sphi %s1223_s19, %s1411_s19   ;;  %s1176_s18 = sphi %s1221_s18, %s1410_s18   ;;  %s1172_s17 = sphi %s1219_s17, %s1409_s17   ;;  %s1168_s16 = sphi %s1217_s16, %s1408_s16   ;;  %s1164_s15 = sphi %s1215_s15, %s1407_s15  }
   0x5   : > { %p35_p0 = scmp.ge.s32.totalorder %s33_s22, 2  ;;  %s74_s23 = sadd.s32 1, %s1172_s17 }
   0x6   : > { %p81_p1 = scmp.ne.s32.totalorder %s1172_s17, %s1168_s16  ;;  %p82_p2 = scmp.eq.s32.totalorder %s1184_s20, 0 }
   0x7   : > { %s1413_s22 = smov (%p35_p0, %s33_s22), 0  ;;  %p87_p4 = scmp.ne.s32.totalorder %s1168_s16, %s1164_s15 }
   0x8   : > { %p1251_p3 = por %p82_p2, %p81_p1  ;;  %s70_s25 = ssub.s32 %s1180_s19, %s1413_s22 }
   0x9   : > { %p88_p5 = scmp.eq.s32.totalorder %s869_s21, 0  ;;  %p72_p6 = scmp.eq.s32.totalorder %s70_s25, 0 }
   0xa   : > { %p1051_p8 = scmp.lt.s32.totalorder %s1184_s20, 2  ;;  %s207_s28 = sand.u32 1, %s1172_s17  }
   0xb   : > { %p1258_p7 = por %p88_p5, %p87_p4  ;;  %s1012_s29 = sshll.u32 %s1180_s19, 3 }
   0xc   : > { %s1264_s27 = scalar_select %p72_p6, %s1172_s17, %s74_s23  }
   0xd   : > { %s874_s30 = sshll.u32 %s207_s28, 8  ;;  %s219_s7 = scalar_lea.hbm %s1399_s1, %s1012_s29 }
   0xe   : > { %s220_s8 = sshll.u32 %s219_s7, 4  ;;  %s211_s9 = scalar_lea.vmem [#allocation3], %s874_s30  ;;  %s221_s8 = int_to_ptr.hbm [resolvable:$true] %s220_s8 }
   0xf   : > { %s222_s10 = sshll.u32 %s211_s9, 4  ;;  %p1048_p9 = pnand %p1051_p8, %p1251_p3  ;;  %s223_s10 = int_to_ptr.vmem [resolvable:$true] %s222_s10 }
  0x10   : > { %p877_p10 = scmp.ge.s32.totalorder %s1184_s20, 1  ;;  %s208_s11 = scalar_lea.sflag [#allocation4], %s207_s28 }
  0x11   : > { %s1186_s12 = smov 256   ;;  %s1187_s13 = smov 128  }
  0x12   : > { %s1188_s14 = smov 8   ;;  %p230_p11 = scmp.lt.s32.totalorder %s1184_s20, 3 }
  0x13   : > { %1050 = dma.hbm_to_vmem [thread:$0]  (!%p1048_p9), %s221_s8, 4096, %s223_s10, %s208_s11, %s1186_s12, %s1187_s13, %s1188_s14  }
  0x14   : > { %p231_p12 = pnand %p877_p10, %p230_p11 }
  0x15   : > { %s236_s15 = sand.u32 (!%p231_p12), 1, %s1168_s16  }
  0x16   : > { %234 = sbr.rel (%p231_p12) target bundleno = 253 (0xfd), region = 28  ;;  %s878_s21 = sshll.u32 (!%p231_p12), %s236_s15, 8 }
  0x17   : > { %s237_s23 = scalar_lea.sflag (!%p231_p12), [#allocation4], %s236_s15  ;;  %s1276_s25 = scalar_lea.vmem (!%p231_p12), [#allocation3], %s878_s21 }
  0x1b   : > { %1159 = dma.done.wait (%p1258_p7), %s237_s23, 4096  }
  0x1c   : > { %1161 = vsyncadd (%p1258_p7), %s237_s23, 4294963200  ;;  %v940_v0 = vld [vmem:[%s1276_s25 + $0x70] sm:$0xf]  ;;  %v1028_v1 = vld [vmem:[%s1276_s25 + $0x74] sm:$0xf0]  ;;  %vm591_vm0 = vcmask 1041408  }
  0x1d   : > { %v1004_v2 = vld [vmem:[%s1276_s25 + $0xf0] sm:$0xf]  ;;  %v941_v3 = vor.u32 %v1028_v1, %v940_v0  ;;  %v1044_v4 = vld [vmem:[%s1276_s25 + $0xf4] sm:$0xf0]  ;;  %v1027_v5 = vld [vmem:[%s1276_s25 + $0x74] sm:$0xf] }
  0x1e   : > { %v942_v6 = vld [vmem:[%s1276_s25 + $0x78] sm:$0xf0]  ;;  %v1005_v7 = vor.u32 %v1044_v4, %v1004_v2  ;;  %v1043_v9 = vld [vmem:[%s1276_s25 + $0xf4] sm:$0xf]  ;;  %v932_v11 = vld [vmem:[%s1276_s25 + $0x60] sm:$0xf] }
  0x1f   : > { %v945_v8 = vor.u32 %v1027_v5, %v942_v6  ;;  %v1006_v10 = vld [vmem:[%s1276_s25 + $0xf8] sm:$0xf0]  ;;  %536 = vmatpush.bf16.msra.mxu0 %v941_v3  ;;  %v1026_v13 = vld [vmem:[%s1276_s25 + $0x64] sm:$0xf0]  ;;  %v996_v14 = vld [vmem:[%s1276_s25 + $0xe0] sm:$0xf] }
  0x20   : > { %v1009_v12 = vor.u32 %v1043_v9, %v1006_v10  ;;  %v1042_v15 = vld [vmem:[%s1276_s25 + $0xe4] sm:$0xf0]  ;;  %549 = vmatpush.bf16.msra.mxu1 %v1005_v7  ;;  %v933_v16 = vor.u32 %v1026_v13, %v932_v11  ;;  %v1025_v18 = vld [vmem:[%s1276_s25 + $0x64] sm:$0xf]  ;;  %v934_v19 = vld [vmem:[%s1276_s25 + $0x68] sm:$0xf0] }
  0x21   : > { %562 = vmatpush.bf16.msra.mxu2 %v945_v8  ;;  %v997_v17 = vor.u32 %v1042_v15, %v996_v14  ;;  %v1041_v20 = vld [vmem:[%s1276_s25 + $0xe4] sm:$0xf]  ;;  %v937_v21 = vor.u32 %v1025_v18, %v934_v19  ;;  %v998_v22 = vld [vmem:[%s1276_s25 + $0xe8] sm:$0xf0]  ;;  %v924_v23 = vld [vmem:[%s1276_s25 + $0x50] sm:$0xf] }
  0x22   : > { %575 = vmatpush.bf16.msra.mxu3 %v1009_v12  ;;  %v1024_v24 = vld [vmem:[%s1276_s25 + $0x54] sm:$0xf0]  ;;  %v1001_v25 = vor.u32 %v1041_v20, %v998_v22  ;;  %v988_v26 = vld [vmem:[%s1276_s25 + $0xd0] sm:$0xf]  ;;  %v1023_v28 = vld [vmem:[%s1276_s25 + $0x54] sm:$0xf] }
  0x23   : > { %v1040_v27 = vld [vmem:[%s1276_s25 + $0xd4] sm:$0xf0]  ;;  %537 = vmatpush.bf16.msra.mxu0 %v933_v16  ;;  %v925_v29 = vor.u32 %v1024_v24, %v924_v23  ;;  %v926_v30 = vld [vmem:[%s1276_s25 + $0x58] sm:$0xf0]  ;;  %v1039_v31 = vld [vmem:[%s1276_s25 + $0xd4] sm:$0xf] }
  0x24   : > { %v990_v32 = vld [vmem:[%s1276_s25 + $0xd8] sm:$0xf0]  ;;  %550 = vmatpush.bf16.msra.mxu1 %v997_v17  ;;  %v989_v33 = vor.u32 %v1040_v27, %v988_v26  ;;  %v929_v34 = vor.u32 %v1023_v28, %v926_v30  ;;  %v916_v35 = vld [vmem:[%s1276_s25 + $0x40] sm:$0xf]  ;;  %v1022_v36 = vld [vmem:[%s1276_s25 + $0x44] sm:$0xf0] }
  0x25   : > { %563 = vmatpush.bf16.msra.mxu2 %v937_v21  ;;  %v980_v37 = vld [vmem:[%s1276_s25 + $0xc0] sm:$0xf]  ;;  %v993_v38 = vor.u32 %v1039_v31, %v990_v32  ;;  %v1038_v39 = vld [vmem:[%s1276_s25 + $0xc4] sm:$0xf0]  ;;  %v1021_v40 = vld [vmem:[%s1276_s25 + $0x44] sm:$0xf]  ;;  %v917_v44 = vor.u32 %v1022_v36, %v916_v35 }
  0x26   : > { %576 = vmatpush.bf16.msra.mxu3 %v1001_v25  ;;  %v918_v41 = vld [vmem:[%s1276_s25 + $0x48] sm:$0xf0]  ;;  %v1037_v42 = vld [vmem:[%s1276_s25 + $0xc4] sm:$0xf]  ;;  %v981_v45 = vor.u32 %v1038_v39, %v980_v37  ;;  %v908_v47 = vld [vmem:[%s1276_s25 + $0x30] sm:$0xf] }
  0x27   : > { %v982_v43 = vld [vmem:[%s1276_s25 + $0xc8] sm:$0xf0]  ;;  %538 = vmatpush.bf16.msra.mxu0 %v925_v29  ;;  %v921_v46 = vor.u32 %v1021_v40, %v918_v41  ;;  %v1020_v48 = vld [vmem:[%s1276_s25 + $0x34] sm:$0xf0]  ;;  %v972_v49 = vld [vmem:[%s1276_s25 + $0xb0] sm:$0xf] }
  0x28   : > { %551 = vmatpush.bf16.msra.mxu1 %v989_v33  ;;  %v985_v50 = vor.u32 %v1037_v42, %v982_v43  ;;  %v1036_v51 = vld [vmem:[%s1276_s25 + $0xb4] sm:$0xf0]  ;;  %v1019_v52 = vld [vmem:[%s1276_s25 + $0x34] sm:$0xf]  ;;  %v910_v53 = vld [vmem:[%s1276_s25 + $0x38] sm:$0xf0]  ;;  %v909_v56 = vor.u32 %v1020_v48, %v908_v47 }
  0x29   : > { %564 = vmatpush.bf16.msra.mxu2 %v929_v34  ;;  %v1035_v54 = vld [vmem:[%s1276_s25 + $0xb4] sm:$0xf]  ;;  %v974_v55 = vld [vmem:[%s1276_s25 + $0xb8] sm:$0xf0]  ;;  %v973_v57 = vor.u32 %v1036_v51, %v972_v49  ;;  %v913_v58 = vor.u32 %v1019_v52, %v910_v53  ;;  %v900_v59 = vld [vmem:[%s1276_s25 + $0x20] sm:$0xf] }
  0x2a   : > { %577 = vmatpush.bf16.msra.mxu3 %v993_v38  ;;  %v1018_v60 = vld [vmem:[%s1276_s25 + $0x24] sm:$0xf0]  ;;  %v964_v61 = vld [vmem:[%s1276_s25 + $0xa0] sm:$0xf]  ;;  %v977_v62 = vor.u32 %v1035_v54, %v974_v55  ;;  %v1017_v0 = vld [vmem:[%s1276_s25 + $0x24] sm:$0xf] }
  0x2b   : > { %539 = vmatpush.bf16.msra.mxu0 %v917_v44  ;;  %v1034_v63 = vld [vmem:[%s1276_s25 + $0xa4] sm:$0xf0]  ;;  %v902_v1 = vld [vmem:[%s1276_s25 + $0x28] sm:$0xf0]  ;;  %v1033_v2 = vld [vmem:[%s1276_s25 + $0xa4] sm:$0xf]  ;;  %v901_v4 = vor.u32 %v1018_v60, %v900_v59 }
  0x2c   : > { %552 = vmatpush.bf16.msra.mxu1 %v981_v45  ;;  %v966_v3 = vld [vmem:[%s1276_s25 + $0xa8] sm:$0xf0]  ;;  %v892_v5 = vld [vmem:[%s1276_s25 + $0x10] sm:$0xf]  ;;  %v965_v6 = vor.u32 %v1034_v63, %v964_v61  ;;  %v905_v7 = vor.u32 %v1017_v0, %v902_v1  ;;  %v1016_v8 = vld [vmem:[%s1276_s25 + $0x14] sm:$0xf0] }
  0x2d   : > { %565 = vmatpush.bf16.msra.mxu2 %v921_v46  ;;  %v956_v9 = vld [vmem:[%s1276_s25 + $0x90] sm:$0xf]  ;;  %v1032_v10 = vld [vmem:[%s1276_s25 + $0x94] sm:$0xf0]  ;;  %v969_v11 = vor.u32 %v1033_v2, %v966_v3  ;;  %v1015_v12 = vld [vmem:[%s1276_s25 + $0x14] sm:$0xf]  ;;  %v893_v17 = vor.u32 %v1016_v8, %v892_v5 }
  0x2e   : > { %578 = vmatpush.bf16.msra.mxu3 %v985_v50  ;;  %v894_v13 = vld [vmem:[%s1276_s25 + $0x18] sm:$0xf0]  ;;  %v337_v14 = vld [vmem:[%s1398_s0] sm:$0x3]  ;;  %v957_v18 = vor.u32 %v1032_v10, %v956_v9  ;;  %v884_v20 = vld [vmem:[%s1276_s25] sm:$0xf] }
  0x2f   : > { %540 = vmatpush.bf16.msra.mxu0 %v909_v56  ;;  %v1031_v15 = vld [vmem:[%s1276_s25 + $0x94] sm:$0xf]  ;;  %v958_v16 = vld [vmem:[%s1276_s25 + $0x98] sm:$0xf0]  ;;  %371 = vst [vmem:[#allocation1] ss:$9 sm:$0xff] %v337_v14  ;;  %v897_v19 = vor.u32 %v1015_v12, %v894_v13 }
  0x30   : > { %553 = vmatpush.bf16.msra.mxu1 %v973_v57  ;;  %v1014_v21 = vld [vmem:[%s1276_s25 + $0x4] sm:$0xf0]  ;;  %v948_v22 = vld [vmem:[%s1276_s25 + $0x80] sm:$0xf]  ;;  %v961_v23 = vor.u32 %v1031_v15, %v958_v16  ;;  %v1013_v25 = vld [vmem:[%s1276_s25 + $0x4] sm:$0xf] }
  0x31   : > { %566 = vmatpush.bf16.msra.mxu2 %v913_v58  ;;  %v1030_v24 = vld [vmem:[%s1276_s25 + $0x84] sm:$0xf0]  ;;  %v886_v26 = vld [vmem:[%s1276_s25 + $0x8] sm:$0xf0]  ;;  %v1029_v27 = vld [vmem:[%s1276_s25 + $0x84] sm:$0xf]  ;;  %v885_v29 = vor.u32 %v1014_v21, %v884_v20 }
  0x32   : > { %579 = vmatpush.bf16.msra.mxu3 %v977_v62  ;;  %v950_v28 = vld [vmem:[%s1276_s25 + $0x88] sm:$0xf0]  ;;  %v949_v30 = vor.u32 %v1030_v24, %v948_v22  ;;  %v889_v31 = vor.u32 %v1013_v25, %v886_v26  ;;  %v1189_v35 = vmov 0.0   ;;  %s879_s28 = sshll.u32 %s1176_s18, 1  ;;  %vm609_vm1 = vcmask 1040384  }
  0x33   : > { %541 = vmatpush.bf16.msra.mxu0 %v901_v4  ;;  %v953_v32 = vor.u32 %v1029_v27, %v950_v28  ;;  %335 = vst [vmem:[#allocation2] sm:$0xf] %v1189_v35  ;;  %p307_p13 = scmp.lt.s32.totalorder %s879_s28, 3 }
  0x34   : > { %554 = vmatpush.bf16.msra.mxu1 %v965_v6 }
  0x35   : > { %567 = vmatpush.bf16.msra.mxu2 %v905_v7  ;;  %s1415_s28 = smov (!%p307_p13, %s879_s28), 3  ;;  %v639_v7 = vlaneseq }
  0x36   : > { %580 = vmatpush.bf16.msra.mxu3 %v969_v11  ;;  %v372_v33 = vld [vmem:[#allocation1] sm:$0xff]  ;;  %v373_v34 = vld [vmem:[#allocation1 + $0x9] sm:$0xff]  ;;  %s311_s5 = scalar_lea.vmem %s1400_s2, %s1415_s28  ;;  %s320_s7 = scalar_lea.vmem %s1401_s3, %s1415_s28 }
  0x37   : > { %542 = vmatpush.bf16.msra.mxu0 %v893_v17  ;;  %vm1362_vm2 = vcmp.lt.s32.totalorder %v639_v7, 256  ;;  %s329_s10 = scalar_lea.vmem %s1402_s4, %s1415_s28 }
  0x38   : > { %555 = vmatpush.bf16.msra.mxu1 %v957_v18 }
  0x39   : > { %568 = vmatpush.bf16.msra.mxu2 %v897_v19 }
  0x3a   : > { %581 = vmatpush.bf16.msra.mxu3 %v961_v23  ;;  %v336_v44 = vld [vmem:[#allocation2] sm:$0xf] }
  0x3b   : > { %543 = vmatpush.bf16.msra.mxu0 %v885_v29 }
  0x3c   : > { %556 = vmatpush.bf16.msra.mxu1 %v949_v30 }
  0x3d   : > { %569 = vmatpush.bf16.msra.mxu2 %v889_v31 }
  0x3e   : > { %582 = vmatpush.bf16.msra.mxu3 %v953_v32  ;;  %544 = vmatmul.bf16.vlgmr.msra.gmra.mxu0 %v372_v33 }
  0x3f   : > { %557 = vmatmul.bf16.vlgmr.msra.gmra.mxu1 %v373_v34 }
  0x40   : > { %570 = vmatmul.bf16.vlgmr.msra.gmra.mxu2 %v372_v33 }
  0x41   : > { %583 = vmatmul.bf16.vlgmr.msra.gmra.mxu3 %v373_v34 }
  0xbb   : > { %v545_v36 = vpop.f32.mrf.mxu0 }
  0xbc   : > { %v558_v37 = vpop.f32.mrf.mxu1 }
  0xbd   : > { %v559_v41 = vadd.f32 %v558_v37, %v545_v36 }
  0xc3   : > { %v571_v38 = vpop.f32.mrf.mxu2  ;;  %v547_v40 = vpop.f32.mrf.mxu0 }
  0xc4   : > { %v584_v39 = vpop.f32.mrf.mxu3  ;;  %v560_v43 = vpop.f32.mrf.mxu1 }
  0xc5   : > { %v585_v42 = vadd.f32 %v584_v39, %v571_v38 }
  0xc7   : > { %v590_v45 = vrot.slane %v585_v42, 6 }
  0xc9   : > { %v592_v46 = vsel %vm591_vm0, %v559_v41, %v590_v45 }
  0xca   : > { %v594_v47 = vadd.f32 %v592_v46, %v336_v44 }
  0xcb   : > { %v573_v48 = vpop.f32.mrf.mxu2 }
  0xcc   : > { %595 = vst [vmem:[#allocation2] sm:$0xf] %v594_v47  ;;  %v586_v49 = vpop.f32.mrf.mxu3 }
  0xd3   : > { %v599_v50 = vld [vmem:[#allocation2] sm:$0xf] }
  0xd4   : > { %601 = vst [vmem:[#allocation1] ss:$4 sm:$0xff] %v599_v50  ;;  %v644_v56 = vmul.f32 %v599_v50, %v599_v50 }
  0xdb   : > { %v602_v51 = vld.sshfl [vmem:[#allocation1] sm:$0xff pattern:$0x73625140]  ;;  %v603_v52 = vld.sshfl [vmem:[#allocation1 + $0x8] sm:$0xff pattern:$0x73625140] }
  0xdc   : > { %v606_v53 = vpack.c.bf16 %v603_v52, %v602_v51  ;;  %615 = vst [vmem:[#allocation1] ss:$4 sm:$0xff] %v599_v50 }
  0xde   : > { %v608_v54 = vrot.slane %v606_v53, 3 }
  0xe0   : > { %v612_v55 = vsel %vm609_vm1, %v606_v53, %v608_v54 }
  0xe1   : > { %614 = vst [vmem:[%s311_s5] sm:$0x3] %v612_v55 }
  0xe3   : > { %v616_v57 = vld.sshfl [vmem:[#allocation1] sm:$0xff pattern:$0x73625140]  ;;  %v617_v58 = vld.sshfl [vmem:[#allocation1 + $0x8] sm:$0xff pattern:$0x73625140] }
  0xe4   : > { %v620_v59 = vsel %vm591_vm0, %v616_v57, 0.0  ;;  %v627_v60 = vsel %vm591_vm0, %v617_v58, 0.0  ;;  %646 = vst [vmem:[#allocation1] ss:$4 sm:$0xff] %v644_v56 }
  0xe5   : > { %v621_v61 = vrot.slane %v620_v59, 4  ;;  %v628_v62 = vrot.slane %v627_v60, 4 }
  0xe7   : > { %v622_v63 = vadd.f32 %v621_v61, %v620_v59  ;;  %v629_v0 = vadd.f32 %v628_v62, %v627_v60 }
  0xe9   : > { %v623_v1 = vrot.slane %v622_v63, 2  ;;  %v630_v2 = vrot.slane %v629_v0, 2 }
  0xeb   : > { %v624_v3 = vadd.f32 %v623_v1, %v622_v63  ;;  %v631_v4 = vadd.f32 %v630_v2, %v629_v0  ;;  %v647_v5 = vld.sshfl [vmem:[#allocation1] sm:$0xff pattern:$0x73625140]  ;;  %v648_v6 = vld.sshfl [vmem:[#allocation1 + $0x8] sm:$0xff pattern:$0x73625140] }
  0xec   : > { %v651_v8 = vsel %vm591_vm0, %v647_v5, 0.0  ;;  %v658_v9 = vsel %vm591_vm0, %v648_v6, 0.0 }
  0xed   : > { %v625_v10 = vrot.slane %v624_v3, 1  ;;  %v632_v11 = vrot.slane %v631_v4, 1  ;;  %v652_v12 = vrot.slane %v651_v8, 4  ;;  %v659_v13 = vrot.slane %v658_v9, 4 }
  0xef   : > { %v633_v14 = vadd.f32 %v632_v11, %v631_v4  ;;  %v653_v15 = vadd.f32 %v652_v12, %v651_v8  ;;  %v660_v16 = vadd.f32 %v659_v13, %v658_v9  ;;  %v626_v18 = vadd.f32 %v625_v10, %v624_v3 }
  0xf1   : > { %v636_v19 = vrot.slane %v633_v14, 7  ;;  %v654_v20 = vrot.slane %v653_v15, 2  ;;  %v661_v21 = vrot.slane %v660_v16, 2 }
  0xf3   : > { %v637_v22 = vsel %vm609_vm1, %v626_v18, %v636_v19  ;;  %v655_v23 = vadd.f32 %v654_v20, %v653_v15  ;;  %v662_v24 = vadd.f32 %v661_v21, %v660_v16 }
  0xf4   : > { %643 = vst.msk [vmem:[%s320_s7] sm:$0x3] %vm1362_vm2, %v637_v22 }
  0xf5   : > { %v656_v25 = vrot.slane %v655_v23, 1  ;;  %v663_v26 = vrot.slane %v662_v24, 1 }
  0xf7   : > { %v664_v27 = vadd.f32 %v663_v26, %v662_v24  ;;  %v657_v28 = vadd.f32 %v656_v25, %v655_v23 }
  0xf9   : > { %v667_v29 = vrot.slane %v664_v27, 7 }
  0xfb   : > { %v668_v30 = vsel %vm609_vm1, %v657_v28, %v667_v29 }
  0xfc   : > { %670 = vst.msk [vmem:[%s329_s10] sm:$0x3] %vm1362_vm2, %v668_v30 }
  0xfd PF: > { %s18_s20 = sadd.s32 1, %s1184_s20   ;;  %s1407_s15 = smov %s1168_s16 }
  0xfe   : > { %p15_p0 = scmp.ge.s32.totalorder %s18_s20, 4   ;;  %s1408_s16 = smov %s1172_s17 }
  0xff   : > { %s1409_s17 = smov %s1264_s27  ;;  %s1410_s18 = smov %s1180_s19 }
 0x100   : > { %s1411_s19 = smov %s1413_s22  ;;  %17 = sbr.rel (!%p15_p0) target bundleno = 4 (0x4), region = 103 }
 0x105   :  { %745 = vsyncpa [#allocation4], 1 }
 0x106   :  { %747 = vsyncpa [#allocation4 + $0x1], 1 }

// kernel: resnet_forward.44
= control target key start
LH: loop header
LB: loop body
LE: loop exit
PB: predicated region body
PF: predicated region fallthrough
CT: control target
= control target key end

     0   :  { %vm27_vm0 = vcmask 1041408   ;;  %vm29_vm1 = vcmask 1045508   ;;  %vm31_vm2 = vcmask 1043456   ;;  %vm67_vm3 = vcmask 1040384   ;;  %s162_s0 = inlined_call_operand.vmem [shape: bf16[2,1,1,9,512], index: 0, kind: input, shape index: {}, may-alias: {0,4}]   ;;  %s163_s1 = inlined_call_operand.vmem [shape: bf16[2,512], index: 1, kind: input, shape index: {}]   ;;  %s164_s2 = inlined_call_operand.vmem [shape: f32[1,512], index: 2, kind: input, shape index: {}]   ;;  %s165_s3 = inlined_call_operand.vmem [shape: f32[1,512], index: 3, kind: input, shape index: {}]   ;;  %s166_s4 = inlined_call_operand.vmem [shape: bf16[2,1,1,9,512], index: 4, kind: output, shape index: {}, may-alias: {0,4}]  }
   0x1   :  { %v16_v0 = vld [vmem:[%s163_s1] sm:$0xf]  ;;  %vm71_vm4 = vcmask 1042434  }
   0x2   :  { %v18_v1 = vld [vmem:[%s164_s2] sm:$0xf]  ;;  %v17_v13 = vunpack.c.l.bf16 %v16_v0 }
   0x3   :  { %v20_v2 = vperm.slane %v18_v1, 0  ;;  %v21_v3 = vperm.slane %v18_v1, 1  ;;  %v22_v4 = vperm.slane %v18_v1, 2  ;;  %v35_v5 = vld [vmem:[%s165_s3] sm:$0xf]  ;;  %v23_v6 = vperm.slane %v18_v1, 3 }
   0x4   :  { %v37_v7 = vperm.slane %v35_v5, 0  ;;  %v38_v8 = vperm.slane %v35_v5, 1  ;;  %v39_v11 = vperm.slane %v35_v5, 2  ;;  %v40_v12 = vperm.slane %v35_v5, 3 }
   0x5   :  { %v24_v9 = vrot.slane %v21_v3, 6  ;;  %v25_v10 = vrot.slane %v22_v4, 4  ;;  %v26_v14 = vrot.slane %v23_v6, 2 }
   0x6   :  { %v41_v15 = vrot.slane %v38_v8, 6  ;;  %v42_v17 = vrot.slane %v39_v11, 4  ;;  %v43_v18 = vrot.slane %v40_v12, 2 }
   0x7   :  { %v28_v16 = vsel %vm27_vm0, %v20_v2, %v24_v9  ;;  %v30_v19 = vsel %vm29_vm1, %v25_v10, %v26_v14 }
   0x8   :  { %v44_v20 = vsel %vm27_vm0, %v37_v7, %v41_v15  ;;  %v32_v21 = vsel %vm31_vm2, %v28_v16, %v30_v19  ;;  %v45_v22 = vsel %vm29_vm1, %v42_v17, %v43_v18 }
   0x9   :  { %v34_v23 = vmul.f32 %v32_v21, %v17_v13  ;;  %v46_v24 = vsel %vm31_vm2, %v44_v20, %v45_v22 }
   0xb   :  { %v48_v25 = vadd.f32 %v46_v24, %v34_v23 }
   0xd   :  { %v49_v26 = vmax.f32 %v48_v25, 0.0 }
   0xf   :  { %51 = vst [vmem:[#allocation1] ss:$4 sm:$0xff] %v49_v26 }
  0x16   :  { %v52_v27 = vld.sshfl [vmem:[#allocation1] sm:$0xff pattern:$0x73625140]  ;;  %v53_v28 = vld.sshfl [vmem:[#allocation1 + $0x8] sm:$0xff pattern:$0x73625140] }
  0x17   :  { %v54_v29 = vld.sshfl [vmem:[#allocation1 + $0x10] sm:$0xff pattern:$0x73625140]  ;;  %v55_v30 = vld.sshfl [vmem:[#allocation1 + $0x18] sm:$0xff pattern:$0x73625140]  ;;  %v60_v31 = vpack.c.bf16 %v53_v28, %v52_v27 }
  0x18   :  { %v61_v32 = vpack.c.bf16 %v55_v30, %v54_v29 }
  0x19   :  { %v64_v33 = vrot.slane %v60_v31, 3 }
  0x1a   :  { %v65_v34 = vrot.slane %v61_v32, 6  ;;  %v66_v35 = vrot.slane %v61_v32, 1 }
  0x1b   :  { %v70_v36 = vsel %vm67_vm3, %v60_v31, %v64_v33 }
  0x1c   :  { %v74_v37 = vsel %vm71_vm4, %v65_v34, %v66_v35 }
  0x1d   :  { %v75_v38 = vsel %vm27_vm0, %v70_v36, %v74_v37 }
  0x1e   :  { %77 = vst [vmem:[#allocation2] sm:$0xf] %v75_v38 }
  0x25   :  { %v96_v39 = vld [vmem:[#allocation2] sm:$0xf] }
  0x26   :  { %119 = vst [vmem:[%s166_s4 + $0x10] sm:$0xf] %v96_v39 }

// kernel: resnet_forward.39
= control target key start
LH: loop header
LB: loop body
LE: loop exit
PB: predicated region body
PF: predicated region fallthrough
CT: control target
= control target key end

     0   :  { %s1322_s15 = smov 0   ;;  %s1324_s16 = smov 0   ;;  %s1592_s0 = inlined_call_operand.vmem [shape: bf16[2,2304], index: 0, kind: input, shape index: {}]   ;;  %s1593_s1 = inlined_call_operand.vmem [shape: bf16[2304,512], index: 1, kind: input, shape index: {}]   ;;  %s1594_s2 = inlined_call_operand.vmem [shape: bf16[2,512], index: 2, kind: output, shape index: {0}]   ;;  %s1595_s3 = inlined_call_operand.vmem [shape: f32[1,1,512], index: 3, kind: output, shape index: {1}]   ;;  %s1596_s4 = inlined_call_operand.vmem [shape: f32[1,1,512], index: 4, kind: output, shape index: {2}]  }
   0x1   :  { %s1326_s17 = smov 0   ;;  %s1328_s18 = smov 0  }
   0x2   :  { %s1330_s19 = smov 0   ;;  %s1332_s20 = smov 0  }
   0x3   :  { %s1334_s21 = smov 0  }
   0x4 LB: > { %s27_s22 = sadd.s32 1, %s1286_s19  ;;  %s30_s23 = sadd.s32 1, %s1290_s20  ;;  %s1294_s21 = sphi %s1334_s21, %s15_s21   ;;  %s1290_s20 = sphi %s1332_s20, %s1602_s20   ;;  %s1286_s19 = sphi %s1330_s19, %s1601_s19   ;;  %s1282_s18 = sphi %s1328_s18, %s1600_s18   ;;  %s1278_s17 = sphi %s1326_s17, %s1599_s17   ;;  %s1274_s16 = sphi %s1324_s16, %s1598_s16   ;;  %s1270_s15 = sphi %s1322_s15, %s1597_s15  }
   0x5   : > { %p28_p0 = scmp.ge.s32.totalorder %s27_s22, 9  ;;  %p78_p1 = scmp.ne.s32.totalorder %s1274_s16, %s1270_s15 }
   0x6   : > { %p79_p2 = scmp.eq.s32.totalorder %s1294_s21, 0  ;;  %s71_s27 = sadd.s32 1, %s1274_s16 }
   0x7   : > { %s1604_s22 = smov (%p28_p0, %s27_s22), 0  ;;  %s1606_s23 = smov (!%p28_p0, %s30_s23), %s1290_s20 }
   0x8   : > { %p80_p3 = por %p79_p2, %p78_p1  ;;  %p32_p4 = scmp.ge.s32.totalorder %s1606_s23, 2 }
   0x9   : > { %s66_s24 = ssub.s32 %s1286_s19, %s1604_s22  ;;  %p1006_p6 = scmp.ge.s32.totalorder %s1294_s21, 18 }
   0xa   : > { %s1608_s23 = smov (%p32_p4, %s1606_s23), 0 }
   0xb   : > { %s67_s25 = ssub.s32 %s1290_s20, %s1608_s23  ;;  %188 = sbr.rel (%p1006_p6) target bundleno = 55 (0x37), region = 16 }
   0xc   : > { %s68_s26 = sor.u32 %s67_s25, %s66_s24 }
   0xd   : > { %p69_p5 = scmp.eq.s32.totalorder %s68_s26, 0 }
   0xf   : > { %s1373_s28 = scalar_select %p69_p5, %s1274_s16, %s71_s27  }
  0x10   : > { %203 = sbr.rel (!%p80_p3) target bundleno = 55 (0x37), region = 24  ;;  %s205_s29 = sand.u32 (%p80_p3), 1, %s1274_s16  }
  0x11   : > { %s1009_s30 = sshll.u32 (%p80_p3), %s1290_s20, 1  ;;  %s1007_s5 = sshll.u32 (%p80_p3), %s205_s29, 8 }
  0x12   : > { %s1150_s6 = sshll.u32 (%p80_p3), %s1286_s19, 7  ;;  %s1387_s12 = scalar_lea.vmem (%p80_p3), [#allocation3], %s1007_s5 }
  0x13   : > { %s211_s7 = sadd.s32 (%p80_p3), %s1150_s6, %s1009_s30 }
  0x14   : > { %s1011_s8 = sshll.u32 (%p80_p3), %s211_s7, 2 }
  0x15   : > { %s1382_s11 = scalar_lea.vmem %s1593_s1, %s1011_s8 }
  0x16   : > { %v304_v0 = vld [vmem:[%s1382_s11] sm:$0xff]  ;;  %v306_v1 = vld [vmem:[%s1382_s11 + $0x10] sm:$0xff] }
  0x17   : > { %v308_v2 = vld [vmem:[%s1382_s11 + $0x20] sm:$0xff]  ;;  %305 = vst [vmem:[%s1387_s12] sm:$0xff] %v304_v0  ;;  %v310_v3 = vld [vmem:[%s1382_s11 + $0x30] sm:$0xff] }
  0x18   : > { %307 = vst [vmem:[%s1387_s12 + $0x8] sm:$0xff] %v306_v1  ;;  %v312_v4 = vld [vmem:[%s1382_s11 + $0x40] sm:$0xff]  ;;  %v314_v5 = vld [vmem:[%s1382_s11 + $0x50] sm:$0xff] }
  0x19   : > { %309 = vst [vmem:[%s1387_s12 + $0x10] sm:$0xff] %v308_v2  ;;  %v316_v6 = vld [vmem:[%s1382_s11 + $0x60] sm:$0xff]  ;;  %v318_v7 = vld [vmem:[%s1382_s11 + $0x70] sm:$0xff] }
  0x1a   : > { %311 = vst [vmem:[%s1387_s12 + $0x18] sm:$0xff] %v310_v3  ;;  %v320_v8 = vld [vmem:[%s1382_s11 + $0x80] sm:$0xff]  ;;  %v322_v9 = vld [vmem:[%s1382_s11 + $0x90] sm:$0xff] }
  0x1b   : > { %313 = vst [vmem:[%s1387_s12 + $0x20] sm:$0xff] %v312_v4  ;;  %v324_v10 = vld [vmem:[%s1382_s11 + $0xa0] sm:$0xff]  ;;  %v326_v11 = vld [vmem:[%s1382_s11 + $0xb0] sm:$0xff] }
  0x1c   : > { %315 = vst [vmem:[%s1387_s12 + $0x28] sm:$0xff] %v314_v5  ;;  %v328_v12 = vld [vmem:[%s1382_s11 + $0xc0] sm:$0xff]  ;;  %v330_v13 = vld [vmem:[%s1382_s11 + $0xd0] sm:$0xff] }
  0x1d   : > { %317 = vst [vmem:[%s1387_s12 + $0x30] sm:$0xff] %v316_v6  ;;  %v332_v14 = vld [vmem:[%s1382_s11 + $0xe0] sm:$0xff]  ;;  %v334_v15 = vld [vmem:[%s1382_s11 + $0xf0] sm:$0xff] }
  0x1e   : > { %319 = vst [vmem:[%s1387_s12 + $0x38] sm:$0xff] %v318_v7  ;;  %v336_v16 = vld [vmem:[%s1382_s11 + $0x100] sm:$0xff]  ;;  %v338_v17 = vld [vmem:[%s1382_s11 + $0x110] sm:$0xff] }
  0x1f   : > { %321 = vst [vmem:[%s1387_s12 + $0x40] sm:$0xff] %v320_v8  ;;  %v340_v18 = vld [vmem:[%s1382_s11 + $0x120] sm:$0xff]  ;;  %v342_v19 = vld [vmem:[%s1382_s11 + $0x130] sm:$0xff] }
  0x20   : > { %323 = vst [vmem:[%s1387_s12 + $0x48] sm:$0xff] %v322_v9  ;;  %v344_v20 = vld [vmem:[%s1382_s11 + $0x140] sm:$0xff]  ;;  %v346_v21 = vld [vmem:[%s1382_s11 + $0x150] sm:$0xff] }
  0x21   : > { %325 = vst [vmem:[%s1387_s12 + $0x50] sm:$0xff] %v324_v10  ;;  %v348_v22 = vld [vmem:[%s1382_s11 + $0x160] sm:$0xff]  ;;  %v350_v23 = vld [vmem:[%s1382_s11 + $0x170] sm:$0xff] }
  0x22   : > { %327 = vst [vmem:[%s1387_s12 + $0x58] sm:$0xff] %v326_v11  ;;  %v352_v24 = vld [vmem:[%s1382_s11 + $0x180] sm:$0xff]  ;;  %v354_v25 = vld [vmem:[%s1382_s11 + $0x190] sm:$0xff] }
  0x23   : > { %329 = vst [vmem:[%s1387_s12 + $0x60] sm:$0xff] %v328_v12  ;;  %v356_v26 = vld [vmem:[%s1382_s11 + $0x1a0] sm:$0xff]  ;;  %v358_v27 = vld [vmem:[%s1382_s11 + $0x1b0] sm:$0xff] }
  0x24   : > { %331 = vst [vmem:[%s1387_s12 + $0x68] sm:$0xff] %v330_v13  ;;  %v360_v28 = vld [vmem:[%s1382_s11 + $0x1c0] sm:$0xff]  ;;  %v362_v29 = vld [vmem:[%s1382_s11 + $0x1d0] sm:$0xff] }
  0x25   : > { %333 = vst [vmem:[%s1387_s12 + $0x70] sm:$0xff] %v332_v14  ;;  %v364_v30 = vld [vmem:[%s1382_s11 + $0x1e0] sm:$0xff]  ;;  %v366_v31 = vld [vmem:[%s1382_s11 + $0x1f0] sm:$0xff] }
  0x26   : > { %335 = vst [vmem:[%s1387_s12 + $0x78] sm:$0xff] %v334_v15 }
  0x27   : > { %337 = vst [vmem:[%s1387_s12 + $0x80] sm:$0xff] %v336_v16 }
  0x28   : > { %339 = vst [vmem:[%s1387_s12 + $0x88] sm:$0xff] %v338_v17 }
  0x29   : > { %341 = vst [vmem:[%s1387_s12 + $0x90] sm:$0xff] %v340_v18 }
  0x2a   : > { %343 = vst [vmem:[%s1387_s12 + $0x98] sm:$0xff] %v342_v19 }
  0x2b   : > { %345 = vst [vmem:[%s1387_s12 + $0xa0] sm:$0xff] %v344_v20 }
  0x2c   : > { %347 = vst [vmem:[%s1387_s12 + $0xa8] sm:$0xff] %v346_v21 }
  0x2d   : > { %349 = vst [vmem:[%s1387_s12 + $0xb0] sm:$0xff] %v348_v22 }
  0x2e   : > { %351 = vst [vmem:[%s1387_s12 + $0xb8] sm:$0xff] %v350_v23 }
  0x2f   : > { %353 = vst [vmem:[%s1387_s12 + $0xc0] sm:$0xff] %v352_v24 }
  0x30   : > { %355 = vst [vmem:[%s1387_s12 + $0xc8] sm:$0xff] %v354_v25 }
  0x31   : > { %357 = vst [vmem:[%s1387_s12 + $0xd0] sm:$0xff] %v356_v26 }
  0x32   : > { %359 = vst [vmem:[%s1387_s12 + $0xd8] sm:$0xff] %v358_v27 }
  0x33   : > { %361 = vst [vmem:[%s1387_s12 + $0xe0] sm:$0xff] %v360_v28 }
  0x34   : > { %363 = vst [vmem:[%s1387_s12 + $0xe8] sm:$0xff] %v362_v29 }
  0x35   : > { %365 = vst [vmem:[%s1387_s12 + $0xf0] sm:$0xff] %v364_v30 }
  0x36   : > { %367 = vst [vmem:[%s1387_s12 + $0xf8] sm:$0xff] %v366_v31 }
  0x37 PF: > { %p1012_p7 = scmp.ge.s32.totalorder %s1294_s21, 1  ;;  %p372_p8 = scmp.lt.s32.totalorder %s1294_s21, 19 }
  0x39   : > { %p373_p9 = pnand %p1012_p7, %p372_p8 }
  0x3a   : > { %s379_s13 = sand.u32 (!%p373_p9), 1, %s1270_s15   ;;  %s1014_s14 = sshll.u32 (!%p373_p9), %s1278_s17, 1 }
  0x3b   : > { %376 = sbr.rel (%p373_p9) target bundleno = 298 (0x12a), region = 62  ;;  %s1013_s24 = sshll.u32 (!%p373_p9), %s379_s13, 8 }
  0x3c   : > { %p434_p10 = scmp.lt.s32.totalorder (!%p373_p9), %s1014_s14, 17  ;;  %s1015_s25 = sshll.u32 (!%p373_p9), %s1282_s18, 1 }
  0x3d   : > { %p445_p11 = scmp.lt.s32.totalorder (!%p373_p9), %s1015_s25, 3  ;;  %s1475_s11 = scalar_lea.vmem (!%p373_p9), [#allocation3], %s1013_s24 }
  0x3e   : > { %p1018_p12 = scmp.ne.s32.totalorder (!%p373_p9), %s1278_s17, 0 }
  0x40   : > { %s1610_s14 = smov (!%p434_p10, %s1014_s14), 17  ;;  %s1612_s25 = smov (!%p445_p11, %s1015_s25), 3 }
  0x41   : > { %s438_s29 = scalar_lea.vmem %s1592_s0, %s1610_s14  ;;  %s449_s15 = scalar_lea.vmem %s1594_s2, %s1612_s25 }
  0x42   : > { %s458_s18 = scalar_lea.vmem %s1595_s3, %s1612_s25  ;;  %s467_s10 = scalar_lea.vmem %s1596_s4, %s1612_s25 }
  0x43   : > { %472 = sbr.rel (%p1018_p12) target bundleno = 74 (0x4a), region = 70 }
  0x48   : > { %v1296_v32 = vmov 0.0  }
  0x49   : > { %473 = vst [vmem:[#allocation2] sm:$0xf] %v1296_v32 }
  0x4a PF: > { %v1077_v33 = vld [vmem:[%s1475_s11 + $0x70] sm:$0xf]  ;;  %v1166_v34 = vld [vmem:[%s1475_s11 + $0x74] sm:$0xf0]  ;;  %v1165_v38 = vld [vmem:[%s1475_s11 + $0x74] sm:$0xf] }
  0x4b   : > { %v1141_v35 = vld [vmem:[%s1475_s11 + $0xf0] sm:$0xf]  ;;  %v1078_v36 = vor.u32 %v1166_v34, %v1077_v33  ;;  %v1182_v37 = vld [vmem:[%s1475_s11 + $0xf4] sm:$0xf0]  ;;  %v1079_v39 = vld [vmem:[%s1475_s11 + $0x78] sm:$0xf0] }
  0x4c   : > { %v1142_v40 = vor.u32 %v1182_v37, %v1141_v35  ;;  %v1082_v41 = vor.u32 %v1165_v38, %v1079_v39  ;;  %v1181_v42 = vld [vmem:[%s1475_s11 + $0xf4] sm:$0xf]  ;;  %v1143_v43 = vld [vmem:[%s1475_s11 + $0xf8] sm:$0xf0]  ;;  %v1069_v44 = vld [vmem:[%s1475_s11 + $0x60] sm:$0xf] }
  0x4d   : > { %674 = vmatpush.bf16.msra.mxu0 %v1078_v36  ;;  %v1146_v45 = vor.u32 %v1181_v42, %v1143_v43  ;;  %v1164_v46 = vld [vmem:[%s1475_s11 + $0x64] sm:$0xf0]  ;;  %v1133_v47 = vld [vmem:[%s1475_s11 + $0xe0] sm:$0xf]  ;;  %v1163_v51 = vld [vmem:[%s1475_s11 + $0x64] sm:$0xf] }
  0x4e   : > { %v1180_v48 = vld [vmem:[%s1475_s11 + $0xe4] sm:$0xf0]  ;;  %687 = vmatpush.bf16.msra.mxu1 %v1142_v40  ;;  %700 = vmatpush.bf16.msra.mxu2 %v1082_v41  ;;  %v1070_v49 = vor.u32 %v1164_v46, %v1069_v44  ;;  %v1071_v52 = vld [vmem:[%s1475_s11 + $0x68] sm:$0xf0]  ;;  %v1179_v53 = vld [vmem:[%s1475_s11 + $0xe4] sm:$0xf] }
  0x4f   : > { %v1134_v50 = vor.u32 %v1180_v48, %v1133_v47  ;;  %713 = vmatpush.bf16.msra.mxu3 %v1146_v45  ;;  %v1074_v54 = vor.u32 %v1163_v51, %v1071_v52  ;;  %v1135_v55 = vld [vmem:[%s1475_s11 + $0xe8] sm:$0xf0]  ;;  %v1061_v56 = vld [vmem:[%s1475_s11 + $0x50] sm:$0xf]  ;;  %v1162_v57 = vld [vmem:[%s1475_s11 + $0x54] sm:$0xf0] }
  0x50   : > { %v1138_v58 = vor.u32 %v1179_v53, %v1135_v55  ;;  %v1125_v59 = vld [vmem:[%s1475_s11 + $0xd0] sm:$0xf]  ;;  %v1178_v60 = vld [vmem:[%s1475_s11 + $0xd4] sm:$0xf0]  ;;  %v1161_v61 = vld [vmem:[%s1475_s11 + $0x54] sm:$0xf]  ;;  %v1062_v62 = vor.u32 %v1162_v57, %v1061_v56 }
  0x51   : > { %675 = vmatpush.bf16.msra.mxu0 %v1070_v49  ;;  %v1063_v63 = vld [vmem:[%s1475_s11 + $0x58] sm:$0xf0]  ;;  %v1177_v0 = vld [vmem:[%s1475_s11 + $0xd4] sm:$0xf]  ;;  %v1126_v2 = vor.u32 %v1178_v60, %v1125_v59  ;;  %v1053_v4 = vld [vmem:[%s1475_s11 + $0x40] sm:$0xf] }
  0x52   : > { %v1127_v1 = vld [vmem:[%s1475_s11 + $0xd8] sm:$0xf0]  ;;  %688 = vmatpush.bf16.msra.mxu1 %v1134_v50  ;;  %701 = vmatpush.bf16.msra.mxu2 %v1074_v54  ;;  %v1066_v3 = vor.u32 %v1161_v61, %v1063_v63  ;;  %v1160_v5 = vld [vmem:[%s1475_s11 + $0x44] sm:$0xf0]  ;;  %v1117_v6 = vld [vmem:[%s1475_s11 + $0xc0] sm:$0xf] }
  0x53   : > { %714 = vmatpush.bf16.msra.mxu3 %v1138_v58  ;;  %v1130_v7 = vor.u32 %v1177_v0, %v1127_v1  ;;  %v1176_v8 = vld [vmem:[%s1475_s11 + $0xc4] sm:$0xf0]  ;;  %v1159_v9 = vld [vmem:[%s1475_s11 + $0x44] sm:$0xf]  ;;  %v1055_v10 = vld [vmem:[%s1475_s11 + $0x48] sm:$0xf0]  ;;  %v1054_v13 = vor.u32 %v1160_v5, %v1053_v4 }
  0x54   : > { %v1175_v11 = vld [vmem:[%s1475_s11 + $0xc4] sm:$0xf]  ;;  %v1119_v12 = vld [vmem:[%s1475_s11 + $0xc8] sm:$0xf0]  ;;  %v1118_v14 = vor.u32 %v1176_v8, %v1117_v6  ;;  %v1058_v15 = vor.u32 %v1159_v9, %v1055_v10  ;;  %v1045_v16 = vld [vmem:[%s1475_s11 + $0x30] sm:$0xf] }
  0x55   : > { %676 = vmatpush.bf16.msra.mxu0 %v1062_v62  ;;  %v1158_v17 = vld [vmem:[%s1475_s11 + $0x34] sm:$0xf0]  ;;  %v1109_v18 = vld [vmem:[%s1475_s11 + $0xb0] sm:$0xf]  ;;  %v1122_v19 = vor.u32 %v1175_v11, %v1119_v12  ;;  %v1157_v21 = vld [vmem:[%s1475_s11 + $0x34] sm:$0xf] }
  0x56   : > { %689 = vmatpush.bf16.msra.mxu1 %v1126_v2  ;;  %702 = vmatpush.bf16.msra.mxu2 %v1066_v3  ;;  %v1174_v20 = vld [vmem:[%s1475_s11 + $0xb4] sm:$0xf0]  ;;  %v1047_v22 = vld [vmem:[%s1475_s11 + $0x38] sm:$0xf0]  ;;  %v1173_v23 = vld [vmem:[%s1475_s11 + $0xb4] sm:$0xf]  ;;  %v1046_v25 = vor.u32 %v1158_v17, %v1045_v16 }
  0x57   : > { %715 = vmatpush.bf16.msra.mxu3 %v1130_v7  ;;  %v1111_v24 = vld [vmem:[%s1475_s11 + $0xb8] sm:$0xf0]  ;;  %v1110_v26 = vor.u32 %v1174_v20, %v1109_v18  ;;  %v1050_v27 = vor.u32 %v1157_v21, %v1047_v22  ;;  %v1037_v28 = vld [vmem:[%s1475_s11 + $0x20] sm:$0xf]  ;;  %v1156_v29 = vld [vmem:[%s1475_s11 + $0x24] sm:$0xf0] }
  0x58   : > { %v1101_v30 = vld [vmem:[%s1475_s11 + $0xa0] sm:$0xf]  ;;  %v1114_v31 = vor.u32 %v1173_v23, %v1111_v24  ;;  %v1172_v32 = vld [vmem:[%s1475_s11 + $0xa4] sm:$0xf0]  ;;  %v1155_v33 = vld [vmem:[%s1475_s11 + $0x24] sm:$0xf]  ;;  %v1038_v37 = vor.u32 %v1156_v29, %v1037_v28 }
  0x59   : > { %677 = vmatpush.bf16.msra.mxu0 %v1054_v13  ;;  %v1039_v34 = vld [vmem:[%s1475_s11 + $0x28] sm:$0xf0]  ;;  %v1171_v35 = vld [vmem:[%s1475_s11 + $0xa4] sm:$0xf]  ;;  %v1029_v38 = vld [vmem:[%s1475_s11 + $0x10] sm:$0xf]  ;;  %v1102_v39 = vor.u32 %v1172_v32, %v1101_v30 }
  0x5a   : > { %690 = vmatpush.bf16.msra.mxu1 %v1118_v14  ;;  %703 = vmatpush.bf16.msra.mxu2 %v1058_v15  ;;  %v1103_v36 = vld [vmem:[%s1475_s11 + $0xa8] sm:$0xf0]  ;;  %v1042_v40 = vor.u32 %v1155_v33, %v1039_v34  ;;  %v1154_v41 = vld [vmem:[%s1475_s11 + $0x14] sm:$0xf0]  ;;  %v1093_v42 = vld [vmem:[%s1475_s11 + $0x90] sm:$0xf] }
  0x5b   : > { %716 = vmatpush.bf16.msra.mxu3 %v1122_v19  ;;  %v1170_v43 = vld [vmem:[%s1475_s11 + $0x94] sm:$0xf0]  ;;  %v1106_v44 = vor.u32 %v1171_v35, %v1103_v36  ;;  %v1153_v45 = vld [vmem:[%s1475_s11 + $0x14] sm:$0xf]  ;;  %v1031_v46 = vld [vmem:[%s1475_s11 + $0x18] sm:$0xf0]  ;;  %v1030_v50 = vor.u32 %v1154_v41, %v1029_v38 }
  0x5c   : > { %v475_v47 = vld [vmem:[%s438_s29] sm:$0x3]  ;;  %v1095_v49 = vld [vmem:[%s1475_s11 + $0x98] sm:$0xf0]  ;;  %v1094_v51 = vor.u32 %v1170_v43, %v1093_v42  ;;  %v1034_v52 = vor.u32 %v1153_v45, %v1031_v46  ;;  %v1021_v53 = vld [vmem:[%s1475_s11] sm:$0xf] }
  0x5d   : > { %678 = vmatpush.bf16.msra.mxu0 %v1046_v25  ;;  %v1169_v48 = vld [vmem:[%s1475_s11 + $0x94] sm:$0xf]  ;;  %509 = vst [vmem:[#allocation1] ss:$9 sm:$0xff] %v475_v47  ;;  %v1152_v54 = vld [vmem:[%s1475_s11 + $0x4] sm:$0xf0] }
  0x5e   : > { %691 = vmatpush.bf16.msra.mxu1 %v1110_v26  ;;  %704 = vmatpush.bf16.msra.mxu2 %v1050_v27  ;;  %v1085_v55 = vld [vmem:[%s1475_s11 + $0x80] sm:$0xf]  ;;  %v1098_v56 = vor.u32 %v1169_v48, %v1095_v49  ;;  %v1168_v57 = vld [vmem:[%s1475_s11 + $0x84] sm:$0xf0]  ;;  %v1151_v58 = vld [vmem:[%s1475_s11 + $0x4] sm:$0xf]  ;;  %v1022_v62 = vor.u32 %v1152_v54, %v1021_v53 }
  0x5f   : > { %717 = vmatpush.bf16.msra.mxu3 %v1114_v31  ;;  %v1023_v59 = vld [vmem:[%s1475_s11 + $0x8] sm:$0xf0]  ;;  %v1167_v60 = vld [vmem:[%s1475_s11 + $0x84] sm:$0xf]  ;;  %v1086_v63 = vor.u32 %v1168_v57, %v1085_v55  ;;  %vm729_vm0 = vcmask 1041408   ;;  %p1147_p13 = scmp.ne.s32.totalorder %s1278_s17, 8 }
  0x60   : > { %v1087_v61 = vld [vmem:[%s1475_s11 + $0x88] sm:$0xf0]  ;;  %v1026_v0 = vor.u32 %v1151_v58, %v1023_v59  ;;  %v474_v12 = vld [vmem:[#allocation2] sm:$0xf] }
  0x61   : > { %679 = vmatpush.bf16.msra.mxu0 %v1038_v37  ;;  %v1090_v1 = vor.u32 %v1167_v60, %v1087_v61 }
  0x62   : > { %692 = vmatpush.bf16.msra.mxu1 %v1102_v39  ;;  %705 = vmatpush.bf16.msra.mxu2 %v1042_v40 }
  0x63   : > { %718 = vmatpush.bf16.msra.mxu3 %v1106_v44 }
  0x64   : > { %v510_v2 = vld [vmem:[#allocation1] sm:$0xff]  ;;  %v511_v3 = vld [vmem:[#allocation1 + $0x9] sm:$0xff] }
  0x65   : > { %680 = vmatpush.bf16.msra.mxu0 %v1030_v50 }
  0x66   : > { %693 = vmatpush.bf16.msra.mxu1 %v1094_v51  ;;  %706 = vmatpush.bf16.msra.mxu2 %v1034_v52 }
  0x67   : > { %719 = vmatpush.bf16.msra.mxu3 %v1098_v56 }
  0x69   : > { %681 = vmatpush.bf16.msra.mxu0 %v1022_v62 }
  0x6a   : > { %694 = vmatpush.bf16.msra.mxu1 %v1086_v63  ;;  %707 = vmatpush.bf16.msra.mxu2 %v1026_v0 }
  0x6b   : > { %720 = vmatpush.bf16.msra.mxu3 %v1090_v1 }
  0x6c   : > { %682 = vmatmul.bf16.vlgmr.msra.gmra.mxu0 %v510_v2 }
  0x6d   : > { %695 = vmatmul.bf16.vlgmr.msra.gmra.mxu1 %v511_v3  ;;  %708 = vmatmul.bf16.vlgmr.msra.gmra.mxu2 %v510_v2 }
  0x6e   : > { %721 = vmatmul.bf16.vlgmr.msra.gmra.mxu3 %v511_v3 }
  0xe9   : > { %v683_v4 = vpop.f32.mrf.mxu0 }
  0xea   : > { %v696_v5 = vpop.f32.mrf.mxu1 }
  0xeb   : > { %v697_v11 = vadd.f32 %v696_v5, %v683_v4 }
  0xf0   : > { %v709_v6 = vpop.f32.mrf.mxu2 }
  0xf1   : > { %v722_v7 = vpop.f32.mrf.mxu3  ;;  %v685_v8 = vpop.f32.mrf.mxu0 }
  0xf2   : > { %v723_v9 = vadd.f32 %v722_v7, %v709_v6  ;;  %v698_v10 = vpop.f32.mrf.mxu1 }
  0xf4   : > { %v728_v13 = vrot.slane %v723_v9, 6 }
  0xf5   : > { %737 = sbr.rel (%p1147_p13) target bundleno = 298 (0x12a), region = 74 }
  0xf6   : > { %v730_v14 = vsel %vm729_vm0, %v697_v11, %v728_v13 }
  0xf7   : > { %v732_v15 = vadd.f32 %v730_v14, %v474_v12 }
  0xf8   : > { %v711_v16 = vpop.f32.mrf.mxu2 }
  0xf9   : > { %733 = vst [vmem:[#allocation2] sm:$0xf] %v732_v15  ;;  %v724_v17 = vpop.f32.mrf.mxu3 }
  0xfa   : > { %vm748_vm1 = vcmask 1040384   ;;  %v778_v39 = vlaneseq }
  0xfc   : > { %vm780_vm2 = vcmp.lt.s32.totalorder %v778_v39, 256 }
 0x100   : > { %v738_v18 = vld [vmem:[#allocation2] sm:$0xf] }
 0x101   : > { %740 = vst [vmem:[#allocation1] ss:$4 sm:$0xff] %v738_v18  ;;  %v783_v23 = vmul.f32 %v738_v18, %v738_v18 }
 0x108   : > { %v741_v19 = vld.sshfl [vmem:[#allocation1] sm:$0xff pattern:$0x73625140]  ;;  %v742_v20 = vld.sshfl [vmem:[#allocation1 + $0x8] sm:$0xff pattern:$0x73625140] }
 0x109   : > { %754 = vst [vmem:[#allocation1] ss:$4 sm:$0xff] %v738_v18  ;;  %v745_v21 = vpack.c.bf16 %v742_v20, %v741_v19 }
 0x10b   : > { %v747_v22 = vrot.slane %v745_v21, 3 }
 0x10d   : > { %v751_v24 = vsel %vm748_vm1, %v745_v21, %v747_v22 }
 0x10e   : > { %753 = vst [vmem:[%s449_s15] sm:$0x3] %v751_v24 }
 0x110   : > { %v755_v25 = vld.sshfl [vmem:[#allocation1] sm:$0xff pattern:$0x73625140]  ;;  %v756_v26 = vld.sshfl [vmem:[#allocation1 + $0x8] sm:$0xff pattern:$0x73625140] }
 0x111   : > { %v759_v27 = vsel %vm729_vm0, %v755_v25, 0.0  ;;  %v766_v28 = vsel %vm729_vm0, %v756_v26, 0.0  ;;  %785 = vst [vmem:[#allocation1] ss:$4 sm:$0xff] %v783_v23 }
 0x112   : > { %v760_v29 = vrot.slane %v759_v27, 4  ;;  %v767_v30 = vrot.slane %v766_v28, 4 }
 0x114   : > { %v761_v31 = vadd.f32 %v760_v29, %v759_v27  ;;  %v768_v32 = vadd.f32 %v767_v30, %v766_v28 }
 0x116   : > { %v762_v33 = vrot.slane %v761_v31, 2  ;;  %v769_v34 = vrot.slane %v768_v32, 2 }
 0x118   : > { %v763_v35 = vadd.f32 %v762_v33, %v761_v31  ;;  %v770_v36 = vadd.f32 %v769_v34, %v768_v32  ;;  %v786_v37 = vld.sshfl [vmem:[#allocation1] sm:$0xff pattern:$0x73625140]  ;;  %v787_v38 = vld.sshfl [vmem:[#allocation1 + $0x8] sm:$0xff pattern:$0x73625140] }
 0x119   : > { %v790_v40 = vsel %vm729_vm0, %v786_v37, 0.0  ;;  %v797_v41 = vsel %vm729_vm0, %v787_v38, 0.0 }
 0x11a   : > { %v764_v42 = vrot.slane %v763_v35, 1  ;;  %v771_v43 = vrot.slane %v770_v36, 1  ;;  %v791_v44 = vrot.slane %v790_v40, 4  ;;  %v798_v45 = vrot.slane %v797_v41, 4 }
 0x11c   : > { %v772_v46 = vadd.f32 %v771_v43, %v770_v36  ;;  %v792_v47 = vadd.f32 %v791_v44, %v790_v40  ;;  %v799_v48 = vadd.f32 %v798_v45, %v797_v41  ;;  %v765_v49 = vadd.f32 %v764_v42, %v763_v35 }
 0x11e   : > { %v775_v50 = vrot.slane %v772_v46, 7  ;;  %v793_v51 = vrot.slane %v792_v47, 2  ;;  %v800_v52 = vrot.slane %v799_v48, 2 }
 0x120   : > { %v776_v53 = vsel %vm748_vm1, %v765_v49, %v775_v50  ;;  %v794_v54 = vadd.f32 %v793_v51, %v792_v47  ;;  %v801_v55 = vadd.f32 %v800_v52, %v799_v48 }
 0x121   : > { %782 = vst.msk [vmem:[%s458_s18] sm:$0x3] %vm780_vm2, %v776_v53 }
 0x122   : > { %v795_v56 = vrot.slane %v794_v54, 1  ;;  %v802_v57 = vrot.slane %v801_v55, 1 }
 0x124   : > { %v803_v58 = vadd.f32 %v802_v57, %v801_v55  ;;  %v796_v59 = vadd.f32 %v795_v56, %v794_v54 }
 0x126   : > { %v806_v60 = vrot.slane %v803_v58, 7 }
 0x128   : > { %v807_v61 = vsel %vm748_vm1, %v796_v59, %v806_v60 }
 0x129   : > { %809 = vst.msk [vmem:[%s467_s10] sm:$0x3] %vm780_vm2, %v807_v61 }
 0x12a PF: > { %s15_s21 = sadd.s32 1, %s1294_s21   ;;  %s1597_s15 = smov %s1274_s16 }
 0x12b   : > { %p12_p0 = scmp.ge.s32.totalorder %s15_s21, 20   ;;  %s1598_s16 = smov %s1373_s28 }
 0x12c   : > { %s1599_s17 = smov %s1286_s19  ;;  %s1600_s18 = smov %s1290_s20 }
 0x12d   : > { %s1601_s19 = smov %s1604_s22  ;;  %s1602_s20 = smov %s1608_s23 }
 0x12e   :  { %14 = sbr.rel (!%p12_p0) target bundleno = 4 (0x4), region = 136 }

// kernel: resnet_forward.40
= control target key start
LH: loop header
LB: loop body
LE: loop exit
PB: predicated region body
PF: predicated region fallthrough
CT: control target
= control target key end

     0   :  { %s1858_s15 = smov 0   ;;  %s1860_s16 = smov 0   ;;  %s2272_s0 = inlined_call_operand.vmem [shape: bf16[2,4608], index: 0, kind: input, shape index: {}]   ;;  %s2273_s1 = inlined_call_operand.vmem [shape: bf16[4608,512], index: 1, kind: input, shape index: {}]   ;;  %s2274_s2 = inlined_call_operand.vmem [shape: bf16[2,512], index: 2, kind: output, shape index: {0}]   ;;  %s2275_s3 = inlined_call_operand.vmem [shape: f32[1,1,512], index: 3, kind: output, shape index: {1}]   ;;  %s2276_s4 = inlined_call_operand.vmem [shape: f32[1,1,512], index: 4, kind: output, shape index: {2}]  }
   0x1   :  { %s1862_s17 = smov 0   ;;  %s1864_s18 = smov 0  }
   0x2   :  { %s1866_s19 = smov 0   ;;  %s1868_s20 = smov 0  }
   0x3   :  { %s1870_s21 = smov 0  }
   0x4 LB: > { %s27_s22 = sadd.s32 1, %s1822_s19  ;;  %s30_s23 = sadd.s32 1, %s1826_s20  ;;  %s1830_s21 = sphi %s1870_s21, %s15_s21   ;;  %s1826_s20 = sphi %s1868_s20, %s2282_s20   ;;  %s1822_s19 = sphi %s1866_s19, %s2281_s19   ;;  %s1818_s18 = sphi %s1864_s18, %s2280_s18   ;;  %s1814_s17 = sphi %s1862_s17, %s2279_s17   ;;  %s1810_s16 = sphi %s1860_s16, %s2278_s16   ;;  %s1806_s15 = sphi %s1858_s15, %s2277_s15  }
   0x5   : > { %p28_p0 = scmp.ge.s32.totalorder %s27_s22, 9  ;;  %p78_p1 = scmp.ne.s32.totalorder %s1810_s16, %s1806_s15 }
   0x6   : > { %p79_p2 = scmp.eq.s32.totalorder %s1830_s21, 0  ;;  %s71_s27 = sadd.s32 1, %s1810_s16 }
   0x7   : > { %s2284_s22 = smov (%p28_p0, %s27_s22), 0  ;;  %s2286_s23 = smov (!%p28_p0, %s30_s23), %s1826_s20 }
   0x8   : > { %p80_p3 = por %p79_p2, %p78_p1  ;;  %p32_p4 = scmp.ge.s32.totalorder %s2286_s23, 2 }
   0x9   : > { %s66_s24 = ssub.s32 %s1822_s19, %s2284_s22  ;;  %p1382_p6 = scmp.ge.s32.totalorder %s1830_s21, 18 }
   0xa   : > { %s2288_s23 = smov (%p32_p4, %s2286_s23), 0 }
   0xb   : > { %s67_s25 = ssub.s32 %s1826_s20, %s2288_s23  ;;  %188 = sbr.rel (%p1382_p6) target bundleno = 87 (0x57), region = 16 }
   0xc   : > { %s68_s26 = sor.u32 %s67_s25, %s66_s24 }
   0xd   : > { %p69_p5 = scmp.eq.s32.totalorder %s68_s26, 0 }
   0xf   : > { %s1909_s28 = scalar_select %p69_p5, %s1810_s16, %s71_s27  }
  0x10   : > { %203 = sbr.rel (!%p80_p3) target bundleno = 87 (0x57), region = 24  ;;  %s205_s29 = sand.u32 (%p80_p3), 1, %s1810_s16  }
  0x11   : > { %s1385_s30 = sshll.u32 (%p80_p3), %s1826_s20, 1  ;;  %s1383_s5 = sshll.u32 (%p80_p3), %s205_s29, 9 }
  0x12   : > { %s1654_s6 = sshll.u32 (%p80_p3), %s1822_s19, 8  ;;  %s1923_s12 = scalar_lea.vmem (%p80_p3), [#allocation3], %s1383_s5 }
  0x13   : > { %s211_s7 = sadd.s32 (%p80_p3), %s1654_s6, %s1385_s30 }
  0x14   : > { %s1387_s8 = sshll.u32 (%p80_p3), %s211_s7, 2 }
  0x15   : > { %s1918_s11 = scalar_lea.vmem %s2273_s1, %s1387_s8 }
  0x16   : > { %v368_v0 = vld [vmem:[%s1918_s11] sm:$0xff]  ;;  %v370_v1 = vld [vmem:[%s1918_s11 + $0x10] sm:$0xff] }
  0x17   : > { %v372_v2 = vld [vmem:[%s1918_s11 + $0x20] sm:$0xff]  ;;  %369 = vst [vmem:[%s1923_s12] sm:$0xff] %v368_v0  ;;  %v374_v3 = vld [vmem:[%s1918_s11 + $0x30] sm:$0xff] }
  0x18   : > { %371 = vst [vmem:[%s1923_s12 + $0x8] sm:$0xff] %v370_v1  ;;  %v376_v4 = vld [vmem:[%s1918_s11 + $0x40] sm:$0xff]  ;;  %v378_v5 = vld [vmem:[%s1918_s11 + $0x50] sm:$0xff] }
  0x19   : > { %373 = vst [vmem:[%s1923_s12 + $0x10] sm:$0xff] %v372_v2  ;;  %v380_v6 = vld [vmem:[%s1918_s11 + $0x60] sm:$0xff]  ;;  %v382_v7 = vld [vmem:[%s1918_s11 + $0x70] sm:$0xff] }
  0x1a   : > { %375 = vst [vmem:[%s1923_s12 + $0x18] sm:$0xff] %v374_v3  ;;  %v384_v8 = vld [vmem:[%s1918_s11 + $0x80] sm:$0xff]  ;;  %v386_v9 = vld [vmem:[%s1918_s11 + $0x90] sm:$0xff] }
  0x1b   : > { %377 = vst [vmem:[%s1923_s12 + $0x20] sm:$0xff] %v376_v4  ;;  %v388_v10 = vld [vmem:[%s1918_s11 + $0xa0] sm:$0xff]  ;;  %v390_v11 = vld [vmem:[%s1918_s11 + $0xb0] sm:$0xff] }
  0x1c   : > { %379 = vst [vmem:[%s1923_s12 + $0x28] sm:$0xff] %v378_v5  ;;  %v392_v12 = vld [vmem:[%s1918_s11 + $0xc0] sm:$0xff]  ;;  %v394_v13 = vld [vmem:[%s1918_s11 + $0xd0] sm:$0xff] }
  0x1d   : > { %381 = vst [vmem:[%s1923_s12 + $0x30] sm:$0xff] %v380_v6  ;;  %v396_v14 = vld [vmem:[%s1918_s11 + $0xe0] sm:$0xff]  ;;  %v398_v15 = vld [vmem:[%s1918_s11 + $0xf0] sm:$0xff] }
  0x1e   : > { %383 = vst [vmem:[%s1923_s12 + $0x38] sm:$0xff] %v382_v7  ;;  %v400_v16 = vld [vmem:[%s1918_s11 + $0x100] sm:$0xff]  ;;  %v402_v17 = vld [vmem:[%s1918_s11 + $0x110] sm:$0xff] }
  0x1f   : > { %385 = vst [vmem:[%s1923_s12 + $0x40] sm:$0xff] %v384_v8  ;;  %v404_v18 = vld [vmem:[%s1918_s11 + $0x120] sm:$0xff]  ;;  %v406_v19 = vld [vmem:[%s1918_s11 + $0x130] sm:$0xff] }
  0x20   : > { %387 = vst [vmem:[%s1923_s12 + $0x48] sm:$0xff] %v386_v9  ;;  %v408_v20 = vld [vmem:[%s1918_s11 + $0x140] sm:$0xff]  ;;  %v410_v21 = vld [vmem:[%s1918_s11 + $0x150] sm:$0xff] }
  0x21   : > { %389 = vst [vmem:[%s1923_s12 + $0x50] sm:$0xff] %v388_v10  ;;  %v412_v22 = vld [vmem:[%s1918_s11 + $0x160] sm:$0xff]  ;;  %v414_v23 = vld [vmem:[%s1918_s11 + $0x170] sm:$0xff] }
  0x22   : > { %391 = vst [vmem:[%s1923_s12 + $0x58] sm:$0xff] %v390_v11  ;;  %v416_v24 = vld [vmem:[%s1918_s11 + $0x180] sm:$0xff]  ;;  %v418_v25 = vld [vmem:[%s1918_s11 + $0x190] sm:$0xff] }
  0x23   : > { %393 = vst [vmem:[%s1923_s12 + $0x60] sm:$0xff] %v392_v12  ;;  %v420_v26 = vld [vmem:[%s1918_s11 + $0x1a0] sm:$0xff]  ;;  %v422_v27 = vld [vmem:[%s1918_s11 + $0x1b0] sm:$0xff] }
  0x24   : > { %395 = vst [vmem:[%s1923_s12 + $0x68] sm:$0xff] %v394_v13  ;;  %v424_v28 = vld [vmem:[%s1918_s11 + $0x1c0] sm:$0xff]  ;;  %v426_v29 = vld [vmem:[%s1918_s11 + $0x1d0] sm:$0xff] }
  0x25   : > { %397 = vst [vmem:[%s1923_s12 + $0x70] sm:$0xff] %v396_v14  ;;  %v428_v30 = vld [vmem:[%s1918_s11 + $0x1e0] sm:$0xff]  ;;  %v430_v31 = vld [vmem:[%s1918_s11 + $0x1f0] sm:$0xff] }
  0x26   : > { %399 = vst [vmem:[%s1923_s12 + $0x78] sm:$0xff] %v398_v15  ;;  %v432_v32 = vld [vmem:[%s1918_s11 + $0x200] sm:$0xff]  ;;  %v434_v33 = vld [vmem:[%s1918_s11 + $0x210] sm:$0xff] }
  0x27   : > { %401 = vst [vmem:[%s1923_s12 + $0x80] sm:$0xff] %v400_v16  ;;  %v436_v34 = vld [vmem:[%s1918_s11 + $0x220] sm:$0xff]  ;;  %v438_v35 = vld [vmem:[%s1918_s11 + $0x230] sm:$0xff] }
  0x28   : > { %403 = vst [vmem:[%s1923_s12 + $0x88] sm:$0xff] %v402_v17  ;;  %v440_v36 = vld [vmem:[%s1918_s11 + $0x240] sm:$0xff]  ;;  %v442_v37 = vld [vmem:[%s1918_s11 + $0x250] sm:$0xff] }
  0x29   : > { %405 = vst [vmem:[%s1923_s12 + $0x90] sm:$0xff] %v404_v18  ;;  %v444_v38 = vld [vmem:[%s1918_s11 + $0x260] sm:$0xff]  ;;  %v446_v39 = vld [vmem:[%s1918_s11 + $0x270] sm:$0xff] }
  0x2a   : > { %407 = vst [vmem:[%s1923_s12 + $0x98] sm:$0xff] %v406_v19  ;;  %v448_v40 = vld [vmem:[%s1918_s11 + $0x280] sm:$0xff]  ;;  %v450_v41 = vld [vmem:[%s1918_s11 + $0x290] sm:$0xff] }
  0x2b   : > { %409 = vst [vmem:[%s1923_s12 + $0xa0] sm:$0xff] %v408_v20  ;;  %v452_v42 = vld [vmem:[%s1918_s11 + $0x2a0] sm:$0xff]  ;;  %v454_v43 = vld [vmem:[%s1918_s11 + $0x2b0] sm:$0xff] }
  0x2c   : > { %411 = vst [vmem:[%s1923_s12 + $0xa8] sm:$0xff] %v410_v21  ;;  %v456_v44 = vld [vmem:[%s1918_s11 + $0x2c0] sm:$0xff]  ;;  %v458_v45 = vld [vmem:[%s1918_s11 + $0x2d0] sm:$0xff] }
  0x2d   : > { %413 = vst [vmem:[%s1923_s12 + $0xb0] sm:$0xff] %v412_v22  ;;  %v460_v46 = vld [vmem:[%s1918_s11 + $0x2e0] sm:$0xff]  ;;  %v462_v47 = vld [vmem:[%s1918_s11 + $0x2f0] sm:$0xff] }
  0x2e   : > { %415 = vst [vmem:[%s1923_s12 + $0xb8] sm:$0xff] %v414_v23  ;;  %v464_v48 = vld [vmem:[%s1918_s11 + $0x300] sm:$0xff]  ;;  %v466_v49 = vld [vmem:[%s1918_s11 + $0x310] sm:$0xff] }
  0x2f   : > { %417 = vst [vmem:[%s1923_s12 + $0xc0] sm:$0xff] %v416_v24  ;;  %v468_v50 = vld [vmem:[%s1918_s11 + $0x320] sm:$0xff]  ;;  %v470_v51 = vld [vmem:[%s1918_s11 + $0x330] sm:$0xff] }
  0x30   : > { %419 = vst [vmem:[%s1923_s12 + $0xc8] sm:$0xff] %v418_v25  ;;  %v472_v52 = vld [vmem:[%s1918_s11 + $0x340] sm:$0xff]  ;;  %v474_v53 = vld [vmem:[%s1918_s11 + $0x350] sm:$0xff] }
  0x31   : > { %421 = vst [vmem:[%s1923_s12 + $0xd0] sm:$0xff] %v420_v26  ;;  %v476_v54 = vld [vmem:[%s1918_s11 + $0x360] sm:$0xff]  ;;  %v478_v55 = vld [vmem:[%s1918_s11 + $0x370] sm:$0xff] }
  0x32   : > { %423 = vst [vmem:[%s1923_s12 + $0xd8] sm:$0xff] %v422_v27  ;;  %v480_v56 = vld [vmem:[%s1918_s11 + $0x380] sm:$0xff]  ;;  %v482_v57 = vld [vmem:[%s1918_s11 + $0x390] sm:$0xff] }
  0x33   : > { %425 = vst [vmem:[%s1923_s12 + $0xe0] sm:$0xff] %v424_v28  ;;  %v484_v58 = vld [vmem:[%s1918_s11 + $0x3a0] sm:$0xff]  ;;  %v486_v59 = vld [vmem:[%s1918_s11 + $0x3b0] sm:$0xff] }
  0x34   : > { %427 = vst [vmem:[%s1923_s12 + $0xe8] sm:$0xff] %v426_v29  ;;  %v488_v60 = vld [vmem:[%s1918_s11 + $0x3c0] sm:$0xff]  ;;  %v490_v61 = vld [vmem:[%s1918_s11 + $0x3d0] sm:$0xff] }
  0x35   : > { %429 = vst [vmem:[%s1923_s12 + $0xf0] sm:$0xff] %v428_v30  ;;  %v492_v62 = vld [vmem:[%s1918_s11 + $0x3e0] sm:$0xff]  ;;  %v494_v63 = vld [vmem:[%s1918_s11 + $0x3f0] sm:$0xff] }
  0x36   : > { %431 = vst [vmem:[%s1923_s12 + $0xf8] sm:$0xff] %v430_v31 }
  0x37   : > { %433 = vst [vmem:[%s1923_s12 + $0x100] sm:$0xff] %v432_v32 }
  0x38   : > { %435 = vst [vmem:[%s1923_s12 + $0x108] sm:$0xff] %v434_v33 }
  0x39   : > { %437 = vst [vmem:[%s1923_s12 + $0x110] sm:$0xff] %v436_v34 }
  0x3a   : > { %439 = vst [vmem:[%s1923_s12 + $0x118] sm:$0xff] %v438_v35 }
  0x3b   : > { %441 = vst [vmem:[%s1923_s12 + $0x120] sm:$0xff] %v440_v36 }
  0x3c   : > { %443 = vst [vmem:[%s1923_s12 + $0x128] sm:$0xff] %v442_v37 }
  0x3d   : > { %445 = vst [vmem:[%s1923_s12 + $0x130] sm:$0xff] %v444_v38 }
  0x3e   : > { %447 = vst [vmem:[%s1923_s12 + $0x138] sm:$0xff] %v446_v39 }
  0x3f   : > { %449 = vst [vmem:[%s1923_s12 + $0x140] sm:$0xff] %v448_v40 }
  0x40   : > { %451 = vst [vmem:[%s1923_s12 + $0x148] sm:$0xff] %v450_v41 }
  0x41   : > { %453 = vst [vmem:[%s1923_s12 + $0x150] sm:$0xff] %v452_v42 }
  0x42   : > { %455 = vst [vmem:[%s1923_s12 + $0x158] sm:$0xff] %v454_v43 }
  0x43   : > { %457 = vst [vmem:[%s1923_s12 + $0x160] sm:$0xff] %v456_v44 }
  0x44   : > { %459 = vst [vmem:[%s1923_s12 + $0x168] sm:$0xff] %v458_v45 }
  0x45   : > { %461 = vst [vmem:[%s1923_s12 + $0x170] sm:$0xff] %v460_v46 }
  0x46   : > { %463 = vst [vmem:[%s1923_s12 + $0x178] sm:$0xff] %v462_v47 }
  0x47   : > { %465 = vst [vmem:[%s1923_s12 + $0x180] sm:$0xff] %v464_v48 }
  0x48   : > { %467 = vst [vmem:[%s1923_s12 + $0x188] sm:$0xff] %v466_v49 }
  0x49   : > { %469 = vst [vmem:[%s1923_s12 + $0x190] sm:$0xff] %v468_v50 }
  0x4a   : > { %471 = vst [vmem:[%s1923_s12 + $0x198] sm:$0xff] %v470_v51 }
  0x4b   : > { %473 = vst [vmem:[%s1923_s12 + $0x1a0] sm:$0xff] %v472_v52 }
  0x4c   : > { %475 = vst [vmem:[%s1923_s12 + $0x1a8] sm:$0xff] %v474_v53 }
  0x4d   : > { %477 = vst [vmem:[%s1923_s12 + $0x1b0] sm:$0xff] %v476_v54 }
  0x4e   : > { %479 = vst [vmem:[%s1923_s12 + $0x1b8] sm:$0xff] %v478_v55 }
  0x4f   : > { %481 = vst [vmem:[%s1923_s12 + $0x1c0] sm:$0xff] %v480_v56 }
  0x50   : > { %483 = vst [vmem:[%s1923_s12 + $0x1c8] sm:$0xff] %v482_v57 }
  0x51   : > { %485 = vst [vmem:[%s1923_s12 + $0x1d0] sm:$0xff] %v484_v58 }
  0x52   : > { %487 = vst [vmem:[%s1923_s12 + $0x1d8] sm:$0xff] %v486_v59 }
  0x53   : > { %489 = vst [vmem:[%s1923_s12 + $0x1e0] sm:$0xff] %v488_v60 }
  0x54   : > { %491 = vst [vmem:[%s1923_s12 + $0x1e8] sm:$0xff] %v490_v61 }
  0x55   : > { %493 = vst [vmem:[%s1923_s12 + $0x1f0] sm:$0xff] %v492_v62 }
  0x56   : > { %495 = vst [vmem:[%s1923_s12 + $0x1f8] sm:$0xff] %v494_v63 }
  0x57 PF: > { %p1388_p7 = scmp.ge.s32.totalorder %s1830_s21, 1  ;;  %p500_p8 = scmp.lt.s32.totalorder %s1830_s21, 19 }
  0x59   : > { %p501_p9 = pnand %p1388_p7, %p500_p8 }
  0x5a   : > { %s507_s13 = sand.u32 (!%p501_p9), 1, %s1806_s15   ;;  %s1390_s14 = sshll.u32 (!%p501_p9), %s1814_s17, 2 }
  0x5b   : > { %504 = sbr.rel (%p501_p9) target bundleno = 364 (0x16c), region = 62  ;;  %s1389_s24 = sshll.u32 (!%p501_p9), %s507_s13, 9 }
  0x5c   : > { %p562_p10 = scmp.lt.s32.totalorder (!%p501_p9), %s1390_s14, 35  ;;  %s1391_s25 = sshll.u32 (!%p501_p9), %s1818_s18, 1 }
  0x5d   : > { %p573_p11 = scmp.lt.s32.totalorder (!%p501_p9), %s1391_s25, 3  ;;  %s2075_s11 = scalar_lea.vmem (!%p501_p9), [#allocation3], %s1389_s24 }
  0x5e   : > { %p1394_p12 = scmp.ne.s32.totalorder (!%p501_p9), %s1814_s17, 0 }
  0x60   : > { %s2290_s14 = smov (!%p562_p10, %s1390_s14), 35  ;;  %s2292_s25 = smov (!%p573_p11, %s1391_s25), 3 }
  0x61   : > { %s566_s29 = scalar_lea.vmem %s2272_s0, %s2290_s14  ;;  %s577_s15 = scalar_lea.vmem %s2274_s2, %s2292_s25 }
  0x62   : > { %s586_s18 = scalar_lea.vmem %s2275_s3, %s2292_s25  ;;  %s595_s10 = scalar_lea.vmem %s2276_s4, %s2292_s25 }
  0x63   : > { %600 = sbr.rel (%p1394_p12) target bundleno = 106 (0x6a), region = 70 }
  0x68   : > { %v1832_v0 = vmov 0.0  }
  0x69   : > { %601 = vst [vmem:[#allocation2] sm:$0xf] %v1832_v0 }
  0x6a PF: > { %v1453_v1 = vld [vmem:[%s2075_s11 + $0x70] sm:$0xf]  ;;  %v1670_v2 = vld [vmem:[%s2075_s11 + $0x74] sm:$0xf0]  ;;  %v1445_v12 = vld [vmem:[%s2075_s11 + $0x60] sm:$0xf] }
  0x6b   : > { %v1517_v3 = vld [vmem:[%s2075_s11 + $0xf0] sm:$0xf]  ;;  %v1454_v4 = vor.u32 %v1670_v2, %v1453_v1  ;;  %v1686_v5 = vld [vmem:[%s2075_s11 + $0xf4] sm:$0xf0]  ;;  %v1668_v14 = vld [vmem:[%s2075_s11 + $0x64] sm:$0xf0] }
  0x6c   : > { %v1581_v6 = vld [vmem:[%s2075_s11 + $0x170] sm:$0xf]  ;;  %v1702_v7 = vld [vmem:[%s2075_s11 + $0x174] sm:$0xf0]  ;;  %v1518_v8 = vor.u32 %v1686_v5, %v1517_v3  ;;  %v1509_v15 = vld [vmem:[%s2075_s11 + $0xe0] sm:$0xf]  ;;  %v1446_v17 = vor.u32 %v1668_v14, %v1445_v12 }
  0x6d   : > { %v1582_v9 = vor.u32 %v1702_v7, %v1581_v6  ;;  %v1645_v10 = vld [vmem:[%s2075_s11 + $0x1f0] sm:$0xf]  ;;  %v1718_v11 = vld [vmem:[%s2075_s11 + $0x1f4] sm:$0xf0]  ;;  %998 = vmatpush.bf16.msra.mxu0 %v1454_v4  ;;  %v1684_v16 = vld [vmem:[%s2075_s11 + $0xe4] sm:$0xf0] }
  0x6e   : > { %v1646_v13 = vor.u32 %v1718_v11, %v1645_v10  ;;  %1011 = vmatpush.bf16.msra.mxu1 %v1518_v8  ;;  %v1510_v18 = vor.u32 %v1684_v16, %v1509_v15  ;;  %v1573_v19 = vld [vmem:[%s2075_s11 + $0x160] sm:$0xf]  ;;  %v1700_v20 = vld [vmem:[%s2075_s11 + $0x164] sm:$0xf0]  ;;  %v1437_v24 = vld [vmem:[%s2075_s11 + $0x50] sm:$0xf] }
  0x6f   : > { %1024 = vmatpush.bf16.msra.mxu2 %v1582_v9  ;;  %v1637_v21 = vld [vmem:[%s2075_s11 + $0x1e0] sm:$0xf]  ;;  %v1574_v22 = vor.u32 %v1700_v20, %v1573_v19  ;;  %v1716_v23 = vld [vmem:[%s2075_s11 + $0x1e4] sm:$0xf0]  ;;  %v1666_v25 = vld [vmem:[%s2075_s11 + $0x54] sm:$0xf0] }
  0x70   : > { %1037 = vmatpush.bf16.msra.mxu3 %v1646_v13  ;;  %v1638_v26 = vor.u32 %v1716_v23, %v1637_v21  ;;  %v1501_v27 = vld [vmem:[%s2075_s11 + $0xd0] sm:$0xf]  ;;  %v1682_v28 = vld [vmem:[%s2075_s11 + $0xd4] sm:$0xf0]  ;;  %v1438_v30 = vor.u32 %v1666_v25, %v1437_v24  ;;  %v1429_v36 = vld [vmem:[%s2075_s11 + $0x40] sm:$0xf] }
  0x71   : > { %v1565_v29 = vld [vmem:[%s2075_s11 + $0x150] sm:$0xf]  ;;  %999 = vmatpush.bf16.msra.mxu0 %v1446_v17  ;;  %v1698_v31 = vld [vmem:[%s2075_s11 + $0x154] sm:$0xf0]  ;;  %v1502_v34 = vor.u32 %v1682_v28, %v1501_v27  ;;  %v1664_v37 = vld [vmem:[%s2075_s11 + $0x44] sm:$0xf0] }
  0x72   : > { %v1629_v32 = vld [vmem:[%s2075_s11 + $0x1d0] sm:$0xf]  ;;  %v1714_v33 = vld [vmem:[%s2075_s11 + $0x1d4] sm:$0xf0]  ;;  %1012 = vmatpush.bf16.msra.mxu1 %v1510_v18  ;;  %v1566_v35 = vor.u32 %v1698_v31, %v1565_v29  ;;  %v1493_v38 = vld [vmem:[%s2075_s11 + $0xc0] sm:$0xf]  ;;  %v1430_v45 = vor.u32 %v1664_v37, %v1429_v36 }
  0x73   : > { %1025 = vmatpush.bf16.msra.mxu2 %v1574_v22  ;;  %v1630_v39 = vor.u32 %v1714_v33, %v1629_v32  ;;  %v1680_v40 = vld [vmem:[%s2075_s11 + $0xc4] sm:$0xf0]  ;;  %v1557_v41 = vld [vmem:[%s2075_s11 + $0x140] sm:$0xf]  ;;  %v1421_v48 = vld [vmem:[%s2075_s11 + $0x30] sm:$0xf] }
  0x74   : > { %1038 = vmatpush.bf16.msra.mxu3 %v1638_v26  ;;  %v1696_v42 = vld [vmem:[%s2075_s11 + $0x144] sm:$0xf0]  ;;  %v1621_v43 = vld [vmem:[%s2075_s11 + $0x1c0] sm:$0xf]  ;;  %v1494_v46 = vor.u32 %v1680_v40, %v1493_v38  ;;  %v1662_v49 = vld [vmem:[%s2075_s11 + $0x34] sm:$0xf0] }
  0x75   : > { %v1712_v44 = vld [vmem:[%s2075_s11 + $0x1c4] sm:$0xf0]  ;;  %1000 = vmatpush.bf16.msra.mxu0 %v1438_v30  ;;  %v1558_v47 = vor.u32 %v1696_v42, %v1557_v41  ;;  %v1485_v50 = vld [vmem:[%s2075_s11 + $0xb0] sm:$0xf]  ;;  %v1678_v52 = vld [vmem:[%s2075_s11 + $0xb4] sm:$0xf0]  ;;  %v1422_v57 = vor.u32 %v1662_v49, %v1421_v48 }
  0x76   : > { %1013 = vmatpush.bf16.msra.mxu1 %v1502_v34  ;;  %v1622_v51 = vor.u32 %v1712_v44, %v1621_v43  ;;  %v1549_v53 = vld [vmem:[%s2075_s11 + $0x130] sm:$0xf]  ;;  %v1694_v54 = vld [vmem:[%s2075_s11 + $0x134] sm:$0xf0]  ;;  %v1486_v58 = vor.u32 %v1678_v52, %v1485_v50  ;;  %v1413_v60 = vld [vmem:[%s2075_s11 + $0x20] sm:$0xf] }
  0x77   : > { %1026 = vmatpush.bf16.msra.mxu2 %v1566_v35  ;;  %v1613_v55 = vld [vmem:[%s2075_s11 + $0x1b0] sm:$0xf]  ;;  %v1710_v56 = vld [vmem:[%s2075_s11 + $0x1b4] sm:$0xf0]  ;;  %v1550_v59 = vor.u32 %v1694_v54, %v1549_v53  ;;  %v1660_v61 = vld [vmem:[%s2075_s11 + $0x24] sm:$0xf0] }
  0x78   : > { %1039 = vmatpush.bf16.msra.mxu3 %v1630_v39  ;;  %v1477_v62 = vld [vmem:[%s2075_s11 + $0xa0] sm:$0xf]  ;;  %v1614_v63 = vor.u32 %v1710_v56, %v1613_v55  ;;  %v1676_v0 = vld [vmem:[%s2075_s11 + $0xa4] sm:$0xf0]  ;;  %v1414_v5 = vor.u32 %v1660_v61, %v1413_v60  ;;  %v1405_v8 = vld [vmem:[%s2075_s11 + $0x10] sm:$0xf] }
  0x79   : > { %1001 = vmatpush.bf16.msra.mxu0 %v1430_v45  ;;  %v1541_v1 = vld [vmem:[%s2075_s11 + $0x120] sm:$0xf]  ;;  %v1692_v2 = vld [vmem:[%s2075_s11 + $0x124] sm:$0xf0]  ;;  %v1478_v6 = vor.u32 %v1676_v0, %v1477_v62  ;;  %v1658_v9 = vld [vmem:[%s2075_s11 + $0x14] sm:$0xf0] }
  0x7a   : > { %1014 = vmatpush.bf16.msra.mxu1 %v1494_v46  ;;  %v1605_v3 = vld [vmem:[%s2075_s11 + $0x1a0] sm:$0xf]  ;;  %v1708_v4 = vld [vmem:[%s2075_s11 + $0x1a4] sm:$0xf0]  ;;  %v1542_v7 = vor.u32 %v1692_v2, %v1541_v1  ;;  %v1469_v10 = vld [vmem:[%s2075_s11 + $0x90] sm:$0xf]  ;;  %v1406_v18 = vor.u32 %v1658_v9, %v1405_v8 }
  0x7b   : > { %1027 = vmatpush.bf16.msra.mxu2 %v1558_v47  ;;  %v1606_v11 = vor.u32 %v1708_v4, %v1605_v3  ;;  %v1674_v12 = vld [vmem:[%s2075_s11 + $0x94] sm:$0xf0]  ;;  %v1533_v13 = vld [vmem:[%s2075_s11 + $0x110] sm:$0xf]  ;;  %v1397_v17 = vld [vmem:[%s2075_s11] sm:$0xf] }
  0x7c   : > { %1040 = vmatpush.bf16.msra.mxu3 %v1622_v51  ;;  %v1690_v14 = vld [vmem:[%s2075_s11 + $0x114] sm:$0xf0]  ;;  %v1597_v15 = vld [vmem:[%s2075_s11 + $0x190] sm:$0xf]  ;;  %v1656_v19 = vld [vmem:[%s2075_s11 + $0x4] sm:$0xf0]  ;;  %v1470_v22 = vor.u32 %v1674_v12, %v1469_v10 }
  0x7d   : > { %1002 = vmatpush.bf16.msra.mxu0 %v1422_v57  ;;  %v1706_v16 = vld [vmem:[%s2075_s11 + $0x194] sm:$0xf0]  ;;  %v1461_v20 = vld [vmem:[%s2075_s11 + $0x80] sm:$0xf]  ;;  %v1672_v21 = vld [vmem:[%s2075_s11 + $0x84] sm:$0xf0]  ;;  %v1534_v23 = vor.u32 %v1690_v14, %v1533_v13  ;;  %v1398_v34 = vor.u32 %v1656_v19, %v1397_v17 }
  0x7e   : > { %1015 = vmatpush.bf16.msra.mxu1 %v1486_v58  ;;  %v1525_v24 = vld [vmem:[%s2075_s11 + $0x100] sm:$0xf]  ;;  %v1688_v25 = vld [vmem:[%s2075_s11 + $0x104] sm:$0xf0]  ;;  %v1598_v27 = vor.u32 %v1706_v16, %v1597_v15  ;;  %v1669_v29 = vld [vmem:[%s2075_s11 + $0x74] sm:$0xf]  ;;  %v1462_v37 = vor.u32 %v1672_v21, %v1461_v20 }
  0x7f   : > { %1028 = vmatpush.bf16.msra.mxu2 %v1550_v59  ;;  %v1589_v26 = vld [vmem:[%s2075_s11 + $0x180] sm:$0xf]  ;;  %v1704_v28 = vld [vmem:[%s2075_s11 + $0x184] sm:$0xf0]  ;;  %v1455_v30 = vld [vmem:[%s2075_s11 + $0x78] sm:$0xf0]  ;;  %v1526_v38 = vor.u32 %v1688_v25, %v1525_v24 }
  0x80   : > { %1041 = vmatpush.bf16.msra.mxu3 %v1614_v63  ;;  %v1685_v31 = vld [vmem:[%s2075_s11 + $0xf4] sm:$0xf]  ;;  %v1519_v32 = vld [vmem:[%s2075_s11 + $0xf8] sm:$0xf0]  ;;  %v1590_v41 = vor.u32 %v1704_v28, %v1589_v26  ;;  %v1458_v42 = vor.u32 %v1669_v29, %v1455_v30  ;;  %v1667_v45 = vld [vmem:[%s2075_s11 + $0x64] sm:$0xf] }
  0x81   : > { %1003 = vmatpush.bf16.msra.mxu0 %v1414_v5  ;;  %v603_v33 = vld [vmem:[%s566_s29] sm:$0xf]  ;;  %v1583_v36 = vld [vmem:[%s2075_s11 + $0x178] sm:$0xf0]  ;;  %v1522_v43 = vor.u32 %v1685_v31, %v1519_v32  ;;  %v1447_v46 = vld [vmem:[%s2075_s11 + $0x68] sm:$0xf0] }
  0x82   : > { %1016 = vmatpush.bf16.msra.mxu1 %v1478_v6  ;;  %v1701_v35 = vld [vmem:[%s2075_s11 + $0x174] sm:$0xf]  ;;  %669 = vst [vmem:[#allocation1] ss:$9 sm:$0xff] %v603_v33  ;;  %v1647_v40 = vld [vmem:[%s2075_s11 + $0x1f8] sm:$0xf0]  ;;  %v1450_v55 = vor.u32 %v1667_v45, %v1447_v46 }
  0x83   : > { %1029 = vmatpush.bf16.msra.mxu2 %v1542_v7  ;;  %v1717_v39 = vld [vmem:[%s2075_s11 + $0x1f4] sm:$0xf]  ;;  %v1586_v44 = vor.u32 %v1701_v35, %v1583_v36  ;;  %v1683_v47 = vld [vmem:[%s2075_s11 + $0xe4] sm:$0xf]  ;;  %v1511_v49 = vld [vmem:[%s2075_s11 + $0xe8] sm:$0xf0] }
  0x84   : > { %1042 = vmatpush.bf16.msra.mxu3 %v1606_v11  ;;  %v1650_v48 = vor.u32 %v1717_v39, %v1647_v40  ;;  %v1699_v50 = vld [vmem:[%s2075_s11 + $0x164] sm:$0xf]  ;;  %v1575_v51 = vld [vmem:[%s2075_s11 + $0x168] sm:$0xf0]  ;;  %v1665_v54 = vld [vmem:[%s2075_s11 + $0x54] sm:$0xf]  ;;  %v1514_v59 = vor.u32 %v1683_v47, %v1511_v49 }
  0x85   : > { %1004 = vmatpush.bf16.msra.mxu0 %v1406_v18  ;;  %v1715_v52 = vld [vmem:[%s2075_s11 + $0x1e4] sm:$0xf]  ;;  %v1639_v53 = vld [vmem:[%s2075_s11 + $0x1e8] sm:$0xf0]  ;;  %v1439_v56 = vld [vmem:[%s2075_s11 + $0x58] sm:$0xf0]  ;;  %v1578_v60 = vor.u32 %v1699_v50, %v1575_v51 }
  0x86   : > { %1017 = vmatpush.bf16.msra.mxu1 %v1470_v22  ;;  %v1681_v57 = vld [vmem:[%s2075_s11 + $0xd4] sm:$0xf]  ;;  %v1503_v58 = vld [vmem:[%s2075_s11 + $0xd8] sm:$0xf0]  ;;  %v1642_v0 = vor.u32 %v1715_v52, %v1639_v53  ;;  %v1442_v6 = vor.u32 %v1665_v54, %v1439_v56  ;;  %v1663_v9 = vld [vmem:[%s2075_s11 + $0x44] sm:$0xf] }
  0x87   : > { %1030 = vmatpush.bf16.msra.mxu2 %v1534_v23  ;;  %v1697_v1 = vld [vmem:[%s2075_s11 + $0x154] sm:$0xf]  ;;  %v1567_v2 = vld [vmem:[%s2075_s11 + $0x158] sm:$0xf0]  ;;  %v1506_v7 = vor.u32 %v1681_v57, %v1503_v58  ;;  %v1431_v10 = vld [vmem:[%s2075_s11 + $0x48] sm:$0xf0] }
  0x88   : > { %1043 = vmatpush.bf16.msra.mxu3 %v1598_v27  ;;  %v1713_v4 = vld [vmem:[%s2075_s11 + $0x1d4] sm:$0xf]  ;;  %v1631_v5 = vld [vmem:[%s2075_s11 + $0x1d8] sm:$0xf0]  ;;  %v1570_v8 = vor.u32 %v1697_v1, %v1567_v2  ;;  %v1679_v11 = vld [vmem:[%s2075_s11 + $0xc4] sm:$0xf]  ;;  %v1434_v18 = vor.u32 %v1663_v9, %v1431_v10 }
  0x89   : > { %1005 = vmatpush.bf16.msra.mxu0 %v1398_v34  ;;  %v2167_v61 = vld [vmem:[#allocation1 + $0x12] sm:$0xff]  ;;  %v2169_v62 = vld [vmem:[#allocation1 + $0x1b] sm:$0xff]  ;;  %v2176_v3 = vld [vmem:[#allocation1 + $0x9] sm:$0xff]  ;;  %v1634_v12 = vor.u32 %v1713_v4, %v1631_v5  ;;  %vm1105_vm0 = vcmask 1041408   ;;  %p1651_p13 = scmp.ne.s32.totalorder %s1814_s17, 8 }
  0x8a   : > { %1018 = vmatpush.bf16.msra.mxu1 %v1462_v37  ;;  %v2171_v63 = vld [vmem:[#allocation1] sm:$0xff]  ;;  %v1495_v13 = vld [vmem:[%s2075_s11 + $0xc8] sm:$0xf0]  ;;  %v1695_v14 = vld [vmem:[%s2075_s11 + $0x144] sm:$0xf] }
  0x8b   : > { %1031 = vmatpush.bf16.msra.mxu2 %v1526_v38  ;;  %v1559_v15 = vld [vmem:[%s2075_s11 + $0x148] sm:$0xf0]  ;;  %v1711_v16 = vld [vmem:[%s2075_s11 + $0x1c4] sm:$0xf]  ;;  %v1498_v19 = vor.u32 %v1679_v11, %v1495_v13  ;;  %v1661_v21 = vld [vmem:[%s2075_s11 + $0x34] sm:$0xf] }
  0x8c   : > { %1044 = vmatpush.bf16.msra.mxu3 %v1590_v41  ;;  %1006 = vmatmul.bf16.vlgmr.msra.gmra.mxu0 %v2171_v63  ;;  %v1623_v17 = vld [vmem:[%s2075_s11 + $0x1c8] sm:$0xf0]  ;;  %v1562_v20 = vor.u32 %v1695_v14, %v1559_v15  ;;  %v1423_v22 = vld [vmem:[%s2075_s11 + $0x38] sm:$0xf0]  ;;  %v1677_v23 = vld [vmem:[%s2075_s11 + $0xb4] sm:$0xf] }
  0x8d   : > { %1050 = vmatpush.bf16.msrb.mxu0 %v1458_v42  ;;  %1019 = vmatmul.bf16.vlgmr.msra.gmra.mxu1 %v2176_v3  ;;  %v1626_v24 = vor.u32 %v1711_v16, %v1623_v17  ;;  %v1487_v25 = vld [vmem:[%s2075_s11 + $0xb8] sm:$0xf0]  ;;  %v1693_v26 = vld [vmem:[%s2075_s11 + $0x134] sm:$0xf]  ;;  %v1426_v30 = vor.u32 %v1661_v21, %v1423_v22  ;;  %v1659_v33 = vld [vmem:[%s2075_s11 + $0x24] sm:$0xf] }
  0x8e   : > { %1063 = vmatpush.bf16.msrb.mxu1 %v1522_v43  ;;  %1032 = vmatmul.bf16.vlgmr.msra.gmra.mxu2 %v2167_v61  ;;  %v1551_v27 = vld [vmem:[%s2075_s11 + $0x138] sm:$0xf0]  ;;  %v1709_v28 = vld [vmem:[%s2075_s11 + $0x1b4] sm:$0xf]  ;;  %v1490_v31 = vor.u32 %v1677_v23, %v1487_v25  ;;  %v1415_v34 = vld [vmem:[%s2075_s11 + $0x28] sm:$0xf0] }
  0x8f   : > { %1076 = vmatpush.bf16.msrb.mxu2 %v1586_v44  ;;  %1045 = vmatmul.bf16.vlgmr.msra.gmra.mxu3 %v2169_v62  ;;  %v1615_v29 = vld [vmem:[%s2075_s11 + $0x1b8] sm:$0xf0]  ;;  %v1554_v32 = vor.u32 %v1693_v26, %v1551_v27  ;;  %v1675_v35 = vld [vmem:[%s2075_s11 + $0xa4] sm:$0xf]  ;;  %v1479_v37 = vld [vmem:[%s2075_s11 + $0xa8] sm:$0xf0]  ;;  %v1418_v42 = vor.u32 %v1659_v33, %v1415_v34 }
  0x90   : > { %1089 = vmatpush.bf16.msrb.mxu3 %v1650_v48  ;;  %v1618_v36 = vor.u32 %v1709_v28, %v1615_v29  ;;  %v1691_v38 = vld [vmem:[%s2075_s11 + $0x124] sm:$0xf]  ;;  %v1543_v39 = vld [vmem:[%s2075_s11 + $0x128] sm:$0xf0]  ;;  %v1482_v43 = vor.u32 %v1675_v35, %v1479_v37  ;;  %v1657_v45 = vld [vmem:[%s2075_s11 + $0x14] sm:$0xf] }
  0x91   : > { %1051 = vmatpush.bf16.msrb.mxu0 %v1450_v55  ;;  %v1707_v40 = vld [vmem:[%s2075_s11 + $0x1a4] sm:$0xf]  ;;  %v1607_v41 = vld [vmem:[%s2075_s11 + $0x1a8] sm:$0xf0]  ;;  %v1546_v44 = vor.u32 %v1691_v38, %v1543_v39  ;;  %v1407_v46 = vld [vmem:[%s2075_s11 + $0x18] sm:$0xf0] }
  0x92   : > { %1064 = vmatpush.bf16.msrb.mxu1 %v1514_v59  ;;  %v1673_v47 = vld [vmem:[%s2075_s11 + $0x94] sm:$0xf]  ;;  %v1610_v48 = vor.u32 %v1707_v40, %v1607_v41  ;;  %v1471_v49 = vld [vmem:[%s2075_s11 + $0x98] sm:$0xf0]  ;;  %v1410_v54 = vor.u32 %v1657_v45, %v1407_v46  ;;  %v1655_v57 = vld [vmem:[%s2075_s11 + $0x4] sm:$0xf] }
  0x93   : > { %1077 = vmatpush.bf16.msrb.mxu2 %v1578_v60  ;;  %v1689_v50 = vld [vmem:[%s2075_s11 + $0x114] sm:$0xf]  ;;  %v1535_v51 = vld [vmem:[%s2075_s11 + $0x118] sm:$0xf0]  ;;  %v1474_v55 = vor.u32 %v1673_v47, %v1471_v49  ;;  %v1399_v58 = vld [vmem:[%s2075_s11 + $0x8] sm:$0xf0] }
  0x94   : > { %1090 = vmatpush.bf16.msrb.mxu3 %v1642_v0  ;;  %v1705_v52 = vld [vmem:[%s2075_s11 + $0x194] sm:$0xf]  ;;  %v1599_v53 = vld [vmem:[%s2075_s11 + $0x198] sm:$0xf0]  ;;  %v1538_v56 = vor.u32 %v1689_v50, %v1535_v51  ;;  %v1671_v59 = vld [vmem:[%s2075_s11 + $0x84] sm:$0xf] }
  0x95   : > { %1052 = vmatpush.bf16.msrb.mxu0 %v1442_v6  ;;  %v1602_v60 = vor.u32 %v1705_v52, %v1599_v53  ;;  %v1463_v0 = vld [vmem:[%s2075_s11 + $0x88] sm:$0xf0]  ;;  %v1687_v1 = vld [vmem:[%s2075_s11 + $0x104] sm:$0xf]  ;;  %v1402_v6 = vor.u32 %v1655_v57, %v1399_v58  ;;  %v602_v26 = vld [vmem:[#allocation2] sm:$0xf] }
  0x96   : > { %1065 = vmatpush.bf16.msrb.mxu1 %v1506_v7  ;;  %v1527_v2 = vld [vmem:[%s2075_s11 + $0x108] sm:$0xf0]  ;;  %v1703_v4 = vld [vmem:[%s2075_s11 + $0x184] sm:$0xf]  ;;  %v1466_v7 = vor.u32 %v1671_v59, %v1463_v0 }
  0x97   : > { %1078 = vmatpush.bf16.msrb.mxu2 %v1570_v8  ;;  %v1591_v5 = vld [vmem:[%s2075_s11 + $0x188] sm:$0xf0]  ;;  %v1530_v8 = vor.u32 %v1687_v1, %v1527_v2 }
  0x98   : > { %1091 = vmatpush.bf16.msrb.mxu3 %v1634_v12  ;;  %v1594_v9 = vor.u32 %v1703_v4, %v1591_v5 }
  0x99   : > { %1053 = vmatpush.bf16.msrb.mxu0 %v1434_v18 }
  0x9a   : > { %1066 = vmatpush.bf16.msrb.mxu1 %v1498_v19 }
  0x9b   : > { %1079 = vmatpush.bf16.msrb.mxu2 %v1562_v20 }
  0x9c   : > { %1092 = vmatpush.bf16.msrb.mxu3 %v1626_v24 }
  0x9d   : > { %1054 = vmatpush.bf16.msrb.mxu0 %v1426_v30 }
  0x9e   : > { %1067 = vmatpush.bf16.msrb.mxu1 %v1490_v31 }
  0x9f   : > { %1080 = vmatpush.bf16.msrb.mxu2 %v1554_v32 }
  0xa0   : > { %1093 = vmatpush.bf16.msrb.mxu3 %v1618_v36 }
  0xa1   : > { %1055 = vmatpush.bf16.msrb.mxu0 %v1418_v42 }
  0xa2   : > { %1068 = vmatpush.bf16.msrb.mxu1 %v1482_v43 }
  0xa3   : > { %1081 = vmatpush.bf16.msrb.mxu2 %v1546_v44 }
  0xa4   : > { %1094 = vmatpush.bf16.msrb.mxu3 %v1610_v48 }
  0xa5   : > { %1056 = vmatpush.bf16.msrb.mxu0 %v1410_v54 }
  0xa6   : > { %1069 = vmatpush.bf16.msrb.mxu1 %v1474_v55 }
  0xa7   : > { %1082 = vmatpush.bf16.msrb.mxu2 %v1538_v56 }
  0xa8   : > { %1095 = vmatpush.bf16.msrb.mxu3 %v1602_v60 }
  0xa9   : > { %1057 = vmatpush.bf16.msrb.mxu0 %v1402_v6 }
  0xaa   : > { %1070 = vmatpush.bf16.msrb.mxu1 %v1466_v7 }
  0xab   : > { %1083 = vmatpush.bf16.msrb.mxu2 %v1530_v8 }
  0xac   : > { %1096 = vmatpush.bf16.msrb.mxu3 %v1594_v9  ;;  %1058 = vmatmul.bf16.vlgmr.msrb.gmra.mxu0 %v2171_v63 }
  0xad   : > { %1071 = vmatmul.bf16.vlgmr.msrb.gmra.mxu1 %v2176_v3 }
  0xae   : > { %1084 = vmatmul.bf16.vlgmr.msrb.gmra.mxu2 %v2167_v61 }
  0xaf   : > { %1097 = vmatmul.bf16.vlgmr.msrb.gmra.mxu3 %v2169_v62 }
 0x109   : > { %v1007_v10 = vpop.f32.mrf.mxu0 }
 0x10a   : > { %v1020_v11 = vpop.f32.mrf.mxu1 }
 0x10b   : > { %v1021_v20 = vadd.f32 %v1020_v11, %v1007_v10 }
 0x111   : > { %v1033_v12 = vpop.f32.mrf.mxu2  ;;  %v1009_v14 = vpop.f32.mrf.mxu0 }
 0x112   : > { %v1046_v13 = vpop.f32.mrf.mxu3  ;;  %v1022_v15 = vpop.f32.mrf.mxu1  ;;  %v1034_v63 = vadd.f32 %v1033_v12, %v1021_v20 }
 0x114   : > { %v1047_v62 = vadd.f32 %v1046_v13, %v1034_v63 }
 0x119   : > { %v1035_v16 = vpop.f32.mrf.mxu2 }
 0x11a   : > { %v1048_v17 = vpop.f32.mrf.mxu3 }
 0x129   : > { %v1059_v18 = vpop.f32.mrf.mxu0 }
 0x12a   : > { %v1072_v19 = vpop.f32.mrf.mxu1 }
 0x12b   : > { %v1073_v21 = vadd.f32 %v1072_v19, %v1059_v18 }
 0x131   : > { %v1085_v22 = vpop.f32.mrf.mxu2  ;;  %v1061_v24 = vpop.f32.mrf.mxu0 }
 0x132   : > { %v1086_v23 = vadd.f32 %v1085_v22, %v1073_v21  ;;  %v1098_v3 = vpop.f32.mrf.mxu3  ;;  %v1074_v61 = vpop.f32.mrf.mxu1 }
 0x134   : > { %v1099_v25 = vadd.f32 %v1098_v3, %v1086_v23 }
 0x136   : > { %v1104_v27 = vrot.slane %v1099_v25, 6 }
 0x137   : > { %1113 = sbr.rel (%p1651_p13) target bundleno = 364 (0x16c), region = 74 }
 0x138   : > { %v1106_v28 = vsel %vm1105_vm0, %v1047_v62, %v1104_v27 }
 0x139   : > { %v1108_v29 = vadd.f32 %v1106_v28, %v602_v26  ;;  %v1087_v30 = vpop.f32.mrf.mxu2 }
 0x13a   : > { %v1100_v31 = vpop.f32.mrf.mxu3 }
 0x13b   : > { %1109 = vst [vmem:[#allocation2] sm:$0xf] %v1108_v29 }
 0x13c   : > { %vm1124_vm1 = vcmask 1040384   ;;  %v1154_v53 = vlaneseq }
 0x13e   : > { %vm1156_vm2 = vcmp.lt.s32.totalorder %v1154_v53, 256 }
 0x142   : > { %v1114_v32 = vld [vmem:[#allocation2] sm:$0xf] }
 0x143   : > { %1116 = vst [vmem:[#allocation1] ss:$4 sm:$0xff] %v1114_v32  ;;  %v1159_v37 = vmul.f32 %v1114_v32, %v1114_v32 }
 0x14a   : > { %v1117_v33 = vld.sshfl [vmem:[#allocation1] sm:$0xff pattern:$0x73625140]  ;;  %v1118_v34 = vld.sshfl [vmem:[#allocation1 + $0x8] sm:$0xff pattern:$0x73625140] }
 0x14b   : > { %1130 = vst [vmem:[#allocation1] ss:$4 sm:$0xff] %v1114_v32  ;;  %v1121_v35 = vpack.c.bf16 %v1118_v34, %v1117_v33 }
 0x14d   : > { %v1123_v36 = vrot.slane %v1121_v35, 3 }
 0x14f   : > { %v1127_v38 = vsel %vm1124_vm1, %v1121_v35, %v1123_v36 }
 0x150   : > { %1129 = vst [vmem:[%s577_s15] sm:$0x3] %v1127_v38 }
 0x152   : > { %v1131_v39 = vld.sshfl [vmem:[#allocation1] sm:$0xff pattern:$0x73625140]  ;;  %v1132_v40 = vld.sshfl [vmem:[#allocation1 + $0x8] sm:$0xff pattern:$0x73625140] }
 0x153   : > { %v1135_v41 = vsel %vm1105_vm0, %v1131_v39, 0.0  ;;  %v1142_v42 = vsel %vm1105_vm0, %v1132_v40, 0.0  ;;  %1161 = vst [vmem:[#allocation1] ss:$4 sm:$0xff] %v1159_v37 }
 0x154   : > { %v1136_v43 = vrot.slane %v1135_v41, 4  ;;  %v1143_v44 = vrot.slane %v1142_v42, 4 }
 0x156   : > { %v1137_v45 = vadd.f32 %v1136_v43, %v1135_v41  ;;  %v1144_v46 = vadd.f32 %v1143_v44, %v1142_v42 }
 0x158   : > { %v1138_v47 = vrot.slane %v1137_v45, 2  ;;  %v1145_v48 = vrot.slane %v1144_v46, 2 }
 0x15a   : > { %v1139_v49 = vadd.f32 %v1138_v47, %v1137_v45  ;;  %v1146_v50 = vadd.f32 %v1145_v48, %v1144_v46  ;;  %v1162_v51 = vld.sshfl [vmem:[#allocation1] sm:$0xff pattern:$0x73625140]  ;;  %v1163_v52 = vld.sshfl [vmem:[#allocation1 + $0x8] sm:$0xff pattern:$0x73625140] }
 0x15b   : > { %v1166_v54 = vsel %vm1105_vm0, %v1162_v51, 0.0  ;;  %v1173_v55 = vsel %vm1105_vm0, %v1163_v52, 0.0 }
 0x15c   : > { %v1140_v56 = vrot.slane %v1139_v49, 1  ;;  %v1147_v57 = vrot.slane %v1146_v50, 1  ;;  %v1167_v58 = vrot.slane %v1166_v54, 4  ;;  %v1174_v59 = vrot.slane %v1173_v55, 4 }
 0x15e   : > { %v1148_v60 = vadd.f32 %v1147_v57, %v1146_v50  ;;  %v1168_v0 = vadd.f32 %v1167_v58, %v1166_v54  ;;  %v1175_v1 = vadd.f32 %v1174_v59, %v1173_v55  ;;  %v1141_v2 = vadd.f32 %v1140_v56, %v1139_v49 }
 0x160   : > { %v1151_v4 = vrot.slane %v1148_v60, 7  ;;  %v1169_v5 = vrot.slane %v1168_v0, 2  ;;  %v1176_v6 = vrot.slane %v1175_v1, 2 }
 0x162   : > { %v1152_v7 = vsel %vm1124_vm1, %v1141_v2, %v1151_v4  ;;  %v1170_v8 = vadd.f32 %v1169_v5, %v1168_v0  ;;  %v1177_v9 = vadd.f32 %v1176_v6, %v1175_v1 }
 0x163   : > { %1158 = vst.msk [vmem:[%s586_s18] sm:$0x3] %vm1156_vm2, %v1152_v7 }
 0x164   : > { %v1171_v10 = vrot.slane %v1170_v8, 1  ;;  %v1178_v11 = vrot.slane %v1177_v9, 1 }
 0x166   : > { %v1179_v12 = vadd.f32 %v1178_v11, %v1177_v9  ;;  %v1172_v13 = vadd.f32 %v1171_v10, %v1170_v8 }
 0x168   : > { %v1182_v14 = vrot.slane %v1179_v12, 7 }
 0x16a   : > { %v1183_v15 = vsel %vm1124_vm1, %v1172_v13, %v1182_v14 }
 0x16b   : > { %1185 = vst.msk [vmem:[%s595_s10] sm:$0x3] %vm1156_vm2, %v1183_v15 }
 0x16c PF: > { %s15_s21 = sadd.s32 1, %s1830_s21   ;;  %s2277_s15 = smov %s1810_s16 }
 0x16d   : > { %p12_p0 = scmp.ge.s32.totalorder %s15_s21, 20   ;;  %s2278_s16 = smov %s1909_s28 }
 0x16e   : > { %s2279_s17 = smov %s1822_s19  ;;  %s2280_s18 = smov %s1826_s20 }
 0x16f   : > { %s2281_s19 = smov %s2284_s22  ;;  %s2282_s20 = smov %s2288_s23 }
 0x170   :  { %14 = sbr.rel (!%p12_p0) target bundleno = 4 (0x4), region = 136 }

// kernel: resnet_forward.42
= control target key start
LH: loop header
LB: loop body
LE: loop exit
PB: predicated region body
PF: predicated region fallthrough
CT: control target
= control target key end

     0   :  { %vm34_vm0 = vcmask 1041408   ;;  %vm36_vm1 = vcmask 1045508   ;;  %vm38_vm2 = vcmask 1043456   ;;  %vm105_vm3 = vcmask 1040384   ;;  %s189_s0 = inlined_call_operand.vmem [shape: bf16[2,512], index: 0, kind: input, shape index: {}]   ;;  %s190_s1 = inlined_call_operand.vmem [shape: f32[1,512], index: 1, kind: input, shape index: {}]   ;;  %s191_s2 = inlined_call_operand.vmem [shape: f32[1,512], index: 2, kind: input, shape index: {}]   ;;  %s192_s4 = inlined_call_operand.vmem [shape: f32[1,512], index: 4, kind: input, shape index: {}]   ;;  %s193_s3 = inlined_call_operand.vmem [shape: bf16[2,512], index: 3, kind: input, shape index: {}]   ;;  %s194_s5 = inlined_call_operand.vmem [shape: f32[1,512], index: 5, kind: input, shape index: {}]   ;;  %s195_s6 = inlined_call_operand.vmem [shape: bf16[2,512], index: 6, kind: output, shape index: {}]  }
   0x1   :  { %v23_v0 = vld [vmem:[%s189_s0] sm:$0xf]  ;;  %vm109_vm4 = vcmask 1042434  }
   0x2   :  { %v25_v1 = vld [vmem:[%s190_s1] sm:$0xf]  ;;  %v24_v11 = vunpack.c.l.bf16 %v23_v0 }
   0x3   :  { %v42_v2 = vld [vmem:[%s191_s2] sm:$0xf]  ;;  %v27_v3 = vperm.slane %v25_v1, 0  ;;  %v28_v4 = vperm.slane %v25_v1, 1  ;;  %v29_v5 = vperm.slane %v25_v1, 2  ;;  %v30_v6 = vperm.slane %v25_v1, 3 }
   0x4   :  { %v44_v7 = vperm.slane %v42_v2, 0  ;;  %v45_v8 = vperm.slane %v42_v2, 1  ;;  %v46_v9 = vperm.slane %v42_v2, 2  ;;  %v58_v10 = vld [vmem:[%s192_s4] sm:$0xf]  ;;  %v47_v14 = vperm.slane %v42_v2, 3 }
   0x5   :  { %v31_v12 = vrot.slane %v28_v4, 6  ;;  %v32_v13 = vrot.slane %v29_v5, 4  ;;  %v33_v15 = vrot.slane %v30_v6, 2  ;;  %v56_v18 = vld [vmem:[%s193_s3] sm:$0xf]  ;;  %v60_v19 = vperm.slane %v58_v10, 0 }
   0x6   :  { %v48_v16 = vrot.slane %v45_v8, 6  ;;  %v49_v17 = vrot.slane %v46_v9, 4  ;;  %v50_v21 = vrot.slane %v47_v14, 2  ;;  %v61_v22 = vperm.slane %v58_v10, 1  ;;  %v72_v24 = vld [vmem:[%s194_s5] sm:$0xf] }
   0x7   :  { %v35_v20 = vsel %vm34_vm0, %v27_v3, %v31_v12  ;;  %v62_v23 = vperm.slane %v58_v10, 2  ;;  %v37_v25 = vsel %vm36_vm1, %v32_v13, %v33_v15  ;;  %v63_v27 = vperm.slane %v58_v10, 3 }
   0x8   :  { %v51_v26 = vsel %vm34_vm0, %v44_v7, %v48_v16  ;;  %v39_v28 = vsel %vm38_vm2, %v35_v20, %v37_v25  ;;  %v52_v29 = vsel %vm36_vm1, %v49_v17, %v50_v21  ;;  %v64_v30 = vrot.slane %v61_v22, 6 }
   0x9   :  { %v65_v31 = vrot.slane %v62_v23, 4  ;;  %v57_v32 = vunpack.c.l.bf16 %v56_v18  ;;  %v66_v33 = vrot.slane %v63_v27, 2  ;;  %v74_v34 = vperm.slane %v72_v24, 0 }
   0xa   :  { %v75_v35 = vperm.slane %v72_v24, 1  ;;  %v41_v36 = vmul.f32 %v39_v28, %v24_v11  ;;  %v67_v37 = vsel %vm34_vm0, %v60_v19, %v64_v30  ;;  %v76_v38 = vperm.slane %v72_v24, 2 }
   0xb   :  { %v77_v39 = vperm.slane %v72_v24, 3  ;;  %v53_v40 = vsel %vm38_vm2, %v51_v26, %v52_v29  ;;  %v68_v41 = vsel %vm36_vm1, %v65_v31, %v66_v33 }
   0xc   :  { %v78_v42 = vrot.slane %v75_v35, 6  ;;  %v69_v43 = vsel %vm38_vm2, %v67_v37, %v68_v41  ;;  %v79_v44 = vrot.slane %v76_v38, 4  ;;  %v55_v48 = vadd.f32 %v53_v40, %v41_v36 }
   0xd   :  { %v80_v45 = vrot.slane %v77_v39, 2  ;;  %v71_v46 = vmul.f32 %v69_v43, %v57_v32 }
   0xe   :  { %v81_v47 = vsel %vm34_vm0, %v74_v34, %v78_v42 }
   0xf   :  { %v82_v49 = vsel %vm36_vm1, %v79_v44, %v80_v45 }
  0x10   :  { %v83_v50 = vsel %vm38_vm2, %v81_v47, %v82_v49 }
  0x11   :  { %v85_v51 = vadd.f32 %v83_v50, %v71_v46 }
  0x13   :  { %v86_v52 = vadd.f32 %v85_v51, %v55_v48 }
  0x15   :  { %v87_v53 = vmax.f32 %v86_v52, 0.0 }
  0x17   :  { %89 = vst [vmem:[#allocation1] ss:$4 sm:$0xff] %v87_v53 }
  0x1e   :  { %v90_v54 = vld.sshfl [vmem:[#allocation1] sm:$0xff pattern:$0x73625140]  ;;  %v91_v55 = vld.sshfl [vmem:[#allocation1 + $0x8] sm:$0xff pattern:$0x73625140] }
  0x1f   :  { %v92_v56 = vld.sshfl [vmem:[#allocation1 + $0x10] sm:$0xff pattern:$0x73625140]  ;;  %v93_v57 = vld.sshfl [vmem:[#allocation1 + $0x18] sm:$0xff pattern:$0x73625140]  ;;  %v98_v58 = vpack.c.bf16 %v91_v55, %v90_v54 }
  0x20   :  { %v99_v59 = vpack.c.bf16 %v93_v57, %v92_v56 }
  0x21   :  { %v102_v60 = vrot.slane %v98_v58, 3 }
  0x22   :  { %v103_v61 = vrot.slane %v99_v59, 6  ;;  %v104_v62 = vrot.slane %v99_v59, 1 }
  0x23   :  { %v108_v63 = vsel %vm105_vm3, %v98_v58, %v102_v60 }
  0x24   :  { %v112_v0 = vsel %vm109_vm4, %v103_v61, %v104_v62 }
  0x25   :  { %v113_v1 = vsel %vm34_vm0, %v108_v63, %v112_v0 }
  0x26   :  { %115 = vst [vmem:[%s195_s6] sm:$0xf] %v113_v1 }

// kernel: resnet_forward.43
= control target key start
LH: loop header
LB: loop body
LE: loop exit
PB: predicated region body
PF: predicated region fallthrough
CT: control target
= control target key end

     0   :  { %vm21_vm0 = vcmask 1041409   ;;  %vm23_vm1 = vcmask 1043459   ;;  %vm25_vm2 = vcmask 1045509   ;;  %vm27_vm3 = vcmask 1047559   ;;  %s55_s0 = inlined_call_operand.vmem [shape: bf16[2,1,512], index: 0, kind: input, shape index: {}]   ;;  %s56_s1 = inlined_call_operand.vmem [shape: f32[2,512], index: 1, kind: output, shape index: {}]  }
   0x1   :  { %v36_v0 = vld [vmem:[%s55_s0] sm:$0xff]  }
   0x2   :  { %v37_v1 = vunpack.c.l.bf16 %v36_v0  ;;  %v38_v2 = vunpack.c.h.bf16 %v36_v0 }
   0x4   :  { %v20_v3 = vrot.slane %v38_v2, 7 }
   0x6   :  { %v22_v4 = vsel %vm21_vm0, %v20_v3, %v37_v1 }
   0x7   :  { %v24_v5 = vsel %vm23_vm1, %v20_v3, %v22_v4 }
   0x8   :  { %v26_v6 = vsel %vm25_vm2, %v20_v3, %v24_v5 }
   0x9   :  { %v28_v7 = vsel %vm27_vm3, %v20_v3, %v26_v6 }
   0xa   :  { %30 = vst [vmem:[%s56_s1] sm:$0xff] %v28_v7 }

</bundles_post_ra>
